<compile_context>
chip_gen: v5e
topology: v5e:2x2
jax: 0.10.0
libtpu: 0.0.40
codegen_flags: <defaults>
</compile_context>

<pallas_src>
from functools import partial

import jax
import jax.numpy as jnp
from jax import lax
from jax.experimental import pallas as pl
from jax.experimental.pallas import tpu as pltpu

BN_EPS = 1e-5
LANE = 128


def _conv_block_kernel(x_ref, w1_ref, w2_ref, g_ref, b_ref, o_ref, xpad, ypad):
    """Fused conv3x3 -> BN -> ReLU -> conv3x3 -> BN -> ReLU (one invocation).

    x_ref : (N, H, W, Cin)         input, NHWC, f32, VMEM
    w1_ref: (9, Cin, Cpad)         conv1 weights per tap, out-ch zero-padded
    w2_ref: (9, Cpad, Cpad)        conv2 weights per tap, in/out-ch zero-padded
    g_ref : (1, Cpad)              BN gamma (zero-padded past Cout), f32
    b_ref : (1, Cpad)              BN beta  (zero-padded past Cout), f32
    o_ref : (N, Cout, H*W)         NCHW-native, lane-dense output, f32
    xpad  : (N, H+2, W+2, Cin)     VMEM scratch: halo-padded input, f32
    ypad  : (N, H+2, W+2, Cpad)    VMEM scratch: halo-padded intermediate, f32
    """
    N, H, W, Cin = x_ref.shape
    Cpad = w1_ref.shape[-1]
    Cout = o_ref.shape[1]
    HW = H * W
    rows = N * HW
    inv_cnt = 1.0 / rows
    cdt = w1_ref.dtype                       # MXU operand dtype (f32 or bf16)

    # Sublane-aligned ones matrix: column sums run on the (idle) MXU, not XLU.
    ones = jnp.ones((8, rows), jnp.float32)

    def zero_halo(pad_ref):
        # Zero ONLY the 1-pixel frame; interior is written exactly once below.
        C = pad_ref.shape[-1]
        dt = pad_ref.dtype
        pad_ref[:, 0:1, :, :] = jnp.zeros((N, 1, W + 2, C), dt)
        pad_ref[:, H + 1:H + 2, :, :] = jnp.zeros((N, 1, W + 2, C), dt)
        pad_ref[:, 1:H + 1, 0:1, :] = jnp.zeros((N, H, 1, C), dt)
        pad_ref[:, 1:H + 1, W + 1:W + 2, :] = jnp.zeros((N, H, 1, C), dt)

    def conv3x3(pad_ref, w_ref, cin):
        # 9 tap-accumulated MXU matmuls; no im2col scratch, no masked stores.
        acc = None
        for dy in range(3):
            for dx in range(3):
                t = dy * 3 + dx
                patch = pad_ref[:, dy:dy + H, dx:dx + W, :].reshape(rows, cin)
                part = jnp.dot(patch.astype(cdt), w_ref[t],
                               preferred_element_type=jnp.float32)
                acc = part if acc is None else acc + part
        return acc                            # (rows, Cpad) f32

    def bn_relu(acc):
        # Training-mode batch stats (biased var); sums via MXU ones-matmul.
        mean = jnp.dot(ones, acc, preferred_element_type=jnp.float32)[0:1] * inv_cnt
        xc = acc - mean
        var = jnp.dot(ones, xc * xc, preferred_element_type=jnp.float32)[0:1] * inv_cnt
        scale = g_ref[...] * lax.rsqrt(var + BN_EPS)
        return jnp.maximum(xc * scale + b_ref[...], 0.0)

    # ------------------------- layer 1 ---------------------------------------
    zero_halo(xpad)
    xpad[:, 1:H + 1, 1:W + 1, :] = x_ref[...].astype(xpad.dtype)
    y1 = bn_relu(conv3x3(xpad, w1_ref, Cin))          # (rows, Cpad), lane-dense

    # ------------------------- layer 2 (intermediate never leaves VMEM) ------
    zero_halo(ypad)
    ypad[:, 1:H + 1, 1:W + 1, :] = y1.reshape(N, H, W, Cpad).astype(ypad.dtype)
    y2 = bn_relu(conv3x3(ypad, w2_ref, Cpad))

    # NCHW-native, lane-dense store: (N, Cout, H*W).  The 128-lane channel pad
    # never reaches HBM; the wrapper only does a free reshape to (N,Cout,H,W).
    out_t = jnp.transpose(y2.reshape(N, HW, Cpad), (0, 2, 1))   # XLU transpose
    o_ref[...] = out_t[:, :Cout, :].astype(o_ref.dtype)


def _vmem_bytes(shape, dtype):
    """Approximate Mosaic VMEM footprint: last two dims padded to (8, 128)."""
    shape = (1, 1) + tuple(int(d) for d in shape)
    lead = 1
    for d in shape[:-2]:
        lead *= d
    sub = -(-shape[-2] // 8) * 8
    lane = -(-shape[-1] // LANE) * LANE
    return lead * sub * lane * jnp.dtype(dtype).itemsize


@partial(jax.jit, static_argnames=("compute_dtype",))
def conv_block_forward(x_nchw, w1_hwio, w2_hwio, gamma, beta,
                       compute_dtype=jnp.float32):
    """ConvBlock.forward.  Input / output are NCHW to match PyTorch.

    compute_dtype: dtype of the MXU matmul operands (f32, or bf16 for the
    v6e/v7x fast path); accumulation / BN stats / epilogue are always f32.
    """
    N, Cin, H, W = x_nchw.shape
    Cout = w1_hwio.shape[-1]
    Cpad = max(LANE, ((Cout + LANE - 1) // LANE) * LANE)
    HW = H * W
    rows = N * HW

    x_nhwc = jnp.transpose(x_nchw, (0, 2, 3, 1)).astype(jnp.float32)

    # Per-tap weights; out-channels (and conv2 in-channels) zero-padded to
    # Cpad=128 so every matmul / store in the kernel is lane-dense.  The zero
    # pad rows of w2 guarantee padded y1 lanes never contaminate real outputs.
    w1 = jnp.pad(w1_hwio.reshape(9, Cin, Cout).astype(jnp.float32),
                 ((0, 0), (0, 0), (0, Cpad - Cout))).astype(compute_dtype)
    w2 = jnp.pad(w2_hwio.reshape(9, Cout, Cout).astype(jnp.float32),
                 ((0, 0), (0, Cpad - Cout), (0, Cpad - Cout))).astype(compute_dtype)
    g = jnp.pad(gamma.reshape(1, Cout).astype(jnp.float32),
                ((0, 0), (0, Cpad - Cout)))
    b = jnp.pad(beta.reshape(1, Cout).astype(jnp.float32),
                ((0, 0), (0, Cpad - Cout)))

    # VMEM budget from actual footprints (v7x has only 64 MiB per TensorCore).
    buf_bytes = (_vmem_bytes((N, H, W, Cin), jnp.float32)             # x
                 + _vmem_bytes((9, Cin, Cpad), compute_dtype)         # w1
                 + _vmem_bytes((9, Cpad, Cpad), compute_dtype)        # w2
                 + 2 * _vmem_bytes((1, Cpad), jnp.float32)            # gamma/beta
                 + _vmem_bytes((N, Cout, HW), jnp.float32)            # output
                 + _vmem_bytes((N, H + 2, W + 2, Cin), jnp.float32)   # xpad
                 + _vmem_bytes((N, H + 2, W + 2, Cpad), jnp.float32)) # ypad
    value_bytes = 16 * rows * Cpad * 4            # acc/xc/y/patch temporaries
    vmem_limit = int(buf_bytes + value_bytes + (8 << 20))

    itemsize = jnp.dtype(compute_dtype).itemsize
    flops = (2 * rows * 9 * Cin * Cpad            # conv1 MXU
             + 2 * rows * 9 * Cpad * Cpad         # conv2 MXU
             + 4 * 2 * 8 * rows * Cpad            # BN stat matmuls
             + 12 * rows * Cpad)                  # BN / ReLU VPU epilogues
    bytes_accessed = (4 * rows * Cin + itemsize * 9 * Cin * Cpad
                      + itemsize * 9 * Cpad * Cpad + 4 * 2 * Cpad
                      + 4 * N * Cout * HW)

    vmem = lambda: pl.BlockSpec(memory_space=pltpu.MemorySpace.VMEM)
    out3 = pl.pallas_call(
        _conv_block_kernel,
        out_shape=jax.ShapeDtypeStruct((N, Cout, HW), jnp.float32),
        in_specs=[vmem() for _ in range(5)],
        out_specs=vmem(),
        scratch_shapes=[
            pltpu.VMEM((N, H + 2, W + 2, Cin), jnp.float32),   # padded input
            pltpu.VMEM((N, H + 2, W + 2, Cpad), jnp.float32),  # padded interm.
        ],
        compiler_params=pltpu.CompilerParams(vmem_limit_bytes=vmem_limit),
        cost_estimate=pl.CostEstimate(flops=flops,
                                      transcendentals=2 * Cpad,
                                      bytes_accessed=bytes_accessed),
    )(x_nhwc, w1, w2, g, b)

    return out3.reshape(N, Cout, H, W)             # free reshape, no transpose


# ---------------- pure-JAX reference (correctness check) ----------------------
def _ref_layer(x_nhwc, w_hwio, gamma, beta, compute_dtype):
    y = lax.conv_general_dilated(
        x_nhwc.astype(compute_dtype), w_hwio.astype(compute_dtype),
        window_strides=(1, 1), padding="SAME",
        dimension_numbers=("NHWC", "HWIO", "NHWC"),
        preferred_element_type=jnp.float32)
    mean = jnp.mean(y, axis=(0, 1, 2), keepdims=True)
    var = jnp.mean(jnp.square(y - mean), axis=(0, 1, 2), keepdims=True)
    y = (y - mean) * lax.rsqrt(var + BN_EPS) * gamma + beta
    return jnp.maximum(y, 0.0)


def _ref_forward(x_nchw, w1, w2, gamma, beta, compute_dtype=jnp.float32):
    x = jnp.transpose(x_nchw, (0, 2, 3, 1))
    x = _ref_layer(x, w1, gamma, beta, compute_dtype)
    x = _ref_layer(x, w2, gamma, beta, compute_dtype)
    return jnp.transpose(x, (0, 3, 1, 2))


if __name__ == "__main__":
    # Shapes consistent with ConvBlock(in_ch=4, out_ch=8).
    N, IN_CH, OUT_CH, HW_ = 2, 4, 8, 16

    key = jax.random.PRNGKey(0)
    kx, k1, k2, kg, kb = jax.random.split(key, 5)

    x = jax.random.normal(kx, (N, IN_CH, HW_, HW_), dtype=jnp.float32)   # NCHW

    # Conv weights: PyTorch stores OIHW; kernel consumes HWIO.
    w1_oihw = 0.1 * jax.random.normal(k1, (OUT_CH, IN_CH, 3, 3), jnp.float32)
    w2_oihw = 0.1 * jax.random.normal(k2, (OUT_CH, OUT_CH, 3, 3), jnp.float32)
    w1_hwio = jnp.transpose(w1_oihw, (2, 3, 1, 0))
    w2_hwio = jnp.transpose(w2_oihw, (2, 3, 1, 0))

    # Shared BN params (single self.bn in the PyTorch module).
    gamma = 1.0 + 0.1 * jax.random.normal(kg, (OUT_CH,), jnp.float32)
    beta = 0.1 * jax.random.normal(kb, (OUT_CH,), jnp.float32)

    # f32 MXU operands: exact check against the reference.
    out = jax.block_until_ready(conv_block_forward(x, w1_hwio, w2_hwio, gamma, beta))
    ref = _ref_forward(x, w1_hwio, w2_hwio, gamma, beta, jnp.float32)
    assert out.shape == (N, OUT_CH, HW_, HW_), out.shape
    err = float(jnp.max(jnp.abs(out - ref)))
    assert jnp.allclose(out, ref, atol=5e-4, rtol=5e-4), err

    # bf16 MXU operands (v6e/v7x fast path), f32 accumulation/stats: checked
    # against a precision-matched (bf16-operand) reference.
    out_bf = jax.block_until_ready(
        conv_block_forward(x, w1_hwio, w2_hwio, gamma, beta,
                           compute_dtype=jnp.bfloat16))
    ref_bf = _ref_forward(x, w1_hwio, w2_hwio, gamma, beta, jnp.bfloat16)
    err_bf = float(jnp.max(jnp.abs(out_bf - ref_bf)))
    assert jnp.allclose(out_bf, ref_bf, atol=1e-2, rtol=1e-2), err_bf

    print("KERNEL_OK")
</pallas_src>

<mosaic_0001>
module attributes {stable_mosaic.version = 11 : i64} {
  func.func @_conv_block_kernel(%arg0: memref<2x16x16x4xf32, #tpu.memory_space<vmem>>, %arg1: memref<9x4x128xf32, #tpu.memory_space<vmem>>, %arg2: memref<9x128x128xf32, #tpu.memory_space<vmem>>, %arg3: memref<1x128xf32, #tpu.memory_space<vmem>>, %arg4: memref<1x128xf32, #tpu.memory_space<vmem>>, %arg5: memref<2x8x256xf32, #tpu.memory_space<vmem>>, %arg6: memref<2x18x18x4xf32, #tpu.memory_space<vmem>>, %arg7: memref<2x18x18x128xf32, #tpu.memory_space<vmem>>) attributes {dimension_semantics = [], scalar_prefetch = 0 : i64, scratch_operands = 2 : i64, tpu.core_type = #tpu.core_type<tc>} {
    %cst = arith.constant 1.000000e+00 : f32
    %0 = vector.broadcast %cst : f32 to vector<8x512xf32>
    %cst_0 = arith.constant 0.000000e+00 : f32
    %1 = vector.broadcast %cst_0 : f32 to vector<2x1x18x4xf32>
    %c0 = arith.constant 0 : index
    %c0_1 = arith.constant 0 : index
    %c0_2 = arith.constant 0 : index
    %c0_3 = arith.constant 0 : index
    %2 = vector.load %arg6[%c0, %c0_1, %c0_2, %c0_3] : memref<2x18x18x4xf32, #tpu.memory_space<vmem>>, vector<2x1x18x4xf32>
    tpu.vector_store %arg6[%c0, %c0_1, %c0_2, %c0_3], %1 {strides = array<i32>} : memref<2x18x18x4xf32, #tpu.memory_space<vmem>>, vector<2x1x18x4xf32>,
    %cst_4 = arith.constant 0.000000e+00 : f32
    %3 = vector.broadcast %cst_4 : f32 to vector<2x1x18x4xf32>
    %c0_5 = arith.constant 0 : index
    %c17 = arith.constant 17 : index
    %c0_6 = arith.constant 0 : index
    %c0_7 = arith.constant 0 : index
    %4 = vector.load %arg6[%c0_5, %c17, %c0_6, %c0_7] : memref<2x18x18x4xf32, #tpu.memory_space<vmem>>, vector<2x1x18x4xf32>
    tpu.vector_store %arg6[%c0_5, %c17, %c0_6, %c0_7], %3 {strides = array<i32>} : memref<2x18x18x4xf32, #tpu.memory_space<vmem>>, vector<2x1x18x4xf32>,
    %cst_8 = arith.constant 0.000000e+00 : f32
    %5 = vector.broadcast %cst_8 : f32 to vector<2x16x1x4xf32>
    %c0_9 = arith.constant 0 : index
    %c1 = arith.constant 1 : index
    %c0_10 = arith.constant 0 : index
    %c0_11 = arith.constant 0 : index
    %6 = vector.load %arg6[%c0_9, %c1, %c0_10, %c0_11] : memref<2x18x18x4xf32, #tpu.memory_space<vmem>>, vector<2x16x1x4xf32>
    tpu.vector_store %arg6[%c0_9, %c1, %c0_10, %c0_11], %5 {strides = array<i32>} : memref<2x18x18x4xf32, #tpu.memory_space<vmem>>, vector<2x16x1x4xf32>,
    %cst_12 = arith.constant 0.000000e+00 : f32
    %7 = vector.broadcast %cst_12 : f32 to vector<2x16x1x4xf32>
    %c0_13 = arith.constant 0 : index
    %c1_14 = arith.constant 1 : index
    %c17_15 = arith.constant 17 : index
    %c0_16 = arith.constant 0 : index
    %8 = vector.load %arg6[%c0_13, %c1_14, %c17_15, %c0_16] : memref<2x18x18x4xf32, #tpu.memory_space<vmem>>, vector<2x16x1x4xf32>
    tpu.vector_store %arg6[%c0_13, %c1_14, %c17_15, %c0_16], %7 {strides = array<i32>} : memref<2x18x18x4xf32, #tpu.memory_space<vmem>>, vector<2x16x1x4xf32>,
    %c0_17 = arith.constant 0 : index
    %c0_18 = arith.constant 0 : index
    %c0_19 = arith.constant 0 : index
    %c0_20 = arith.constant 0 : index
    %9 = vector.load %arg0[%c0_17, %c0_18, %c0_19, %c0_20] : memref<2x16x16x4xf32, #tpu.memory_space<vmem>>, vector<2x16x16x4xf32>
    %c0_21 = arith.constant 0 : index
    %c1_22 = arith.constant 1 : index
    %c1_23 = arith.constant 1 : index
    %c0_24 = arith.constant 0 : index
    %10 = vector.load %arg6[%c0_21, %c1_22, %c1_23, %c0_24] : memref<2x18x18x4xf32, #tpu.memory_space<vmem>>, vector<2x16x16x4xf32>
    tpu.vector_store %arg6[%c0_21, %c1_22, %c1_23, %c0_24], %9 {strides = array<i32>} : memref<2x18x18x4xf32, #tpu.memory_space<vmem>>, vector<2x16x16x4xf32>,
    %c0_25 = arith.constant 0 : index
    %c0_26 = arith.constant 0 : index
    %c0_27 = arith.constant 0 : index
    %c0_28 = arith.constant 0 : index
    %11 = vector.load %arg6[%c0_25, %c0_26, %c0_27, %c0_28] : memref<2x18x18x4xf32, #tpu.memory_space<vmem>>, vector<2x16x16x4xf32>
    %12 = vector.shape_cast %11 : vector<2x16x16x4xf32> to vector<512x4xf32>
    %c0_29 = arith.constant 0 : index
    %c0_30 = arith.constant 0 : index
    %c0_31 = arith.constant 0 : index
    %13 = vector.load %arg1[%c0_29, %c0_30, %c0_31] : memref<9x4x128xf32, #tpu.memory_space<vmem>>, vector<1x4x128xf32>
    %14 = vector.shape_cast %13 : vector<1x4x128xf32> to vector<4x128xf32>
    %cst_32 = arith.constant dense<0.000000e+00> : vector<512x128xf32>
    %15 = tpu.matmul %12, %14, %cst_32 {dimension_numbers = #tpu.dot_dimension_numbers<[1], [0], [0], [1], [0, 0, 1, 1], [], []>} : vector<512x4xf32>, vector<4x128xf32>, vector<512x128xf32> -> vector<512x128xf32>
    %c0_33 = arith.constant 0 : index
    %c0_34 = arith.constant 0 : index
    %c1_35 = arith.constant 1 : index
    %c0_36 = arith.constant 0 : index
    %16 = vector.load %arg6[%c0_33, %c0_34, %c1_35, %c0_36] : memref<2x18x18x4xf32, #tpu.memory_space<vmem>>, vector<2x16x16x4xf32>
    %17 = vector.shape_cast %16 : vector<2x16x16x4xf32> to vector<512x4xf32>
    %c1_37 = arith.constant 1 : index
    %c0_38 = arith.constant 0 : index
    %c0_39 = arith.constant 0 : index
    %18 = vector.load %arg1[%c1_37, %c0_38, %c0_39] : memref<9x4x128xf32, #tpu.memory_space<vmem>>, vector<1x4x128xf32>
    %19 = vector.shape_cast %18 : vector<1x4x128xf32> to vector<4x128xf32>
    %cst_40 = arith.constant dense<0.000000e+00> : vector<512x128xf32>
    %20 = tpu.matmul %17, %19, %cst_40 {dimension_numbers = #tpu.dot_dimension_numbers<[1], [0], [0], [1], [0, 0, 1, 1], [], []>} : vector<512x4xf32>, vector<4x128xf32>, vector<512x128xf32> -> vector<512x128xf32>
    %21 = arith.addf %15, %20 : vector<512x128xf32>
    %c0_41 = arith.constant 0 : index
    %c0_42 = arith.constant 0 : index
    %c2 = arith.constant 2 : index
    %c0_43 = arith.constant 0 : index
    %22 = vector.load %arg6[%c0_41, %c0_42, %c2, %c0_43] : memref<2x18x18x4xf32, #tpu.memory_space<vmem>>, vector<2x16x16x4xf32>
    %23 = vector.shape_cast %22 : vector<2x16x16x4xf32> to vector<512x4xf32>
    %c2_44 = arith.constant 2 : index
    %c0_45 = arith.constant 0 : index
    %c0_46 = arith.constant 0 : index
    %24 = vector.load %arg1[%c2_44, %c0_45, %c0_46] : memref<9x4x128xf32, #tpu.memory_space<vmem>>, vector<1x4x128xf32>
    %25 = vector.shape_cast %24 : vector<1x4x128xf32> to vector<4x128xf32>
    %cst_47 = arith.constant dense<0.000000e+00> : vector<512x128xf32>
    %26 = tpu.matmul %23, %25, %cst_47 {dimension_numbers = #tpu.dot_dimension_numbers<[1], [0], [0], [1], [0, 0, 1, 1], [], []>} : vector<512x4xf32>, vector<4x128xf32>, vector<512x128xf32> -> vector<512x128xf32>
    %27 = arith.addf %21, %26 : vector<512x128xf32>
    %c0_48 = arith.constant 0 : index
    %c1_49 = arith.constant 1 : index
    %c0_50 = arith.constant 0 : index
    %c0_51 = arith.constant 0 : index
    %28 = vector.load %arg6[%c0_48, %c1_49, %c0_50, %c0_51] : memref<2x18x18x4xf32, #tpu.memory_space<vmem>>, vector<2x16x16x4xf32>
    %29 = vector.shape_cast %28 : vector<2x16x16x4xf32> to vector<512x4xf32>
    %c3 = arith.constant 3 : index
    %c0_52 = arith.constant 0 : index
    %c0_53 = arith.constant 0 : index
    %30 = vector.load %arg1[%c3, %c0_52, %c0_53] : memref<9x4x128xf32, #tpu.memory_space<vmem>>, vector<1x4x128xf32>
    %31 = vector.shape_cast %30 : vector<1x4x128xf32> to vector<4x128xf32>
    %cst_54 = arith.constant dense<0.000000e+00> : vector<512x128xf32>
    %32 = tpu.matmul %29, %31, %cst_54 {dimension_numbers = #tpu.dot_dimension_numbers<[1], [0], [0], [1], [0, 0, 1, 1], [], []>} : vector<512x4xf32>, vector<4x128xf32>, vector<512x128xf32> -> vector<512x128xf32>
    %33 = arith.addf %27, %32 : vector<512x128xf32>
    %c0_55 = arith.constant 0 : index
    %c1_56 = arith.constant 1 : index
    %c1_57 = arith.constant 1 : index
    %c0_58 = arith.constant 0 : index
    %34 = vector.load %arg6[%c0_55, %c1_56, %c1_57, %c0_58] : memref<2x18x18x4xf32, #tpu.memory_space<vmem>>, vector<2x16x16x4xf32>
    %35 = vector.shape_cast %34 : vector<2x16x16x4xf32> to vector<512x4xf32>
    %c4 = arith.constant 4 : index
    %c0_59 = arith.constant 0 : index
    %c0_60 = arith.constant 0 : index
    %36 = vector.load %arg1[%c4, %c0_59, %c0_60] : memref<9x4x128xf32, #tpu.memory_space<vmem>>, vector<1x4x128xf32>
    %37 = vector.shape_cast %36 : vector<1x4x128xf32> to vector<4x128xf32>
    %cst_61 = arith.constant dense<0.000000e+00> : vector<512x128xf32>
    %38 = tpu.matmul %35, %37, %cst_61 {dimension_numbers = #tpu.dot_dimension_numbers<[1], [0], [0], [1], [0, 0, 1, 1], [], []>} : vector<512x4xf32>, vector<4x128xf32>, vector<512x128xf32> -> vector<512x128xf32>
    %39 = arith.addf %33, %38 : vector<512x128xf32>
    %c0_62 = arith.constant 0 : index
    %c1_63 = arith.constant 1 : index
    %c2_64 = arith.constant 2 : index
    %c0_65 = arith.constant 0 : index
    %40 = vector.load %arg6[%c0_62, %c1_63, %c2_64, %c0_65] : memref<2x18x18x4xf32, #tpu.memory_space<vmem>>, vector<2x16x16x4xf32>
    %41 = vector.shape_cast %40 : vector<2x16x16x4xf32> to vector<512x4xf32>
    %c5 = arith.constant 5 : index
    %c0_66 = arith.constant 0 : index
    %c0_67 = arith.constant 0 : index
    %42 = vector.load %arg1[%c5, %c0_66, %c0_67] : memref<9x4x128xf32, #tpu.memory_space<vmem>>, vector<1x4x128xf32>
    %43 = vector.shape_cast %42 : vector<1x4x128xf32> to vector<4x128xf32>
    %cst_68 = arith.constant dense<0.000000e+00> : vector<512x128xf32>
    %44 = tpu.matmul %41, %43, %cst_68 {dimension_numbers = #tpu.dot_dimension_numbers<[1], [0], [0], [1], [0, 0, 1, 1], [], []>} : vector<512x4xf32>, vector<4x128xf32>, vector<512x128xf32> -> vector<512x128xf32>
    %45 = arith.addf %39, %44 : vector<512x128xf32>
    %c0_69 = arith.constant 0 : index
    %c2_70 = arith.constant 2 : index
    %c0_71 = arith.constant 0 : index
    %c0_72 = arith.constant 0 : index
    %46 = vector.load %arg6[%c0_69, %c2_70, %c0_71, %c0_72] : memref<2x18x18x4xf32, #tpu.memory_space<vmem>>, vector<2x16x16x4xf32>
    %47 = vector.shape_cast %46 : vector<2x16x16x4xf32> to vector<512x4xf32>
    %c6 = arith.constant 6 : index
    %c0_73 = arith.constant 0 : index
    %c0_74 = arith.constant 0 : index
    %48 = vector.load %arg1[%c6, %c0_73, %c0_74] : memref<9x4x128xf32, #tpu.memory_space<vmem>>, vector<1x4x128xf32>
    %49 = vector.shape_cast %48 : vector<1x4x128xf32> to vector<4x128xf32>
    %cst_75 = arith.constant dense<0.000000e+00> : vector<512x128xf32>
    %50 = tpu.matmul %47, %49, %cst_75 {dimension_numbers = #tpu.dot_dimension_numbers<[1], [0], [0], [1], [0, 0, 1, 1], [], []>} : vector<512x4xf32>, vector<4x128xf32>, vector<512x128xf32> -> vector<512x128xf32>
    %51 = arith.addf %45, %50 : vector<512x128xf32>
    %c0_76 = arith.constant 0 : index
    %c2_77 = arith.constant 2 : index
    %c1_78 = arith.constant 1 : index
    %c0_79 = arith.constant 0 : index
    %52 = vector.load %arg6[%c0_76, %c2_77, %c1_78, %c0_79] : memref<2x18x18x4xf32, #tpu.memory_space<vmem>>, vector<2x16x16x4xf32>
    %53 = vector.shape_cast %52 : vector<2x16x16x4xf32> to vector<512x4xf32>
    %c7 = arith.constant 7 : index
    %c0_80 = arith.constant 0 : index
    %c0_81 = arith.constant 0 : index
    %54 = vector.load %arg1[%c7, %c0_80, %c0_81] : memref<9x4x128xf32, #tpu.memory_space<vmem>>, vector<1x4x128xf32>
    %55 = vector.shape_cast %54 : vector<1x4x128xf32> to vector<4x128xf32>
    %cst_82 = arith.constant dense<0.000000e+00> : vector<512x128xf32>
    %56 = tpu.matmul %53, %55, %cst_82 {dimension_numbers = #tpu.dot_dimension_numbers<[1], [0], [0], [1], [0, 0, 1, 1], [], []>} : vector<512x4xf32>, vector<4x128xf32>, vector<512x128xf32> -> vector<512x128xf32>
    %57 = arith.addf %51, %56 : vector<512x128xf32>
    %c0_83 = arith.constant 0 : index
    %c2_84 = arith.constant 2 : index
    %c2_85 = arith.constant 2 : index
    %c0_86 = arith.constant 0 : index
    %58 = vector.load %arg6[%c0_83, %c2_84, %c2_85, %c0_86] : memref<2x18x18x4xf32, #tpu.memory_space<vmem>>, vector<2x16x16x4xf32>
    %59 = vector.shape_cast %58 : vector<2x16x16x4xf32> to vector<512x4xf32>
    %c8 = arith.constant 8 : index
    %c0_87 = arith.constant 0 : index
    %c0_88 = arith.constant 0 : index
    %60 = vector.load %arg1[%c8, %c0_87, %c0_88] : memref<9x4x128xf32, #tpu.memory_space<vmem>>, vector<1x4x128xf32>
    %61 = vector.shape_cast %60 : vector<1x4x128xf32> to vector<4x128xf32>
    %cst_89 = arith.constant dense<0.000000e+00> : vector<512x128xf32>
    %62 = tpu.matmul %59, %61, %cst_89 {dimension_numbers = #tpu.dot_dimension_numbers<[1], [0], [0], [1], [0, 0, 1, 1], [], []>} : vector<512x4xf32>, vector<4x128xf32>, vector<512x128xf32> -> vector<512x128xf32>
    %63 = arith.addf %57, %62 : vector<512x128xf32>
    %cst_90 = arith.constant dense<0.000000e+00> : vector<8x128xf32>
    %64 = tpu.matmul %0, %63, %cst_90 {dimension_numbers = #tpu.dot_dimension_numbers<[1], [0], [0], [1], [0, 0, 1, 1], [], []>} : vector<8x512xf32>, vector<512x128xf32>, vector<8x128xf32> -> vector<8x128xf32>
    %65 = vector.extract_strided_slice %64 {offsets = [0, 0], sizes = [1, 128], strides = [1, 1]} : vector<8x128xf32> to vector<1x128xf32>
    %cst_91 = arith.constant 0.001953125 : f32
    %66 = vector.broadcast %cst_91 : f32 to vector<1x128xf32>
    %67 = arith.mulf %65, %66 : vector<1x128xf32>
    %68 = vector.broadcast %67 : vector<1x128xf32> to vector<512x128xf32>
    %69 = arith.subf %63, %68 : vector<512x128xf32>
    %70 = arith.mulf %69, %69 : vector<512x128xf32>
    %cst_92 = arith.constant dense<0.000000e+00> : vector<8x128xf32>
    %71 = tpu.matmul %0, %70, %cst_92 {dimension_numbers = #tpu.dot_dimension_numbers<[1], [0], [0], [1], [0, 0, 1, 1], [], []>} : vector<8x512xf32>, vector<512x128xf32>, vector<8x128xf32> -> vector<8x128xf32>
    %72 = vector.extract_strided_slice %71 {offsets = [0, 0], sizes = [1, 128], strides = [1, 1]} : vector<8x128xf32> to vector<1x128xf32>
    %cst_93 = arith.constant 0.001953125 : f32
    %73 = vector.broadcast %cst_93 : f32 to vector<1x128xf32>
    %74 = arith.mulf %72, %73 : vector<1x128xf32>
    %c0_94 = arith.constant 0 : index
    %c0_95 = arith.constant 0 : index
    %75 = vector.load %arg3[%c0_94, %c0_95] : memref<1x128xf32, #tpu.memory_space<vmem>>, vector<1x128xf32>
    %cst_96 = arith.constant 9.99999974E-6 : f32
    %76 = vector.broadcast %cst_96 : f32 to vector<1x128xf32>
    %77 = arith.addf %74, %76 : vector<1x128xf32>
    %78 = math.rsqrt %77 : vector<1x128xf32>
    %79 = arith.mulf %75, %78 : vector<1x128xf32>
    %80 = vector.broadcast %79 : vector<1x128xf32> to vector<512x128xf32>
    %81 = arith.mulf %69, %80 : vector<512x128xf32>
    %c0_97 = arith.constant 0 : index
    %c0_98 = arith.constant 0 : index
    %82 = vector.load %arg4[%c0_97, %c0_98] : memref<1x128xf32, #tpu.memory_space<vmem>>, vector<1x128xf32>
    %83 = vector.broadcast %82 : vector<1x128xf32> to vector<512x128xf32>
    %84 = arith.addf %81, %83 : vector<512x128xf32>
    %cst_99 = arith.constant 0.000000e+00 : f32
    %85 = vector.broadcast %cst_99 : f32 to vector<512x128xf32>
    %86 = arith.maximumf %84, %85 : vector<512x128xf32>
    %cst_100 = arith.constant 0.000000e+00 : f32
    %87 = vector.broadcast %cst_100 : f32 to vector<2x1x18x128xf32>
    %c0_101 = arith.constant 0 : index
    %c0_102 = arith.constant 0 : index
    %c0_103 = arith.constant 0 : index
    %c0_104 = arith.constant 0 : index
    %88 = vector.load %arg7[%c0_101, %c0_102, %c0_103, %c0_104] : memref<2x18x18x128xf32, #tpu.memory_space<vmem>>, vector<2x1x18x128xf32>
    tpu.vector_store %arg7[%c0_101, %c0_102, %c0_103, %c0_104], %87 {strides = array<i32>} : memref<2x18x18x128xf32, #tpu.memory_space<vmem>>, vector<2x1x18x128xf32>,
    %cst_105 = arith.constant 0.000000e+00 : f32
    %89 = vector.broadcast %cst_105 : f32 to vector<2x1x18x128xf32>
    %c0_106 = arith.constant 0 : index
    %c17_107 = arith.constant 17 : index
    %c0_108 = arith.constant 0 : index
    %c0_109 = arith.constant 0 : index
    %90 = vector.load %arg7[%c0_106, %c17_107, %c0_108, %c0_109] : memref<2x18x18x128xf32, #tpu.memory_space<vmem>>, vector<2x1x18x128xf32>
    tpu.vector_store %arg7[%c0_106, %c17_107, %c0_108, %c0_109], %89 {strides = array<i32>} : memref<2x18x18x128xf32, #tpu.memory_space<vmem>>, vector<2x1x18x128xf32>,
    %cst_110 = arith.constant 0.000000e+00 : f32
    %91 = vector.broadcast %cst_110 : f32 to vector<2x16x1x128xf32>
    %c0_111 = arith.constant 0 : index
    %c1_112 = arith.constant 1 : index
    %c0_113 = arith.constant 0 : index
    %c0_114 = arith.constant 0 : index
    %92 = vector.load %arg7[%c0_111, %c1_112, %c0_113, %c0_114] : memref<2x18x18x128xf32, #tpu.memory_space<vmem>>, vector<2x16x1x128xf32>
    tpu.vector_store %arg7[%c0_111, %c1_112, %c0_113, %c0_114], %91 {strides = array<i32>} : memref<2x18x18x128xf32, #tpu.memory_space<vmem>>, vector<2x16x1x128xf32>,
    %cst_115 = arith.constant 0.000000e+00 : f32
    %93 = vector.broadcast %cst_115 : f32 to vector<2x16x1x128xf32>
    %c0_116 = arith.constant 0 : index
    %c1_117 = arith.constant 1 : index
    %c17_118 = arith.constant 17 : index
    %c0_119 = arith.constant 0 : index
    %94 = vector.load %arg7[%c0_116, %c1_117, %c17_118, %c0_119] : memref<2x18x18x128xf32, #tpu.memory_space<vmem>>, vector<2x16x1x128xf32>
    tpu.vector_store %arg7[%c0_116, %c1_117, %c17_118, %c0_119], %93 {strides = array<i32>} : memref<2x18x18x128xf32, #tpu.memory_space<vmem>>, vector<2x16x1x128xf32>,
    %95 = vector.shape_cast %86 : vector<512x128xf32> to vector<2x16x16x128xf32>
    %c0_120 = arith.constant 0 : index
    %c1_121 = arith.constant 1 : index
    %c1_122 = arith.constant 1 : index
    %c0_123 = arith.constant 0 : index
    %96 = vector.load %arg7[%c0_120, %c1_121, %c1_122, %c0_123] : memref<2x18x18x128xf32, #tpu.memory_space<vmem>>, vector<2x16x16x128xf32>
    tpu.vector_store %arg7[%c0_120, %c1_121, %c1_122, %c0_123], %95 {strides = array<i32>} : memref<2x18x18x128xf32, #tpu.memory_space<vmem>>, vector<2x16x16x128xf32>,
    %c0_124 = arith.constant 0 : index
    %c0_125 = arith.constant 0 : index
    %c0_126 = arith.constant 0 : index
    %c0_127 = arith.constant 0 : index
    %97 = vector.load %arg7[%c0_124, %c0_125, %c0_126, %c0_127] : memref<2x18x18x128xf32, #tpu.memory_space<vmem>>, vector<2x16x16x128xf32>
    %98 = vector.shape_cast %97 : vector<2x16x16x128xf32> to vector<512x128xf32>
    %c0_128 = arith.constant 0 : index
    %c0_129 = arith.constant 0 : index
    %c0_130 = arith.constant 0 : index
    %99 = vector.load %arg2[%c0_128, %c0_129, %c0_130] : memref<9x128x128xf32, #tpu.memory_space<vmem>>, vector<1x128x128xf32>
    %100 = vector.shape_cast %99 : vector<1x128x128xf32> to vector<128x128xf32>
    %cst_131 = arith.constant dense<0.000000e+00> : vector<512x128xf32>
    %101 = tpu.matmul %98, %100, %cst_131 {dimension_numbers = #tpu.dot_dimension_numbers<[1], [0], [0], [1], [0, 0, 1, 1], [], []>} : vector<512x128xf32>, vector<128x128xf32>, vector<512x128xf32> -> vector<512x128xf32>
    %c0_132 = arith.constant 0 : index
    %c0_133 = arith.constant 0 : index
    %c1_134 = arith.constant 1 : index
    %c0_135 = arith.constant 0 : index
    %102 = vector.load %arg7[%c0_132, %c0_133, %c1_134, %c0_135] : memref<2x18x18x128xf32, #tpu.memory_space<vmem>>, vector<2x16x16x128xf32>
    %103 = vector.shape_cast %102 : vector<2x16x16x128xf32> to vector<512x128xf32>
    %c1_136 = arith.constant 1 : index
    %c0_137 = arith.constant 0 : index
    %c0_138 = arith.constant 0 : index
    %104 = vector.load %arg2[%c1_136, %c0_137, %c0_138] : memref<9x128x128xf32, #tpu.memory_space<vmem>>, vector<1x128x128xf32>
    %105 = vector.shape_cast %104 : vector<1x128x128xf32> to vector<128x128xf32>
    %cst_139 = arith.constant dense<0.000000e+00> : vector<512x128xf32>
    %106 = tpu.matmul %103, %105, %cst_139 {dimension_numbers = #tpu.dot_dimension_numbers<[1], [0], [0], [1], [0, 0, 1, 1], [], []>} : vector<512x128xf32>, vector<128x128xf32>, vector<512x128xf32> -> vector<512x128xf32>
    %107 = arith.addf %101, %106 : vector<512x128xf32>
    %c0_140 = arith.constant 0 : index
    %c0_141 = arith.constant 0 : index
    %c2_142 = arith.constant 2 : index
    %c0_143 = arith.constant 0 : index
    %108 = vector.load %arg7[%c0_140, %c0_141, %c2_142, %c0_143] : memref<2x18x18x128xf32, #tpu.memory_space<vmem>>, vector<2x16x16x128xf32>
    %109 = vector.shape_cast %108 : vector<2x16x16x128xf32> to vector<512x128xf32>
    %c2_144 = arith.constant 2 : index
    %c0_145 = arith.constant 0 : index
    %c0_146 = arith.constant 0 : index
    %110 = vector.load %arg2[%c2_144, %c0_145, %c0_146] : memref<9x128x128xf32, #tpu.memory_space<vmem>>, vector<1x128x128xf32>
    %111 = vector.shape_cast %110 : vector<1x128x128xf32> to vector<128x128xf32>
    %cst_147 = arith.constant dense<0.000000e+00> : vector<512x128xf32>
    %112 = tpu.matmul %109, %111, %cst_147 {dimension_numbers = #tpu.dot_dimension_numbers<[1], [0], [0], [1], [0, 0, 1, 1], [], []>} : vector<512x128xf32>, vector<128x128xf32>, vector<512x128xf32> -> vector<512x128xf32>
    %113 = arith.addf %107, %112 : vector<512x128xf32>
    %c0_148 = arith.constant 0 : index
    %c1_149 = arith.constant 1 : index
    %c0_150 = arith.constant 0 : index
    %c0_151 = arith.constant 0 : index
    %114 = vector.load %arg7[%c0_148, %c1_149, %c0_150, %c0_151] : memref<2x18x18x128xf32, #tpu.memory_space<vmem>>, vector<2x16x16x128xf32>
    %115 = vector.shape_cast %114 : vector<2x16x16x128xf32> to vector<512x128xf32>
    %c3_152 = arith.constant 3 : index
    %c0_153 = arith.constant 0 : index
    %c0_154 = arith.constant 0 : index
    %116 = vector.load %arg2[%c3_152, %c0_153, %c0_154] : memref<9x128x128xf32, #tpu.memory_space<vmem>>, vector<1x128x128xf32>
    %117 = vector.shape_cast %116 : vector<1x128x128xf32> to vector<128x128xf32>
    %cst_155 = arith.constant dense<0.000000e+00> : vector<512x128xf32>
    %118 = tpu.matmul %115, %117, %cst_155 {dimension_numbers = #tpu.dot_dimension_numbers<[1], [0], [0], [1], [0, 0, 1, 1], [], []>} : vector<512x128xf32>, vector<128x128xf32>, vector<512x128xf32> -> vector<512x128xf32>
    %119 = arith.addf %113, %118 : vector<512x128xf32>
    %c0_156 = arith.constant 0 : index
    %c1_157 = arith.constant 1 : index
    %c1_158 = arith.constant 1 : index
    %c0_159 = arith.constant 0 : index
    %120 = vector.load %arg7[%c0_156, %c1_157, %c1_158, %c0_159] : memref<2x18x18x128xf32, #tpu.memory_space<vmem>>, vector<2x16x16x128xf32>
    %121 = vector.shape_cast %120 : vector<2x16x16x128xf32> to vector<512x128xf32>
    %c4_160 = arith.constant 4 : index
    %c0_161 = arith.constant 0 : index
    %c0_162 = arith.constant 0 : index
    %122 = vector.load %arg2[%c4_160, %c0_161, %c0_162] : memref<9x128x128xf32, #tpu.memory_space<vmem>>, vector<1x128x128xf32>
    %123 = vector.shape_cast %122 : vector<1x128x128xf32> to vector<128x128xf32>
    %cst_163 = arith.constant dense<0.000000e+00> : vector<512x128xf32>
    %124 = tpu.matmul %121, %123, %cst_163 {dimension_numbers = #tpu.dot_dimension_numbers<[1], [0], [0], [1], [0, 0, 1, 1], [], []>} : vector<512x128xf32>, vector<128x128xf32>, vector<512x128xf32> -> vector<512x128xf32>
    %125 = arith.addf %119, %124 : vector<512x128xf32>
    %c0_164 = arith.constant 0 : index
    %c1_165 = arith.constant 1 : index
    %c2_166 = arith.constant 2 : index
    %c0_167 = arith.constant 0 : index
    %126 = vector.load %arg7[%c0_164, %c1_165, %c2_166, %c0_167] : memref<2x18x18x128xf32, #tpu.memory_space<vmem>>, vector<2x16x16x128xf32>
    %127 = vector.shape_cast %126 : vector<2x16x16x128xf32> to vector<512x128xf32>
    %c5_168 = arith.constant 5 : index
    %c0_169 = arith.constant 0 : index
    %c0_170 = arith.constant 0 : index
    %128 = vector.load %arg2[%c5_168, %c0_169, %c0_170] : memref<9x128x128xf32, #tpu.memory_space<vmem>>, vector<1x128x128xf32>
    %129 = vector.shape_cast %128 : vector<1x128x128xf32> to vector<128x128xf32>
    %cst_171 = arith.constant dense<0.000000e+00> : vector<512x128xf32>
    %130 = tpu.matmul %127, %129, %cst_171 {dimension_numbers = #tpu.dot_dimension_numbers<[1], [0], [0], [1], [0, 0, 1, 1], [], []>} : vector<512x128xf32>, vector<128x128xf32>, vector<512x128xf32> -> vector<512x128xf32>
    %131 = arith.addf %125, %130 : vector<512x128xf32>
    %c0_172 = arith.constant 0 : index
    %c2_173 = arith.constant 2 : index
    %c0_174 = arith.constant 0 : index
    %c0_175 = arith.constant 0 : index
    %132 = vector.load %arg7[%c0_172, %c2_173, %c0_174, %c0_175] : memref<2x18x18x128xf32, #tpu.memory_space<vmem>>, vector<2x16x16x128xf32>
    %133 = vector.shape_cast %132 : vector<2x16x16x128xf32> to vector<512x128xf32>
    %c6_176 = arith.constant 6 : index
    %c0_177 = arith.constant 0 : index
    %c0_178 = arith.constant 0 : index
    %134 = vector.load %arg2[%c6_176, %c0_177, %c0_178] : memref<9x128x128xf32, #tpu.memory_space<vmem>>, vector<1x128x128xf32>
    %135 = vector.shape_cast %134 : vector<1x128x128xf32> to vector<128x128xf32>
    %cst_179 = arith.constant dense<0.000000e+00> : vector<512x128xf32>
    %136 = tpu.matmul %133, %135, %cst_179 {dimension_numbers = #tpu.dot_dimension_numbers<[1], [0], [0], [1], [0, 0, 1, 1], [], []>} : vector<512x128xf32>, vector<128x128xf32>, vector<512x128xf32> -> vector<512x128xf32>
    %137 = arith.addf %131, %136 : vector<512x128xf32>
    %c0_180 = arith.constant 0 : index
    %c2_181 = arith.constant 2 : index
    %c1_182 = arith.constant 1 : index
    %c0_183 = arith.constant 0 : index
    %138 = vector.load %arg7[%c0_180, %c2_181, %c1_182, %c0_183] : memref<2x18x18x128xf32, #tpu.memory_space<vmem>>, vector<2x16x16x128xf32>
    %139 = vector.shape_cast %138 : vector<2x16x16x128xf32> to vector<512x128xf32>
    %c7_184 = arith.constant 7 : index
    %c0_185 = arith.constant 0 : index
    %c0_186 = arith.constant 0 : index
    %140 = vector.load %arg2[%c7_184, %c0_185, %c0_186] : memref<9x128x128xf32, #tpu.memory_space<vmem>>, vector<1x128x128xf32>
    %141 = vector.shape_cast %140 : vector<1x128x128xf32> to vector<128x128xf32>
    %cst_187 = arith.constant dense<0.000000e+00> : vector<512x128xf32>
    %142 = tpu.matmul %139, %141, %cst_187 {dimension_numbers = #tpu.dot_dimension_numbers<[1], [0], [0], [1], [0, 0, 1, 1], [], []>} : vector<512x128xf32>, vector<128x128xf32>, vector<512x128xf32> -> vector<512x128xf32>
    %143 = arith.addf %137, %142 : vector<512x128xf32>
    %c0_188 = arith.constant 0 : index
    %c2_189 = arith.constant 2 : index
    %c2_190 = arith.constant 2 : index
    %c0_191 = arith.constant 0 : index
    %144 = vector.load %arg7[%c0_188, %c2_189, %c2_190, %c0_191] : memref<2x18x18x128xf32, #tpu.memory_space<vmem>>, vector<2x16x16x128xf32>
    %145 = vector.shape_cast %144 : vector<2x16x16x128xf32> to vector<512x128xf32>
    %c8_192 = arith.constant 8 : index
    %c0_193 = arith.constant 0 : index
    %c0_194 = arith.constant 0 : index
    %146 = vector.load %arg2[%c8_192, %c0_193, %c0_194] : memref<9x128x128xf32, #tpu.memory_space<vmem>>, vector<1x128x128xf32>
    %147 = vector.shape_cast %146 : vector<1x128x128xf32> to vector<128x128xf32>
    %cst_195 = arith.constant dense<0.000000e+00> : vector<512x128xf32>
    %148 = tpu.matmul %145, %147, %cst_195 {dimension_numbers = #tpu.dot_dimension_numbers<[1], [0], [0], [1], [0, 0, 1, 1], [], []>} : vector<512x128xf32>, vector<128x128xf32>, vector<512x128xf32> -> vector<512x128xf32>
    %149 = arith.addf %143, %148 : vector<512x128xf32>
    %cst_196 = arith.constant dense<0.000000e+00> : vector<8x128xf32>
    %150 = tpu.matmul %0, %149, %cst_196 {dimension_numbers = #tpu.dot_dimension_numbers<[1], [0], [0], [1], [0, 0, 1, 1], [], []>} : vector<8x512xf32>, vector<512x128xf32>, vector<8x128xf32> -> vector<8x128xf32>
    %151 = vector.extract_strided_slice %150 {offsets = [0, 0], sizes = [1, 128], strides = [1, 1]} : vector<8x128xf32> to vector<1x128xf32>
    %cst_197 = arith.constant 0.001953125 : f32
    %152 = vector.broadcast %cst_197 : f32 to vector<1x128xf32>
    %153 = arith.mulf %151, %152 : vector<1x128xf32>
    %154 = vector.broadcast %153 : vector<1x128xf32> to vector<512x128xf32>
    %155 = arith.subf %149, %154 : vector<512x128xf32>
    %156 = arith.mulf %155, %155 : vector<512x128xf32>
    %cst_198 = arith.constant dense<0.000000e+00> : vector<8x128xf32>
    %157 = tpu.matmul %0, %156, %cst_198 {dimension_numbers = #tpu.dot_dimension_numbers<[1], [0], [0], [1], [0, 0, 1, 1], [], []>} : vector<8x512xf32>, vector<512x128xf32>, vector<8x128xf32> -> vector<8x128xf32>
    %158 = vector.extract_strided_slice %157 {offsets = [0, 0], sizes = [1, 128], strides = [1, 1]} : vector<8x128xf32> to vector<1x128xf32>
    %cst_199 = arith.constant 0.001953125 : f32
    %159 = vector.broadcast %cst_199 : f32 to vector<1x128xf32>
    %160 = arith.mulf %158, %159 : vector<1x128xf32>
    %c0_200 = arith.constant 0 : index
    %c0_201 = arith.constant 0 : index
    %161 = vector.load %arg3[%c0_200, %c0_201] : memref<1x128xf32, #tpu.memory_space<vmem>>, vector<1x128xf32>
    %cst_202 = arith.constant 9.99999974E-6 : f32
    %162 = vector.broadcast %cst_202 : f32 to vector<1x128xf32>
    %163 = arith.addf %160, %162 : vector<1x128xf32>
    %164 = math.rsqrt %163 : vector<1x128xf32>
    %165 = arith.mulf %161, %164 : vector<1x128xf32>
    %166 = vector.broadcast %165 : vector<1x128xf32> to vector<512x128xf32>
    %167 = arith.mulf %155, %166 : vector<512x128xf32>
    %c0_203 = arith.constant 0 : index
    %c0_204 = arith.constant 0 : index
    %168 = vector.load %arg4[%c0_203, %c0_204] : memref<1x128xf32, #tpu.memory_space<vmem>>, vector<1x128xf32>
    %169 = vector.broadcast %168 : vector<1x128xf32> to vector<512x128xf32>
    %170 = arith.addf %167, %169 : vector<512x128xf32>
    %cst_205 = arith.constant 0.000000e+00 : f32
    %171 = vector.broadcast %cst_205 : f32 to vector<512x128xf32>
    %172 = arith.maximumf %170, %171 : vector<512x128xf32>
    %173 = vector.shape_cast %172 : vector<512x128xf32> to vector<2x256x128xf32>
    %174 = tpu.transpose %173, [0, 2, 1] : vector<2x256x128xf32> -> vector<2x128x256xf32>
    %175 = vector.extract_strided_slice %174 {offsets = [0, 0, 0], sizes = [2, 8, 256], strides = [1, 1, 1]} : vector<2x128x256xf32> to vector<2x8x256xf32>
    %c0_206 = arith.constant 0 : index
    %c0_207 = arith.constant 0 : index
    %c0_208 = arith.constant 0 : index
    %176 = vector.load %arg5[%c0_206, %c0_207, %c0_208] : memref<2x8x256xf32, #tpu.memory_space<vmem>>, vector<2x8x256xf32>
    tpu.vector_store %arg5[%c0_206, %c0_207, %c0_208], %175 {strides = array<i32>} : memref<2x8x256xf32, #tpu.memory_space<vmem>>, vector<2x8x256xf32>,
    return
  }
}

</mosaic_0001>

<bundles_post_ra>
// kernel: conv_block_forward.1
= control target key start
LH: loop header
LB: loop body
LE: loop exit
PB: predicated region body
PF: predicated region fallthrough
CT: control target
= control target key end

     0   :  { %vm552_vm0 = vcmask 1043456   ;;  %vm20_vm1 = vcmask 31744   ;;  %v9984_v2 = vmov 0.0   ;;  %vm23_vm2 = vcmask 25600   ;;  %s16029_s1 = inlined_call_operand.vmem [shape: f32[9,4,128], index: 1, kind: input, shape index: {}]   ;;  %s16030_s0 = inlined_call_operand.vmem [shape: f32[2,16,16,4], index: 0, kind: input, shape index: {}]   ;;  %s16031_s4 = inlined_call_operand.vmem [shape: f32[1,128], index: 4, kind: input, shape index: {}]   ;;  %s16032_s2 = inlined_call_operand.vmem [shape: f32[9,128,128], index: 2, kind: input, shape index: {}]   ;;  %s16033_s3 = inlined_call_operand.vmem [shape: f32[1,128], index: 3, kind: input, shape index: {}]   ;;  %s16034_s5 = inlined_call_operand.vmem [shape: f32[2,8,256], index: 5, kind: output, shape index: {}]  }
   0x1   :  { %v9250_v0 = vld [vmem:[%s16029_s1 + $0x4] sm:$0xf]  ;;  %v293_v1 = vld [vmem:[%s16029_s1] sm:$0xf]  ;;  %21 = vst.msk [vmem:[#allocation2] sm:$0xff] %vm20_vm1, %v9984_v2  ;;  %v146_v6 = vld [vmem:[%s16030_s0 + $0x168] sm:$0xff] }
   0x2   :  { %9251 = vmatpush.msk.msra.mxu0 %vm552_vm0, %v9250_v0  ;;  %9316 = vmatpush.msk.msra.mxu1 %vm552_vm0, %v293_v1  ;;  %22 = vst.msk [vmem:[#allocation2 + $0x8] sm:$0xff] %vm20_vm1, %v9984_v2  ;;  %v147_v7 = vld [vmem:[%s16030_s0 + $0x170] sm:$0xff]  ;;  %v101_v8 = vld [vmem:[%s16030_s0] sm:$0xff]  ;;  %vm36_vm3 = vcmask 24576   ;;  %v148_v14 = vld [vmem:[%s16030_s0 + $0x178] sm:$0xff] }
   0x3   :  { %9971 = vmatpush.msk.msra.mxu2 %vm552_vm0, %v9250_v0  ;;  %25 = vst.msk [vmem:[#allocation2 + $0x1b0] sm:$0xff] %vm20_vm1, %v9984_v2  ;;  %v102_v15 = vld [vmem:[%s16030_s0 + $0x8] sm:$0xff]  ;;  %v149_v16 = vld [vmem:[%s16030_s0 + $0x180] sm:$0xff]  ;;  %v103_v17 = vld [vmem:[%s16030_s0 + $0x10] sm:$0xff] }
   0x4   :  { %26 = vst.msk [vmem:[#allocation2 + $0x1b8] sm:$0xff] %vm20_vm1, %v9984_v2  ;;  %v150_v18 = vld [vmem:[%s16030_s0 + $0x188] sm:$0xff]  ;;  %v104_v19 = vld [vmem:[%s16030_s0 + $0x18] sm:$0xff]  ;;  %v151_v20 = vld [vmem:[%s16030_s0 + $0x190] sm:$0xff] }
   0x5   :  { %29 = vst.msk [vmem:[#allocation2 + $0x198] sm:$0xff] %vm20_vm1, %v9984_v2  ;;  %v105_v21 = vld [vmem:[%s16030_s0 + $0x20] sm:$0xff]  ;;  %v152_v22 = vld [vmem:[%s16030_s0 + $0x198] sm:$0xff]  ;;  %v106_v23 = vld [vmem:[%s16030_s0 + $0x28] sm:$0xff] }
   0x6   :  { %30 = vst.msk [vmem:[#allocation2 + $0x1a0] sm:$0xff] %vm20_vm1, %v9984_v2  ;;  %v153_v25 = vld [vmem:[%s16030_s0 + $0x1a0] sm:$0xff]  ;;  %v107_v31 = vld [vmem:[%s16030_s0 + $0x30] sm:$0xff]  ;;  %v154_v32 = vld [vmem:[%s16030_s0 + $0x1a8] sm:$0xff] }
   0x7   :  { %32 = vst.msk [vmem:[#allocation2 + $0x348] sm:$0xff] %vm20_vm1, %v9984_v2  ;;  %v108_v36 = vld [vmem:[%s16030_s0 + $0x38] sm:$0xff]  ;;  %v155_v37 = vld [vmem:[%s16030_s0 + $0x1b0] sm:$0xff]  ;;  %v109_v41 = vld [vmem:[%s16030_s0 + $0x40] sm:$0xff] }
   0x8   :  { %33 = vst.msk [vmem:[#allocation2 + $0x350] sm:$0xff] %vm20_vm1, %v9984_v2  ;;  %v229_v3 = vld [vmem:[#allocation2] sm:$0xff]  ;;  %v156_v42 = vld [vmem:[%s16030_s0 + $0x1b8] sm:$0xff]  ;;  %v110_v46 = vld [vmem:[%s16030_s0 + $0x48] sm:$0xff] }
   0x9   :  { %v294_v4 = vld [vmem:[#allocation2 + $0x1] sm:$0xff]  ;;  %5411 = vst [vmem:[#allocation3] sm:$0xff] %v9984_v2  ;;  %9317 = vmatmul.msk.f32.vlgmr.msra.gmra.mxu1 %vm20_vm1, %v229_v3  ;;  %v111_v51 = vld [vmem:[%s16030_s0 + $0x50] sm:$0xff]  ;;  %v112_v56 = vld [vmem:[%s16030_s0 + $0x58] sm:$0xff] }
   0xa   :  { %9252 = vmatmul.msk.f32.vlgmr.msra.gmra.mxu0 %vm20_vm1, %v294_v4  ;;  %5412 = vst [vmem:[#allocation3 + $0x8] sm:$0xff] %v9984_v2  ;;  %v230_v5 = vld [vmem:[#allocation2 + $0x8] sm:$0xff]  ;;  %v157_v47 = vld [vmem:[%s16030_s0 + $0x1c0] sm:$0xff]  ;;  %v159_v57 = vld [vmem:[%s16030_s0 + $0x1d0] sm:$0xff] }
   0xb   :  { %5413 = vst [vmem:[#allocation3 + $0x10] sm:$0x3] %v9984_v2  ;;  %v158_v52 = vld [vmem:[%s16030_s0 + $0x1c8] sm:$0xff]  ;;  %v113_v61 = vld [vmem:[%s16030_s0 + $0x60] sm:$0xff]  ;;  %v160_v62 = vld [vmem:[%s16030_s0 + $0x1d8] sm:$0xff] }
   0xc   :  { %5414 = vst [vmem:[#allocation3 + $0x1b0] sm:$0xff] %v9984_v2  ;;  %v161_v3 = vld [vmem:[%s16030_s0 + $0x1e0] sm:$0xff] }
   0xd   :  { %5415 = vst [vmem:[#allocation3 + $0x1b8] sm:$0xff] %v9984_v2 }
   0xe   :  { %5416 = vst [vmem:[#allocation3 + $0x1c0] sm:$0x3] %v9984_v2 }
   0xf   :  { %5418 = vst [vmem:[#allocation3 + $0x198] sm:$0xff] %v9984_v2 }
  0x10   :  { %5419 = vst [vmem:[#allocation3 + $0x1a0] sm:$0xff] %v9984_v2 }
  0x11   :  { %5420 = vst [vmem:[#allocation3 + $0x1a8] sm:$0x3] %v9984_v2  ;;  %9318 = vmatmul.msk.f32.gmra.mxu1 %vm20_vm1, %v230_v5 }
  0x12   :  { %5421 = vst [vmem:[#allocation3 + $0x348] sm:$0xff] %v9984_v2 }
  0x13   :  { %5422 = vst [vmem:[#allocation3 + $0x350] sm:$0xff] %v9984_v2 }
  0x14   :  { %5423 = vst [vmem:[#allocation3 + $0x358] sm:$0x3] %v9984_v2 }
  0x15   :  { %5425 = vst [vmem:[#allocation3 + $0x18] sm:$0x1] %v9984_v2 }
  0x16   :  { %5426 = vst [vmem:[#allocation3 + $0x30] sm:$0x1] %v9984_v2 }
  0x17   :  { %5427 = vst [vmem:[#allocation3 + $0x48] sm:$0x1] %v9984_v2 }
  0x18   :  { %5428 = vst [vmem:[#allocation3 + $0x60] sm:$0x1] %v9984_v2 }
  0x19   :  { %5429 = vst [vmem:[#allocation3 + $0x78] sm:$0x1] %v9984_v2 }
  0x1a   :  { %5430 = vst [vmem:[#allocation3 + $0x90] sm:$0x1] %v9984_v2 }
  0x1b   :  { %5431 = vst [vmem:[#allocation3 + $0xa8] sm:$0x1] %v9984_v2 }
  0x1c   :  { %5432 = vst [vmem:[#allocation3 + $0xc0] sm:$0x1] %v9984_v2 }
  0x1d   :  { %5433 = vst [vmem:[#allocation3 + $0xd8] sm:$0x1] %v9984_v2 }
  0x1e   :  { %5434 = vst [vmem:[#allocation3 + $0xf0] sm:$0x1] %v9984_v2 }
  0x1f   :  { %5435 = vst [vmem:[#allocation3 + $0x108] sm:$0x1] %v9984_v2 }
  0x20   :  { %5436 = vst [vmem:[#allocation3 + $0x120] sm:$0x1] %v9984_v2 }
  0x21   :  { %5437 = vst [vmem:[#allocation3 + $0x138] sm:$0x1] %v9984_v2 }
  0x22   :  { %5438 = vst [vmem:[#allocation3 + $0x150] sm:$0x1] %v9984_v2 }
  0x23   :  { %5439 = vst [vmem:[#allocation3 + $0x168] sm:$0x1] %v9984_v2 }
  0x24   :  { %5440 = vst [vmem:[#allocation3 + $0x180] sm:$0x1] %v9984_v2 }
  0x25   :  { %5441 = vst [vmem:[#allocation3 + $0x1c8] sm:$0x1] %v9984_v2 }
  0x26   :  { %5442 = vst [vmem:[#allocation3 + $0x1e0] sm:$0x1] %v9984_v2 }
  0x27   :  { %5443 = vst [vmem:[#allocation3 + $0x1f8] sm:$0x1] %v9984_v2 }
  0x28   :  { %5444 = vst [vmem:[#allocation3 + $0x210] sm:$0x1] %v9984_v2 }
  0x29   :  { %5445 = vst [vmem:[#allocation3 + $0x228] sm:$0x1] %v9984_v2 }
  0x2a   :  { %5446 = vst [vmem:[#allocation3 + $0x240] sm:$0x1] %v9984_v2 }
  0x2b   :  { %5447 = vst [vmem:[#allocation3 + $0x258] sm:$0x1] %v9984_v2 }
  0x2c   :  { %5448 = vst [vmem:[#allocation3 + $0x270] sm:$0x1] %v9984_v2 }
  0x2d   :  { %5449 = vst [vmem:[#allocation3 + $0x288] sm:$0x1] %v9984_v2 }
  0x2e   :  { %5450 = vst [vmem:[#allocation3 + $0x2a0] sm:$0x1] %v9984_v2 }
  0x2f   :  { %5451 = vst [vmem:[#allocation3 + $0x2b8] sm:$0x1] %v9984_v2 }
  0x30   :  { %5452 = vst [vmem:[#allocation3 + $0x2d0] sm:$0x1] %v9984_v2 }
  0x31   :  { %5453 = vst [vmem:[#allocation3 + $0x2e8] sm:$0x1] %v9984_v2 }
  0x32   :  { %5454 = vst [vmem:[#allocation3 + $0x300] sm:$0x1] %v9984_v2 }
  0x33   :  { %5455 = vst [vmem:[#allocation3 + $0x318] sm:$0x1] %v9984_v2 }
  0x34   :  { %5456 = vst [vmem:[#allocation3 + $0x330] sm:$0x1] %v9984_v2 }
  0x35   :  { %5457 = vst [vmem:[#allocation3 + $0x29] sm:$0x1] %v9984_v2 }
  0x36   :  { %5458 = vst [vmem:[#allocation3 + $0x41] sm:$0x1] %v9984_v2 }
  0x37   :  { %5459 = vst [vmem:[#allocation3 + $0x59] sm:$0x1] %v9984_v2 }
  0x38   :  { %5460 = vst [vmem:[#allocation3 + $0x71] sm:$0x1] %v9984_v2 }
  0x39   :  { %5461 = vst [vmem:[#allocation3 + $0x89] sm:$0x1] %v9984_v2 }
  0x3a   :  { %5462 = vst [vmem:[#allocation3 + $0xa1] sm:$0x1] %v9984_v2 }
  0x3b   :  { %5463 = vst [vmem:[#allocation3 + $0xb9] sm:$0x1] %v9984_v2 }
  0x3c   :  { %5464 = vst [vmem:[#allocation3 + $0xd1] sm:$0x1] %v9984_v2 }
  0x3d   :  { %5465 = vst [vmem:[#allocation3 + $0xe9] sm:$0x1] %v9984_v2 }
  0x3e   :  { %5466 = vst [vmem:[#allocation3 + $0x101] sm:$0x1] %v9984_v2 }
  0x3f   :  { %5467 = vst [vmem:[#allocation3 + $0x119] sm:$0x1] %v9984_v2 }
  0x40   :  { %5468 = vst [vmem:[#allocation3 + $0x131] sm:$0x1] %v9984_v2 }
  0x41   :  { %5469 = vst [vmem:[#allocation3 + $0x149] sm:$0x1] %v9984_v2 }
  0x42   :  { %5470 = vst [vmem:[#allocation3 + $0x161] sm:$0x1] %v9984_v2 }
  0x43   :  { %5471 = vst [vmem:[#allocation3 + $0x179] sm:$0x1] %v9984_v2 }
  0x44   :  { %5472 = vst [vmem:[#allocation3 + $0x191] sm:$0x1] %v9984_v2 }
  0x45   :  { %5473 = vst [vmem:[#allocation3 + $0x1d9] sm:$0x1] %v9984_v2 }
  0x46   :  { %5474 = vst [vmem:[#allocation3 + $0x1f1] sm:$0x1] %v9984_v2 }
  0x47   :  { %5475 = vst [vmem:[#allocation3 + $0x209] sm:$0x1] %v9984_v2 }
  0x48   :  { %5476 = vst [vmem:[#allocation3 + $0x221] sm:$0x1] %v9984_v2 }
  0x49   :  { %5477 = vst [vmem:[#allocation3 + $0x239] sm:$0x1] %v9984_v2 }
  0x4a   :  { %5478 = vst [vmem:[#allocation3 + $0x251] sm:$0x1] %v9984_v2 }
  0x4b   :  { %5479 = vst [vmem:[#allocation3 + $0x269] sm:$0x1] %v9984_v2 }
  0x4c   :  { %5480 = vst [vmem:[#allocation3 + $0x281] sm:$0x1] %v9984_v2 }
  0x4d   :  { %5481 = vst [vmem:[#allocation3 + $0x299] sm:$0x1] %v9984_v2 }
  0x4e   :  { %5482 = vst [vmem:[#allocation3 + $0x2b1] sm:$0x1] %v9984_v2 }
  0x4f   :  { %5483 = vst [vmem:[#allocation3 + $0x2c9] sm:$0x1] %v9984_v2 }
  0x50   :  { %5484 = vst [vmem:[#allocation3 + $0x2e1] sm:$0x1] %v9984_v2 }
  0x51   :  { %5485 = vst [vmem:[#allocation3 + $0x2f9] sm:$0x1] %v9984_v2 }
  0x52   :  { %5486 = vst [vmem:[#allocation3 + $0x311] sm:$0x1] %v9984_v2 }
  0x53   :  { %5487 = vst [vmem:[#allocation3 + $0x329] sm:$0x1] %v9984_v2 }
  0x54   :  { %5488 = vst [vmem:[#allocation3 + $0x341] sm:$0x1] %v9984_v2 }
  0x55   :  { %210 = vst.msk [vmem:[#allocation2 + $0x261] sm:$0xff] %vm20_vm1, %v146_v6 }
  0x56   :  { %24 = vst.msk [vmem:[#allocation2 + $0x10] sm:$0x3] %vm23_vm2, %v9984_v2 }
  0x57   :  { %27 = vst.msk [vmem:[#allocation2 + $0x1c0] sm:$0x3] %vm23_vm2, %v9984_v2 }
  0x58   :  { %31 = vst.msk [vmem:[#allocation2 + $0x1a8] sm:$0x3] %vm23_vm2, %v9984_v2 }
  0x59   :  { %34 = vst.msk [vmem:[#allocation2 + $0x358] sm:$0x3] %vm23_vm2, %v9984_v2 }
  0x5a   :  { %211 = vst.msk [vmem:[#allocation2 + $0x271] sm:$0xff] %vm20_vm1, %v147_v7  ;;  %v115_v7 = vld [vmem:[%s16030_s0 + $0x70] sm:$0xff] }
  0x5b   :  { %165 = vst.msk [vmem:[#allocation2 + $0x19] sm:$0xff] %vm20_vm1, %v101_v8  ;;  %v162_v8 = vld [vmem:[%s16030_s0 + $0x1e8] sm:$0xff] }
  0x5c   :  { %v341_v9 = vld [vmem:[#allocation2 + $0x261] sm:$0xff]  ;;  %37 = vst.msk [vmem:[#allocation2 + $0x18] sm:$0x1] %vm36_vm3, %v9984_v2 }
  0x5d   :  { %9299 = vmatmul.msk.f32.vlgmr.msra.gmra.mxu2 %vm20_vm1, %v341_v9  ;;  %v295_v10 = vld [vmem:[#allocation2 + $0x9] sm:$0xff]  ;;  %38 = vst.msk [vmem:[#allocation2 + $0x30] sm:$0x1] %vm36_vm3, %v9984_v2 }
  0x5e   :  { %9253 = vmatmul.msk.f32.gmra.mxu0 %vm20_vm1, %v295_v10  ;;  %39 = vst.msk [vmem:[#allocation2 + $0x48] sm:$0x1] %vm36_vm3, %v9984_v2 }
  0x5f   :  { %40 = vst.msk [vmem:[#allocation2 + $0x60] sm:$0x1] %vm36_vm3, %v9984_v2 }
  0x60   :  { %41 = vst.msk [vmem:[#allocation2 + $0x78] sm:$0x1] %vm36_vm3, %v9984_v2 }
  0x61   :  { %42 = vst.msk [vmem:[#allocation2 + $0x90] sm:$0x1] %vm36_vm3, %v9984_v2  ;;  %v342_v11 = vld [vmem:[#allocation2 + $0x271] sm:$0xff] }
  0x62   :  { %43 = vst.msk [vmem:[#allocation2 + $0xa8] sm:$0x1] %vm36_vm3, %v9984_v2  ;;  %v296_v12 = vld [vmem:[#allocation2 + $0x19] sm:$0xff] }
  0x63   :  { %v231_v13 = vld [vmem:[#allocation2 + $0x18] sm:$0xff]  ;;  %44 = vst.msk [vmem:[#allocation2 + $0xc0] sm:$0x1] %vm36_vm3, %v9984_v2 }
  0x64   :  { %9319 = vmatmul.msk.f32.gmra.mxu1 %vm20_vm1, %v231_v13  ;;  %45 = vst.msk [vmem:[#allocation2 + $0xd8] sm:$0x1] %vm36_vm3, %v9984_v2  ;;  %v9381_v13 = vld [vmem:[%s16029_s1 + $0x8] sm:$0xf] }
  0x65   :  { %9300 = vmatmul.msk.f32.gmra.mxu2 %vm20_vm1, %v342_v11  ;;  %46 = vst.msk [vmem:[#allocation2 + $0xf0] sm:$0x1] %vm36_vm3, %v9984_v2 }
  0x66   :  { %9254 = vmatmul.msk.f32.gmra.mxu0 %vm20_vm1, %v296_v12  ;;  %47 = vst.msk [vmem:[#allocation2 + $0x108] sm:$0x1] %vm36_vm3, %v9984_v2  ;;  %v116_v12 = vld [vmem:[%s16030_s0 + $0x78] sm:$0xff]  ;;  %9382 = vmatpush.msk.msrb.mxu2 %vm552_vm0, %v9381_v13 }
  0x67   :  { %48 = vst.msk [vmem:[#allocation2 + $0x120] sm:$0x1] %vm36_vm3, %v9984_v2 }
  0x68   :  { %49 = vst.msk [vmem:[#allocation2 + $0x138] sm:$0x1] %vm36_vm3, %v9984_v2 }
  0x69   :  { %50 = vst.msk [vmem:[#allocation2 + $0x150] sm:$0x1] %vm36_vm3, %v9984_v2 }
  0x6a   :  { %51 = vst.msk [vmem:[#allocation2 + $0x168] sm:$0x1] %vm36_vm3, %v9984_v2 }
  0x6b   :  { %52 = vst.msk [vmem:[#allocation2 + $0x180] sm:$0x1] %vm36_vm3, %v9984_v2 }
  0x6c   :  { %53 = vst.msk [vmem:[#allocation2 + $0x1c8] sm:$0x1] %vm36_vm3, %v9984_v2 }
  0x6d   :  { %54 = vst.msk [vmem:[#allocation2 + $0x1e0] sm:$0x1] %vm36_vm3, %v9984_v2 }
  0x6e   :  { %55 = vst.msk [vmem:[#allocation2 + $0x1f8] sm:$0x1] %vm36_vm3, %v9984_v2 }
  0x6f   :  { %56 = vst.msk [vmem:[#allocation2 + $0x210] sm:$0x1] %vm36_vm3, %v9984_v2 }
  0x70   :  { %57 = vst.msk [vmem:[#allocation2 + $0x228] sm:$0x1] %vm36_vm3, %v9984_v2 }
  0x71   :  { %58 = vst.msk [vmem:[#allocation2 + $0x240] sm:$0x1] %vm36_vm3, %v9984_v2 }
  0x72   :  { %59 = vst.msk [vmem:[#allocation2 + $0x258] sm:$0x1] %vm36_vm3, %v9984_v2 }
  0x73   :  { %60 = vst.msk [vmem:[#allocation2 + $0x270] sm:$0x1] %vm36_vm3, %v9984_v2 }
  0x74   :  { %61 = vst.msk [vmem:[#allocation2 + $0x288] sm:$0x1] %vm36_vm3, %v9984_v2 }
  0x75   :  { %62 = vst.msk [vmem:[#allocation2 + $0x2a0] sm:$0x1] %vm36_vm3, %v9984_v2 }
  0x76   :  { %63 = vst.msk [vmem:[#allocation2 + $0x2b8] sm:$0x1] %vm36_vm3, %v9984_v2 }
  0x77   :  { %64 = vst.msk [vmem:[#allocation2 + $0x2d0] sm:$0x1] %vm36_vm3, %v9984_v2 }
  0x78   :  { %65 = vst.msk [vmem:[#allocation2 + $0x2e8] sm:$0x1] %vm36_vm3, %v9984_v2 }
  0x79   :  { %66 = vst.msk [vmem:[#allocation2 + $0x300] sm:$0x1] %vm36_vm3, %v9984_v2 }
  0x7a   :  { %67 = vst.msk [vmem:[#allocation2 + $0x318] sm:$0x1] %vm36_vm3, %v9984_v2 }
  0x7b   :  { %68 = vst.msk [vmem:[#allocation2 + $0x330] sm:$0x1] %vm36_vm3, %v9984_v2 }
  0x7c   :  { %69 = vst.msk [vmem:[#allocation2 + $0x29] sm:$0x1] %vm36_vm3, %v9984_v2 }
  0x7d   :  { %70 = vst.msk [vmem:[#allocation2 + $0x41] sm:$0x1] %vm36_vm3, %v9984_v2 }
  0x7e   :  { %71 = vst.msk [vmem:[#allocation2 + $0x59] sm:$0x1] %vm36_vm3, %v9984_v2 }
  0x7f   :  { %72 = vst.msk [vmem:[#allocation2 + $0x71] sm:$0x1] %vm36_vm3, %v9984_v2 }
  0x80   :  { %73 = vst.msk [vmem:[#allocation2 + $0x89] sm:$0x1] %vm36_vm3, %v9984_v2 }
  0x81   :  { %74 = vst.msk [vmem:[#allocation2 + $0xa1] sm:$0x1] %vm36_vm3, %v9984_v2 }
  0x82   :  { %75 = vst.msk [vmem:[#allocation2 + $0xb9] sm:$0x1] %vm36_vm3, %v9984_v2 }
  0x83   :  { %76 = vst.msk [vmem:[#allocation2 + $0xd1] sm:$0x1] %vm36_vm3, %v9984_v2 }
  0x84   :  { %77 = vst.msk [vmem:[#allocation2 + $0xe9] sm:$0x1] %vm36_vm3, %v9984_v2 }
  0x85   :  { %78 = vst.msk [vmem:[#allocation2 + $0x101] sm:$0x1] %vm36_vm3, %v9984_v2 }
  0x86   :  { %79 = vst.msk [vmem:[#allocation2 + $0x119] sm:$0x1] %vm36_vm3, %v9984_v2 }
  0x87   :  { %80 = vst.msk [vmem:[#allocation2 + $0x131] sm:$0x1] %vm36_vm3, %v9984_v2 }
  0x88   :  { %81 = vst.msk [vmem:[#allocation2 + $0x149] sm:$0x1] %vm36_vm3, %v9984_v2 }
  0x89   :  { %82 = vst.msk [vmem:[#allocation2 + $0x161] sm:$0x1] %vm36_vm3, %v9984_v2 }
  0x8a   :  { %83 = vst.msk [vmem:[#allocation2 + $0x179] sm:$0x1] %vm36_vm3, %v9984_v2 }
  0x8b   :  { %84 = vst.msk [vmem:[#allocation2 + $0x191] sm:$0x1] %vm36_vm3, %v9984_v2 }
  0x8c   :  { %85 = vst.msk [vmem:[#allocation2 + $0x1d9] sm:$0x1] %vm36_vm3, %v9984_v2 }
  0x8d   :  { %86 = vst.msk [vmem:[#allocation2 + $0x1f1] sm:$0x1] %vm36_vm3, %v9984_v2 }
  0x8e   :  { %87 = vst.msk [vmem:[#allocation2 + $0x209] sm:$0x1] %vm36_vm3, %v9984_v2 }
  0x8f   :  { %88 = vst.msk [vmem:[#allocation2 + $0x221] sm:$0x1] %vm36_vm3, %v9984_v2 }
  0x90   :  { %89 = vst.msk [vmem:[#allocation2 + $0x239] sm:$0x1] %vm36_vm3, %v9984_v2 }
  0x91   :  { %90 = vst.msk [vmem:[#allocation2 + $0x251] sm:$0x1] %vm36_vm3, %v9984_v2 }
  0x92   :  { %91 = vst.msk [vmem:[#allocation2 + $0x269] sm:$0x1] %vm36_vm3, %v9984_v2 }
  0x93   :  { %92 = vst.msk [vmem:[#allocation2 + $0x281] sm:$0x1] %vm36_vm3, %v9984_v2 }
  0x94   :  { %93 = vst.msk [vmem:[#allocation2 + $0x299] sm:$0x1] %vm36_vm3, %v9984_v2 }
  0x95   :  { %94 = vst.msk [vmem:[#allocation2 + $0x2b1] sm:$0x1] %vm36_vm3, %v9984_v2 }
  0x96   :  { %95 = vst.msk [vmem:[#allocation2 + $0x2c9] sm:$0x1] %vm36_vm3, %v9984_v2 }
  0x97   :  { %96 = vst.msk [vmem:[#allocation2 + $0x2e1] sm:$0x1] %vm36_vm3, %v9984_v2 }
  0x98   :  { %97 = vst.msk [vmem:[#allocation2 + $0x2f9] sm:$0x1] %vm36_vm3, %v9984_v2 }
  0x99   :  { %98 = vst.msk [vmem:[#allocation2 + $0x311] sm:$0x1] %vm36_vm3, %v9984_v2 }
  0x9a   :  { %99 = vst.msk [vmem:[#allocation2 + $0x329] sm:$0x1] %vm36_vm3, %v9984_v2 }
  0x9b   :  { %100 = vst.msk [vmem:[#allocation2 + $0x341] sm:$0x1] %vm36_vm3, %v9984_v2  ;;  %v114_v2 = vld [vmem:[%s16030_s0 + $0x68] sm:$0xff] }
  0x9c   :  { %212 = vst.msk [vmem:[#allocation2 + $0x279] sm:$0xff] %vm20_vm1, %v148_v14 }
  0x9d   :  { %166 = vst.msk [vmem:[#allocation2 + $0x21] sm:$0xff] %vm20_vm1, %v102_v15 }
  0x9e   :  { %213 = vst.msk [vmem:[#allocation2 + $0x289] sm:$0xff] %vm20_vm1, %v149_v16 }
  0x9f   :  { %167 = vst.msk [vmem:[#allocation2 + $0x31] sm:$0xff] %vm20_vm1, %v103_v17  ;;  %v117_v17 = vld [vmem:[%s16030_s0 + $0x80] sm:$0xff] }
  0xa0   :  { %214 = vst.msk [vmem:[#allocation2 + $0x291] sm:$0xff] %vm20_vm1, %v150_v18 }
  0xa1   :  { %168 = vst.msk [vmem:[#allocation2 + $0x39] sm:$0xff] %vm20_vm1, %v104_v19 }
  0xa2   :  { %215 = vst.msk [vmem:[#allocation2 + $0x2a1] sm:$0xff] %vm20_vm1, %v151_v20 }
  0xa3   :  { %v343_v24 = vld [vmem:[#allocation2 + $0x279] sm:$0xff]  ;;  %169 = vst.msk [vmem:[#allocation2 + $0x49] sm:$0xff] %vm20_vm1, %v105_v21  ;;  %v118_v21 = vld [vmem:[%s16030_s0 + $0x88] sm:$0xff] }
  0xa4   :  { %9301 = vmatmul.msk.f32.gmra.mxu2 %vm20_vm1, %v343_v24  ;;  %v297_v26 = vld [vmem:[#allocation2 + $0x21] sm:$0xff]  ;;  %216 = vst.msk [vmem:[#allocation2 + $0x2a9] sm:$0xff] %vm20_vm1, %v152_v22  ;;  %v10438_v22 = vpop.f32.mrf.mxu0 }
  0xa5   :  { %v232_v27 = vld [vmem:[#allocation2 + $0x20] sm:$0xff]  ;;  %9255 = vmatmul.msk.f32.gmra.mxu0 %vm20_vm1, %v297_v26  ;;  %170 = vst.msk [vmem:[#allocation2 + $0x51] sm:$0xff] %vm20_vm1, %v106_v23  ;;  %v344_v28 = vld [vmem:[#allocation2 + $0x289] sm:$0xff]  ;;  %v10440_v23 = vpop.f32.mrf.mxu1 }
  0xa6   :  { %9320 = vmatmul.msk.f32.gmra.mxu1 %vm20_vm1, %v232_v27  ;;  %217 = vst.msk [vmem:[#allocation2 + $0x2b9] sm:$0xff] %vm20_vm1, %v153_v25  ;;  %v298_v29 = vld [vmem:[#allocation2 + $0x31] sm:$0xff] }
  0xa7   :  { %v233_v30 = vld [vmem:[#allocation2 + $0x30] sm:$0xff]  ;;  %171 = vst.msk [vmem:[#allocation2 + $0x61] sm:$0xff] %vm20_vm1, %v107_v31 }
  0xa8   :  { %218 = vst.msk [vmem:[#allocation2 + $0x2c1] sm:$0xff] %vm20_vm1, %v154_v32  ;;  %v345_v33 = vld [vmem:[#allocation2 + $0x291] sm:$0xff]  ;;  %v299_v34 = vld [vmem:[#allocation2 + $0x39] sm:$0xff] }
  0xa9   :  { %v234_v35 = vld [vmem:[#allocation2 + $0x38] sm:$0xff]  ;;  %172 = vst.msk [vmem:[#allocation2 + $0x69] sm:$0xff] %vm20_vm1, %v108_v36  ;;  %v346_v38 = vld [vmem:[#allocation2 + $0x2a1] sm:$0xff]  ;;  %v119_v27 = vld [vmem:[%s16030_s0 + $0x90] sm:$0xff] }
  0xaa   :  { %219 = vst.msk [vmem:[#allocation2 + $0x2d1] sm:$0xff] %vm20_vm1, %v155_v37  ;;  %v300_v39 = vld [vmem:[#allocation2 + $0x49] sm:$0xff] }
  0xab   :  { %v235_v40 = vld [vmem:[#allocation2 + $0x48] sm:$0xff]  ;;  %173 = vst.msk [vmem:[#allocation2 + $0x79] sm:$0xff] %vm20_vm1, %v109_v41 }
  0xac   :  { %9302 = vmatmul.msk.f32.gmra.mxu2 %vm20_vm1, %v344_v28  ;;  %220 = vst.msk [vmem:[#allocation2 + $0x2d9] sm:$0xff] %vm20_vm1, %v156_v42  ;;  %v347_v43 = vld [vmem:[#allocation2 + $0x2a9] sm:$0xff]  ;;  %v301_v44 = vld [vmem:[#allocation2 + $0x51] sm:$0xff] }
  0xad   :  { %9256 = vmatmul.msk.f32.gmra.mxu0 %vm20_vm1, %v298_v29  ;;  %v236_v45 = vld [vmem:[#allocation2 + $0x50] sm:$0xff]  ;;  %174 = vst.msk [vmem:[#allocation2 + $0x81] sm:$0xff] %vm20_vm1, %v110_v46  ;;  %v348_v48 = vld [vmem:[#allocation2 + $0x2b9] sm:$0xff]  ;;  %v10453_v29 = vpop.f32.mrf.mxu1  ;;  %v1169_v37 = vld [vmem:[#allocation2 + $0x2] sm:$0xff] }
  0xae   :  { %9321 = vmatmul.msk.f32.gmra.mxu1 %vm20_vm1, %v233_v30  ;;  %221 = vst.msk [vmem:[#allocation2 + $0x2e9] sm:$0xff] %vm20_vm1, %v157_v47  ;;  %v302_v49 = vld [vmem:[#allocation2 + $0x61] sm:$0xff]  ;;  %v1170_v42 = vld [vmem:[#allocation2 + $0xa] sm:$0xff] }
  0xaf   :  { %v237_v50 = vld [vmem:[#allocation2 + $0x60] sm:$0xff]  ;;  %175 = vst.msk [vmem:[#allocation2 + $0x91] sm:$0xff] %vm20_vm1, %v111_v51  ;;  %v122_v47 = vld [vmem:[%s16030_s0 + $0xa8] sm:$0xff] }
  0xb0   :  { %222 = vst.msk [vmem:[#allocation2 + $0x2f1] sm:$0xff] %vm20_vm1, %v158_v52  ;;  %v349_v53 = vld [vmem:[#allocation2 + $0x2c1] sm:$0xff]  ;;  %v303_v54 = vld [vmem:[#allocation2 + $0x69] sm:$0xff] }
  0xb1   :  { %v238_v55 = vld [vmem:[#allocation2 + $0x68] sm:$0xff]  ;;  %176 = vst.msk [vmem:[#allocation2 + $0x99] sm:$0xff] %vm20_vm1, %v112_v56  ;;  %v350_v58 = vld [vmem:[#allocation2 + $0x2d1] sm:$0xff] }
  0xb2   :  { %223 = vst.msk [vmem:[#allocation2 + $0x301] sm:$0xff] %vm20_vm1, %v159_v57  ;;  %v304_v59 = vld [vmem:[#allocation2 + $0x79] sm:$0xff]  ;;  %v1172_v56 = vld [vmem:[#allocation2 + $0x22] sm:$0xff]  ;;  %v1175_v13 = vld [vmem:[#allocation2 + $0x4a] sm:$0xff] }
  0xb3   :  { %v239_v60 = vld [vmem:[#allocation2 + $0x78] sm:$0xff]  ;;  %177 = vst.msk [vmem:[#allocation2 + $0xa9] sm:$0xff] %vm20_vm1, %v113_v61 }
  0xb4   :  { %9303 = vmatmul.msk.f32.gmra.mxu2 %vm20_vm1, %v345_v33  ;;  %224 = vst.msk [vmem:[#allocation2 + $0x309] sm:$0xff] %vm20_vm1, %v160_v62  ;;  %v351_v63 = vld [vmem:[#allocation2 + $0x2d9] sm:$0xff]  ;;  %v305_v0 = vld [vmem:[#allocation2 + $0x81] sm:$0xff] }
  0xb5   :  { %9257 = vmatmul.msk.f32.gmra.mxu0 %vm20_vm1, %v299_v34  ;;  %v240_v1 = vld [vmem:[#allocation2 + $0x80] sm:$0xff]  ;;  %178 = vst.msk [vmem:[#allocation2 + $0xb1] sm:$0xff] %vm20_vm1, %v114_v2  ;;  %v352_v4 = vld [vmem:[#allocation2 + $0x2e9] sm:$0xff]  ;;  %v120_v33 = vld [vmem:[%s16030_s0 + $0x98] sm:$0xff] }
  0xb6   :  { %9322 = vmatmul.msk.f32.gmra.mxu1 %vm20_vm1, %v234_v35  ;;  %225 = vst.msk [vmem:[#allocation2 + $0x319] sm:$0xff] %vm20_vm1, %v161_v3  ;;  %v306_v5 = vld [vmem:[#allocation2 + $0x91] sm:$0xff] }
  0xb7   :  { %v241_v6 = vld [vmem:[#allocation2 + $0x90] sm:$0xff]  ;;  %179 = vst.msk [vmem:[#allocation2 + $0xc1] sm:$0xff] %vm20_vm1, %v115_v7  ;;  %v124_v61 = vld [vmem:[%s16030_s0 + $0xb8] sm:$0xff] }
  0xb8   :  { %226 = vst.msk [vmem:[#allocation2 + $0x321] sm:$0xff] %vm20_vm1, %v162_v8  ;;  %v353_v9 = vld [vmem:[#allocation2 + $0x2f1] sm:$0xff]  ;;  %v307_v10 = vld [vmem:[#allocation2 + $0x99] sm:$0xff] }
  0xb9   :  { %v242_v11 = vld [vmem:[#allocation2 + $0x98] sm:$0xff]  ;;  %180 = vst.msk [vmem:[#allocation2 + $0xc9] sm:$0xff] %vm20_vm1, %v116_v12  ;;  %v354_v14 = vld [vmem:[#allocation2 + $0x301] sm:$0xff] }
  0xba   :  { %v308_v15 = vld [vmem:[#allocation2 + $0xa9] sm:$0xff]  ;;  %181 = vst.msk [vmem:[#allocation2 + $0xd9] sm:$0xff] %vm20_vm1, %v117_v17 }
  0xbb   :  { %v243_v16 = vld [vmem:[#allocation2 + $0xa8] sm:$0xff]  ;;  %182 = vst.msk [vmem:[#allocation2 + $0xe1] sm:$0xff] %vm20_vm1, %v118_v21 }
  0xbc   :  { %9304 = vmatmul.msk.f32.gmra.mxu2 %vm20_vm1, %v346_v38  ;;  %v355_v18 = vld [vmem:[#allocation2 + $0x309] sm:$0xff]  ;;  %v309_v19 = vld [vmem:[#allocation2 + $0xb1] sm:$0xff]  ;;  %183 = vst.msk [vmem:[#allocation2 + $0xf1] sm:$0xff] %vm20_vm1, %v119_v27 }
  0xbd   :  { %9258 = vmatmul.msk.f32.gmra.mxu0 %vm20_vm1, %v300_v39  ;;  %v244_v20 = vld [vmem:[#allocation2 + $0xb0] sm:$0xff]  ;;  %v356_v24 = vld [vmem:[#allocation2 + $0x319] sm:$0xff]  ;;  %184 = vst.msk [vmem:[#allocation2 + $0xf9] sm:$0xff] %vm20_vm1, %v120_v33 }
  0xbe   :  { %9323 = vmatmul.msk.f32.gmra.mxu1 %vm20_vm1, %v235_v40  ;;  %v310_v25 = vld [vmem:[#allocation2 + $0xc1] sm:$0xff]  ;;  %186 = vst.msk [vmem:[#allocation2 + $0x111] sm:$0xff] %vm20_vm1, %v122_v47  ;;  %v128_v27 = vld [vmem:[%s16030_s0 + $0xd8] sm:$0xff] }
  0xbf   :  { %v245_v26 = vld [vmem:[#allocation2 + $0xc0] sm:$0xff]  ;;  %188 = vst.msk [vmem:[#allocation2 + $0x129] sm:$0xff] %vm20_vm1, %v124_v61 }
  0xc0   :  { %v357_v30 = vld [vmem:[#allocation2 + $0x321] sm:$0xff]  ;;  %v311_v31 = vld [vmem:[#allocation2 + $0xc9] sm:$0xff]  ;;  %192 = vst.msk [vmem:[#allocation2 + $0x159] sm:$0xff] %vm20_vm1, %v128_v27 }
  0xc1   :  { %v246_v32 = vld [vmem:[#allocation2 + $0xc8] sm:$0xff]  ;;  %v312_v38 = vld [vmem:[#allocation2 + $0xd9] sm:$0xff] }
  0xc2   :  { %v247_v39 = vld [vmem:[#allocation2 + $0xd8] sm:$0xff]  ;;  %v121_v40 = vld [vmem:[%s16030_s0 + $0xa0] sm:$0xff] }
  0xc3   :  { %185 = vst.msk [vmem:[#allocation2 + $0x109] sm:$0xff] %vm20_vm1, %v121_v40  ;;  %v248_v46 = vld [vmem:[#allocation2 + $0xe0] sm:$0xff]  ;;  %v314_v52 = vld [vmem:[#allocation2 + $0xf1] sm:$0xff] }
  0xc4   :  { %9305 = vmatmul.msk.f32.gmra.mxu2 %vm20_vm1, %v347_v43 }
  0xc5   :  { %9259 = vmatmul.msk.f32.gmra.mxu0 %vm20_vm1, %v301_v44 }
  0xc6   :  { %9324 = vmatmul.msk.f32.gmra.mxu1 %vm20_vm1, %v236_v45  ;;  %v313_v45 = vld [vmem:[#allocation2 + $0xe1] sm:$0xff] }
  0xca   :  { %v316_v2 = vld [vmem:[#allocation2 + $0x109] sm:$0xff] }
  0xcb   :  { %v251_v3 = vld [vmem:[#allocation2 + $0x108] sm:$0xff] }
  0xcc   :  { %9306 = vmatmul.msk.f32.gmra.mxu2 %vm20_vm1, %v348_v48 }
  0xcd   :  { %9260 = vmatmul.msk.f32.gmra.mxu0 %vm20_vm1, %v302_v49  ;;  %v1171_v49 = vld [vmem:[#allocation2 + $0x1a] sm:$0xff] }
  0xce   :  { %9325 = vmatmul.msk.f32.gmra.mxu1 %vm20_vm1, %v237_v50 }
  0xd4   :  { %9307 = vmatmul.msk.f32.gmra.mxu2 %vm20_vm1, %v349_v53  ;;  %v249_v53 = vld [vmem:[#allocation2 + $0xf0] sm:$0xff] }
  0xd5   :  { %9261 = vmatmul.msk.f32.gmra.mxu0 %vm20_vm1, %v303_v54  ;;  %v123_v54 = vld [vmem:[%s16030_s0 + $0xb0] sm:$0xff] }
  0xd6   :  { %9326 = vmatmul.msk.f32.gmra.mxu1 %vm20_vm1, %v238_v55  ;;  %187 = vst.msk [vmem:[#allocation2 + $0x121] sm:$0xff] %vm20_vm1, %v123_v54  ;;  %v1179_v54 = vld [vmem:[#allocation2 + $0x7a] sm:$0xff] }
  0xdb   :  { %v10451_v28 = vpop.f32.mrf.mxu0 }
  0xdc   :  { %9308 = vmatmul.msk.f32.gmra.mxu2 %vm20_vm1, %v350_v58 }
  0xdd   :  { %9262 = vmatmul.msk.f32.gmra.mxu0 %vm20_vm1, %v304_v59  ;;  %v315_v59 = vld [vmem:[#allocation2 + $0xf9] sm:$0xff] }
  0xde   :  { %9327 = vmatmul.msk.f32.gmra.mxu1 %vm20_vm1, %v239_v60  ;;  %v250_v60 = vld [vmem:[#allocation2 + $0xf8] sm:$0xff]  ;;  %v253_v17 = vld [vmem:[#allocation2 + $0x120] sm:$0xff] }
  0xe0   :  { %v10458_v34 = vpop.f32.mrf.mxu2 }
  0xe1   :  { %16209 = vst [vmem:[#allocation4_spill] sm:$0xff] %v10458_v34  ;;  %v10466_v36 = vpop.f32.mrf.mxu1 }
  0xe2   :  { %16211 = vst [vmem:[#allocation6_spill] sm:$0xff] %v10466_v36  ;;  %v2250_v36 = vld [vmem:[#allocation2 + $0xb1] sm:$0xff] }
  0xe3   :  { %v10464_v35 = vpop.f32.mrf.mxu0 }
  0xe4   :  { %9309 = vmatmul.msk.f32.gmra.mxu2 %vm20_vm1, %v351_v63  ;;  %16210 = vst [vmem:[#allocation5_spill] sm:$0xff] %v10464_v35  ;;  %v1173_v63 = vld [vmem:[#allocation2 + $0x32] sm:$0xff] }
  0xe5   :  { %9263 = vmatmul.msk.f32.gmra.mxu0 %vm20_vm1, %v305_v0 }
  0xe6   :  { %9328 = vmatmul.msk.f32.gmra.mxu1 %vm20_vm1, %v240_v1 }
  0xe8   :  { %v10473_v41 = vpop.f32.mrf.mxu2 }
  0xe9   :  { %16212 = vst [vmem:[#allocation7_spill] sm:$0xff] %v10473_v41  ;;  %v136_v41 = vld [vmem:[%s16030_s0 + $0x118] sm:$0xff] }
  0xea   :  { %200 = vst.msk [vmem:[#allocation2 + $0x1e9] sm:$0xff] %vm20_vm1, %v136_v41  ;;  %v137_v41 = vld [vmem:[%s16030_s0 + $0x120] sm:$0xff] }
  0xeb   :  { %201 = vst.msk [vmem:[#allocation2 + $0x1f9] sm:$0xff] %vm20_vm1, %v137_v41  ;;  %v138_v41 = vld [vmem:[%s16030_s0 + $0x128] sm:$0xff] }
  0xec   :  { %9310 = vmatmul.msk.f32.gmra.mxu2 %vm20_vm1, %v352_v4  ;;  %v125_v4 = vld [vmem:[%s16030_s0 + $0xc0] sm:$0xff]  ;;  %202 = vst.msk [vmem:[#allocation2 + $0x201] sm:$0xff] %vm20_vm1, %v138_v41  ;;  %v139_v41 = vld [vmem:[%s16030_s0 + $0x130] sm:$0xff] }
  0xed   :  { %9264 = vmatmul.msk.f32.gmra.mxu0 %vm20_vm1, %v306_v5  ;;  %189 = vst.msk [vmem:[#allocation2 + $0x139] sm:$0xff] %vm20_vm1, %v125_v4 }
  0xee   :  { %9329 = vmatmul.msk.f32.gmra.mxu1 %vm20_vm1, %v241_v6  ;;  %v1174_v6 = vld [vmem:[#allocation2 + $0x3a] sm:$0xff]  ;;  %203 = vst.msk [vmem:[#allocation2 + $0x211] sm:$0xff] %vm20_vm1, %v139_v41 }
  0xef   :  { %v140_v41 = vld [vmem:[%s16030_s0 + $0x138] sm:$0xff] }
  0xf0   :  { %204 = vst.msk [vmem:[#allocation2 + $0x219] sm:$0xff] %vm20_vm1, %v140_v41  ;;  %v141_v41 = vld [vmem:[%s16030_s0 + $0x140] sm:$0xff] }
  0xf1   :  { %205 = vst.msk [vmem:[#allocation2 + $0x229] sm:$0xff] %vm20_vm1, %v141_v41  ;;  %v142_v41 = vld [vmem:[%s16030_s0 + $0x148] sm:$0xff] }
  0xf2   :  { %v332_v34 = vld [vmem:[#allocation2 + $0x1f9] sm:$0xff]  ;;  %206 = vst.msk [vmem:[#allocation2 + $0x231] sm:$0xff] %vm20_vm1, %v142_v41  ;;  %v1191_v41 = vld [vmem:[#allocation2 + $0x10a] sm:$0xff] }
  0xf4   :  { %9311 = vmatmul.msk.f32.gmra.mxu2 %vm20_vm1, %v353_v9  ;;  %v317_v9 = vld [vmem:[#allocation2 + $0x111] sm:$0xff] }
  0xf5   :  { %9265 = vmatmul.msk.f32.gmra.mxu0 %vm20_vm1, %v307_v10  ;;  %v252_v10 = vld [vmem:[#allocation2 + $0x110] sm:$0xff] }
  0xf6   :  { %9330 = vmatmul.msk.f32.gmra.mxu1 %vm20_vm1, %v242_v11  ;;  %v126_v11 = vld [vmem:[%s16030_s0 + $0xc8] sm:$0xff] }
  0xf7   :  { %190 = vst.msk [vmem:[#allocation2 + $0x141] sm:$0xff] %vm20_vm1, %v126_v11  ;;  %v1181_v11 = vld [vmem:[#allocation2 + $0x92] sm:$0xff] }
  0xfc   :  { %9312 = vmatmul.msk.f32.gmra.mxu2 %vm20_vm1, %v354_v14 }
  0xfd   :  { %9266 = vmatmul.msk.f32.gmra.mxu0 %vm20_vm1, %v308_v15 }
  0xfe   :  { %9331 = vmatmul.msk.f32.gmra.mxu1 %vm20_vm1, %v243_v16  ;;  %v318_v16 = vld [vmem:[#allocation2 + $0x121] sm:$0xff] }
  0xff   :  { %v321_v47 = vld [vmem:[#allocation2 + $0x141] sm:$0xff] }
 0x104   :  { %9313 = vmatmul.msk.f32.gmra.mxu2 %vm20_vm1, %v355_v18  ;;  %v127_v18 = vld [vmem:[%s16030_s0 + $0xd0] sm:$0xff] }
 0x105   :  { %9267 = vmatmul.msk.f32.gmra.mxu0 %vm20_vm1, %v309_v19  ;;  %191 = vst.msk [vmem:[#allocation2 + $0x151] sm:$0xff] %vm20_vm1, %v127_v18 }
 0x106   :  { %9332 = vmatmul.msk.f32.gmra.mxu1 %vm20_vm1, %v244_v20  ;;  %v1176_v20 = vld [vmem:[#allocation2 + $0x52] sm:$0xff] }
 0x10c   :  { %9314 = vmatmul.msk.f32.gmra.mxu2 %vm20_vm1, %v356_v24  ;;  %v10601_v61 = vld [vmem:[#allocation2 + $0x150] sm:$0xff] }
 0x10d   :  { %9268 = vmatmul.msk.f32.gmra.mxu0 %vm20_vm1, %v310_v25  ;;  %v319_v25 = vld [vmem:[#allocation2 + $0x129] sm:$0xff] }
 0x10e   :  { %9333 = vmatmul.msk.f32.gmra.mxu1 %vm20_vm1, %v245_v26  ;;  %v254_v26 = vld [vmem:[#allocation2 + $0x128] sm:$0xff] }
 0x114   :  { %9315 = vmatmul.msk.f32.gmra.mxu2 %vm20_vm1, %v357_v30 }
 0x115   :  { %9269 = vmatmul.msk.f32.gmra.mxu0 %vm20_vm1, %v311_v31  ;;  %v1177_v31 = vld [vmem:[#allocation2 + $0x62] sm:$0xff] }
 0x116   :  { %9334 = vmatmul.msk.f32.gmra.mxu1 %vm20_vm1, %v246_v32 }
 0x11c   :  { %9383 = vmatmul.msk.f32.vlgmr.msrb.gmra.mxu2 %vm20_vm1, %v1169_v37  ;;  %v320_v37 = vld [vmem:[#allocation2 + $0x139] sm:$0xff] }
 0x11d   :  { %9270 = vmatmul.msk.f32.gmra.mxu0 %vm20_vm1, %v312_v38  ;;  %v255_v38 = vld [vmem:[#allocation2 + $0x138] sm:$0xff] }
 0x11e   :  { %9335 = vmatmul.msk.f32.gmra.mxu1 %vm20_vm1, %v247_v39  ;;  %v129_v39 = vld [vmem:[%s16030_s0 + $0xe0] sm:$0xff] }
 0x11f   :  { %193 = vst.msk [vmem:[#allocation2 + $0x169] sm:$0xff] %vm20_vm1, %v129_v39  ;;  %v134_v39 = vld [vmem:[%s16030_s0 + $0x108] sm:$0xff] }
 0x120   :  { %198 = vst.msk [vmem:[#allocation2 + $0x1d1] sm:$0xff] %vm20_vm1, %v134_v39  ;;  %v262_v39 = vld [vmem:[#allocation2 + $0x1b8] sm:$0xff] }
 0x122   :  { %v10477_v43 = vpop.f32.mrf.mxu0 }
 0x123   :  { %16213 = vst [vmem:[#allocation8_spill] sm:$0xff] %v10477_v43  ;;  %v10479_v44 = vpop.f32.mrf.mxu1 }
 0x124   :  { %16214 = vst [vmem:[#allocation9_spill] sm:$0xff] %v10479_v44  ;;  %9384 = vmatmul.msk.f32.gmra.mxu2 %vm20_vm1, %v1170_v42  ;;  %v1178_v42 = vld [vmem:[#allocation2 + $0x6a] sm:$0xff] }
 0x125   :  { %9271 = vmatmul.msk.f32.gmra.mxu0 %vm20_vm1, %v313_v45 }
 0x126   :  { %9336 = vmatmul.msk.f32.gmra.mxu1 %vm20_vm1, %v248_v46  ;;  %v10625_v18 = vld [vmem:[#allocation2 + $0x168] sm:$0xff] }
 0x127   :  { %v10488_v48 = vpop.f32.mrf.mxu2 }
 0x128   :  { %16215 = vst [vmem:[#allocation10_spill] sm:$0xff] %v10488_v48 }
 0x12a   :  { %v10490_v50 = vpop.f32.mrf.mxu0 }
 0x12b   :  { %16216 = vst [vmem:[#allocation11_spill] sm:$0xff] %v10490_v50  ;;  %v10492_v51 = vpop.f32.mrf.mxu1 }
 0x12c   :  { %16217 = vst [vmem:[#allocation12_spill] sm:$0xff] %v10492_v51  ;;  %9385 = vmatmul.msk.f32.gmra.mxu2 %vm20_vm1, %v1171_v49  ;;  %v10585_v49 = vld [vmem:[#allocation2 + $0x140] sm:$0xff] }
 0x12d   :  { %9272 = vmatmul.msk.f32.gmra.mxu0 %vm20_vm1, %v314_v52  ;;  %v130_v52 = vld [vmem:[%s16030_s0 + $0xe8] sm:$0xff] }
 0x12e   :  { %9337 = vmatmul.msk.f32.gmra.mxu1 %vm20_vm1, %v249_v53  ;;  %194 = vst.msk [vmem:[#allocation2 + $0x171] sm:$0xff] %vm20_vm1, %v130_v52  ;;  %v2246_v51 = vld [vmem:[#allocation2 + $0x81] sm:$0xff] }
 0x12f   :  { %v10501_v55 = vpop.f32.mrf.mxu2 }
 0x130   :  { %16218 = vst [vmem:[#allocation13_spill] sm:$0xff] %v10501_v55 }
 0x132   :  { %v10503_v57 = vpop.f32.mrf.mxu0 }
 0x133   :  { %16219 = vst [vmem:[#allocation14_spill] sm:$0xff] %v10503_v57  ;;  %v10505_v58 = vpop.f32.mrf.mxu1  ;;  %v2245_v57 = vld [vmem:[#allocation2 + $0x79] sm:$0xff] }
 0x134   :  { %16220 = vst [vmem:[#allocation15_spill] sm:$0xff] %v10505_v58  ;;  %9386 = vmatmul.msk.f32.gmra.mxu2 %vm20_vm1, %v1172_v56  ;;  %v11018_v58 = vld [vmem:[#allocation2 + $0x2c0] sm:$0xff] }
 0x135   :  { %9273 = vmatmul.msk.f32.gmra.mxu0 %vm20_vm1, %v315_v59 }
 0x136   :  { %9338 = vmatmul.msk.f32.gmra.mxu1 %vm20_vm1, %v250_v60  ;;  %v322_v60 = vld [vmem:[#allocation2 + $0x151] sm:$0xff] }
 0x137   :  { %v10514_v62 = vpop.f32.mrf.mxu2 }
 0x138   :  { %16221 = vst [vmem:[#allocation16_spill] sm:$0xff] %v10514_v62 }
 0x13a   :  { %v10516_v0 = vpop.f32.mrf.mxu0 }
 0x13b   :  { %16222 = vst [vmem:[#allocation17_spill] sm:$0xff] %v10516_v0  ;;  %v10518_v1 = vpop.f32.mrf.mxu1  ;;  %v11004_v0 = vld [vmem:[#allocation2 + $0x2b8] sm:$0xff] }
 0x13c   :  { %16223 = vst [vmem:[#allocation18_spill] sm:$0xff] %v10518_v1  ;;  %9387 = vmatmul.msk.f32.gmra.mxu2 %vm20_vm1, %v1173_v63  ;;  %v2243_v1 = vld [vmem:[#allocation2 + $0x61] sm:$0xff] }
 0x13d   :  { %9274 = vmatmul.msk.f32.gmra.mxu0 %vm20_vm1, %v316_v2  ;;  %v1180_v2 = vld [vmem:[#allocation2 + $0x82] sm:$0xff] }
 0x13e   :  { %9339 = vmatmul.msk.f32.gmra.mxu1 %vm20_vm1, %v251_v3 }
 0x13f   :  { %v10527_v5 = vpop.f32.mrf.mxu2 }
 0x140   :  { %16224 = vst [vmem:[#allocation19_spill] sm:$0xff] %v10527_v5  ;;  %v329_v5 = vld [vmem:[#allocation2 + $0x1d1] sm:$0xff] }
 0x142   :  { %v10529_v7 = vpop.f32.mrf.mxu0 }
 0x143   :  { %16225 = vst [vmem:[#allocation20_spill] sm:$0xff] %v10529_v7  ;;  %v10531_v8 = vpop.f32.mrf.mxu1  ;;  %v2242_v7 = vld [vmem:[#allocation2 + $0x51] sm:$0xff] }
 0x144   :  { %16226 = vst [vmem:[#allocation21_spill] sm:$0xff] %v10531_v8  ;;  %9388 = vmatmul.msk.f32.gmra.mxu2 %vm20_vm1, %v1174_v6  ;;  %v323_v6 = vld [vmem:[#allocation2 + $0x159] sm:$0xff] }
 0x145   :  { %9275 = vmatmul.msk.f32.gmra.mxu0 %vm20_vm1, %v317_v9  ;;  %v10613_v9 = vld [vmem:[#allocation2 + $0x158] sm:$0xff]  ;;  %v10976_v8 = vld [vmem:[#allocation2 + $0x2a0] sm:$0xff] }
 0x146   :  { %9340 = vmatmul.msk.f32.gmra.mxu1 %vm20_vm1, %v252_v10 }
 0x147   :  { %v10540_v12 = vpop.f32.mrf.mxu2 }
 0x148   :  { %16227 = vst [vmem:[#allocation22_spill] sm:$0xff] %v10540_v12 }
 0x14a   :  { %v10542_v14 = vpop.f32.mrf.mxu0 }
 0x14b   :  { %16228 = vst [vmem:[#allocation23_spill] sm:$0xff] %v10542_v14  ;;  %v10544_v15 = vpop.f32.mrf.mxu1  ;;  %v10962_v14 = vld [vmem:[#allocation2 + $0x290] sm:$0xff] }
 0x14c   :  { %16229 = vst [vmem:[#allocation24_spill] sm:$0xff] %v10544_v15  ;;  %9389 = vmatmul.msk.f32.gmra.mxu2 %vm20_vm1, %v1175_v13  ;;  %v2240_v15 = vld [vmem:[#allocation2 + $0x39] sm:$0xff] }
 0x14d   :  { %9276 = vmatmul.msk.f32.gmra.mxu0 %vm20_vm1, %v318_v16 }
 0x14e   :  { %9341 = vmatmul.msk.f32.gmra.mxu1 %vm20_vm1, %v253_v17  ;;  %v324_v17 = vld [vmem:[#allocation2 + $0x169] sm:$0xff] }
 0x14f   :  { %v10553_v19 = vpop.f32.mrf.mxu2 }
 0x150   :  { %16230 = vst [vmem:[#allocation25_spill] sm:$0xff] %v10553_v19 }
 0x152   :  { %v10555_v21 = vpop.f32.mrf.mxu0 }
 0x153   :  { %16231 = vst [vmem:[#allocation26_spill] sm:$0xff] %v10555_v21  ;;  %v10557_v24 = vpop.f32.mrf.mxu1  ;;  %v2239_v21 = vld [vmem:[#allocation2 + $0x31] sm:$0xff] }
 0x154   :  { %16232 = vst [vmem:[#allocation27_spill] sm:$0xff] %v10557_v24  ;;  %9390 = vmatmul.msk.f32.gmra.mxu2 %vm20_vm1, %v1176_v20  ;;  %v133_v20 = vld [vmem:[%s16030_s0 + $0x100] sm:$0xff]  ;;  %v10934_v24 = vld [vmem:[#allocation2 + $0x278] sm:$0xff] }
 0x155   :  { %9277 = vmatmul.msk.f32.gmra.mxu0 %vm20_vm1, %v319_v25  ;;  %197 = vst.msk [vmem:[#allocation2 + $0x1c9] sm:$0xff] %vm20_vm1, %v133_v20 }
 0x156   :  { %9342 = vmatmul.msk.f32.gmra.mxu1 %vm20_vm1, %v254_v26  ;;  %v1182_v26 = vld [vmem:[#allocation2 + $0x9a] sm:$0xff] }
 0x157   :  { %v10566_v30 = vpop.f32.mrf.mxu2 }
 0x158   :  { %16233 = vst [vmem:[#allocation28_spill] sm:$0xff] %v10566_v30 }
 0x15a   :  { %v10568_v32 = vpop.f32.mrf.mxu0 }
 0x15b   :  { %16234 = vst [vmem:[#allocation29_spill] sm:$0xff] %v10568_v32  ;;  %v10570_v33 = vpop.f32.mrf.mxu1  ;;  %v10920_v32 = vld [vmem:[#allocation2 + $0x270] sm:$0xff] }
 0x15c   :  { %16235 = vst [vmem:[#allocation30_spill] sm:$0xff] %v10570_v33  ;;  %9391 = vmatmul.msk.f32.gmra.mxu2 %vm20_vm1, %v1177_v31  ;;  %v328_v48 = vld [vmem:[#allocation2 + $0x1c9] sm:$0xff]  ;;  %v2237_v33 = vld [vmem:[#allocation2 + $0x19] sm:$0xff] }
 0x15d   :  { %9278 = vmatmul.msk.f32.gmra.mxu0 %vm20_vm1, %v320_v37  ;;  %v325_v37 = vld [vmem:[#allocation2 + $0x171] sm:$0xff]  ;;  %v10683_v55 = vld [vmem:[#allocation2 + $0x1c8] sm:$0xff] }
 0x15e   :  { %9343 = vmatmul.msk.f32.gmra.mxu1 %vm20_vm1, %v255_v38  ;;  %v10641_v38 = vld [vmem:[#allocation2 + $0x170] sm:$0xff] }
 0x15f   :  { %v10579_v40 = vpop.f32.mrf.mxu2  ;;  %v10699_v12 = vld [vmem:[#allocation2 + $0x1d0] sm:$0xff] }
 0x160   :  { %16236 = vst [vmem:[#allocation31_spill] sm:$0xff] %v10579_v40 }
 0x162   :  { %v10581_v45 = vpop.f32.mrf.mxu0 }
 0x163   :  { %16237 = vst [vmem:[#allocation32_spill] sm:$0xff] %v10581_v45  ;;  %v10583_v46 = vpop.f32.mrf.mxu1 }
 0x164   :  { %16238 = vst [vmem:[#allocation33_spill] sm:$0xff] %v10583_v46  ;;  %9392 = vmatmul.msk.f32.gmra.mxu2 %vm20_vm1, %v1178_v42 }
 0x165   :  { %9279 = vmatmul.msk.f32.gmra.mxu0 %vm20_vm1, %v321_v47  ;;  %v1183_v47 = vld [vmem:[#allocation2 + $0xaa] sm:$0xff] }
 0x166   :  { %9344 = vmatmul.msk.f32.gmra.mxu1 %vm20_vm1, %v10585_v49 }
 0x167   :  { %v10595_v53 = vpop.f32.mrf.mxu2 }
 0x168   :  { %16239 = vst [vmem:[#allocation34_spill] sm:$0xff] %v10595_v53 }
 0x16a   :  { %v10597_v56 = vpop.f32.mrf.mxu0 }
 0x16b   :  { %16240 = vst [vmem:[#allocation35_spill] sm:$0xff] %v10597_v56  ;;  %v10599_v59 = vpop.f32.mrf.mxu1 }
 0x16c   :  { %16241 = vst [vmem:[#allocation36_spill] sm:$0xff] %v10599_v59  ;;  %9393 = vmatmul.msk.f32.gmra.mxu2 %vm20_vm1, %v1179_v54 }
 0x16d   :  { %9280 = vmatmul.msk.f32.gmra.mxu0 %vm20_vm1, %v322_v60  ;;  %v326_v60 = vld [vmem:[#allocation2 + $0x1b1] sm:$0xff] }
 0x16e   :  { %9345 = vmatmul.msk.f32.gmra.mxu1 %vm20_vm1, %v10601_v61 }
 0x16f   :  { %v10607_v63 = vpop.f32.mrf.mxu2 }
 0x170   :  { %16242 = vst [vmem:[#allocation37_spill] sm:$0xff] %v10607_v63 }
 0x172   :  { %v10609_v3 = vpop.f32.mrf.mxu0 }
 0x173   :  { %16243 = vst [vmem:[#allocation38_spill] sm:$0xff] %v10609_v3  ;;  %v10611_v4 = vpop.f32.mrf.mxu1 }
 0x174   :  { %16244 = vst [vmem:[#allocation39_spill] sm:$0xff] %v10611_v4  ;;  %9394 = vmatmul.msk.f32.gmra.mxu2 %vm20_vm1, %v1180_v2  ;;  %v261_v2 = vld [vmem:[#allocation2 + $0x1b0] sm:$0xff] }
 0x175   :  { %9281 = vmatmul.msk.f32.gmra.mxu0 %vm20_vm1, %v323_v6  ;;  %v135_v6 = vld [vmem:[%s16030_s0 + $0x110] sm:$0xff] }
 0x176   :  { %9346 = vmatmul.msk.f32.gmra.mxu1 %vm20_vm1, %v10613_v9  ;;  %199 = vst.msk [vmem:[#allocation2 + $0x1e1] sm:$0xff] %vm20_vm1, %v135_v6 }
 0x177   :  { %v10619_v10 = vpop.f32.mrf.mxu2 }
 0x178   :  { %16245 = vst [vmem:[#allocation40_spill] sm:$0xff] %v10619_v10 }
 0x17a   :  { %v10621_v13 = vpop.f32.mrf.mxu0 }
 0x17b   :  { %16246 = vst [vmem:[#allocation41_spill] sm:$0xff] %v10621_v13  ;;  %v10623_v16 = vpop.f32.mrf.mxu1 }
 0x17c   :  { %16247 = vst [vmem:[#allocation42_spill] sm:$0xff] %v10623_v16  ;;  %9395 = vmatmul.msk.f32.gmra.mxu2 %vm20_vm1, %v1181_v11  ;;  %v1196_v16 = vld [vmem:[#allocation2 + $0x142] sm:$0xff] }
 0x17d   :  { %9282 = vmatmul.msk.f32.gmra.mxu0 %vm20_vm1, %v324_v17  ;;  %v1184_v17 = vld [vmem:[#allocation2 + $0xb2] sm:$0xff]  ;;  %v330_v40 = vld [vmem:[#allocation2 + $0x1e1] sm:$0xff] }
 0x17e   :  { %9347 = vmatmul.msk.f32.gmra.mxu1 %vm20_vm1, %v10625_v18  ;;  %v10715_v53 = vld [vmem:[#allocation2 + $0x1e0] sm:$0xff] }
 0x17f   :  { %v10635_v25 = vpop.f32.mrf.mxu2 }
 0x180   :  { %16248 = vst [vmem:[#allocation43_spill] sm:$0xff] %v10635_v25  ;;  %v331_v25 = vld [vmem:[#allocation2 + $0x1e9] sm:$0xff] }
 0x182   :  { %v10637_v27 = vpop.f32.mrf.mxu0 }
 0x183   :  { %16249 = vst [vmem:[#allocation44_spill] sm:$0xff] %v10637_v27  ;;  %v10639_v31 = vpop.f32.mrf.mxu1 }
 0x184   :  { %16250 = vst [vmem:[#allocation45_spill] sm:$0xff] %v10639_v31  ;;  %9396 = vmatmul.msk.f32.gmra.mxu2 %vm20_vm1, %v1182_v26 }
 0x185   :  { %9283 = vmatmul.msk.f32.gmra.mxu0 %vm20_vm1, %v325_v37  ;;  %v327_v37 = vld [vmem:[#allocation2 + $0x1b9] sm:$0xff] }
 0x186   :  { %9348 = vmatmul.msk.f32.gmra.mxu1 %vm20_vm1, %v10641_v38 }
 0x187   :  { %v10651_v42 = vpop.f32.mrf.mxu2 }
 0x188   :  { %16251 = vst [vmem:[#allocation46_spill] sm:$0xff] %v10651_v42  ;;  %v10731_v42 = vld [vmem:[#allocation2 + $0x1e8] sm:$0xff] }
 0x18a   :  { %v10653_v52 = vpop.f32.mrf.mxu0 }
 0x18b   :  { %16252 = vst [vmem:[#allocation47_spill] sm:$0xff] %v10653_v52  ;;  %v10655_v54 = vpop.f32.mrf.mxu1  ;;  %v10840_v52 = vld [vmem:[#allocation2 + $0x230] sm:$0xff] }
 0x18c   :  { %16253 = vst [vmem:[#allocation48_spill] sm:$0xff] %v10655_v54  ;;  %9397 = vmatmul.msk.f32.gmra.mxu2 %vm20_vm1, %v1183_v47  ;;  %v337_v54 = vld [vmem:[#allocation2 + $0x231] sm:$0xff] }
 0x18d   :  { %9284 = vmatmul.msk.f32.gmra.mxu0 %vm20_vm1, %v326_v60  ;;  %v1185_v60 = vld [vmem:[#allocation2 + $0xc2] sm:$0xff] }
 0x18e   :  { %9349 = vmatmul.msk.f32.gmra.mxu1 %vm20_vm1, %v261_v2 }
 0x18f   :  { %v10664_v11 = vpop.f32.mrf.mxu2 }
 0x190   :  { %16254 = vst [vmem:[#allocation49_spill] sm:$0xff] %v10664_v11 }
 0x192   :  { %v10666_v20 = vpop.f32.mrf.mxu0 }
 0x193   :  { %16255 = vst [vmem:[#allocation50_spill] sm:$0xff] %v10666_v20  ;;  %v10668_v26 = vpop.f32.mrf.mxu1 }
 0x194   :  { %16256 = vst [vmem:[#allocation51_spill] sm:$0xff] %v10668_v26  ;;  %9398 = vmatmul.msk.f32.gmra.mxu2 %vm20_vm1, %v1184_v17  ;;  %v10822_v26 = vld [vmem:[#allocation2 + $0x228] sm:$0xff] }
 0x195   :  { %9285 = vmatmul.msk.f32.gmra.mxu0 %vm20_vm1, %v327_v37  ;;  %v1186_v37 = vld [vmem:[#allocation2 + $0xca] sm:$0xff] }
 0x196   :  { %9350 = vmatmul.msk.f32.gmra.mxu1 %vm20_vm1, %v262_v39 }
 0x197   :  { %v10677_v47 = vpop.f32.mrf.mxu2 }
 0x198   :  { %16257 = vst [vmem:[#allocation52_spill] sm:$0xff] %v10677_v47 }
 0x19a   :  { %v10679_v2 = vpop.f32.mrf.mxu0 }
 0x19b   :  { %16258 = vst [vmem:[#allocation53_spill] sm:$0xff] %v10679_v2  ;;  %v10681_v6 = vpop.f32.mrf.mxu1  ;;  %v336_v2 = vld [vmem:[#allocation2 + $0x229] sm:$0xff] }
 0x19c   :  { %16259 = vst [vmem:[#allocation54_spill] sm:$0xff] %v10681_v6  ;;  %9399 = vmatmul.msk.f32.gmra.mxu2 %vm20_vm1, %v1185_v60  ;;  %v1187_v60 = vld [vmem:[#allocation2 + $0xda] sm:$0xff] }
 0x19d   :  { %9286 = vmatmul.msk.f32.gmra.mxu0 %vm20_vm1, %v328_v48 }
 0x19e   :  { %9351 = vmatmul.msk.f32.gmra.mxu1 %vm20_vm1, %v10683_v55 }
 0x19f   :  { %v10693_v17 = vpop.f32.mrf.mxu2 }
 0x1a2   :  { %v10695_v39 = vpop.f32.mrf.mxu0 }
 0x1a3   :  { %16260 = vst [vmem:[#allocation55_spill] sm:$0xff] %v10695_v39  ;;  %v10697_v62 = vpop.f32.mrf.mxu1  ;;  %v10804_v39 = vld [vmem:[#allocation2 + $0x218] sm:$0xff] }
 0x1a4   :  { %16261 = vst [vmem:[#allocation56_spill] sm:$0xff] %v10697_v62  ;;  %9400 = vmatmul.msk.f32.gmra.mxu2 %vm20_vm1, %v1186_v37  ;;  %v1188_v37 = vld [vmem:[#allocation2 + $0xe2] sm:$0xff]  ;;  %v335_v62 = vld [vmem:[#allocation2 + $0x219] sm:$0xff] }
 0x1a5   :  { %9287 = vmatmul.msk.f32.gmra.mxu0 %vm20_vm1, %v329_v5 }
 0x1a6   :  { %9352 = vmatmul.msk.f32.gmra.mxu1 %vm20_vm1, %v10699_v12 }
 0x1a7   :  { %v10709_v48 = vpop.f32.mrf.mxu2 }
 0x1aa   :  { %v10711_v19 = vpop.f32.mrf.mxu0 }
 0x1ab   :  { %16262 = vst [vmem:[#allocation57_spill] sm:$0xff] %v10711_v19  ;;  %v10713_v30 = vpop.f32.mrf.mxu1  ;;  %v10786_v19 = vld [vmem:[#allocation2 + $0x210] sm:$0xff] }
 0x1ac   :  { %16263 = vst [vmem:[#allocation58_spill] sm:$0xff] %v10713_v30  ;;  %9401 = vmatmul.msk.f32.gmra.mxu2 %vm20_vm1, %v1187_v60  ;;  %v1189_v60 = vld [vmem:[#allocation2 + $0xf2] sm:$0xff]  ;;  %v10763_v30 = vld [vmem:[#allocation2 + $0x200] sm:$0xff] }
 0x1ad   :  { %9288 = vmatmul.msk.f32.gmra.mxu0 %vm20_vm1, %v330_v40 }
 0x1ae   :  { %9353 = vmatmul.msk.f32.gmra.mxu1 %vm20_vm1, %v10715_v53 }
 0x1af   :  { %v10725_v5 = vpop.f32.mrf.mxu2 }
 0x1b0   :  { %16264 = vst [vmem:[#allocation59_spill] sm:$0xff] %v10725_v5 }
 0x1b2   :  { %v10727_v63 = vpop.f32.mrf.mxu0 }
 0x1b3   :  { %16265 = vst [vmem:[#allocation60_spill] sm:$0xff] %v10727_v63  ;;  %v10729_v10 = vpop.f32.mrf.mxu1  ;;  %v333_v63 = vld [vmem:[#allocation2 + $0x201] sm:$0xff] }
 0x1b4   :  { %16266 = vst [vmem:[#allocation61_spill] sm:$0xff] %v10729_v10  ;;  %9402 = vmatmul.msk.f32.gmra.mxu2 %vm20_vm1, %v1188_v37  ;;  %v10747_v10 = vld [vmem:[#allocation2 + $0x1f8] sm:$0xff] }
 0x1b5   :  { %9289 = vmatmul.msk.f32.gmra.mxu0 %vm20_vm1, %v331_v25  ;;  %v1190_v37 = vld [vmem:[#allocation2 + $0xfa] sm:$0xff] }
 0x1b6   :  { %9354 = vmatmul.msk.f32.gmra.mxu1 %vm20_vm1, %v10731_v42 }
 0x1b7   :  { %v10741_v40 = vpop.f32.mrf.mxu2 }
 0x1b8   :  { %16267 = vst [vmem:[#allocation62_spill] sm:$0xff] %v10741_v40 }
 0x1ba   :  { %v10743_v11 = vpop.f32.mrf.mxu0 }
 0x1bb   :  { %16268 = vst [vmem:[#allocation63_spill] sm:$0xff] %v10743_v11  ;;  %v10745_v47 = vpop.f32.mrf.mxu1 }
 0x1bc   :  { %16269 = vst [vmem:[#allocation64_spill] sm:$0xff] %v10745_v47  ;;  %9403 = vmatmul.msk.f32.gmra.mxu2 %vm20_vm1, %v1189_v60 }
 0x1bd   :  { %9290 = vmatmul.msk.f32.gmra.mxu0 %vm20_vm1, %v332_v34  ;;  %v9447_v34 = vld [vmem:[%s16029_s1 + $0xc] sm:$0xf] }
 0x1be   :  { %9355 = vmatmul.msk.f32.gmra.mxu1 %vm20_vm1, %v10747_v10  ;;  %9972 = vmatpush.msk.msra.mxu3 %vm552_vm0, %v9447_v34 }
 0x1bf   :  { %v10757_v25 = vpop.f32.mrf.mxu2  ;;  %9448 = vmatpush.msk.msrb.mxu1 %vm552_vm0, %v9447_v34  ;;  %9474 = vmatmul.msk.f32.vlgmr.msra.gmra.mxu3 %vm20_vm1, %v10585_v49  ;;  %v1192_v34 = vld [vmem:[#allocation2 + $0x112] sm:$0xff] }
 0x1c0   :  { %16270 = vst [vmem:[#allocation65_spill] sm:$0xff] %v10757_v25  ;;  %v11032_v25 = vld [vmem:[#allocation2 + $0x2d0] sm:$0xff] }
 0x1c2   :  { %v10759_v47 = vpop.f32.mrf.mxu0 }
 0x1c3   :  { %16271 = vst [vmem:[#allocation66_spill] sm:$0xff] %v10759_v47  ;;  %v10761_v11 = vpop.f32.mrf.mxu1  ;;  %v334_v47 = vld [vmem:[#allocation2 + $0x211] sm:$0xff] }
 0x1c4   :  { %16272 = vst [vmem:[#allocation67_spill] sm:$0xff] %v10761_v11  ;;  %9404 = vmatmul.msk.f32.gmra.mxu2 %vm20_vm1, %v1190_v37 }
 0x1c5   :  { %9291 = vmatmul.msk.f32.gmra.mxu0 %vm20_vm1, %v333_v63  ;;  %v143_v63 = vld [vmem:[%s16030_s0 + $0x150] sm:$0xff] }
 0x1c6   :  { %9356 = vmatmul.msk.f32.gmra.mxu1 %vm20_vm1, %v10763_v30  ;;  %207 = vst.msk [vmem:[#allocation2 + $0x241] sm:$0xff] %vm20_vm1, %v143_v63 }
 0x1c7   :  { %v10778_v60 = vpop.f32.mrf.mxu2  ;;  %9475 = vmatmul.msk.f32.gmra.mxu3 %vm20_vm1, %v10601_v61 }
 0x1c8   :  { %16273 = vst [vmem:[#allocation68_spill] sm:$0xff] %v10778_v60  ;;  %v2244_v60 = vld [vmem:[#allocation2 + $0x69] sm:$0xff] }
 0x1ca   :  { %v10782_v37 = vpop.f32.mrf.mxu0 }
 0x1cb   :  { %16274 = vst [vmem:[#allocation69_spill] sm:$0xff] %v10782_v37  ;;  %v10784_v11 = vpop.f32.mrf.mxu1 }
 0x1cc   :  { %16275 = vst [vmem:[#allocation70_spill] sm:$0xff] %v10784_v11  ;;  %9405 = vmatmul.msk.f32.gmra.mxu2 %vm20_vm1, %v1191_v41  ;;  %v1193_v41 = vld [vmem:[#allocation2 + $0x122] sm:$0xff] }
 0x1cd   :  { %9292 = vmatmul.msk.f32.gmra.mxu0 %vm20_vm1, %v334_v47  ;;  %v144_v47 = vld [vmem:[%s16030_s0 + $0x158] sm:$0xff]  ;;  %v338_v31 = vld [vmem:[#allocation2 + $0x241] sm:$0xff] }
 0x1ce   :  { %9357 = vmatmul.msk.f32.gmra.mxu1 %vm20_vm1, %v10786_v19  ;;  %208 = vst.msk [vmem:[#allocation2 + $0x249] sm:$0xff] %vm20_vm1, %v144_v47  ;;  %v10862_v27 = vld [vmem:[#allocation2 + $0x240] sm:$0xff] }
 0x1cf   :  { %v10796_v49 = vpop.f32.mrf.mxu2  ;;  %9476 = vmatmul.msk.f32.gmra.mxu3 %vm20_vm1, %v10613_v9 }
 0x1d0   :  { %16276 = vst [vmem:[#allocation71_spill] sm:$0xff] %v10796_v49  ;;  %v10990_v49 = vld [vmem:[#allocation2 + $0x2a8] sm:$0xff] }
 0x1d2   :  { %v10800_v11 = vpop.f32.mrf.mxu0 }
 0x1d3   :  { %v10802_v37 = vpop.f32.mrf.mxu1 }
 0x1d4   :  { %9406 = vmatmul.msk.f32.gmra.mxu2 %vm20_vm1, %v1192_v34  ;;  %v1194_v34 = vld [vmem:[#allocation2 + $0x12a] sm:$0xff] }
 0x1d5   :  { %9293 = vmatmul.msk.f32.gmra.mxu0 %vm20_vm1, %v335_v62  ;;  %v145_v62 = vld [vmem:[%s16030_s0 + $0x160] sm:$0xff]  ;;  %v10879_v4 = vld [vmem:[#allocation2 + $0x248] sm:$0xff] }
 0x1d6   :  { %9358 = vmatmul.msk.f32.gmra.mxu1 %vm20_vm1, %v10804_v39  ;;  %209 = vst.msk [vmem:[#allocation2 + $0x259] sm:$0xff] %vm20_vm1, %v145_v62  ;;  %v1195_v62 = vld [vmem:[#allocation2 + $0x13a] sm:$0xff] }
 0x1d7   :  { %v10814_v61 = vpop.f32.mrf.mxu2  ;;  %9477 = vmatmul.msk.f32.gmra.mxu3 %vm20_vm1, %v10625_v18 }
 0x1d8   :  { %16277 = vst [vmem:[#allocation72_spill] sm:$0xff] %v10814_v61  ;;  %v2241_v61 = vld [vmem:[#allocation2 + $0x49] sm:$0xff] }
 0x1da   :  { %v10818_v63 = vpop.f32.mrf.mxu0 }
 0x1db   :  { %v10820_v6 = vpop.f32.mrf.mxu1 }
 0x1dc   :  { %9407 = vmatmul.msk.f32.gmra.mxu2 %vm20_vm1, %v1193_v41  ;;  %v9513_v41 = vld [vmem:[%s16029_s1 + $0x10] sm:$0xf] }
 0x1dd   :  { %9294 = vmatmul.msk.f32.gmra.mxu0 %vm20_vm1, %v336_v2  ;;  %v131_v2 = vld [vmem:[%s16030_s0 + $0xf0] sm:$0xff]  ;;  %v340_v46 = vld [vmem:[#allocation2 + $0x259] sm:$0xff] }
 0x1de   :  { %9359 = vmatmul.msk.f32.gmra.mxu1 %vm20_vm1, %v10822_v26  ;;  %195 = vst.msk [vmem:[#allocation2 + $0x181] sm:$0xff] %vm20_vm1, %v131_v2  ;;  %9514 = vmatpush.msk.msrb.mxu0 %vm552_vm0, %v9513_v41  ;;  %v132_v2 = vld [vmem:[%s16030_s0 + $0xf8] sm:$0xff] }
 0x1df   :  { %v10832_v9 = vpop.f32.mrf.mxu2  ;;  %9478 = vmatmul.msk.f32.gmra.mxu3 %vm20_vm1, %v10641_v38  ;;  %196 = vst.msk [vmem:[#allocation2 + $0x189] sm:$0xff] %vm20_vm1, %v132_v2  ;;  %v10892_v45 = vld [vmem:[#allocation2 + $0x258] sm:$0xff] }
 0x1e0   :  { %16278 = vst [vmem:[#allocation73_spill] sm:$0xff] %v10832_v9  ;;  %v10948_v9 = vld [vmem:[#allocation2 + $0x288] sm:$0xff] }
 0x1e2   :  { %v10836_v47 = vpop.f32.mrf.mxu0 }
 0x1e3   :  { %v10838_v20 = vpop.f32.mrf.mxu1 }
 0x1e4   :  { %9408 = vmatmul.msk.f32.gmra.mxu2 %vm20_vm1, %v1194_v34 }
 0x1e5   :  { %9295 = vmatmul.msk.f32.gmra.mxu0 %vm20_vm1, %v337_v54  ;;  %v1733_v38 = vld [vmem:[#allocation2 + $0x180] sm:$0xff] }
 0x1e6   :  { %9360 = vmatmul.msk.f32.gmra.mxu1 %vm20_vm1, %v10840_v52  ;;  %v1734_v2 = vld [vmem:[#allocation2 + $0x188] sm:$0xff] }
 0x1e7   :  { %v10850_v18 = vpop.f32.mrf.mxu2  ;;  %9479 = vmatmul.msk.f32.gmra.mxu3 %vm20_vm1, %v1733_v38  ;;  %v1197_v38 = vld [vmem:[#allocation2 + $0x152] sm:$0xff] }
 0x1e8   :  { %16279 = vst [vmem:[#allocation74_spill] sm:$0xff] %v10850_v18  ;;  %v2238_v18 = vld [vmem:[#allocation2 + $0x21] sm:$0xff] }
 0x1ea   :  { %v10858_v54 = vpop.f32.mrf.mxu0 }
 0x1eb   :  { %v10860_v34 = vpop.f32.mrf.mxu1 }
 0x1ec   :  { %9409 = vmatmul.msk.f32.gmra.mxu2 %vm20_vm1, %v1195_v62 }
 0x1ed   :  { %9296 = vmatmul.msk.f32.gmra.mxu0 %vm20_vm1, %v338_v31  ;;  %v339_v31 = vld [vmem:[#allocation2 + $0x249] sm:$0xff] }
 0x1ee   :  { %9361 = vmatmul.msk.f32.gmra.mxu1 %vm20_vm1, %v10862_v27 }
 0x1ef   :  { %v10872_v41 = vpop.f32.mrf.mxu2  ;;  %9480 = vmatmul.msk.f32.gmra.mxu3 %vm20_vm1, %v1734_v2 }
 0x1f0   :  { %16280 = vst [vmem:[#allocation75_spill] sm:$0xff] %v10872_v41  ;;  %v10906_v41 = vld [vmem:[#allocation2 + $0x260] sm:$0xff] }
 0x1f2   :  { %v10875_v13 = vpop.f32.mrf.mxu0 }
 0x1f3   :  { %v10877_v62 = vpop.f32.mrf.mxu1 }
 0x1f4   :  { %9410 = vmatmul.msk.f32.gmra.mxu2 %vm20_vm1, %v1196_v16 }
 0x1f5   :  { %9297 = vmatmul.msk.f32.gmra.mxu0 %vm20_vm1, %v339_v31  ;;  %v1198_v31 = vld [vmem:[#allocation2 + $0x15a] sm:$0xff] }
 0x1f6   :  { %9362 = vmatmul.msk.f32.gmra.mxu1 %vm20_vm1, %v10879_v4 }
 0x1f7   :  { %v10885_v3 = vpop.f32.mrf.mxu2  ;;  %9481 = vmatmul.msk.f32.gmra.mxu3 %vm20_vm1, %v10683_v55  ;;  %v1199_v55 = vld [vmem:[#allocation2 + $0x16a] sm:$0xff] }
 0x1f8   :  { %16281 = vst [vmem:[#allocation76_spill] sm:$0xff] %v10885_v3 }
 0x1fa   :  { %v10888_v59 = vpop.f32.mrf.mxu0 }
 0x1fb   :  { %v10890_v56 = vpop.f32.mrf.mxu1 }
 0x1fc   :  { %9411 = vmatmul.msk.f32.gmra.mxu2 %vm20_vm1, %v1197_v38 }
 0x1fd   :  { %9298 = vmatmul.msk.f32.gmra.mxu0 %vm20_vm1, %v340_v46 }
 0x1fe   :  { %9363 = vmatmul.msk.f32.gmra.mxu1 %vm20_vm1, %v10892_v45 }
 0x1ff   :  { %v10898_v16 = vpop.f32.mrf.mxu2  ;;  %9482 = vmatmul.msk.f32.gmra.mxu3 %vm20_vm1, %v10699_v12  ;;  %v1200_v12 = vld [vmem:[#allocation2 + $0x172] sm:$0xff] }
 0x200   :  { %16282 = vst [vmem:[#allocation77_spill] sm:$0xff] %v10898_v16 }
 0x202   :  { %v10902_v2 = vpop.f32.mrf.mxu0 }
 0x203   :  { %v10904_v3 = vpop.f32.mrf.mxu1 }
 0x204   :  { %9412 = vmatmul.msk.f32.gmra.mxu2 %vm20_vm1, %v1198_v31 }
 0x205   :  { %9515 = vmatmul.msk.f32.vlgmr.msrb.gmra.mxu0 %vm20_vm1, %v2237_v33 }
 0x206   :  { %9364 = vmatmul.msk.f32.gmra.mxu1 %vm20_vm1, %v10906_v41 }
 0x207   :  { %v10912_v46 = vpop.f32.mrf.mxu2  ;;  %9483 = vmatmul.msk.f32.gmra.mxu3 %vm20_vm1, %v10715_v53  ;;  %v1201_v53 = vld [vmem:[#allocation2 + $0x1b2] sm:$0xff] }
 0x208   :  { %16283 = vst [vmem:[#allocation78_spill] sm:$0xff] %v10912_v46 }
 0x20a   :  { %v10916_v38 = vpop.f32.mrf.mxu0 }
 0x20b   :  { %v10918_v16 = vpop.f32.mrf.mxu1 }
 0x20c   :  { %9413 = vmatmul.msk.f32.gmra.mxu2 %vm20_vm1, %v1199_v55 }
 0x20d   :  { %9516 = vmatmul.msk.f32.gmra.mxu0 %vm20_vm1, %v2238_v18 }
 0x20e   :  { %9365 = vmatmul.msk.f32.gmra.mxu1 %vm20_vm1, %v10920_v32 }
 0x20f   :  { %v10926_v33 = vpop.f32.mrf.mxu2  ;;  %9484 = vmatmul.msk.f32.gmra.mxu3 %vm20_vm1, %v10731_v42  ;;  %v1202_v42 = vld [vmem:[#allocation2 + $0x1ba] sm:$0xff] }
 0x210   :  { %16284 = vst [vmem:[#allocation79_spill] sm:$0xff] %v10926_v33 }
 0x212   :  { %v10930_v31 = vpop.f32.mrf.mxu0 }
 0x213   :  { %v10932_v46 = vpop.f32.mrf.mxu1 }
 0x214   :  { %9414 = vmatmul.msk.f32.gmra.mxu2 %vm20_vm1, %v1200_v12 }
 0x215   :  { %9517 = vmatmul.msk.f32.gmra.mxu0 %vm20_vm1, %v2239_v21 }
 0x216   :  { %9366 = vmatmul.msk.f32.gmra.mxu1 %vm20_vm1, %v10934_v24 }
 0x217   :  { %v10940_v18 = vpop.f32.mrf.mxu2  ;;  %9485 = vmatmul.msk.f32.gmra.mxu3 %vm20_vm1, %v10747_v10  ;;  %v1203_v10 = vld [vmem:[#allocation2 + $0x1ca] sm:$0xff] }
 0x218   :  { %16285 = vst [vmem:[#allocation80_spill] sm:$0xff] %v10940_v18 }
 0x21a   :  { %v10944_v55 = vpop.f32.mrf.mxu0 }
 0x21b   :  { %v10946_v33 = vpop.f32.mrf.mxu1 }
 0x21c   :  { %9415 = vmatmul.msk.f32.gmra.mxu2 %vm20_vm1, %v1201_v53 }
 0x21d   :  { %9518 = vmatmul.msk.f32.gmra.mxu0 %vm20_vm1, %v2240_v15 }
 0x21e   :  { %9367 = vmatmul.msk.f32.gmra.mxu1 %vm20_vm1, %v10948_v9 }
 0x21f   :  { %v10954_v21 = vpop.f32.mrf.mxu2  ;;  %9486 = vmatmul.msk.f32.gmra.mxu3 %vm20_vm1, %v10763_v30  ;;  %v1204_v30 = vld [vmem:[#allocation2 + $0x1d2] sm:$0xff] }
 0x220   :  { %16286 = vst [vmem:[#allocation81_spill] sm:$0xff] %v10954_v21 }
 0x222   :  { %v10958_v12 = vpop.f32.mrf.mxu0 }
 0x223   :  { %v10960_v18 = vpop.f32.mrf.mxu1 }
 0x224   :  { %9416 = vmatmul.msk.f32.gmra.mxu2 %vm20_vm1, %v1202_v42 }
 0x225   :  { %9519 = vmatmul.msk.f32.gmra.mxu0 %vm20_vm1, %v2241_v61 }
 0x226   :  { %9368 = vmatmul.msk.f32.gmra.mxu1 %vm20_vm1, %v10962_v14 }
 0x227   :  { %v10968_v15 = vpop.f32.mrf.mxu2  ;;  %9487 = vmatmul.msk.f32.gmra.mxu3 %vm20_vm1, %v10786_v19  ;;  %v1205_v19 = vld [vmem:[#allocation2 + $0x1e2] sm:$0xff] }
 0x228   :  { %16287 = vst [vmem:[#allocation82_spill] sm:$0xff] %v10968_v15 }
 0x22a   :  { %v10972_v53 = vpop.f32.mrf.mxu0 }
 0x22b   :  { %v10974_v21 = vpop.f32.mrf.mxu1 }
 0x22c   :  { %9417 = vmatmul.msk.f32.gmra.mxu2 %vm20_vm1, %v1203_v10 }
 0x22d   :  { %9520 = vmatmul.msk.f32.gmra.mxu0 %vm20_vm1, %v2242_v7 }
 0x22e   :  { %9369 = vmatmul.msk.f32.gmra.mxu1 %vm20_vm1, %v10976_v8 }
 0x22f   :  { %v10982_v61 = vpop.f32.mrf.mxu2  ;;  %9488 = vmatmul.msk.f32.gmra.mxu3 %vm20_vm1, %v10804_v39  ;;  %v1206_v39 = vld [vmem:[#allocation2 + $0x1ea] sm:$0xff] }
 0x230   :  { %16288 = vst [vmem:[#allocation83_spill] sm:$0xff] %v10982_v61 }
 0x232   :  { %v10986_v42 = vpop.f32.mrf.mxu0 }
 0x233   :  { %v10988_v15 = vpop.f32.mrf.mxu1 }
 0x234   :  { %9418 = vmatmul.msk.f32.gmra.mxu2 %vm20_vm1, %v1204_v30 }
 0x235   :  { %9521 = vmatmul.msk.f32.gmra.mxu0 %vm20_vm1, %v2243_v1 }
 0x236   :  { %9370 = vmatmul.msk.f32.gmra.mxu1 %vm20_vm1, %v10990_v49 }
 0x237   :  { %v10996_v7 = vpop.f32.mrf.mxu2  ;;  %9489 = vmatmul.msk.f32.gmra.mxu3 %vm20_vm1, %v10822_v26  ;;  %v1207_v26 = vld [vmem:[#allocation2 + $0x1fa] sm:$0xff] }
 0x238   :  { %16289 = vst [vmem:[#allocation84_spill] sm:$0xff] %v10996_v7 }
 0x23a   :  { %v11000_v10 = vpop.f32.mrf.mxu0 }
 0x23b   :  { %v11002_v61 = vpop.f32.mrf.mxu1 }
 0x23c   :  { %9419 = vmatmul.msk.f32.gmra.mxu2 %vm20_vm1, %v1205_v19 }
 0x23d   :  { %9522 = vmatmul.msk.f32.gmra.mxu0 %vm20_vm1, %v2244_v60 }
 0x23e   :  { %9371 = vmatmul.msk.f32.gmra.mxu1 %vm20_vm1, %v11004_v0 }
 0x23f   :  { %v11010_v1 = vpop.f32.mrf.mxu2  ;;  %9490 = vmatmul.msk.f32.gmra.mxu3 %vm20_vm1, %v10840_v52  ;;  %v1208_v52 = vld [vmem:[#allocation2 + $0x202] sm:$0xff] }
 0x240   :  { %16290 = vst [vmem:[#allocation85_spill] sm:$0xff] %v11010_v1 }
 0x242   :  { %v11014_v30 = vpop.f32.mrf.mxu0  ;;  %v2056_v50 = vpop.f32.mrf.mxu3 }
 0x243   :  { %v11016_v7 = vpop.f32.mrf.mxu1 }
 0x244   :  { %9420 = vmatmul.msk.f32.gmra.mxu2 %vm20_vm1, %v1206_v39 }
 0x245   :  { %9523 = vmatmul.msk.f32.gmra.mxu0 %vm20_vm1, %v2245_v57 }
 0x246   :  { %9372 = vmatmul.msk.f32.gmra.mxu1 %vm20_vm1, %v11018_v58 }
 0x247   :  { %v11024_v60 = vpop.f32.mrf.mxu2  ;;  %9491 = vmatmul.msk.f32.gmra.mxu3 %vm20_vm1, %v10862_v27  ;;  %v1209_v27 = vld [vmem:[#allocation2 + $0x212] sm:$0xff] }
 0x248   :  { %16291 = vst [vmem:[#allocation86_spill] sm:$0xff] %v11024_v60  ;;  %v2247_v60 = vld [vmem:[#allocation2 + $0x91] sm:$0xff] }
 0x24a   :  { %v11028_v19 = vpop.f32.mrf.mxu0  ;;  %v2059_v40 = vpop.f32.mrf.mxu3 }
 0x24b   :  { %16292 = vst [vmem:[#allocation87_spill] sm:$0xff] %v11028_v19  ;;  %v11030_v1 = vpop.f32.mrf.mxu1  ;;  %v11046_v19 = vld [vmem:[#allocation2 + $0x2d8] sm:$0xff] }
 0x24c   :  { %16293 = vst [vmem:[#allocation88_spill] sm:$0xff] %v11030_v1  ;;  %9421 = vmatmul.msk.f32.gmra.mxu2 %vm20_vm1, %v1207_v26 }
 0x24d   :  { %9524 = vmatmul.msk.f32.gmra.mxu0 %vm20_vm1, %v2246_v51 }
 0x24e   :  { %9373 = vmatmul.msk.f32.gmra.mxu1 %vm20_vm1, %v11032_v25 }
 0x24f   :  { %v11038_v57 = vpop.f32.mrf.mxu2  ;;  %9492 = vmatmul.msk.f32.gmra.mxu3 %vm20_vm1, %v10879_v4  ;;  %v1210_v4 = vld [vmem:[#allocation2 + $0x21a] sm:$0xff] }
 0x250   :  { %16294 = vst [vmem:[#allocation89_spill] sm:$0xff] %v11038_v57  ;;  %v2248_v57 = vld [vmem:[#allocation2 + $0x99] sm:$0xff] }
 0x252   :  { %v11042_v39 = vpop.f32.mrf.mxu0  ;;  %v2062_v44 = vpop.f32.mrf.mxu3 }
 0x253   :  { %16295 = vst [vmem:[#allocation90_spill] sm:$0xff] %v11042_v39  ;;  %v11044_v1 = vpop.f32.mrf.mxu1  ;;  %v11060_v39 = vld [vmem:[#allocation2 + $0x2e8] sm:$0xff] }
 0x254   :  { %16296 = vst [vmem:[#allocation91_spill] sm:$0xff] %v11044_v1  ;;  %9422 = vmatmul.msk.f32.gmra.mxu2 %vm20_vm1, %v1208_v52 }
 0x255   :  { %9525 = vmatmul.msk.f32.gmra.mxu0 %vm20_vm1, %v2247_v60 }
 0x256   :  { %9374 = vmatmul.msk.f32.gmra.mxu1 %vm20_vm1, %v11046_v19 }
 0x257   :  { %v11052_v51 = vpop.f32.mrf.mxu2  ;;  %9493 = vmatmul.msk.f32.gmra.mxu3 %vm20_vm1, %v10892_v45 }
 0x258   :  { %16297 = vst [vmem:[#allocation92_spill] sm:$0xff] %v11052_v51  ;;  %v2249_v51 = vld [vmem:[#allocation2 + $0xa9] sm:$0xff] }
 0x25a   :  { %v11056_v26 = vpop.f32.mrf.mxu0  ;;  %v2065_v43 = vpop.f32.mrf.mxu3 }
 0x25b   :  { %16298 = vst [vmem:[#allocation93_spill] sm:$0xff] %v11056_v26  ;;  %v11058_v1 = vpop.f32.mrf.mxu1  ;;  %v11074_v26 = vld [vmem:[#allocation2 + $0x2f0] sm:$0xff] }
 0x25c   :  { %16299 = vst [vmem:[#allocation94_spill] sm:$0xff] %v11058_v1  ;;  %9423 = vmatmul.msk.f32.gmra.mxu2 %vm20_vm1, %v1209_v27 }
 0x25d   :  { %9526 = vmatmul.msk.f32.gmra.mxu0 %vm20_vm1, %v2248_v57  ;;  %v1053_v57 = vadd.f32 %v10802_v37, %v10800_v11  ;;  %v1056_v11 = vadd.f32 %v10820_v6, %v10818_v63 }
 0x25e   :  { %9375 = vmatmul.msk.f32.gmra.mxu1 %vm20_vm1, %v11060_v39 }
 0x25f   :  { %v11066_v60 = vpop.f32.mrf.mxu2  ;;  %9494 = vmatmul.msk.f32.gmra.mxu3 %vm20_vm1, %v10906_v41  ;;  %v1212_v41 = vld [vmem:[#allocation2 + $0x232] sm:$0xff] }
 0x260   :  { %16300 = vst [vmem:[#allocation95_spill] sm:$0xff] %v11066_v60 }
 0x262   :  { %v11070_v52 = vpop.f32.mrf.mxu0  ;;  %v2068_v35 = vpop.f32.mrf.mxu3 }
 0x263   :  { %16301 = vst [vmem:[#allocation96_spill] sm:$0xff] %v11070_v52  ;;  %v11072_v1 = vpop.f32.mrf.mxu1 }
 0x264   :  { %16302 = vst [vmem:[#allocation97_spill] sm:$0xff] %v11072_v1  ;;  %9424 = vmatmul.msk.f32.gmra.mxu2 %vm20_vm1, %v1210_v4  ;;  %v1211_v1 = vld [vmem:[#allocation2 + $0x22a] sm:$0xff]  ;;  %v11090_v4 = vld [vmem:[#allocation2 + $0x300] sm:$0xff] }
 0x265   :  { %9527 = vmatmul.msk.f32.gmra.mxu0 %vm20_vm1, %v2249_v51 }
 0x266   :  { %9376 = vmatmul.msk.f32.gmra.mxu1 %vm20_vm1, %v11074_v26 }
 0x267   :  { %v1522_v45 = vpop.f32.mrf.mxu2  ;;  %9495 = vmatmul.msk.f32.gmra.mxu3 %vm20_vm1, %v10920_v32 }
 0x268   :  { %v1664_v27 = vadd.f32 %v1522_v45, %v1053_v57 }
 0x26a   :  { %v11084_v52 = vadd.f32 %v2056_v50, %v1664_v27  ;;  %v11086_v60 = vpop.f32.mrf.mxu0  ;;  %v2251_v27 = vld [vmem:[#allocation2 + $0xc1] sm:$0xff] }
 0x26b   :  { %16304 = vst [vmem:[#allocation99_spill] sm:$0xff] %v11086_v60  ;;  %v11088_v5 = vpop.f32.mrf.mxu1 }
 0x26c   :  { %16303 = vst [vmem:[#allocation98_spill] sm:$0xff] %v11084_v52  ;;  %9425 = vmatmul.msk.f32.gmra.mxu2 %vm20_vm1, %v1211_v1  ;;  %v11106_v1 = vld [vmem:[#allocation2 + $0x308] sm:$0xff] }
 0x26d   :  { %16305 = vst [vmem:[#allocation100_spill] sm:$0xff] %v11088_v5  ;;  %9528 = vmatmul.msk.f32.gmra.mxu0 %vm20_vm1, %v2250_v36  ;;  %v2071_v5 = vpop.f32.mrf.mxu3  ;;  %v1059_v36 = vadd.f32 %v10838_v20, %v10836_v47  ;;  %v1214_v47 = vld [vmem:[#allocation2 + $0x24a] sm:$0xff] }
 0x26e   :  { %9377 = vmatmul.msk.f32.gmra.mxu1 %vm20_vm1, %v11090_v4 }
 0x26f   :  { %v1525_v50 = vpop.f32.mrf.mxu2  ;;  %9496 = vmatmul.msk.f32.gmra.mxu3 %vm20_vm1, %v10934_v24  ;;  %v1062_v24 = vadd.f32 %v10860_v34, %v10858_v54  ;;  %v1215_v34 = vld [vmem:[#allocation2 + $0x25a] sm:$0xff] }
 0x270   :  { %v1665_v37 = vadd.f32 %v1525_v50, %v1056_v11 }
 0x272   :  { %v11100_v51 = vadd.f32 %v2059_v40, %v1665_v37  ;;  %v11102_v57 = vpop.f32.mrf.mxu0  ;;  %v1213_v40 = vld [vmem:[#allocation2 + $0x242] sm:$0xff]  ;;  %v11122_v37 = vld [vmem:[#allocation2 + $0x318] sm:$0xff] }
 0x273   :  { %16307 = vst [vmem:[#allocation102_spill] sm:$0xff] %v11102_v57  ;;  %v11104_v45 = vpop.f32.mrf.mxu1 }
 0x274   :  { %16306 = vst [vmem:[#allocation101_spill] sm:$0xff] %v11100_v51  ;;  %9426 = vmatmul.msk.f32.gmra.mxu2 %vm20_vm1, %v1212_v41  ;;  %v2252_v41 = vld [vmem:[#allocation2 + $0xc9] sm:$0xff] }
 0x275   :  { %16308 = vst [vmem:[#allocation103_spill] sm:$0xff] %v11104_v45  ;;  %9529 = vmatmul.msk.f32.gmra.mxu0 %vm20_vm1, %v2251_v27  ;;  %v2074_v60 = vpop.f32.mrf.mxu3 }
 0x276   :  { %9378 = vmatmul.msk.f32.gmra.mxu1 %vm20_vm1, %v11106_v1 }
 0x277   :  { %v1528_v32 = vpop.f32.mrf.mxu2  ;;  %9497 = vmatmul.msk.f32.gmra.mxu3 %vm20_vm1, %v10948_v9  ;;  %v1065_v9 = vadd.f32 %v10877_v62, %v10875_v13  ;;  %v1216_v62 = vld [vmem:[#allocation2 + $0x262] sm:$0xff] }
 0x278   :  { %v1666_v6 = vadd.f32 %v1528_v32, %v1059_v36 }
 0x27a   :  { %v11116_v63 = vadd.f32 %v2062_v44, %v1666_v6  ;;  %v11118_v11 = vpop.f32.mrf.mxu0  ;;  %v11138_v6 = vld [vmem:[#allocation2 + $0x320] sm:$0xff] }
 0x27b   :  { %16310 = vst [vmem:[#allocation105_spill] sm:$0xff] %v11118_v11  ;;  %v11120_v50 = vpop.f32.mrf.mxu1  ;;  %v2271_v11 = vld [vmem:[#allocation2 + $0x1e1] sm:$0xff] }
 0x27c   :  { %16309 = vst [vmem:[#allocation104_spill] sm:$0xff] %v11116_v63  ;;  %9427 = vmatmul.msk.f32.gmra.mxu2 %vm20_vm1, %v1213_v40  ;;  %v2253_v40 = vld [vmem:[#allocation2 + $0xd9] sm:$0xff] }
 0x27d   :  { %16311 = vst [vmem:[#allocation106_spill] sm:$0xff] %v11120_v50  ;;  %9530 = vmatmul.msk.f32.gmra.mxu0 %vm20_vm1, %v2252_v41  ;;  %v2077_v45 = vpop.f32.mrf.mxu3  ;;  %v11420_v50 = vld [vmem:[#allocation2 + $0xe0] sm:$0xff] }
 0x27e   :  { %9379 = vmatmul.msk.f32.gmra.mxu1 %vm20_vm1, %v11122_v37 }
 0x27f   :  { %v1531_v44 = vpop.f32.mrf.mxu2  ;;  %9498 = vmatmul.msk.f32.gmra.mxu3 %vm20_vm1, %v10962_v14  ;;  %v1068_v14 = vadd.f32 %v10890_v56, %v10888_v59 }
 0x280   :  { %v1667_v20 = vadd.f32 %v1531_v44, %v1062_v24 }
 0x282   :  { %v11132_v27 = vadd.f32 %v2065_v43, %v1667_v20  ;;  %v11136_v32 = vpop.f32.mrf.mxu0  ;;  %v1703_v20 = vld [vmem:[#allocation2 + $0x18] sm:$0xff] }
 0x283   :  { %v11134_v36 = vpop.f32.mrf.mxu1 }
 0x284   :  { %16312 = vst [vmem:[#allocation107_spill] sm:$0xff] %v11132_v27  ;;  %9428 = vmatmul.msk.f32.gmra.mxu2 %vm20_vm1, %v1214_v47  ;;  %v2254_v47 = vld [vmem:[#allocation2 + $0xe1] sm:$0xff] }
 0x285   :  { %16313 = vst [vmem:[#allocation108_spill] sm:$0xff] %v11134_v36  ;;  %9531 = vmatmul.msk.f32.gmra.mxu0 %vm20_vm1, %v2253_v40  ;;  %v2080_v57 = vpop.f32.mrf.mxu3 }
 0x286   :  { %9380 = vmatmul.msk.f32.gmra.mxu1 %vm20_vm1, %v11138_v6 }
 0x287   :  { %v1534_v43 = vpop.f32.mrf.mxu2  ;;  %9499 = vmatmul.msk.f32.gmra.mxu3 %vm20_vm1, %v10976_v8  ;;  %v1071_v8 = vadd.f32 %v10904_v3, %v10902_v2  ;;  %v1074_v3 = vadd.f32 %v10918_v16, %v10916_v38 }
 0x288   :  { %v1668_v54 = vadd.f32 %v1534_v43, %v1065_v9 }
 0x28a   :  { %v11148_v41 = vadd.f32 %v2068_v35, %v1668_v54  ;;  %v11152_v44 = vpop.f32.mrf.mxu0  ;;  %v1704_v54 = vld [vmem:[#allocation2 + $0x20] sm:$0xff] }
 0x28b   :  { %v11150_v24 = vpop.f32.mrf.mxu1 }
 0x28c   :  { %16314 = vst [vmem:[#allocation109_spill] sm:$0xff] %v11148_v41  ;;  %9429 = vmatmul.msk.f32.gmra.mxu2 %vm20_vm1, %v1215_v34  ;;  %v2255_v34 = vld [vmem:[#allocation2 + $0xf1] sm:$0xff] }
 0x28d   :  { %16315 = vst [vmem:[#allocation110_spill] sm:$0xff] %v11150_v24  ;;  %9532 = vmatmul.msk.f32.gmra.mxu0 %vm20_vm1, %v2254_v47  ;;  %v2258_v24 = vld [vmem:[#allocation2 + $0x111] sm:$0xff] }
 0x28e   :  { %9449 = vmatmul.msk.f32.vlgmr.msrb.gmra.mxu1 %vm20_vm1, %v1703_v20  ;;  %v2083_v20 = vpop.f32.mrf.mxu3  ;;  %v9645_v41 = vld [vmem:[%s16029_s1 + $0x18] sm:$0xf] }
 0x28f   :  { %v1537_v13 = vpop.f32.mrf.mxu2  ;;  %9500 = vmatmul.msk.f32.gmra.mxu3 %vm20_vm1, %v10990_v49  ;;  %9646 = vmatpush.msk.msra.mxu2 %vm552_vm0, %v9645_v41  ;;  %v9579_v41 = vld [vmem:[%s16029_s1 + $0x14] sm:$0xf] }
 0x290   :  { %v1669_v35 = vadd.f32 %v1537_v13, %v1068_v14  ;;  %9580 = vmatpush.msk.msra.mxu1 %vm552_vm0, %v9579_v41  ;;  %v11515_v41 = vld [vmem:[#allocation2 + $0x128] sm:$0xff] }
 0x292   :  { %v11161_v40 = vadd.f32 %v2071_v5, %v1669_v35  ;;  %v11165_v43 = vpop.f32.mrf.mxu0  ;;  %v1217_v5 = vld [vmem:[#allocation2 + $0x272] sm:$0xff] }
 0x293   :  { %v11163_v9 = vpop.f32.mrf.mxu1  ;;  %v11180_v35 = vld [vmem:[#allocation2 + $0x30] sm:$0xff] }
 0x294   :  { %16316 = vst [vmem:[#allocation111_spill] sm:$0xff] %v11161_v40  ;;  %9430 = vmatmul.msk.f32.gmra.mxu2 %vm20_vm1, %v1216_v62  ;;  %v2256_v62 = vld [vmem:[#allocation2 + $0xf9] sm:$0xff]  ;;  %v2275_v40 = vld [vmem:[#allocation2 + $0x211] sm:$0xff] }
 0x295   :  { %16317 = vst [vmem:[#allocation112_spill] sm:$0xff] %v11163_v9  ;;  %9533 = vmatmul.msk.f32.gmra.mxu0 %vm20_vm1, %v2255_v34  ;;  %v2259_v9 = vld [vmem:[#allocation2 + $0x121] sm:$0xff] }
 0x296   :  { %9450 = vmatmul.msk.f32.gmra.mxu1 %vm20_vm1, %v1704_v54  ;;  %v2086_v54 = vpop.f32.mrf.mxu3 }
 0x297   :  { %v1540_v56 = vpop.f32.mrf.mxu2  ;;  %9501 = vmatmul.msk.f32.gmra.mxu3 %vm20_vm1, %v11004_v0  ;;  %v1077_v0 = vadd.f32 %v10932_v46, %v10930_v31 }
 0x298   :  { %v1670_v59 = vadd.f32 %v1540_v56, %v1071_v8 }
 0x29a   :  { %v11174_v47 = vadd.f32 %v2074_v60, %v1670_v59  ;;  %v11178_v13 = vpop.f32.mrf.mxu0  ;;  %v1218_v60 = vld [vmem:[#allocation2 + $0x27a] sm:$0xff] }
 0x29b   :  { %v11176_v14 = vpop.f32.mrf.mxu1  ;;  %v11196_v59 = vld [vmem:[#allocation2 + $0x38] sm:$0xff] }
 0x29c   :  { %16318 = vst [vmem:[#allocation113_spill] sm:$0xff] %v11174_v47  ;;  %9431 = vmatmul.msk.f32.gmra.mxu2 %vm20_vm1, %v1217_v5  ;;  %v2257_v5 = vld [vmem:[#allocation2 + $0x109] sm:$0xff] }
 0x29d   :  { %16319 = vst [vmem:[#allocation114_spill] sm:$0xff] %v11176_v14  ;;  %9534 = vmatmul.msk.f32.gmra.mxu0 %vm20_vm1, %v2256_v62  ;;  %v1219_v62 = vld [vmem:[#allocation2 + $0x28a] sm:$0xff] }
 0x29e   :  { %9451 = vmatmul.msk.f32.gmra.mxu1 %vm20_vm1, %v11180_v35  ;;  %v2089_v16 = vpop.f32.mrf.mxu3  ;;  %v2260_v14 = vld [vmem:[#allocation2 + $0x129] sm:$0xff] }
 0x29f   :  { %v1543_v49 = vpop.f32.mrf.mxu2  ;;  %9502 = vmatmul.msk.f32.gmra.mxu3 %vm20_vm1, %v11018_v58  ;;  %v1080_v58 = vadd.f32 %v10946_v33, %v10944_v55 }
 0x2a0   :  { %v1671_v2 = vadd.f32 %v1543_v49, %v1074_v3 }
 0x2a2   :  { %v11190_v34 = vadd.f32 %v2077_v45, %v1671_v2  ;;  %v11194_v56 = vpop.f32.mrf.mxu0 }
 0x2a3   :  { %v11192_v8 = vpop.f32.mrf.mxu1 }
 0x2a4   :  { %16320 = vst [vmem:[#allocation115_spill] sm:$0xff] %v11190_v34  ;;  %9432 = vmatmul.msk.f32.gmra.mxu2 %vm20_vm1, %v1218_v60  ;;  %v11212_v60 = vld [vmem:[#allocation2 + $0x48] sm:$0xff] }
 0x2a5   :  { %16321 = vst [vmem:[#allocation116_spill] sm:$0xff] %v11192_v8  ;;  %9535 = vmatmul.msk.f32.gmra.mxu0 %vm20_vm1, %v2257_v5  ;;  %v1220_v5 = vld [vmem:[#allocation2 + $0x292] sm:$0xff] }
 0x2a6   :  { %9452 = vmatmul.msk.f32.gmra.mxu1 %vm20_vm1, %v11196_v59  ;;  %v2092_v31 = vpop.f32.mrf.mxu3 }
 0x2a7   :  { %v1546_v38 = vpop.f32.mrf.mxu2  ;;  %9503 = vmatmul.msk.f32.gmra.mxu3 %vm20_vm1, %v11032_v25  ;;  %v1083_v25 = vadd.f32 %v10960_v18, %v10958_v12  ;;  %v1086_v18 = vadd.f32 %v10974_v21, %v10972_v53  ;;  %v1089_v21 = vadd.f32 %v10988_v15, %v10986_v42  ;;  %v1092_v42 = vadd.f32 %v11002_v61, %v11000_v10 }
 0x2a8   :  { %v1672_v45 = vadd.f32 %v1546_v38, %v1077_v0  ;;  %v1095_v61 = vadd.f32 %v11016_v7, %v11014_v30  ;;  %v1226_v30 = vld [vmem:[#allocation2 + $0x2da] sm:$0xff] }
 0x2aa   :  { %v11206_v3 = vadd.f32 %v2080_v57, %v1672_v45  ;;  %v11210_v2 = vpop.f32.mrf.mxu0 }
 0x2ab   :  { %v11208_v49 = vpop.f32.mrf.mxu1 }
 0x2ac   :  { %16322 = vst [vmem:[#allocation117_spill] sm:$0xff] %v11206_v3  ;;  %9433 = vmatmul.msk.f32.gmra.mxu2 %vm20_vm1, %v1219_v62  ;;  %v11228_v62 = vld [vmem:[#allocation2 + $0x50] sm:$0xff]  ;;  %v2274_v3 = vld [vmem:[#allocation2 + $0x201] sm:$0xff] }
 0x2ad   :  { %16323 = vst [vmem:[#allocation118_spill] sm:$0xff] %v11208_v49  ;;  %9536 = vmatmul.msk.f32.gmra.mxu0 %vm20_vm1, %v2258_v24  ;;  %v1221_v24 = vld [vmem:[#allocation2 + $0x2a2] sm:$0xff]  ;;  %v11312_v49 = vld [vmem:[#allocation2 + $0x90] sm:$0xff] }
 0x2ae   :  { %9453 = vmatmul.msk.f32.gmra.mxu1 %vm20_vm1, %v11212_v60 }
 0x2af   :  { %v1549_v46 = vpop.f32.mrf.mxu2  ;;  %9504 = vmatmul.msk.f32.gmra.mxu3 %vm20_vm1, %v11046_v19 }
 0x2b0   :  { %v1673_v57 = vadd.f32 %v1549_v46, %v1080_v58 }
 0x2b2   :  { %v11222_v0 = vadd.f32 %v2083_v20, %v1673_v57  ;;  %v11226_v45 = vpop.f32.mrf.mxu0  ;;  %v2095_v20 = vpop.f32.mrf.mxu3 }
 0x2b3   :  { %v11224_v38 = vpop.f32.mrf.mxu1 }
 0x2b4   :  { %16324 = vst [vmem:[#allocation119_spill] sm:$0xff] %v11222_v0  ;;  %9434 = vmatmul.msk.f32.gmra.mxu2 %vm20_vm1, %v1220_v5  ;;  %v11244_v5 = vld [vmem:[#allocation2 + $0x60] sm:$0xff] }
 0x2b5   :  { %16325 = vst [vmem:[#allocation120_spill] sm:$0xff] %v11224_v38  ;;  %9537 = vmatmul.msk.f32.gmra.mxu0 %vm20_vm1, %v2259_v9  ;;  %v1222_v9 = vld [vmem:[#allocation2 + $0x2aa] sm:$0xff] }
 0x2b6   :  { %9454 = vmatmul.msk.f32.gmra.mxu1 %vm20_vm1, %v11228_v62 }
 0x2b7   :  { %v1552_v33 = vpop.f32.mrf.mxu2  ;;  %9505 = vmatmul.msk.f32.gmra.mxu3 %vm20_vm1, %v11060_v39 }
 0x2b8   :  { %v1674_v55 = vadd.f32 %v1552_v33, %v1083_v25 }
 0x2ba   :  { %v11238_v58 = vadd.f32 %v2086_v54, %v1674_v55  ;;  %v11242_v57 = vpop.f32.mrf.mxu0  ;;  %v11260_v55 = vld [vmem:[#allocation2 + $0x68] sm:$0xff]  ;;  %v2098_v8 = vpop.f32.mrf.mxu3 }
 0x2bb   :  { %v11240_v46 = vpop.f32.mrf.mxu1 }
 0x2bc   :  { %16326 = vst [vmem:[#allocation121_spill] sm:$0xff] %v11238_v58  ;;  %9435 = vmatmul.msk.f32.gmra.mxu2 %vm20_vm1, %v1221_v24  ;;  %v2261_v24 = vld [vmem:[#allocation2 + $0x139] sm:$0xff] }
 0x2bd   :  { %16327 = vst [vmem:[#allocation122_spill] sm:$0xff] %v11240_v46  ;;  %9538 = vmatmul.msk.f32.gmra.mxu0 %vm20_vm1, %v2260_v14  ;;  %v1223_v14 = vld [vmem:[#allocation2 + $0x2ba] sm:$0xff]  ;;  %v11346_v46 = vld [vmem:[#allocation2 + $0xa8] sm:$0xff] }
 0x2be   :  { %9455 = vmatmul.msk.f32.gmra.mxu1 %vm20_vm1, %v11244_v5 }
 0x2bf   :  { %v1555_v12 = vpop.f32.mrf.mxu2  ;;  %9506 = vmatmul.msk.f32.gmra.mxu3 %vm20_vm1, %v11074_v26 }
 0x2c0   :  { %v1675_v19 = vadd.f32 %v1555_v12, %v1086_v18 }
 0x2c2   :  { %v11254_v54 = vadd.f32 %v2089_v16, %v1675_v19  ;;  %v11258_v33 = vpop.f32.mrf.mxu0  ;;  %v11276_v19 = vld [vmem:[#allocation2 + $0x78] sm:$0xff]  ;;  %v11282_v15 = vpop.f32.mrf.mxu3 }
 0x2c3   :  { %v11256_v25 = vpop.f32.mrf.mxu1  ;;  %16332 = vst [vmem:[#allocation127_spill] sm:$0xff] %v11282_v15 }
 0x2c4   :  { %16328 = vst [vmem:[#allocation123_spill] sm:$0xff] %v11254_v54  ;;  %9436 = vmatmul.msk.f32.gmra.mxu2 %vm20_vm1, %v1222_v9  ;;  %v2262_v9 = vld [vmem:[#allocation2 + $0x141] sm:$0xff]  ;;  %v2273_v54 = vld [vmem:[#allocation2 + $0x1f9] sm:$0xff] }
 0x2c5   :  { %16329 = vst [vmem:[#allocation124_spill] sm:$0xff] %v11256_v25  ;;  %9539 = vmatmul.msk.f32.gmra.mxu0 %vm20_vm1, %v2261_v24  ;;  %v1224_v24 = vld [vmem:[#allocation2 + $0x2c2] sm:$0xff]  ;;  %v2266_v25 = vld [vmem:[#allocation2 + $0x171] sm:$0xff] }
 0x2c6   :  { %9456 = vmatmul.msk.f32.gmra.mxu1 %vm20_vm1, %v11260_v55 }
 0x2c7   :  { %v1558_v53 = vpop.f32.mrf.mxu2  ;;  %9507 = vmatmul.msk.f32.gmra.mxu3 %vm20_vm1, %v11090_v4 }
 0x2c8   :  { %v1676_v39 = vadd.f32 %v1558_v53, %v1089_v21 }
 0x2ca   :  { %v11270_v16 = vadd.f32 %v2092_v31, %v1676_v39  ;;  %v11274_v12 = vpop.f32.mrf.mxu0  ;;  %v11302_v4 = vpop.f32.mrf.mxu3 }
 0x2cb   :  { %v11272_v18 = vpop.f32.mrf.mxu1  ;;  %16335 = vst [vmem:[#allocation130_spill] sm:$0xff] %v11302_v4 }
 0x2cc   :  { %16330 = vst [vmem:[#allocation125_spill] sm:$0xff] %v11270_v16  ;;  %9437 = vmatmul.msk.f32.gmra.mxu2 %vm20_vm1, %v1223_v14  ;;  %v11294_v14 = vld [vmem:[#allocation2 + $0x80] sm:$0xff] }
 0x2cd   :  { %16331 = vst [vmem:[#allocation126_spill] sm:$0xff] %v11272_v18  ;;  %9540 = vmatmul.msk.f32.gmra.mxu0 %vm20_vm1, %v2262_v9  ;;  %v2263_v9 = vld [vmem:[#allocation2 + $0x151] sm:$0xff] }
 0x2ce   :  { %9457 = vmatmul.msk.f32.gmra.mxu1 %vm20_vm1, %v11276_v19 }
 0x2cf   :  { %v1561_v26 = vpop.f32.mrf.mxu2  ;;  %9508 = vmatmul.msk.f32.gmra.mxu3 %vm20_vm1, %v11106_v1 }
 0x2d0   :  { %v1677_v31 = vadd.f32 %v1561_v26, %v1092_v42  ;;  %v1225_v42 = vld [vmem:[#allocation2 + $0x2d2] sm:$0xff] }
 0x2d2   :  { %v11288_v21 = vadd.f32 %v2095_v20, %v1677_v31  ;;  %v11292_v39 = vpop.f32.mrf.mxu0  ;;  %v11322_v1 = vpop.f32.mrf.mxu3 }
 0x2d3   :  { %v11290_v53 = vpop.f32.mrf.mxu1  ;;  %16339 = vst [vmem:[#allocation134_spill] sm:$0xff] %v11322_v1  ;;  %v11380_v1 = vld [vmem:[#allocation2 + $0xc0] sm:$0xff] }
 0x2d4   :  { %16333 = vst [vmem:[#allocation128_spill] sm:$0xff] %v11288_v21  ;;  %9438 = vmatmul.msk.f32.gmra.mxu2 %vm20_vm1, %v1224_v24  ;;  %v2272_v21 = vld [vmem:[#allocation2 + $0x1e9] sm:$0xff] }
 0x2d5   :  { %16334 = vst [vmem:[#allocation129_spill] sm:$0xff] %v11290_v53  ;;  %9541 = vmatmul.msk.f32.gmra.mxu0 %vm20_vm1, %v2263_v9  ;;  %v2264_v9 = vld [vmem:[#allocation2 + $0x159] sm:$0xff] }
 0x2d6   :  { %9458 = vmatmul.msk.f32.gmra.mxu1 %vm20_vm1, %v11294_v14  ;;  %v1228_v53 = vld [vmem:[#allocation2 + $0x2f2] sm:$0xff] }
 0x2d7   :  { %v1564_v10 = vpop.f32.mrf.mxu2  ;;  %9509 = vmatmul.msk.f32.gmra.mxu3 %vm20_vm1, %v11122_v37  ;;  %v163_v37 = vld [vmem:[%s16030_s0 + $0x1f0] sm:$0xff] }
 0x2d8   :  { %v1678_v20 = vadd.f32 %v1564_v10, %v1095_v61  ;;  %v11328_v10 = vld [vmem:[#allocation2 + $0x98] sm:$0xff]  ;;  %227 = vst.msk [vmem:[#allocation2 + $0x331] sm:$0xff] %vm20_vm1, %v163_v37 }
 0x2da   :  { %v11306_v26 = vadd.f32 %v2098_v8, %v1678_v20  ;;  %v11310_v24 = vpop.f32.mrf.mxu0  ;;  %v2265_v20 = vld [vmem:[#allocation2 + $0x169] sm:$0xff] }
 0x2db   :  { %v11308_v31 = vpop.f32.mrf.mxu1 }
 0x2dc   :  { %16336 = vst [vmem:[#allocation131_spill] sm:$0xff] %v11306_v26  ;;  %9439 = vmatmul.msk.f32.gmra.mxu2 %vm20_vm1, %v1225_v42  ;;  %v11434_v26 = vld [vmem:[#allocation2 + $0xf0] sm:$0xff] }
 0x2dd   :  { %16337 = vst [vmem:[#allocation132_spill] sm:$0xff] %v11308_v31  ;;  %9542 = vmatmul.msk.f32.gmra.mxu0 %vm20_vm1, %v2264_v9  ;;  %v1227_v9 = vld [vmem:[#allocation2 + $0x2ea] sm:$0xff] }
 0x2de   :  { %9459 = vmatmul.msk.f32.gmra.mxu1 %vm20_vm1, %v11312_v49 }
 0x2df   :  { %v11318_v7 = vpop.f32.mrf.mxu2  ;;  %9510 = vmatmul.msk.f32.gmra.mxu3 %vm20_vm1, %v11138_v6  ;;  %v1765_v37 = vld [vmem:[#allocation2 + $0x330] sm:$0xff]  ;;  %v164_v6 = vld [vmem:[%s16030_s0 + $0x1f8] sm:$0xff] }
 0x2e0   :  { %16338 = vst [vmem:[#allocation133_spill] sm:$0xff] %v11318_v7 }
 0x2e1   :  { %228 = vst.msk [vmem:[#allocation2 + $0x339] sm:$0xff] %vm20_vm1, %v164_v6 }
 0x2e2   :  { %v11326_v61 = vpop.f32.mrf.mxu0 }
 0x2e3   :  { %v11324_v8 = vpop.f32.mrf.mxu1 }
 0x2e4   :  { %16340 = vst [vmem:[#allocation135_spill] sm:$0xff] %v11324_v8  ;;  %9440 = vmatmul.msk.f32.gmra.mxu2 %vm20_vm1, %v1226_v30  ;;  %v11365_v8 = vld [vmem:[#allocation2 + $0xb0] sm:$0xff] }
 0x2e5   :  { %9543 = vmatmul.msk.f32.gmra.mxu0 %vm20_vm1, %v2265_v20  ;;  %v11348_v20 = vpop.f32.mrf.mxu3 }
 0x2e6   :  { %9460 = vmatmul.msk.f32.gmra.mxu1 %vm20_vm1, %v11328_v10  ;;  %16343 = vst [vmem:[#allocation138_spill] sm:$0xff] %v11348_v20 }
 0x2e7   :  { %v11338_v42 = vpop.f32.mrf.mxu2  ;;  %9511 = vmatmul.msk.f32.gmra.mxu3 %vm20_vm1, %v1765_v37  ;;  %v1229_v37 = vld [vmem:[#allocation2 + $0x302] sm:$0xff] }
 0x2e8   :  { %16341 = vst [vmem:[#allocation136_spill] sm:$0xff] %v11338_v42  ;;  %v1766_v6 = vld [vmem:[#allocation2 + $0x338] sm:$0xff]  ;;  %v11394_v42 = vld [vmem:[#allocation2 + $0xc8] sm:$0xff] }
 0x2ea   :  { %v11344_v30 = vpop.f32.mrf.mxu0 }
 0x2eb   :  { %v11342_v38 = vpop.f32.mrf.mxu1 }
 0x2ec   :  { %16342 = vst [vmem:[#allocation137_spill] sm:$0xff] %v11342_v38  ;;  %9441 = vmatmul.msk.f32.gmra.mxu2 %vm20_vm1, %v1227_v9  ;;  %v2267_v38 = vld [vmem:[#allocation2 + $0x181] sm:$0xff] }
 0x2ed   :  { %9544 = vmatmul.msk.f32.gmra.mxu0 %vm20_vm1, %v2266_v25  ;;  %v11371_v25 = vpop.f32.mrf.mxu3 }
 0x2ee   :  { %9461 = vmatmul.msk.f32.gmra.mxu1 %vm20_vm1, %v11346_v46  ;;  %16346 = vst [vmem:[#allocation141_spill] sm:$0xff] %v11371_v25  ;;  %v2269_v25 = vld [vmem:[#allocation2 + $0x1c9] sm:$0xff] }
 0x2ef   :  { %v11358_v18 = vpop.f32.mrf.mxu2  ;;  %9512 = vmatmul.msk.f32.gmra.mxu3 %vm20_vm1, %v1766_v6  ;;  %v1230_v6 = vld [vmem:[#allocation2 + $0x30a] sm:$0xff] }
 0x2f0   :  { %16344 = vst [vmem:[#allocation139_spill] sm:$0xff] %v11358_v18 }
 0x2f2   :  { %v11363_v9 = vpop.f32.mrf.mxu0 }
 0x2f3   :  { %v11361_v31 = vpop.f32.mrf.mxu1 }
 0x2f4   :  { %16345 = vst [vmem:[#allocation140_spill] sm:$0xff] %v11361_v31  ;;  %9442 = vmatmul.msk.f32.gmra.mxu2 %vm20_vm1, %v1228_v53  ;;  %v2268_v53 = vld [vmem:[#allocation2 + $0x189] sm:$0xff] }
 0x2f5   :  { %9545 = vmatmul.msk.f32.gmra.mxu0 %vm20_vm1, %v2267_v38  ;;  %v11388_v7 = vpop.f32.mrf.mxu3 }
 0x2f6   :  { %9462 = vmatmul.msk.f32.gmra.mxu1 %vm20_vm1, %v11365_v8  ;;  %16351 = vst [vmem:[#allocation146_spill] sm:$0xff] %v11388_v7 }
 0x2f7   :  { %v11373_v15 = vpop.f32.mrf.mxu2 }
 0x2f8   :  { %16347 = vst [vmem:[#allocation142_spill] sm:$0xff] %v11373_v15  ;;  %v11408_v15 = vld [vmem:[#allocation2 + $0xd8] sm:$0xff] }
 0x2fa   :  { %v11378_v4 = vpop.f32.mrf.mxu0 }
 0x2fb   :  { %v11376_v31 = vpop.f32.mrf.mxu1  ;;  %16349 = vst [vmem:[#allocation144_spill] sm:$0xff] %v11378_v4 }
 0x2fc   :  { %16348 = vst [vmem:[#allocation143_spill] sm:$0xff] %v11376_v31  ;;  %9443 = vmatmul.msk.f32.gmra.mxu2 %vm20_vm1, %v1229_v37 }
 0x2fd   :  { %9546 = vmatmul.msk.f32.gmra.mxu0 %vm20_vm1, %v2268_v53  ;;  %v1231_v53 = vld [vmem:[#allocation2 + $0x31a] sm:$0xff]  ;;  %v11402_v18 = vpop.f32.mrf.mxu3 }
 0x2fe   :  { %9463 = vmatmul.msk.f32.gmra.mxu1 %vm20_vm1, %v11380_v1  ;;  %16355 = vst [vmem:[#allocation150_spill] sm:$0xff] %v11402_v18 }
 0x2ff   :  { %v11386_v38 = vpop.f32.mrf.mxu2 }
 0x300   :  { %16350 = vst [vmem:[#allocation145_spill] sm:$0xff] %v11386_v38  ;;  %v2270_v38 = vld [vmem:[#allocation2 + $0x1d1] sm:$0xff] }
 0x302   :  { %v11392_v31 = vpop.f32.mrf.mxu0 }
 0x303   :  { %v11390_v20 = vpop.f32.mrf.mxu1  ;;  %16353 = vst [vmem:[#allocation148_spill] sm:$0xff] %v11392_v31 }
 0x304   :  { %16352 = vst [vmem:[#allocation147_spill] sm:$0xff] %v11390_v20  ;;  %9444 = vmatmul.msk.f32.gmra.mxu2 %vm20_vm1, %v1230_v6  ;;  %v1232_v6 = vld [vmem:[#allocation2 + $0x322] sm:$0xff] }
 0x305   :  { %9547 = vmatmul.msk.f32.gmra.mxu0 %vm20_vm1, %v2269_v25  ;;  %v11422_v36 = vpop.f32.mrf.mxu3 }
 0x306   :  { %9464 = vmatmul.msk.f32.gmra.mxu1 %vm20_vm1, %v11394_v42  ;;  %16359 = vst [vmem:[#allocation154_spill] sm:$0xff] %v11422_v36 }
 0x307   :  { %v11400_v37 = vpop.f32.mrf.mxu2 }
 0x308   :  { %16354 = vst [vmem:[#allocation149_spill] sm:$0xff] %v11400_v37 }
 0x30a   :  { %v11406_v20 = vpop.f32.mrf.mxu0 }
 0x30b   :  { %v11404_v7 = vpop.f32.mrf.mxu1  ;;  %16356 = vst [vmem:[#allocation151_spill] sm:$0xff] %v11406_v20  ;;  %v11631_v20 = vld [vmem:[#allocation2 + $0x62] sm:$0xff] }
 0x30c   :  { %9445 = vmatmul.msk.f32.gmra.mxu2 %vm20_vm1, %v1231_v53 }
 0x30d   :  { %9548 = vmatmul.msk.f32.gmra.mxu0 %vm20_vm1, %v2270_v38  ;;  %v11436_v16 = vpop.f32.mrf.mxu3 }
 0x30e   :  { %9465 = vmatmul.msk.f32.gmra.mxu1 %vm20_vm1, %v11408_v15  ;;  %16362 = vst [vmem:[#allocation157_spill] sm:$0xff] %v11436_v16 }
 0x30f   :  { %v11414_v25 = vpop.f32.mrf.mxu2 }
 0x310   :  { %16357 = vst [vmem:[#allocation152_spill] sm:$0xff] %v11414_v25 }
 0x312   :  { %v11418_v18 = vpop.f32.mrf.mxu0 }
 0x313   :  { %v11416_v37 = vpop.f32.mrf.mxu1  ;;  %16358 = vst [vmem:[#allocation153_spill] sm:$0xff] %v11418_v18  ;;  %v11615_v18 = vld [vmem:[#allocation2 + $0x52] sm:$0xff] }
 0x314   :  { %9446 = vmatmul.msk.f32.gmra.mxu2 %vm20_vm1, %v1232_v6 }
 0x315   :  { %9549 = vmatmul.msk.f32.gmra.mxu0 %vm20_vm1, %v2271_v11  ;;  %v11454_v58 = vpop.f32.mrf.mxu3 }
 0x316   :  { %9466 = vmatmul.msk.f32.gmra.mxu1 %vm20_vm1, %v11420_v50  ;;  %16366 = vst [vmem:[#allocation161_spill] sm:$0xff] %v11454_v58  ;;  %v11473_v58 = vld [vmem:[#allocation2 + $0x110] sm:$0xff] }
 0x317   :  { %v11428_v38 = vpop.f32.mrf.mxu2 }
 0x318   :  { %16360 = vst [vmem:[#allocation155_spill] sm:$0xff] %v11428_v38  ;;  %v11447_v38 = vld [vmem:[#allocation2 + $0xf8] sm:$0xff] }
 0x31a   :  { %v11432_v25 = vpop.f32.mrf.mxu0 }
 0x31b   :  { %v11430_v53 = vpop.f32.mrf.mxu1  ;;  %16361 = vst [vmem:[#allocation156_spill] sm:$0xff] %v11432_v25 }
 0x31c   :  { %9647 = vmatmul.msk.f32.vlgmr.msra.gmra.mxu2 %vm20_vm1, %v11180_v35 }
 0x31d   :  { %9550 = vmatmul.msk.f32.gmra.mxu0 %vm20_vm1, %v2272_v21  ;;  %v11467_v47 = vpop.f32.mrf.mxu3 }
 0x31e   :  { %9467 = vmatmul.msk.f32.gmra.mxu1 %vm20_vm1, %v11434_v26  ;;  %16369 = vst [vmem:[#allocation164_spill] sm:$0xff] %v11467_v47  ;;  %v9711_v47 = vld [vmem:[%s16029_s1 + $0x1c] sm:$0xf] }
 0x31f   :  { %v11441_v6 = vpop.f32.mrf.mxu2  ;;  %9712 = vmatpush.msk.msrb.mxu3 %vm552_vm0, %v9711_v47  ;;  %v3841_v47 = vld [vmem:[#allocation2 + $0x39] sm:$0xff] }
 0x320   :  { %16363 = vst [vmem:[#allocation158_spill] sm:$0xff] %v11441_v6  ;;  %v11460_v6 = vld [vmem:[#allocation2 + $0x108] sm:$0xff] }
 0x322   :  { %v11445_v11 = vpop.f32.mrf.mxu0 }
 0x323   :  { %v11443_v36 = vpop.f32.mrf.mxu1  ;;  %16364 = vst [vmem:[#allocation159_spill] sm:$0xff] %v11445_v11  ;;  %v2772_v11 = vld [vmem:[#allocation2 + $0x22] sm:$0xff] }
 0x324   :  { %9648 = vmatmul.msk.f32.gmra.mxu2 %vm20_vm1, %v11196_v59 }
 0x325   :  { %9551 = vmatmul.msk.f32.gmra.mxu0 %vm20_vm1, %v2273_v54  ;;  %v11501_v63 = vpop.f32.mrf.mxu3 }
 0x326   :  { %9468 = vmatmul.msk.f32.gmra.mxu1 %vm20_vm1, %v11447_v38  ;;  %16373 = vst [vmem:[#allocation168_spill] sm:$0xff] %v11501_v63  ;;  %v2277_v63 = vld [vmem:[#allocation2 + $0x229] sm:$0xff] }
 0x327   :  { %v11452_v16 = vpop.f32.mrf.mxu2 }
 0x328   :  { %16365 = vst [vmem:[#allocation160_spill] sm:$0xff] %v11452_v16 }
 0x32a   :  { %v11458_v21 = vpop.f32.mrf.mxu0 }
 0x32b   :  { %v11456_v0 = vpop.f32.mrf.mxu1  ;;  %16367 = vst [vmem:[#allocation162_spill] sm:$0xff] %v11458_v21  ;;  %v2771_v21 = vld [vmem:[#allocation2 + $0x1a] sm:$0xff] }
 0x32c   :  { %9649 = vmatmul.msk.f32.gmra.mxu2 %vm20_vm1, %v11212_v60  ;;  %v3843_v60 = vld [vmem:[#allocation2 + $0x51] sm:$0xff] }
 0x32d   :  { %9552 = vmatmul.msk.f32.gmra.mxu0 %vm20_vm1, %v2274_v3  ;;  %v11519_v59 = vpop.f32.mrf.mxu3 }
 0x32e   :  { %9469 = vmatmul.msk.f32.gmra.mxu1 %vm20_vm1, %v11460_v6  ;;  %16376 = vst [vmem:[#allocation171_spill] sm:$0xff] %v11519_v59 }
 0x32f   :  { %v11465_v34 = vpop.f32.mrf.mxu2 }
 0x330   :  { %16368 = vst [vmem:[#allocation163_spill] sm:$0xff] %v11465_v34  ;;  %v3840_v34 = vld [vmem:[#allocation2 + $0x31] sm:$0xff] }
 0x331   :  { %9713 = vmatmul.msk.f32.vlgmr.msrb.gmra.mxu3 %vm20_vm1, %v3840_v34 }
 0x332   :  { %v11471_v16 = vpop.f32.mrf.mxu0 }
 0x333   :  { %v11469_v54 = vpop.f32.mrf.mxu1  ;;  %16370 = vst [vmem:[#allocation165_spill] sm:$0xff] %v11471_v16 }
 0x334   :  { %9650 = vmatmul.msk.f32.gmra.mxu2 %vm20_vm1, %v11228_v62 }
 0x335   :  { %9553 = vmatmul.msk.f32.gmra.mxu0 %vm20_vm1, %v2275_v40  ;;  %v11498_v40 = vld [vmem:[#allocation2 + $0x120] sm:$0xff] }
 0x336   :  { %9470 = vmatmul.msk.f32.gmra.mxu1 %vm20_vm1, %v11473_v58 }
 0x337   :  { %v11484_v3 = vpop.f32.mrf.mxu2 }
 0x338   :  { %16371 = vst [vmem:[#allocation166_spill] sm:$0xff] %v11484_v3  ;;  %v2276_v3 = vld [vmem:[#allocation2 + $0x219] sm:$0xff] }
 0x339   :  { %9714 = vmatmul.msk.f32.gmra.mxu3 %vm20_vm1, %v3841_v47 }
 0x33a   :  { %v11496_v27 = vpop.f32.mrf.mxu0 }
 0x33b   :  { %v11494_v35 = vpop.f32.mrf.mxu1  ;;  %16372 = vst [vmem:[#allocation167_spill] sm:$0xff] %v11496_v27  ;;  %v2278_v27 = vld [vmem:[#allocation2 + $0x231] sm:$0xff] }
 0x33c   :  { %9651 = vmatmul.msk.f32.gmra.mxu2 %vm20_vm1, %v11244_v5 }
 0x33d   :  { %9554 = vmatmul.msk.f32.gmra.mxu0 %vm20_vm1, %v2276_v3  ;;  %v3842_v3 = vld [vmem:[#allocation2 + $0x49] sm:$0xff] }
 0x33e   :  { %9471 = vmatmul.msk.f32.gmra.mxu1 %vm20_vm1, %v11498_v40 }
 0x33f   :  { %v11508_v34 = vpop.f32.mrf.mxu2 }
 0x340   :  { %16374 = vst [vmem:[#allocation169_spill] sm:$0xff] %v11508_v34 }
 0x341   :  { %9715 = vmatmul.msk.f32.gmra.mxu3 %vm20_vm1, %v3842_v3 }
 0x342   :  { %v11513_v52 = vpop.f32.mrf.mxu0 }
 0x343   :  { %v11511_v51 = vpop.f32.mrf.mxu1  ;;  %16375 = vst [vmem:[#allocation170_spill] sm:$0xff] %v11513_v52  ;;  %v11529_v52 = vld [vmem:[#allocation2 + $0x138] sm:$0xff] }
 0x344   :  { %9652 = vmatmul.msk.f32.gmra.mxu2 %vm20_vm1, %v11260_v55  ;;  %v3846_v55 = vld [vmem:[#allocation2 + $0x79] sm:$0xff] }
 0x345   :  { %9555 = vmatmul.msk.f32.gmra.mxu0 %vm20_vm1, %v2277_v63  ;;  %v11538_v63 = vpop.f32.mrf.mxu3 }
 0x346   :  { %9472 = vmatmul.msk.f32.gmra.mxu1 %vm20_vm1, %v11515_v41  ;;  %16379 = vst [vmem:[#allocation174_spill] sm:$0xff] %v11538_v63 }
 0x347   :  { %v11531_v16 = vpop.f32.mrf.mxu2 }
 0x348   :  { %16378 = vst [vmem:[#allocation173_spill] sm:$0xff] %v11531_v16 }
 0x349   :  { %9716 = vmatmul.msk.f32.gmra.mxu3 %vm20_vm1, %v3843_v60 }
 0x34a   :  { %v11527_v34 = vpop.f32.mrf.mxu0 }
 0x34b   :  { %v11525_v47 = vpop.f32.mrf.mxu1  ;;  %16377 = vst [vmem:[#allocation172_spill] sm:$0xff] %v11527_v34  ;;  %v2279_v34 = vld [vmem:[#allocation2 + $0x241] sm:$0xff] }
 0x34c   :  { %9653 = vmatmul.msk.f32.gmra.mxu2 %vm20_vm1, %v11276_v19 }
 0x34d   :  { %9556 = vmatmul.msk.f32.gmra.mxu0 %vm20_vm1, %v2278_v27  ;;  %v3844_v27 = vld [vmem:[#allocation2 + $0x61] sm:$0xff]  ;;  %v11551_v63 = vpop.f32.mrf.mxu3 }
 0x34e   :  { %9473 = vmatmul.msk.f32.gmra.mxu1 %vm20_vm1, %v11529_v52  ;;  %16382 = vst [vmem:[#allocation177_spill] sm:$0xff] %v11551_v63  ;;  %v2281_v63 = vld [vmem:[#allocation2 + $0x259] sm:$0xff] }
 0x34f   :  { %v11547_v62 = vpop.f32.mrf.mxu2 }
 0x350   :  { %16381 = vst [vmem:[#allocation176_spill] sm:$0xff] %v11547_v62  ;;  %v11569_v62 = vld [vmem:[#allocation2 + $0x32] sm:$0xff] }
 0x351   :  { %9717 = vmatmul.msk.f32.gmra.mxu3 %vm20_vm1, %v3844_v27 }
 0x352   :  { %v11543_v59 = vpop.f32.mrf.mxu0 }
 0x353   :  { %v11541_v3 = vpop.f32.mrf.mxu1  ;;  %16380 = vst [vmem:[#allocation175_spill] sm:$0xff] %v11543_v59  ;;  %v2280_v59 = vld [vmem:[#allocation2 + $0x249] sm:$0xff] }
 0x354   :  { %9654 = vmatmul.msk.f32.gmra.mxu2 %vm20_vm1, %v11294_v14 }
 0x355   :  { %9557 = vmatmul.msk.f32.gmra.mxu0 %vm20_vm1, %v2279_v34 }
 0x356   :  { %9581 = vmatmul.msk.f32.vlgmr.msra.gmra.mxu1 %vm20_vm1, %v2771_v21  ;;  %v3845_v21 = vld [vmem:[#allocation2 + $0x69] sm:$0xff] }
 0x357   :  { %v11562_v5 = vpop.f32.mrf.mxu2 }
 0x358   :  { %16384 = vst [vmem:[#allocation179_spill] sm:$0xff] %v11562_v5  ;;  %v2282_v5 = vld [vmem:[#allocation2 + $0x261] sm:$0xff] }
 0x359   :  { %9718 = vmatmul.msk.f32.gmra.mxu3 %vm20_vm1, %v3845_v21 }
 0x35a   :  { %v11556_v16 = vpop.f32.mrf.mxu0 }
 0x35b   :  { %v11554_v60 = vpop.f32.mrf.mxu1  ;;  %16383 = vst [vmem:[#allocation178_spill] sm:$0xff] %v11556_v16  ;;  %v11571_v16 = vpop.f32.mrf.mxu3 }
 0x35c   :  { %16386 = vst [vmem:[#allocation181_spill] sm:$0xff] %v11571_v16  ;;  %9655 = vmatmul.msk.f32.gmra.mxu2 %vm20_vm1, %v11312_v49 }
 0x35d   :  { %9558 = vmatmul.msk.f32.gmra.mxu0 %vm20_vm1, %v2280_v59 }
 0x35e   :  { %9582 = vmatmul.msk.f32.gmra.mxu1 %vm20_vm1, %v2772_v11 }
 0x35f   :  { %v11578_v11 = vpop.f32.mrf.mxu2 }
 0x360   :  { %16387 = vst [vmem:[#allocation182_spill] sm:$0xff] %v11578_v11  ;;  %v2283_v11 = vld [vmem:[#allocation2 + $0x271] sm:$0xff] }
 0x361   :  { %9719 = vmatmul.msk.f32.gmra.mxu3 %vm20_vm1, %v3846_v55 }
 0x362   :  { %v11567_v27 = vpop.f32.mrf.mxu0 }
 0x363   :  { %v11565_v34 = vpop.f32.mrf.mxu1  ;;  %16385 = vst [vmem:[#allocation180_spill] sm:$0xff] %v11567_v27  ;;  %v11585_v27 = vld [vmem:[#allocation2 + $0x3a] sm:$0xff]  ;;  %v11589_v19 = vpop.f32.mrf.mxu3 }
 0x364   :  { %16389 = vst [vmem:[#allocation184_spill] sm:$0xff] %v11589_v19  ;;  %9656 = vmatmul.msk.f32.gmra.mxu2 %vm20_vm1, %v11328_v10 }
 0x365   :  { %9559 = vmatmul.msk.f32.gmra.mxu0 %vm20_vm1, %v2281_v63  ;;  %v3847_v63 = vld [vmem:[#allocation2 + $0x81] sm:$0xff] }
 0x366   :  { %9583 = vmatmul.msk.f32.gmra.mxu1 %vm20_vm1, %v11569_v62 }
 0x367   :  { %v11601_v25 = vpop.f32.mrf.mxu2 }
 0x368   :  { %16391 = vst [vmem:[#allocation186_spill] sm:$0xff] %v11601_v25 }
 0x369   :  { %9720 = vmatmul.msk.f32.gmra.mxu3 %vm20_vm1, %v3847_v63 }
 0x36a   :  { %v11583_v21 = vpop.f32.mrf.mxu0 }
 0x36b   :  { %v11581_v59 = vpop.f32.mrf.mxu1  ;;  %16388 = vst [vmem:[#allocation183_spill] sm:$0xff] %v11583_v21  ;;  %v11599_v21 = vld [vmem:[#allocation2 + $0x4a] sm:$0xff]  ;;  %v11608_v14 = vpop.f32.mrf.mxu3 }
 0x36c   :  { %16392 = vst [vmem:[#allocation187_spill] sm:$0xff] %v11608_v14  ;;  %9657 = vmatmul.msk.f32.gmra.mxu2 %vm20_vm1, %v11346_v46  ;;  %v3851_v46 = vld [vmem:[#allocation2 + $0xb1] sm:$0xff] }
 0x36d   :  { %9560 = vmatmul.msk.f32.gmra.mxu0 %vm20_vm1, %v2282_v5  ;;  %v3848_v5 = vld [vmem:[#allocation2 + $0x91] sm:$0xff] }
 0x36e   :  { %9584 = vmatmul.msk.f32.gmra.mxu1 %vm20_vm1, %v11585_v27 }
 0x36f   :  { %v11619_v49 = vpop.f32.mrf.mxu2 }
 0x370   :  { %16394 = vst [vmem:[#allocation189_spill] sm:$0xff] %v11619_v49  ;;  %v2286_v49 = vld [vmem:[#allocation2 + $0x291] sm:$0xff] }
 0x371   :  { %9721 = vmatmul.msk.f32.gmra.mxu3 %vm20_vm1, %v3848_v5 }
 0x372   :  { %v11597_v16 = vpop.f32.mrf.mxu0 }
 0x373   :  { %v11595_v55 = vpop.f32.mrf.mxu1  ;;  %16390 = vst [vmem:[#allocation185_spill] sm:$0xff] %v11597_v16  ;;  %v2284_v16 = vld [vmem:[#allocation2 + $0x279] sm:$0xff]  ;;  %v11624_v14 = vpop.f32.mrf.mxu3 }
 0x374   :  { %16395 = vst [vmem:[#allocation190_spill] sm:$0xff] %v11624_v14  ;;  %9658 = vmatmul.msk.f32.gmra.mxu2 %vm20_vm1, %v11365_v8 }
 0x375   :  { %9561 = vmatmul.msk.f32.gmra.mxu0 %vm20_vm1, %v2283_v11  ;;  %v3849_v11 = vld [vmem:[#allocation2 + $0x99] sm:$0xff] }
 0x376   :  { %9585 = vmatmul.msk.f32.gmra.mxu1 %vm20_vm1, %v11599_v21 }
 0x377   :  { %v11638_v10 = vpop.f32.mrf.mxu2 }
 0x378   :  { %16397 = vst [vmem:[#allocation192_spill] sm:$0xff] %v11638_v10 }
 0x379   :  { %9722 = vmatmul.msk.f32.gmra.mxu3 %vm20_vm1, %v3849_v11 }
 0x37a   :  { %v11613_v19 = vpop.f32.mrf.mxu0 }
 0x37b   :  { %v11611_v63 = vpop.f32.mrf.mxu1  ;;  %16393 = vst [vmem:[#allocation188_spill] sm:$0xff] %v11613_v19  ;;  %v2285_v19 = vld [vmem:[#allocation2 + $0x289] sm:$0xff]  ;;  %v11647_v31 = vpop.f32.mrf.mxu3 }
 0x37c   :  { %16400 = vst [vmem:[#allocation195_spill] sm:$0xff] %v11647_v31  ;;  %9659 = vmatmul.msk.f32.gmra.mxu2 %vm20_vm1, %v11380_v1  ;;  %v3853_v1 = vld [vmem:[#allocation2 + $0xc9] sm:$0xff] }
 0x37d   :  { %9562 = vmatmul.msk.f32.gmra.mxu0 %vm20_vm1, %v2284_v16  ;;  %v3850_v16 = vld [vmem:[#allocation2 + $0xa9] sm:$0xff] }
 0x37e   :  { %9586 = vmatmul.msk.f32.gmra.mxu1 %vm20_vm1, %v11615_v18 }
 0x381   :  { %9723 = vmatmul.msk.f32.gmra.mxu3 %vm20_vm1, %v3850_v16 }
 0x382   :  { %v11629_v25 = vpop.f32.mrf.mxu0 }
 0x383   :  { %v11627_v5 = vpop.f32.mrf.mxu1  ;;  %16396 = vst [vmem:[#allocation191_spill] sm:$0xff] %v11629_v25  ;;  %v11645_v25 = vld [vmem:[#allocation2 + $0x6a] sm:$0xff]  ;;  %v11665_v8 = vpop.f32.mrf.mxu3 }
 0x384   :  { %16404 = vst [vmem:[#allocation199_spill] sm:$0xff] %v11665_v8  ;;  %9660 = vmatmul.msk.f32.gmra.mxu2 %vm20_vm1, %v11394_v42 }
 0x385   :  { %9563 = vmatmul.msk.f32.gmra.mxu0 %vm20_vm1, %v2285_v19  ;;  %v11654_v19 = vpop.f32.mrf.mxu2 }
 0x386   :  { %9587 = vmatmul.msk.f32.gmra.mxu1 %vm20_vm1, %v11631_v20  ;;  %16401 = vst [vmem:[#allocation196_spill] sm:$0xff] %v11654_v19  ;;  %v2288_v19 = vld [vmem:[#allocation2 + $0x2a9] sm:$0xff] }
 0x389   :  { %9724 = vmatmul.msk.f32.gmra.mxu3 %vm20_vm1, %v3851_v46 }
 0x38a   :  { %v11643_v14 = vpop.f32.mrf.mxu0 }
 0x38b   :  { %v11641_v11 = vpop.f32.mrf.mxu1  ;;  %16399 = vst [vmem:[#allocation194_spill] sm:$0xff] %v11643_v14  ;;  %v2287_v14 = vld [vmem:[#allocation2 + $0x2a1] sm:$0xff] }
 0x38c   :  { %16398 = vst [vmem:[#allocation193_spill] sm:$0xff] %v11641_v11  ;;  %v11661_v11 = vld [vmem:[#allocation2 + $0x7a] sm:$0xff]  ;;  %9661 = vmatmul.msk.f32.gmra.mxu2 %vm20_vm1, %v11408_v15 }
 0x38d   :  { %9564 = vmatmul.msk.f32.gmra.mxu0 %vm20_vm1, %v2286_v49  ;;  %v3852_v49 = vld [vmem:[#allocation2 + $0xc1] sm:$0xff] }
 0x38e   :  { %9588 = vmatmul.msk.f32.gmra.mxu1 %vm20_vm1, %v11645_v25  ;;  %v3855_v15 = vld [vmem:[#allocation2 + $0xe1] sm:$0xff] }
 0x391   :  { %9725 = vmatmul.msk.f32.gmra.mxu3 %vm20_vm1, %v3852_v49 }
 0x392   :  { %v11659_v10 = vpop.f32.mrf.mxu0 }
 0x393   :  { %v11657_v16 = vpop.f32.mrf.mxu1  ;;  %16403 = vst [vmem:[#allocation198_spill] sm:$0xff] %v11659_v10  ;;  %v11675_v10 = vld [vmem:[#allocation2 + $0x82] sm:$0xff] }
 0x394   :  { %16402 = vst [vmem:[#allocation197_spill] sm:$0xff] %v11657_v16  ;;  %v11677_v16 = vpop.f32.mrf.mxu2  ;;  %9662 = vmatmul.msk.f32.gmra.mxu2 %vm20_vm1, %v11420_v50  ;;  %v3856_v50 = vld [vmem:[#allocation2 + $0xf1] sm:$0xff] }
 0x395   :  { %9565 = vmatmul.msk.f32.gmra.mxu0 %vm20_vm1, %v2287_v14  ;;  %16407 = vst [vmem:[#allocation202_spill] sm:$0xff] %v11677_v16  ;;  %v11684_v14 = vpop.f32.mrf.mxu3 }
 0x396   :  { %9589 = vmatmul.msk.f32.gmra.mxu1 %vm20_vm1, %v11661_v11  ;;  %16408 = vst [vmem:[#allocation203_spill] sm:$0xff] %v11684_v14 }
 0x399   :  { %9726 = vmatmul.msk.f32.gmra.mxu3 %vm20_vm1, %v3853_v1 }
 0x39a   :  { %v11673_v31 = vpop.f32.mrf.mxu0 }
 0x39b   :  { %v11671_v46 = vpop.f32.mrf.mxu1  ;;  %16406 = vst [vmem:[#allocation201_spill] sm:$0xff] %v11673_v31  ;;  %v2289_v31 = vld [vmem:[#allocation2 + $0x2b9] sm:$0xff] }
 0x39c   :  { %16405 = vst [vmem:[#allocation200_spill] sm:$0xff] %v11671_v46  ;;  %v11691_v46 = vld [vmem:[#allocation2 + $0x92] sm:$0xff]  ;;  %v11695_v42 = vpop.f32.mrf.mxu2  ;;  %9663 = vmatmul.msk.f32.gmra.mxu2 %vm20_vm1, %v11434_v26 }
 0x39d   :  { %9566 = vmatmul.msk.f32.gmra.mxu0 %vm20_vm1, %v2288_v19  ;;  %16411 = vst [vmem:[#allocation206_spill] sm:$0xff] %v11695_v42  ;;  %v3854_v19 = vld [vmem:[#allocation2 + $0xd9] sm:$0xff]  ;;  %v11700_v14 = vpop.f32.mrf.mxu3  ;;  %v2291_v42 = vld [vmem:[#allocation2 + $0x2d1] sm:$0xff] }
 0x39e   :  { %9590 = vmatmul.msk.f32.gmra.mxu1 %vm20_vm1, %v11675_v10  ;;  %16412 = vst [vmem:[#allocation207_spill] sm:$0xff] %v11700_v14  ;;  %v3857_v26 = vld [vmem:[#allocation2 + $0xf9] sm:$0xff] }
 0x3a1   :  { %9727 = vmatmul.msk.f32.gmra.mxu3 %vm20_vm1, %v3854_v19 }
 0x3a2   :  { %v11689_v8 = vpop.f32.mrf.mxu0 }
 0x3a3   :  { %v11687_v49 = vpop.f32.mrf.mxu1  ;;  %16410 = vst [vmem:[#allocation205_spill] sm:$0xff] %v11689_v8  ;;  %v2290_v8 = vld [vmem:[#allocation2 + $0x2c1] sm:$0xff] }
 0x3a4   :  { %16409 = vst [vmem:[#allocation204_spill] sm:$0xff] %v11687_v49  ;;  %v11707_v49 = vld [vmem:[#allocation2 + $0x9a] sm:$0xff]  ;;  %9664 = vmatmul.msk.f32.gmra.mxu2 %vm20_vm1, %v11447_v38  ;;  %v3858_v38 = vld [vmem:[#allocation2 + $0x109] sm:$0xff] }
 0x3a5   :  { %9567 = vmatmul.msk.f32.gmra.mxu0 %vm20_vm1, %v2289_v31  ;;  %16415 = vst [vmem:[#allocation210_spill] sm:$0xff] %v11707_v49  ;;  %v11714_v31 = vpop.f32.mrf.mxu2 }
 0x3a6   :  { %9591 = vmatmul.msk.f32.gmra.mxu1 %vm20_vm1, %v11691_v46  ;;  %16416 = vst [vmem:[#allocation211_spill] sm:$0xff] %v11714_v31 }
 0x3a9   :  { %9728 = vmatmul.msk.f32.gmra.mxu3 %vm20_vm1, %v3855_v15 }
 0x3aa   :  { %v11705_v16 = vpop.f32.mrf.mxu0 }
 0x3ab   :  { %v11703_v1 = vpop.f32.mrf.mxu1  ;;  %16414 = vst [vmem:[#allocation209_spill] sm:$0xff] %v11705_v16  ;;  %v11721_v16 = vld [vmem:[#allocation2 + $0xaa] sm:$0xff] }
 0x3ac   :  { %16413 = vst [vmem:[#allocation208_spill] sm:$0xff] %v11703_v1  ;;  %v11723_v1 = vpop.f32.mrf.mxu3  ;;  %9665 = vmatmul.msk.f32.gmra.mxu2 %vm20_vm1, %v11460_v6 }
 0x3ad   :  { %9568 = vmatmul.msk.f32.gmra.mxu0 %vm20_vm1, %v2290_v8  ;;  %16419 = vst [vmem:[#allocation214_spill] sm:$0xff] %v11721_v16  ;;  %v3584_v8 = vpop.f32.mrf.mxu2 }
 0x3ae   :  { %9592 = vmatmul.msk.f32.gmra.mxu1 %vm20_vm1, %v11707_v49  ;;  %16420 = vst [vmem:[#allocation215_spill] sm:$0xff] %v11723_v1 }
 0x3b1   :  { %9729 = vmatmul.msk.f32.gmra.mxu3 %vm20_vm1, %v3856_v50 }
 0x3b2   :  { %v11719_v14 = vpop.f32.mrf.mxu0 }
 0x3b3   :  { %v11717_v19 = vpop.f32.mrf.mxu1  ;;  %16418 = vst [vmem:[#allocation213_spill] sm:$0xff] %v11719_v14  ;;  %v2292_v14 = vld [vmem:[#allocation2 + $0x2d9] sm:$0xff] }
 0x3b4   :  { %16417 = vst [vmem:[#allocation212_spill] sm:$0xff] %v11717_v19  ;;  %v11735_v19 = vld [vmem:[#allocation2 + $0xb2] sm:$0xff]  ;;  %v4118_v1 = vpop.f32.mrf.mxu3  ;;  %9666 = vmatmul.msk.f32.gmra.mxu2 %vm20_vm1, %v11473_v58 }
 0x3b5   :  { %9569 = vmatmul.msk.f32.gmra.mxu0 %vm20_vm1, %v2291_v42  ;;  %16423 = vst [vmem:[#allocation218_spill] sm:$0xff] %v11735_v19  ;;  %v3587_v42 = vpop.f32.mrf.mxu2 }
 0x3b6   :  { %9593 = vmatmul.msk.f32.gmra.mxu1 %vm20_vm1, %v11721_v16  ;;  %v11747_v16 = vld [vmem:[#allocation2 + $0xc2] sm:$0xff] }
 0x3b7   :  { %16426 = vst [vmem:[#allocation221_spill] sm:$0xff] %v11747_v16 }
 0x3b9   :  { %9730 = vmatmul.msk.f32.gmra.mxu3 %vm20_vm1, %v3857_v26  ;;  %v9777_v26 = vld [vmem:[%s16029_s1 + $0x20] sm:$0xf] }
 0x3ba   :  { %v11733_v31 = vpop.f32.mrf.mxu0  ;;  %9778 = vmatpush.msk.msra.mxu0 %vm552_vm0, %v9777_v26 }
 0x3bb   :  { %v11731_v15 = vpop.f32.mrf.mxu1  ;;  %16422 = vst [vmem:[#allocation217_spill] sm:$0xff] %v11733_v31  ;;  %v2293_v31 = vld [vmem:[#allocation2 + $0x2e9] sm:$0xff] }
 0x3bc   :  { %16421 = vst [vmem:[#allocation216_spill] sm:$0xff] %v11731_v15  ;;  %v4121_v49 = vpop.f32.mrf.mxu3  ;;  %9667 = vmatmul.msk.f32.gmra.mxu2 %vm20_vm1, %v11498_v40 }
 0x3bd   :  { %9570 = vmatmul.msk.f32.gmra.mxu0 %vm20_vm1, %v2292_v14  ;;  %v11754_v14 = vpop.f32.mrf.mxu2 }
 0x3be   :  { %9594 = vmatmul.msk.f32.gmra.mxu1 %vm20_vm1, %v11735_v19 }
 0x3c1   :  { %9731 = vmatmul.msk.f32.gmra.mxu3 %vm20_vm1, %v3858_v38  ;;  %v981_v38 = vadd.f32 %v10453_v29, %v10451_v28  ;;  %v3860_v29 = vld [vmem:[#allocation2 + $0x121] sm:$0xff] }
 0x3c2   :  { %v11745_v15 = vpop.f32.mrf.mxu0 }
 0x3c3   :  { %v11743_v50 = vpop.f32.mrf.mxu1  ;;  %16425 = vst [vmem:[#allocation220_spill] sm:$0xff] %v11745_v15  ;;  %v978_v15 = vadd.f32 %v10440_v23, %v10438_v22  ;;  %v3859_v22 = vld [vmem:[#allocation2 + $0x111] sm:$0xff] }
 0x3c4   :  { %16424 = vst [vmem:[#allocation219_spill] sm:$0xff] %v11743_v50  ;;  %v2294_v50 = vld [vmem:[#allocation2 + $0x2f1] sm:$0xff]  ;;  %v4124_v4 = vpop.f32.mrf.mxu3  ;;  %9668 = vmatmul.msk.f32.gmra.mxu2 %vm20_vm1, %v11515_v41 }
 0x3c5   :  { %9571 = vmatmul.msk.f32.gmra.mxu0 %vm20_vm1, %v2293_v31  ;;  %v1639_v19 = vadd.f32 %v10693_v17, %v978_v15  ;;  %v11776_v23 = vpop.f32.mrf.mxu2  ;;  %v2295_v15 = vld [vmem:[#allocation2 + $0x301] sm:$0xff] }
 0x3c6   :  { %9595 = vmatmul.msk.f32.gmra.mxu1 %vm20_vm1, %v11747_v16  ;;  %v11767_v16 = vld [vmem:[#allocation2 + $0xca] sm:$0xff] }
 0x3c7   :  { %16429 = vst [vmem:[#allocation224_spill] sm:$0xff] %v11767_v16  ;;  %v2173_v26 = vadd.f32 %v11404_v7, %v1639_v19  ;;  %v11784_v7 = vld [vmem:[#allocation2 + $0xda] sm:$0xff]  ;;  %v1640_v19 = vadd.f32 %v10709_v48, %v981_v38  ;;  %v16432_v48 = vld [vmem:[#allocation6_spill] sm:$0xff] }
 0x3c9   :  { %9732 = vmatmul.msk.f32.gmra.mxu3 %vm20_vm1, %v3859_v22  ;;  %v16431_v22 = vld [vmem:[#allocation5_spill] sm:$0xff] }
 0x3ca   :  { %v11765_v31 = vpop.f32.mrf.mxu0 }
 0x3cb   :  { %v11763_v6 = vpop.f32.mrf.mxu1  ;;  %16428 = vst [vmem:[#allocation223_spill] sm:$0xff] %v11765_v31  ;;  %v2707_v31 = vadd.f32 %v11136_v32, %v2173_v26 }
 0x3cc   :  { %16427 = vst [vmem:[#allocation222_spill] sm:$0xff] %v11763_v6  ;;  %v4127_v6 = vpop.f32.mrf.mxu3  ;;  %9669 = vmatmul.msk.f32.gmra.mxu2 %vm20_vm1, %v11529_v52  ;;  %v3329_v52 = vld [vmem:[#allocation2 + $0x140] sm:$0xff] }
 0x3cd   :  { %9572 = vmatmul.msk.f32.gmra.mxu0 %vm20_vm1, %v2294_v50  ;;  %v11795_v26 = vpop.f32.mrf.mxu2 }
 0x3ce   :  { %9596 = vmatmul.msk.f32.gmra.mxu1 %vm20_vm1, %v11767_v16  ;;  %v2174_v16 = vadd.f32 %v11416_v37, %v1640_v19 }
 0x3d0   :  { %v2708_v38 = vadd.f32 %v11152_v44, %v2174_v16  ;;  %v3861_v44 = vld [vmem:[#allocation2 + $0x129] sm:$0xff] }
 0x3d1   :  { %9733 = vmatmul.msk.f32.gmra.mxu3 %vm20_vm1, %v3860_v29 }
 0x3d2   :  { %v11782_v17 = vpop.f32.mrf.mxu0 }
 0x3d3   :  { %16430 = vst [vmem:[#allocation225_spill] sm:$0xff] %v11782_v17  ;;  %v3049_v58 = vpop.f32.mrf.mxu1 }
 0x3d4   :  { %v3241_v50 = vadd.f32 %v3049_v58, %v2707_v31  ;;  %v984_v31 = vadd.f32 %v16432_v48, %v16431_v22  ;;  %v11803_v58 = vld [vmem:[#allocation2 + $0xe2] sm:$0xff]  ;;  %9670 = vmatmul.msk.f32.gmra.mxu2 %vm20_vm1, %v3329_v52 }
 0x3d5   :  { %9573 = vmatmul.msk.f32.gmra.mxu0 %vm20_vm1, %v2295_v15  ;;  %v16434_v15 = vld [vmem:[#allocation59_spill] sm:$0xff]  ;;  %v11816_v29 = vpop.f32.mrf.mxu2  ;;  %v16435_v48 = vld [vmem:[#allocation8_spill] sm:$0xff] }
 0x3d6   :  { %v3776_v28 = vadd.f32 %v3584_v8, %v3241_v50  ;;  %9597 = vmatmul.msk.f32.gmra.mxu1 %vm20_vm1, %v11784_v7  ;;  %v2296_v8 = vld [vmem:[#allocation2 + $0x309] sm:$0xff]  ;;  %v1641_v19 = vadd.f32 %v16434_v15, %v984_v31 }
 0x3d7   :  { %v16436_v31 = vld [vmem:[#allocation9_spill] sm:$0xff]  ;;  %v16438_v15 = vld [vmem:[#allocation62_spill] sm:$0xff] }
 0x3d8   :  { %v11793_v32 = vadd.f32 %v4118_v1, %v3776_v28  ;;  %v11806_v1 = vpop.f32.mrf.mxu3  ;;  %v2175_v28 = vadd.f32 %v11430_v53, %v1641_v19 }
 0x3d9   :  { %9734 = vmatmul.msk.f32.gmra.mxu3 %vm20_vm1, %v3861_v44 }
 0x3da   :  { %v11801_v40 = vpop.f32.mrf.mxu0 }
 0x3db   :  { %16433 = vst [vmem:[#allocation5_spill] sm:$0xff] %v11801_v40  ;;  %v3052_v37 = vpop.f32.mrf.mxu1 }
 0x3dc   :  { %v3242_v50 = vadd.f32 %v3052_v37, %v2708_v38  ;;  %v987_v38 = vadd.f32 %v16436_v31, %v16435_v48  ;;  %v2709_v37 = vadd.f32 %v11165_v43, %v2175_v28  ;;  %v3862_v28 = vld [vmem:[#allocation2 + $0x139] sm:$0xff] }
 0x3dd   :  { %9574 = vmatmul.msk.f32.gmra.mxu0 %vm20_vm1, %v2296_v8  ;;  %v11824_v8 = vld [vmem:[#allocation2 + $0xf2] sm:$0xff]  ;;  %v11838_v48 = vpop.f32.mrf.mxu2 }
 0x3de   :  { %v3777_v22 = vadd.f32 %v3587_v42, %v3242_v50  ;;  %9598 = vmatmul.msk.f32.gmra.mxu1 %vm20_vm1, %v11803_v58  ;;  %v2297_v42 = vld [vmem:[#allocation2 + $0x319] sm:$0xff]  ;;  %v1642_v19 = vadd.f32 %v16438_v15, %v987_v38 }
 0x3df   :  { %v16439_v31 = vld [vmem:[#allocation11_spill] sm:$0xff]  ;;  %v16440_v38 = vld [vmem:[#allocation12_spill] sm:$0xff] }
 0x3e0   :  { %v11814_v16 = vadd.f32 %v4121_v49, %v3777_v22  ;;  %v11827_v49 = vpop.f32.mrf.mxu3  ;;  %v2176_v22 = vadd.f32 %v11443_v36, %v1642_v19  ;;  %v11846_v15 = vld [vmem:[#allocation2 + $0xfa] sm:$0xff]  ;;  %v16442_v19 = vld [vmem:[#allocation65_spill] sm:$0xff] }
 0x3e1   :  { %9735 = vmatmul.msk.f32.gmra.mxu3 %vm20_vm1, %v3862_v28 }
 0x3e2   :  { %v11822_v41 = vpop.f32.mrf.mxu0 }
 0x3e3   :  { %16437 = vst [vmem:[#allocation6_spill] sm:$0xff] %v11822_v41  ;;  %v3055_v53 = vpop.f32.mrf.mxu1 }
 0x3e4   :  { %v3243_v50 = vadd.f32 %v3055_v53, %v2709_v37  ;;  %v990_v37 = vadd.f32 %v16440_v38, %v16439_v31  ;;  %v2710_v53 = vadd.f32 %v11178_v13, %v2176_v22  ;;  %v3863_v22 = vld [vmem:[#allocation2 + $0x141] sm:$0xff] }
 0x3e5   :  { %9575 = vmatmul.msk.f32.gmra.mxu0 %vm20_vm1, %v2297_v42  ;;  %v2298_v42 = vld [vmem:[#allocation2 + $0x321] sm:$0xff]  ;;  %v11859_v38 = vpop.f32.mrf.mxu2 }
 0x3e6   :  { %v3778_v43 = vadd.f32 %v11754_v14, %v3243_v50  ;;  %9599 = vmatmul.msk.f32.gmra.mxu1 %vm20_vm1, %v11824_v8  ;;  %v1643_v50 = vadd.f32 %v16442_v19, %v990_v37  ;;  %v16443_v37 = vld [vmem:[#allocation14_spill] sm:$0xff] }
 0x3e8   :  { %v11836_v44 = vadd.f32 %v4124_v4, %v3778_v43  ;;  %v11849_v43 = vpop.f32.mrf.mxu3  ;;  %v2177_v31 = vadd.f32 %v11456_v0, %v1643_v50  ;;  %v3330_v0 = vld [vmem:[#allocation2 + $0x150] sm:$0xff] }
 0x3e9   :  { %9736 = vmatmul.msk.f32.gmra.mxu3 %vm20_vm1, %v3863_v22  ;;  %v11867_v50 = vld [vmem:[#allocation2 + $0x10a] sm:$0xff]  ;;  %9671 = vmatmul.msk.f32.gmra.mxu2 %vm20_vm1, %v3330_v0 }
 0x3ea   :  { %v11844_v36 = vpop.f32.mrf.mxu0  ;;  %v2711_v19 = vadd.f32 %v11194_v56, %v2177_v31  ;;  %v3864_v31 = vld [vmem:[#allocation2 + $0x151] sm:$0xff] }
 0x3eb   :  { %16441 = vst [vmem:[#allocation59_spill] sm:$0xff] %v11844_v36  ;;  %v3058_v14 = vpop.f32.mrf.mxu1 }
 0x3ec   :  { %v3244_v4 = vadd.f32 %v3058_v14, %v2710_v53  ;;  %v16444_v53 = vld [vmem:[#allocation15_spill] sm:$0xff] }
 0x3ed   :  { %9576 = vmatmul.msk.f32.gmra.mxu0 %vm20_vm1, %v2298_v42  ;;  %v993_v14 = vadd.f32 %v16444_v53, %v16443_v37  ;;  %v2299_v42 = vld [vmem:[#allocation2 + $0x331] sm:$0xff]  ;;  %v11881_v53 = vpop.f32.mrf.mxu2 }
 0x3ee   :  { %v3779_v13 = vadd.f32 %v11776_v23, %v3244_v4  ;;  %9600 = vmatmul.msk.f32.gmra.mxu1 %vm20_vm1, %v11846_v15  ;;  %v16446_v4 = vld [vmem:[#allocation68_spill] sm:$0xff] }
 0x3ef   :  { %v1644_v17 = vadd.f32 %v16446_v4, %v993_v14  ;;  %v16447_v14 = vld [vmem:[#allocation17_spill] sm:$0xff]  ;;  %v11889_v4 = vld [vmem:[#allocation2 + $0x112] sm:$0xff] }
 0x3f0   :  { %v11857_v28 = vadd.f32 %v4127_v6, %v3779_v13  ;;  %v11870_v13 = vpop.f32.mrf.mxu3 }
 0x3f1   :  { %v2178_v37 = vadd.f32 %v11469_v54, %v1644_v17  ;;  %9737 = vmatmul.msk.f32.gmra.mxu3 %vm20_vm1, %v3864_v31  ;;  %v3331_v54 = vld [vmem:[#allocation2 + $0x158] sm:$0xff] }
 0x3f2   :  { %v11865_v52 = vpop.f32.mrf.mxu0  ;;  %9672 = vmatmul.msk.f32.gmra.mxu2 %vm20_vm1, %v3331_v54 }
 0x3f3   :  { %16445 = vst [vmem:[#allocation8_spill] sm:$0xff] %v11865_v52  ;;  %v3061_v23 = vpop.f32.mrf.mxu1  ;;  %v2712_v0 = vadd.f32 %v11210_v2, %v2178_v37  ;;  %v3865_v2 = vld [vmem:[#allocation2 + $0x159] sm:$0xff] }
 0x3f4   :  { %v3245_v6 = vadd.f32 %v3061_v23, %v2711_v19  ;;  %v16448_v19 = vld [vmem:[#allocation18_spill] sm:$0xff] }
 0x3f5   :  { %9577 = vmatmul.msk.f32.gmra.mxu0 %vm20_vm1, %v2299_v42  ;;  %v996_v23 = vadd.f32 %v16448_v19, %v16447_v14  ;;  %v2300_v42 = vld [vmem:[#allocation2 + $0x339] sm:$0xff]  ;;  %v11901_v31 = vpop.f32.mrf.mxu2 }
 0x3f6   :  { %v3780_v56 = vadd.f32 %v11795_v26, %v3245_v6  ;;  %9601 = vmatmul.msk.f32.gmra.mxu1 %vm20_vm1, %v11867_v50  ;;  %v16450_v6 = vld [vmem:[#allocation71_spill] sm:$0xff]  ;;  %v16451_v19 = vld [vmem:[#allocation20_spill] sm:$0xff] }
 0x3f7   :  { %v1645_v40 = vadd.f32 %v16450_v6, %v996_v23  ;;  %v16452_v23 = vld [vmem:[#allocation21_spill] sm:$0xff] }
 0x3f8   :  { %v11879_v22 = vadd.f32 %v11806_v1, %v3780_v56  ;;  %v4142_v56 = vpop.f32.mrf.mxu3 }
 0x3f9   :  { %v2179_v41 = vadd.f32 %v11494_v35, %v1645_v40  ;;  %9738 = vmatmul.msk.f32.gmra.mxu3 %vm20_vm1, %v3865_v2  ;;  %v3332_v35 = vld [vmem:[#allocation2 + $0x168] sm:$0xff] }
 0x3fa   :  { %v11887_v17 = vpop.f32.mrf.mxu0  ;;  %9673 = vmatmul.msk.f32.gmra.mxu2 %vm20_vm1, %v3332_v35 }
 0x3fb   :  { %16449 = vst [vmem:[#allocation9_spill] sm:$0xff] %v11887_v17  ;;  %v3064_v26 = vpop.f32.mrf.mxu1  ;;  %v2713_v54 = vadd.f32 %v11226_v45, %v2179_v41  ;;  %v3866_v45 = vld [vmem:[#allocation2 + $0x169] sm:$0xff] }
 0x3fc   :  { %v3246_v1 = vadd.f32 %v3064_v26, %v2712_v0  ;;  %v999_v0 = vadd.f32 %v16452_v23, %v16451_v19  ;;  %v11909_v26 = vld [vmem:[#allocation2 + $0x122] sm:$0xff]  ;;  %v16455_v23 = vld [vmem:[#allocation23_spill] sm:$0xff] }
 0x3fd   :  { %9578 = vmatmul.msk.f32.gmra.mxu0 %vm20_vm1, %v2300_v42  ;;  %v16454_v42 = vld [vmem:[#allocation72_spill] sm:$0xff]  ;;  %v11922_v2 = vpop.f32.mrf.mxu2 }
 0x3fe   :  { %v3781_v14 = vadd.f32 %v11816_v29, %v3246_v1  ;;  %9602 = vmatmul.msk.f32.gmra.mxu1 %vm20_vm1, %v11889_v4  ;;  %v1646_v6 = vadd.f32 %v16454_v42, %v999_v0  ;;  %v16456_v0 = vld [vmem:[#allocation24_spill] sm:$0xff]  ;;  %v11930_v42 = vld [vmem:[#allocation2 + $0x12a] sm:$0xff] }
 0x400   :  { %v11899_v37 = vadd.f32 %v11827_v49, %v3781_v14  ;;  %v4145_v49 = vpop.f32.mrf.mxu3  ;;  %v2180_v14 = vadd.f32 %v11511_v51, %v1646_v6  ;;  %v3333_v51 = vld [vmem:[#allocation2 + $0x170] sm:$0xff] }
 0x401   :  { %9739 = vmatmul.msk.f32.gmra.mxu3 %vm20_vm1, %v3866_v45 }
 0x402   :  { %v11907_v40 = vpop.f32.mrf.mxu0  ;;  %v2714_v35 = vadd.f32 %v11242_v57, %v2180_v14  ;;  %9674 = vmatmul.msk.f32.gmra.mxu2 %vm20_vm1, %v3333_v51  ;;  %v3867_v57 = vld [vmem:[#allocation2 + $0x171] sm:$0xff] }
 0x403   :  { %16453 = vst [vmem:[#allocation62_spill] sm:$0xff] %v11907_v40  ;;  %v3067_v29 = vpop.f32.mrf.mxu1 }
 0x404   :  { %v3247_v1 = vadd.f32 %v3067_v29, %v2713_v54  ;;  %v1002_v54 = vadd.f32 %v16456_v0, %v16455_v23  ;;  %v16459_v0 = vld [vmem:[#allocation26_spill] sm:$0xff] }
 0x405   :  { %9779 = vmatmul.msk.f32.vlgmr.msra.gmra.mxu0 %vm20_vm1, %v11569_v62  ;;  %v16458_v62 = vld [vmem:[#allocation73_spill] sm:$0xff]  ;;  %v11943_v45 = vpop.f32.mrf.mxu2 }
 0x406   :  { %v3782_v19 = vadd.f32 %v11838_v48, %v3247_v1  ;;  %9603 = vmatmul.msk.f32.gmra.mxu1 %vm20_vm1, %v11909_v26  ;;  %v1647_v6 = vadd.f32 %v16458_v62, %v1002_v54  ;;  %v16460_v54 = vld [vmem:[#allocation27_spill] sm:$0xff] }
 0x407   :  { %v11951_v62 = vld [vmem:[#allocation2 + $0x13a] sm:$0xff] }
 0x408   :  { %v11920_v41 = vadd.f32 %v11849_v43, %v3782_v19  ;;  %v4148_v43 = vpop.f32.mrf.mxu3  ;;  %v2181_v19 = vadd.f32 %v11525_v47, %v1647_v6  ;;  %v3334_v47 = vld [vmem:[#allocation2 + $0x180] sm:$0xff] }
 0x409   :  { %9740 = vmatmul.msk.f32.gmra.mxu3 %vm20_vm1, %v3867_v57 }
 0x40a   :  { %v11928_v48 = vpop.f32.mrf.mxu0  ;;  %v2715_v51 = vadd.f32 %v11258_v33, %v2181_v19  ;;  %9675 = vmatmul.msk.f32.gmra.mxu2 %vm20_vm1, %v3334_v47  ;;  %v3868_v33 = vld [vmem:[#allocation2 + $0x181] sm:$0xff] }
 0x40b   :  { %16457 = vst [vmem:[#allocation11_spill] sm:$0xff] %v11928_v48  ;;  %v3070_v29 = vpop.f32.mrf.mxu1 }
 0x40c   :  { %v3248_v1 = vadd.f32 %v3070_v29, %v2714_v35  ;;  %v1005_v35 = vadd.f32 %v16460_v54, %v16459_v0  ;;  %v16463_v54 = vld [vmem:[#allocation29_spill] sm:$0xff] }
 0x40d   :  { %9780 = vmatmul.msk.f32.gmra.mxu0 %vm20_vm1, %v11585_v27  ;;  %v16462_v27 = vld [vmem:[#allocation74_spill] sm:$0xff]  ;;  %v11963_v57 = vpop.f32.mrf.mxu2 }
 0x40e   :  { %v3783_v23 = vadd.f32 %v11859_v38, %v3248_v1  ;;  %9604 = vmatmul.msk.f32.gmra.mxu1 %vm20_vm1, %v11930_v42  ;;  %v1648_v6 = vadd.f32 %v16462_v27, %v1005_v35  ;;  %v16464_v35 = vld [vmem:[#allocation30_spill] sm:$0xff]  ;;  %v11971_v27 = vld [vmem:[#allocation2 + $0x142] sm:$0xff] }
 0x410   :  { %v11941_v14 = vadd.f32 %v11870_v13, %v3783_v23  ;;  %v4151_v13 = vpop.f32.mrf.mxu3  ;;  %v2182_v23 = vadd.f32 %v11541_v3, %v1648_v6  ;;  %v3335_v3 = vld [vmem:[#allocation2 + $0x188] sm:$0xff]  ;;  %v16466_v6 = vld [vmem:[#allocation75_spill] sm:$0xff] }
 0x411   :  { %9741 = vmatmul.msk.f32.gmra.mxu3 %vm20_vm1, %v3868_v33 }
 0x412   :  { %v11949_v38 = vpop.f32.mrf.mxu0  ;;  %v2716_v47 = vadd.f32 %v11274_v12, %v2182_v23  ;;  %9676 = vmatmul.msk.f32.gmra.mxu2 %vm20_vm1, %v3335_v3  ;;  %v3869_v12 = vld [vmem:[#allocation2 + $0x189] sm:$0xff] }
 0x413   :  { %16461 = vst [vmem:[#allocation12_spill] sm:$0xff] %v11949_v38  ;;  %v3073_v29 = vpop.f32.mrf.mxu1  ;;  %v16498_v38 = vld [vmem:[#allocation82_spill] sm:$0xff] }
 0x414   :  { %v3249_v1 = vadd.f32 %v3073_v29, %v2715_v51  ;;  %v1008_v51 = vadd.f32 %v16464_v35, %v16463_v54  ;;  %v16467_v35 = vld [vmem:[#allocation32_spill] sm:$0xff] }
 0x415   :  { %9781 = vmatmul.msk.f32.gmra.mxu0 %vm20_vm1, %v11599_v21  ;;  %v11983_v33 = vpop.f32.mrf.mxu2 }
 0x416   :  { %v3784_v0 = vadd.f32 %v11881_v53, %v3249_v1  ;;  %9605 = vmatmul.msk.f32.gmra.mxu1 %vm20_vm1, %v11951_v62  ;;  %v1649_v21 = vadd.f32 %v16466_v6, %v1008_v51  ;;  %v16468_v51 = vld [vmem:[#allocation33_spill] sm:$0xff]  ;;  %v11991_v6 = vld [vmem:[#allocation2 + $0x152] sm:$0xff] }
 0x418   :  { %v11961_v19 = vadd.f32 %v4142_v56, %v3784_v0  ;;  %v4154_v56 = vpop.f32.mrf.mxu3  ;;  %v2183_v0 = vadd.f32 %v11554_v60, %v1649_v21  ;;  %v3336_v60 = vld [vmem:[#allocation2 + $0x198] sm:$0xff]  ;;  %v16470_v21 = vld [vmem:[#allocation76_spill] sm:$0xff] }
 0x419   :  { %9742 = vmatmul.msk.f32.gmra.mxu3 %vm20_vm1, %v3869_v12 }
 0x41a   :  { %v11969_v53 = vpop.f32.mrf.mxu0  ;;  %v2717_v3 = vadd.f32 %v11292_v39, %v2183_v0  ;;  %9677 = vmatmul.msk.f32.gmra.mxu2 %vm20_vm1, %v3336_v60  ;;  %v3870_v39 = vld [vmem:[#allocation2 + $0x199] sm:$0xff] }
 0x41b   :  { %16465 = vst [vmem:[#allocation65_spill] sm:$0xff] %v11969_v53  ;;  %v3076_v29 = vpop.f32.mrf.mxu1 }
 0x41c   :  { %v3250_v1 = vadd.f32 %v3076_v29, %v2716_v47  ;;  %v1011_v47 = vadd.f32 %v16468_v51, %v16467_v35  ;;  %v16471_v51 = vld [vmem:[#allocation35_spill] sm:$0xff] }
 0x41d   :  { %9782 = vmatmul.msk.f32.gmra.mxu0 %vm20_vm1, %v11615_v18  ;;  %v12003_v12 = vpop.f32.mrf.mxu2 }
 0x41e   :  { %v3785_v54 = vadd.f32 %v11901_v31, %v3250_v1  ;;  %9606 = vmatmul.msk.f32.gmra.mxu1 %vm20_vm1, %v11971_v27  ;;  %v1650_v18 = vadd.f32 %v16470_v21, %v1011_v47  ;;  %v16472_v47 = vld [vmem:[#allocation36_spill] sm:$0xff] }
 0x41f   :  { %v12011_v21 = vld [vmem:[#allocation2 + $0x15a] sm:$0xff] }
 0x420   :  { %v11981_v23 = vadd.f32 %v4145_v49, %v3785_v54  ;;  %v4157_v49 = vpop.f32.mrf.mxu3  ;;  %v2184_v54 = vadd.f32 %v11565_v34, %v1650_v18  ;;  %v3337_v34 = vld [vmem:[#allocation2 + $0x1a0] sm:$0xff]  ;;  %v16474_v18 = vld [vmem:[#allocation77_spill] sm:$0xff] }
 0x421   :  { %9743 = vmatmul.msk.f32.gmra.mxu3 %vm20_vm1, %v3870_v39 }
 0x422   :  { %v11989_v31 = vpop.f32.mrf.mxu0  ;;  %v2718_v60 = vadd.f32 %v11310_v24, %v2184_v54  ;;  %9678 = vmatmul.msk.f32.gmra.mxu2 %vm20_vm1, %v3337_v34  ;;  %v3871_v24 = vld [vmem:[#allocation2 + $0x1a1] sm:$0xff] }
 0x423   :  { %16469 = vst [vmem:[#allocation14_spill] sm:$0xff] %v11989_v31  ;;  %v3079_v29 = vpop.f32.mrf.mxu1 }
 0x424   :  { %v3251_v1 = vadd.f32 %v3079_v29, %v2717_v3  ;;  %v1014_v3 = vadd.f32 %v16472_v47, %v16471_v51  ;;  %v16475_v47 = vld [vmem:[#allocation38_spill] sm:$0xff] }
 0x425   :  { %9783 = vmatmul.msk.f32.gmra.mxu0 %vm20_vm1, %v11631_v20  ;;  %v12023_v39 = vpop.f32.mrf.mxu2 }
 0x426   :  { %v3786_v35 = vadd.f32 %v11922_v2, %v3251_v1  ;;  %9607 = vmatmul.msk.f32.gmra.mxu1 %vm20_vm1, %v11991_v6  ;;  %v1651_v20 = vadd.f32 %v16474_v18, %v1014_v3  ;;  %v16476_v3 = vld [vmem:[#allocation39_spill] sm:$0xff]  ;;  %v12031_v18 = vld [vmem:[#allocation2 + $0x16a] sm:$0xff] }
 0x428   :  { %v12001_v0 = vadd.f32 %v4148_v43, %v3786_v35  ;;  %v4160_v43 = vpop.f32.mrf.mxu3  ;;  %v2185_v35 = vadd.f32 %v11581_v59, %v1651_v20  ;;  %v3338_v59 = vld [vmem:[#allocation2 + $0x1e0] sm:$0xff]  ;;  %v16478_v20 = vld [vmem:[#allocation78_spill] sm:$0xff] }
 0x429   :  { %9744 = vmatmul.msk.f32.gmra.mxu3 %vm20_vm1, %v3871_v24 }
 0x42a   :  { %v12009_v2 = vpop.f32.mrf.mxu0  ;;  %v2719_v34 = vadd.f32 %v11326_v61, %v2185_v35  ;;  %9679 = vmatmul.msk.f32.gmra.mxu2 %vm20_vm1, %v3338_v59  ;;  %v3872_v61 = vld [vmem:[#allocation2 + $0x1e1] sm:$0xff] }
 0x42b   :  { %16473 = vst [vmem:[#allocation15_spill] sm:$0xff] %v12009_v2  ;;  %v3082_v29 = vpop.f32.mrf.mxu1 }
 0x42c   :  { %v3252_v1 = vadd.f32 %v3082_v29, %v2718_v60  ;;  %v1017_v60 = vadd.f32 %v16476_v3, %v16475_v47  ;;  %v16479_v3 = vld [vmem:[#allocation41_spill] sm:$0xff] }
 0x42d   :  { %9784 = vmatmul.msk.f32.gmra.mxu0 %vm20_vm1, %v11645_v25  ;;  %v12043_v24 = vpop.f32.mrf.mxu2 }
 0x42e   :  { %v3787_v51 = vadd.f32 %v11943_v45, %v3252_v1  ;;  %9608 = vmatmul.msk.f32.gmra.mxu1 %vm20_vm1, %v12011_v21  ;;  %v1652_v25 = vadd.f32 %v16478_v20, %v1017_v60  ;;  %v16480_v60 = vld [vmem:[#allocation42_spill] sm:$0xff] }
 0x42f   :  { %v12051_v20 = vld [vmem:[#allocation2 + $0x172] sm:$0xff] }
 0x430   :  { %v12021_v54 = vadd.f32 %v4151_v13, %v3787_v51  ;;  %v4163_v13 = vpop.f32.mrf.mxu3  ;;  %v2186_v51 = vadd.f32 %v11595_v55, %v1652_v25  ;;  %v3339_v55 = vld [vmem:[#allocation2 + $0x1e8] sm:$0xff]  ;;  %v16482_v25 = vld [vmem:[#allocation79_spill] sm:$0xff] }
 0x431   :  { %9745 = vmatmul.msk.f32.gmra.mxu3 %vm20_vm1, %v3872_v61 }
 0x432   :  { %v12029_v45 = vpop.f32.mrf.mxu0  ;;  %v2720_v59 = vadd.f32 %v11344_v30, %v2186_v51  ;;  %9680 = vmatmul.msk.f32.gmra.mxu2 %vm20_vm1, %v3339_v55  ;;  %v3873_v30 = vld [vmem:[#allocation2 + $0x1e9] sm:$0xff] }
 0x433   :  { %16477 = vst [vmem:[#allocation68_spill] sm:$0xff] %v12029_v45  ;;  %v3085_v29 = vpop.f32.mrf.mxu1 }
 0x434   :  { %v3253_v1 = vadd.f32 %v3085_v29, %v2719_v34  ;;  %v1020_v34 = vadd.f32 %v16480_v60, %v16479_v3  ;;  %v16483_v60 = vld [vmem:[#allocation44_spill] sm:$0xff] }
 0x435   :  { %9785 = vmatmul.msk.f32.gmra.mxu0 %vm20_vm1, %v11661_v11  ;;  %v12063_v61 = vpop.f32.mrf.mxu2 }
 0x436   :  { %v3788_v47 = vadd.f32 %v11963_v57, %v3253_v1  ;;  %9609 = vmatmul.msk.f32.gmra.mxu1 %vm20_vm1, %v12031_v18  ;;  %v1653_v11 = vadd.f32 %v16482_v25, %v1020_v34  ;;  %v16484_v34 = vld [vmem:[#allocation45_spill] sm:$0xff] }
 0x437   :  { %v12071_v25 = vld [vmem:[#allocation2 + $0x182] sm:$0xff] }
 0x438   :  { %v12041_v35 = vadd.f32 %v4154_v56, %v3788_v47  ;;  %v4166_v56 = vpop.f32.mrf.mxu3  ;;  %v2187_v47 = vadd.f32 %v11611_v63, %v1653_v11  ;;  %v3340_v63 = vld [vmem:[#allocation2 + $0x1f8] sm:$0xff]  ;;  %v16486_v11 = vld [vmem:[#allocation80_spill] sm:$0xff] }
 0x439   :  { %9746 = vmatmul.msk.f32.gmra.mxu3 %vm20_vm1, %v3873_v30 }
 0x43a   :  { %v12049_v57 = vpop.f32.mrf.mxu0  ;;  %v2721_v55 = vadd.f32 %v11363_v9, %v2187_v47  ;;  %9681 = vmatmul.msk.f32.gmra.mxu2 %vm20_vm1, %v3340_v63  ;;  %v3874_v9 = vld [vmem:[#allocation2 + $0x1f9] sm:$0xff] }
 0x43b   :  { %16481 = vst [vmem:[#allocation17_spill] sm:$0xff] %v12049_v57  ;;  %v3088_v29 = vpop.f32.mrf.mxu1 }
 0x43c   :  { %v3254_v1 = vadd.f32 %v3088_v29, %v2720_v59  ;;  %v1023_v59 = vadd.f32 %v16484_v34, %v16483_v60  ;;  %v16487_v34 = vld [vmem:[#allocation47_spill] sm:$0xff] }
 0x43d   :  { %9786 = vmatmul.msk.f32.gmra.mxu0 %vm20_vm1, %v11675_v10  ;;  %v12083_v30 = vpop.f32.mrf.mxu2 }
 0x43e   :  { %v3789_v3 = vadd.f32 %v11983_v33, %v3254_v1  ;;  %9610 = vmatmul.msk.f32.gmra.mxu1 %vm20_vm1, %v12051_v20  ;;  %v1654_v10 = vadd.f32 %v16486_v11, %v1023_v59  ;;  %v16488_v59 = vld [vmem:[#allocation48_spill] sm:$0xff] }
 0x440   :  { %v12061_v51 = vadd.f32 %v4157_v49, %v3789_v3  ;;  %v4169_v49 = vpop.f32.mrf.mxu3  ;;  %v2188_v3 = vadd.f32 %v11627_v5, %v1654_v10  ;;  %v3341_v5 = vld [vmem:[#allocation2 + $0x200] sm:$0xff]  ;;  %v12091_v10 = vld [vmem:[#allocation2 + $0x18a] sm:$0xff] }
 0x441   :  { %9747 = vmatmul.msk.f32.gmra.mxu3 %vm20_vm1, %v3874_v9  ;;  %v3875_v9 = vld [vmem:[#allocation2 + $0x201] sm:$0xff] }
 0x442   :  { %v12069_v33 = vpop.f32.mrf.mxu0  ;;  %9682 = vmatmul.msk.f32.gmra.mxu2 %vm20_vm1, %v3341_v5 }
 0x443   :  { %16485 = vst [vmem:[#allocation18_spill] sm:$0xff] %v12069_v33  ;;  %v3091_v29 = vpop.f32.mrf.mxu1 }
 0x444   :  { %v3255_v1 = vadd.f32 %v3091_v29, %v2721_v55  ;;  %v1026_v55 = vadd.f32 %v16488_v59, %v16487_v34  ;;  %v16489_v29 = vld [vmem:[#allocation144_spill] sm:$0xff] }
 0x445   :  { %9787 = vmatmul.msk.f32.gmra.mxu0 %vm20_vm1, %v11691_v46  ;;  %v2722_v63 = vadd.f32 %v16489_v29, %v2188_v3  ;;  %v16493_v3 = vld [vmem:[#allocation210_spill] sm:$0xff]  ;;  %v12103_v29 = vpop.f32.mrf.mxu2 }
 0x446   :  { %v3790_v60 = vadd.f32 %v12003_v12, %v3255_v1  ;;  %9611 = vmatmul.msk.f32.gmra.mxu1 %vm20_vm1, %v12071_v25  ;;  %v16491_v1 = vld [vmem:[#allocation81_spill] sm:$0xff] }
 0x447   :  { %v1655_v46 = vadd.f32 %v16491_v1, %v1026_v55  ;;  %v16494_v55 = vld [vmem:[#allocation50_spill] sm:$0xff]  ;;  %v16496_v1 = vld [vmem:[#allocation148_spill] sm:$0xff] }
 0x448   :  { %v12081_v47 = vadd.f32 %v4160_v43, %v3790_v60  ;;  %v4172_v43 = vpop.f32.mrf.mxu3  ;;  %v16492_v60 = vld [vmem:[#allocation193_spill] sm:$0xff] }
 0x449   :  { %v2189_v48 = vadd.f32 %v16492_v60, %v1655_v46  ;;  %9748 = vmatmul.msk.f32.gmra.mxu3 %vm20_vm1, %v3875_v9  ;;  %v3342_v46 = vld [vmem:[#allocation2 + $0x210] sm:$0xff] }
 0x44a   :  { %v12089_v12 = vpop.f32.mrf.mxu0  ;;  %v2803_v60 = vld [vmem:[#allocation2 + $0x1ca] sm:$0xff]  ;;  %9683 = vmatmul.msk.f32.gmra.mxu2 %vm20_vm1, %v3342_v46 }
 0x44b   :  { %16490 = vst [vmem:[#allocation71_spill] sm:$0xff] %v12089_v12  ;;  %v3094_v11 = vpop.f32.mrf.mxu1  ;;  %v2723_v5 = vadd.f32 %v16496_v1, %v2189_v48  ;;  %v16500_v48 = vld [vmem:[#allocation214_spill] sm:$0xff]  ;;  %v16502_v1 = vld [vmem:[#allocation53_spill] sm:$0xff] }
 0x44c   :  { %v3256_v40 = vadd.f32 %v3094_v11, %v2722_v63  ;;  %v16495_v63 = vld [vmem:[#allocation51_spill] sm:$0xff]  ;;  %v16522_v12 = vld [vmem:[#allocation85_spill] sm:$0xff] }
 0x44d   :  { %9788 = vmatmul.msk.f32.gmra.mxu0 %vm20_vm1, %v16493_v3  ;;  %v1029_v11 = vadd.f32 %v16495_v63, %v16494_v55  ;;  %v3876_v9 = vld [vmem:[#allocation2 + $0x211] sm:$0xff]  ;;  %v12120_v63 = vpop.f32.mrf.mxu2 }
 0x44e   :  { %v3791_v34 = vadd.f32 %v12023_v39, %v3256_v40  ;;  %9612 = vmatmul.msk.f32.gmra.mxu1 %vm20_vm1, %v12091_v10 }
 0x44f   :  { %v1656_v53 = vadd.f32 %v16498_v38, %v1029_v11  ;;  %v16503_v38 = vld [vmem:[#allocation54_spill] sm:$0xff] }
 0x450   :  { %v12101_v59 = vadd.f32 %v4163_v13, %v3791_v34  ;;  %v4175_v31 = vpop.f32.mrf.mxu3  ;;  %v16499_v13 = vld [vmem:[#allocation197_spill] sm:$0xff]  ;;  %v1032_v11 = vadd.f32 %v16503_v38, %v16502_v1 }
 0x451   :  { %v2190_v34 = vadd.f32 %v16499_v13, %v1656_v53  ;;  %9749 = vmatmul.msk.f32.gmra.mxu3 %vm20_vm1, %v3876_v9  ;;  %v3343_v53 = vld [vmem:[#allocation2 + $0x218] sm:$0xff] }
 0x452   :  { %v12109_v40 = vpop.f32.mrf.mxu0  ;;  %9684 = vmatmul.msk.f32.gmra.mxu2 %vm20_vm1, %v3343_v53  ;;  %v3877_v9 = vld [vmem:[#allocation2 + $0x219] sm:$0xff]  ;;  %v3344_v53 = vld [vmem:[#allocation2 + $0x228] sm:$0xff] }
 0x453   :  { %16497 = vst [vmem:[#allocation20_spill] sm:$0xff] %v12109_v40  ;;  %v3097_v39 = vpop.f32.mrf.mxu1 }
 0x454   :  { %v3257_v3 = vadd.f32 %v3097_v39, %v2723_v5  ;;  %v16504_v5 = vld [vmem:[#allocation151_spill] sm:$0xff] }
 0x455   :  { %9789 = vmatmul.msk.f32.gmra.mxu0 %vm20_vm1, %v16500_v48  ;;  %v2724_v39 = vadd.f32 %v16504_v5, %v2190_v34  ;;  %v16508_v34 = vld [vmem:[#allocation218_spill] sm:$0xff]  ;;  %v12137_v38 = vpop.f32.mrf.mxu2  ;;  %v16510_v5 = vld [vmem:[#allocation55_spill] sm:$0xff] }
 0x456   :  { %v3792_v2 = vadd.f32 %v12043_v24, %v3257_v3  ;;  %9613 = vmatmul.msk.f32.gmra.mxu1 %vm20_vm1, %v2803_v60  ;;  %v2804_v60 = vld [vmem:[#allocation2 + $0x1d2] sm:$0xff] }
 0x457   :  { %v16506_v3 = vld [vmem:[#allocation83_spill] sm:$0xff] }
 0x458   :  { %v12118_v55 = vadd.f32 %v4166_v56, %v3792_v2  ;;  %v1657_v13 = vadd.f32 %v16506_v3, %v1032_v11  ;;  %v4178_v45 = vpop.f32.mrf.mxu3  ;;  %v16507_v2 = vld [vmem:[#allocation200_spill] sm:$0xff] }
 0x459   :  { %v16511_v11 = vld [vmem:[#allocation56_spill] sm:$0xff]  ;;  %9750 = vmatmul.msk.f32.gmra.mxu3 %vm20_vm1, %v3877_v9  ;;  %v3878_v9 = vld [vmem:[#allocation2 + $0x229] sm:$0xff] }
 0x45a   :  { %16501 = vst [vmem:[#allocation21_spill] sm:$0xff] %v12118_v55  ;;  %v12126_v46 = vpop.f32.mrf.mxu0  ;;  %v2191_v56 = vadd.f32 %v16507_v2, %v1657_v13  ;;  %9685 = vmatmul.msk.f32.gmra.mxu2 %vm20_vm1, %v3344_v53 }
 0x45b   :  { %16505 = vst [vmem:[#allocation72_spill] sm:$0xff] %v12126_v46  ;;  %v3100_v24 = vpop.f32.mrf.mxu1 }
 0x45c   :  { %v3258_v48 = vadd.f32 %v3100_v24, %v2724_v39  ;;  %v1035_v39 = vadd.f32 %v16511_v11, %v16510_v5  ;;  %v16512_v24 = vld [vmem:[#allocation153_spill] sm:$0xff] }
 0x45d   :  { %9790 = vmatmul.msk.f32.gmra.mxu0 %vm20_vm1, %v16508_v34  ;;  %v2725_v3 = vadd.f32 %v16512_v24, %v2191_v56  ;;  %v16516_v56 = vld [vmem:[#allocation221_spill] sm:$0xff]  ;;  %v12157_v24 = vpop.f32.mrf.mxu2 }
 0x45e   :  { %v3793_v57 = vadd.f32 %v12063_v61, %v3258_v48  ;;  %9614 = vmatmul.msk.f32.gmra.mxu1 %vm20_vm1, %v2804_v60  ;;  %v12145_v60 = vld [vmem:[#allocation2 + $0x1e2] sm:$0xff] }
 0x45f   :  { %v16514_v48 = vld [vmem:[#allocation84_spill] sm:$0xff] }
 0x460   :  { %v12135_v1 = vadd.f32 %v4169_v49, %v3793_v57  ;;  %v1658_v2 = vadd.f32 %v16514_v48, %v1035_v39  ;;  %v4181_v57 = vpop.f32.mrf.mxu3  ;;  %v16515_v49 = vld [vmem:[#allocation204_spill] sm:$0xff]  ;;  %v16518_v39 = vld [vmem:[#allocation57_spill] sm:$0xff] }
 0x461   :  { %v16520_v48 = vld [vmem:[#allocation156_spill] sm:$0xff]  ;;  %9751 = vmatmul.msk.f32.gmra.mxu3 %vm20_vm1, %v3878_v9  ;;  %v3879_v9 = vld [vmem:[#allocation2 + $0x231] sm:$0xff] }
 0x462   :  { %16509 = vst [vmem:[#allocation23_spill] sm:$0xff] %v12135_v1  ;;  %v12143_v13 = vpop.f32.mrf.mxu0  ;;  %v2192_v33 = vadd.f32 %v16515_v49, %v1658_v2  ;;  %v3345_v2 = vld [vmem:[#allocation2 + $0x230] sm:$0xff] }
 0x463   :  { %16513 = vst [vmem:[#allocation24_spill] sm:$0xff] %v12143_v13  ;;  %v3103_v61 = vpop.f32.mrf.mxu1  ;;  %v12165_v49 = vld [vmem:[#allocation2 + $0x1ea] sm:$0xff]  ;;  %9686 = vmatmul.msk.f32.gmra.mxu2 %vm20_vm1, %v3345_v2 }
 0x464   :  { %v3259_v34 = vadd.f32 %v3103_v61, %v2725_v3  ;;  %v16519_v3 = vld [vmem:[#allocation58_spill] sm:$0xff]  ;;  %v2726_v53 = vadd.f32 %v16520_v48, %v2192_v33  ;;  %v16524_v33 = vld [vmem:[#allocation224_spill] sm:$0xff] }
 0x465   :  { %9791 = vmatmul.msk.f32.gmra.mxu0 %vm20_vm1, %v16516_v56  ;;  %v1038_v61 = vadd.f32 %v16519_v3, %v16518_v39  ;;  %v12177_v48 = vpop.f32.mrf.mxu2  ;;  %v16530_v13 = vld [vmem:[#allocation86_spill] sm:$0xff] }
 0x466   :  { %v3794_v5 = vadd.f32 %v12083_v30, %v3259_v34  ;;  %9615 = vmatmul.msk.f32.gmra.mxu1 %vm20_vm1, %v12145_v60 }
 0x467   :  { %v1659_v56 = vadd.f32 %v16522_v12, %v1038_v61  ;;  %v16526_v12 = vld [vmem:[#allocation60_spill] sm:$0xff]  ;;  %v16527_v61 = vld [vmem:[#allocation61_spill] sm:$0xff] }
 0x468   :  { %v12155_v11 = vadd.f32 %v4172_v43, %v3794_v5  ;;  %v4184_v43 = vpop.f32.mrf.mxu3  ;;  %v16523_v5 = vld [vmem:[#allocation208_spill] sm:$0xff] }
 0x469   :  { %v2193_v46 = vadd.f32 %v16523_v5, %v1659_v56  ;;  %9752 = vmatmul.msk.f32.gmra.mxu3 %vm20_vm1, %v3879_v9  ;;  %v3346_v56 = vld [vmem:[#allocation2 + $0x240] sm:$0xff] }
 0x46a   :  { %16517 = vst [vmem:[#allocation73_spill] sm:$0xff] %v12155_v11  ;;  %v12163_v30 = vpop.f32.mrf.mxu0  ;;  %v12185_v5 = vld [vmem:[#allocation2 + $0x1fa] sm:$0xff] }
 0x46b   :  { %16521 = vst [vmem:[#allocation26_spill] sm:$0xff] %v12163_v30  ;;  %v3106_v34 = vpop.f32.mrf.mxu1  ;;  %9687 = vmatmul.msk.f32.gmra.mxu2 %vm20_vm1, %v3346_v56 }
 0x46c   :  { %v3260_v40 = vadd.f32 %v3106_v34, %v2726_v53  ;;  %v1041_v53 = vadd.f32 %v16527_v61, %v16526_v12  ;;  %v16528_v34 = vld [vmem:[#allocation159_spill] sm:$0xff] }
 0x46d   :  { %9792 = vmatmul.msk.f32.gmra.mxu0 %vm20_vm1, %v16524_v33  ;;  %v2727_v2 = vadd.f32 %v16528_v34, %v2193_v46  ;;  %v3880_v46 = vld [vmem:[#allocation2 + $0x241] sm:$0xff]  ;;  %v12197_v61 = vpop.f32.mrf.mxu2 }
 0x46e   :  { %v3795_v39 = vadd.f32 %v12103_v29, %v3260_v40  ;;  %9616 = vmatmul.msk.f32.gmra.mxu1 %vm20_vm1, %v12165_v49  ;;  %v1660_v33 = vadd.f32 %v16530_v13, %v1041_v53  ;;  %v16533_v13 = vld [vmem:[#allocation63_spill] sm:$0xff]  ;;  %v16534_v53 = vld [vmem:[#allocation64_spill] sm:$0xff] }
 0x46f   :  { %v1044_v34 = vadd.f32 %v16534_v53, %v16533_v13 }
 0x470   :  { %v12175_v3 = vadd.f32 %v4175_v31, %v3795_v39  ;;  %v4187_v31 = vpop.f32.mrf.mxu3  ;;  %v16531_v39 = vld [vmem:[#allocation212_spill] sm:$0xff] }
 0x471   :  { %v2194_v36 = vadd.f32 %v16531_v39, %v1660_v33  ;;  %9753 = vmatmul.msk.f32.gmra.mxu3 %vm20_vm1, %v3880_v46  ;;  %v12205_v33 = vld [vmem:[#allocation2 + $0x202] sm:$0xff] }
 0x472   :  { %16525 = vst [vmem:[#allocation27_spill] sm:$0xff] %v12175_v3  ;;  %v12183_v29 = vpop.f32.mrf.mxu0  ;;  %v16537_v39 = vld [vmem:[#allocation89_spill] sm:$0xff] }
 0x473   :  { %16529 = vst [vmem:[#allocation74_spill] sm:$0xff] %v12183_v29  ;;  %v3109_v40 = vpop.f32.mrf.mxu1 }
 0x474   :  { %v3261_v30 = vadd.f32 %v3109_v40, %v2727_v2  ;;  %v16535_v2 = vld [vmem:[#allocation162_spill] sm:$0xff]  ;;  %v3347_v40 = vld [vmem:[#allocation2 + $0x248] sm:$0xff] }
 0x475   :  { %9793 = vmatmul.msk.f32.gmra.mxu0 %vm20_vm1, %v11784_v7  ;;  %v2728_v56 = vadd.f32 %v16535_v2, %v2194_v36  ;;  %v1661_v7 = vadd.f32 %v16537_v39, %v1044_v34  ;;  %9688 = vmatmul.msk.f32.gmra.mxu2 %vm20_vm1, %v3347_v40  ;;  %v3881_v36 = vld [vmem:[#allocation2 + $0x249] sm:$0xff]  ;;  %v3659_v53 = vpop.f32.mrf.mxu2  ;;  %v16541_v34 = vld [vmem:[#allocation67_spill] sm:$0xff] }
 0x476   :  { %v3796_v12 = vadd.f32 %v12120_v63, %v3261_v30  ;;  %9617 = vmatmul.msk.f32.gmra.mxu1 %vm20_vm1, %v12185_v5  ;;  %v16540_v2 = vld [vmem:[#allocation66_spill] sm:$0xff]  ;;  %v3348_v40 = vld [vmem:[#allocation2 + $0x258] sm:$0xff] }
 0x478   :  { %v12195_v9 = vadd.f32 %v4178_v45, %v3796_v12  ;;  %v4190_v45 = vpop.f32.mrf.mxu3  ;;  %v16538_v12 = vld [vmem:[#allocation216_spill] sm:$0xff] }
 0x479   :  { %v2195_v52 = vadd.f32 %v16538_v12, %v1661_v7  ;;  %9754 = vmatmul.msk.f32.gmra.mxu3 %vm20_vm1, %v3881_v36  ;;  %v16543_v12 = vld [vmem:[#allocation92_spill] sm:$0xff] }
 0x47a   :  { %16532 = vst [vmem:[#allocation29_spill] sm:$0xff] %v12195_v9  ;;  %v12203_v63 = vpop.f32.mrf.mxu0 }
 0x47b   :  { %16536 = vst [vmem:[#allocation30_spill] sm:$0xff] %v12203_v63  ;;  %v3112_v30 = vpop.f32.mrf.mxu1 }
 0x47c   :  { %v3262_v29 = vadd.f32 %v3112_v30, %v2728_v56  ;;  %v1047_v56 = vadd.f32 %v16541_v34, %v16540_v2  ;;  %v16542_v30 = vld [vmem:[#allocation165_spill] sm:$0xff] }
 0x47d   :  { %9794 = vmatmul.msk.f32.gmra.mxu0 %vm20_vm1, %v11803_v58  ;;  %v2729_v39 = vadd.f32 %v16542_v30, %v2195_v52  ;;  %9689 = vmatmul.msk.f32.gmra.mxu2 %vm20_vm1, %v3348_v40  ;;  %v3882_v52 = vld [vmem:[#allocation2 + $0x259] sm:$0xff]  ;;  %v3662_v34 = vpop.f32.mrf.mxu2  ;;  %v16546_v30 = vld [vmem:[#allocation69_spill] sm:$0xff] }
 0x47e   :  { %v3797_v13 = vadd.f32 %v12137_v38, %v3262_v29  ;;  %9618 = vmatmul.msk.f32.gmra.mxu1 %vm20_vm1, %v12205_v33  ;;  %v12223_v29 = vld [vmem:[#allocation2 + $0x212] sm:$0xff]  ;;  %v1662_v63 = vadd.f32 %v16543_v12, %v1047_v56 }
 0x47f   :  { %v16547_v56 = vld [vmem:[#allocation70_spill] sm:$0xff] }
 0x480   :  { %v12215_v46 = vadd.f32 %v4181_v57, %v3797_v13  ;;  %v4193_v17 = vpop.f32.mrf.mxu3  ;;  %v16544_v57 = vld [vmem:[#allocation219_spill] sm:$0xff] }
 0x481   :  { %v2196_v13 = vadd.f32 %v16544_v57, %v1662_v63  ;;  %9755 = vmatmul.msk.f32.gmra.mxu3 %vm20_vm1, %v3882_v52  ;;  %v3349_v63 = vld [vmem:[#allocation2 + $0x260] sm:$0xff]  ;;  %v16549_v57 = vld [vmem:[#allocation95_spill] sm:$0xff] }
 0x482   :  { %16539 = vst [vmem:[#allocation75_spill] sm:$0xff] %v12215_v46  ;;  %v12221_v38 = vpop.f32.mrf.mxu0 }
 0x483   :  { %v3115_v7 = vpop.f32.mrf.mxu1 }
 0x484   :  { %v3263_v58 = vadd.f32 %v3115_v7, %v2729_v39  ;;  %v1050_v39 = vadd.f32 %v16547_v56, %v16546_v30  ;;  %v16548_v7 = vld [vmem:[#allocation167_spill] sm:$0xff]  ;;  %v16552_v56 = vld [vmem:[#allocation170_spill] sm:$0xff] }
 0x485   :  { %9795 = vmatmul.msk.f32.gmra.mxu0 %vm20_vm1, %v11824_v8  ;;  %v2730_v12 = vadd.f32 %v16548_v7, %v2196_v13  ;;  %9690 = vmatmul.msk.f32.gmra.mxu2 %vm20_vm1, %v3349_v63  ;;  %v3883_v13 = vld [vmem:[#allocation2 + $0x261] sm:$0xff] }
 0x486   :  { %v3798_v2 = vadd.f32 %v12157_v24, %v3263_v58  ;;  %9619 = vmatmul.msk.f32.gmra.mxu1 %vm20_vm1, %v12223_v29  ;;  %v12241_v58 = vld [vmem:[#allocation2 + $0x21a] sm:$0xff]  ;;  %v1663_v55 = vadd.f32 %v16549_v57, %v1050_v39  ;;  %v3665_v39 = vpop.f32.mrf.mxu2 }
 0x488   :  { %v12233_v36 = vadd.f32 %v4184_v43, %v3798_v2  ;;  %v4196_v1 = vpop.f32.mrf.mxu3  ;;  %v16550_v43 = vld [vmem:[#allocation222_spill] sm:$0xff] }
 0x489   :  { %v2197_v2 = vadd.f32 %v16550_v43, %v1663_v55  ;;  %9756 = vmatmul.msk.f32.gmra.mxu3 %vm20_vm1, %v3883_v13  ;;  %v12257_v55 = vld [vmem:[#allocation2 + $0x22a] sm:$0xff]  ;;  %v3351_v13 = vld [vmem:[#allocation2 + $0x278] sm:$0xff] }
 0x48a   :  { %16545 = vst [vmem:[#allocation32_spill] sm:$0xff] %v12233_v36  ;;  %v12239_v24 = vpop.f32.mrf.mxu0  ;;  %v16553_v43 = vld [vmem:[#allocation98_spill] sm:$0xff] }
 0x48b   :  { %v3118_v40 = vpop.f32.mrf.mxu1  ;;  %v2731_v7 = vadd.f32 %v16552_v56, %v2197_v2  ;;  %v16554_v2 = vld [vmem:[#allocation172_spill] sm:$0xff] }
 0x48c   :  { %v3264_v8 = vadd.f32 %v3118_v40, %v2730_v12  ;;  %v3350_v12 = vld [vmem:[#allocation2 + $0x270] sm:$0xff] }
 0x48d   :  { %9796 = vmatmul.msk.f32.gmra.mxu0 %vm20_vm1, %v11846_v15  ;;  %9691 = vmatmul.msk.f32.gmra.mxu2 %vm20_vm1, %v3350_v12  ;;  %v12272_v12 = vld [vmem:[#allocation2 + $0x232] sm:$0xff] }
 0x48e   :  { %v3799_v30 = vadd.f32 %v12177_v48, %v3264_v8  ;;  %9620 = vmatmul.msk.f32.gmra.mxu1 %vm20_vm1, %v12241_v58 }
 0x490   :  { %v12251_v52 = vadd.f32 %v4187_v31, %v3799_v30  ;;  %v4199_v57 = vpop.f32.mrf.mxu3  ;;  %v3884_v31 = vld [vmem:[#allocation2 + $0x271] sm:$0xff]  ;;  %v2732_v30 = vadd.f32 %v16554_v2, %v16553_v43 }
 0x491   :  { %9757 = vmatmul.msk.f32.gmra.mxu3 %vm20_vm1, %v3884_v31  ;;  %v16556_v31 = vld [vmem:[#allocation101_spill] sm:$0xff]  ;;  %v16557_v43 = vld [vmem:[#allocation175_spill] sm:$0xff] }
 0x492   :  { %16551 = vst [vmem:[#allocation33_spill] sm:$0xff] %v12251_v52  ;;  %v12255_v40 = vpop.f32.mrf.mxu0  ;;  %v2733_v2 = vadd.f32 %v16557_v43, %v16556_v31  ;;  %v16559_v31 = vld [vmem:[#allocation104_spill] sm:$0xff]  ;;  %v16560_v43 = vld [vmem:[#allocation178_spill] sm:$0xff]  ;;  %v3355_v52 = vld [vmem:[#allocation2 + $0x2a8] sm:$0xff] }
 0x493   :  { %v3121_v63 = vpop.f32.mrf.mxu1  ;;  %v2734_v3 = vadd.f32 %v16560_v43, %v16559_v31  ;;  %v16562_v31 = vld [vmem:[#allocation107_spill] sm:$0xff]  ;;  %v16563_v43 = vld [vmem:[#allocation180_spill] sm:$0xff] }
 0x494   :  { %v3265_v48 = vadd.f32 %v3121_v63, %v2731_v7  ;;  %v3668_v63 = vpop.f32.mrf.mxu2  ;;  %v2735_v9 = vadd.f32 %v16563_v43, %v16562_v31  ;;  %v16566_v31 = vld [vmem:[#allocation183_spill] sm:$0xff] }
 0x495   :  { %9797 = vmatmul.msk.f32.gmra.mxu0 %vm20_vm1, %v11867_v50  ;;  %9692 = vmatmul.msk.f32.gmra.mxu2 %vm20_vm1, %v3351_v13 }
 0x496   :  { %v3800_v15 = vadd.f32 %v12197_v61, %v3265_v48  ;;  %9621 = vmatmul.msk.f32.gmra.mxu1 %vm20_vm1, %v12257_v55 }
 0x498   :  { %v12265_v8 = vadd.f32 %v4190_v45, %v3800_v15  ;;  %v4202_v50 = vpop.f32.mrf.mxu3  ;;  %v3885_v45 = vld [vmem:[#allocation2 + $0x279] sm:$0xff] }
 0x499   :  { %9758 = vmatmul.msk.f32.gmra.mxu3 %vm20_vm1, %v3885_v45 }
 0x49a   :  { %v12270_v7 = vpop.f32.mrf.mxu0 }
 0x49b   :  { %v3124_v56 = vpop.f32.mrf.mxu1 }
 0x49c   :  { %v3266_v61 = vadd.f32 %v3124_v56, %v2732_v30  ;;  %v3352_v30 = vld [vmem:[#allocation2 + $0x288] sm:$0xff] }
 0x49d   :  { %9798 = vmatmul.msk.f32.gmra.mxu0 %vm20_vm1, %v11889_v4  ;;  %9693 = vmatmul.msk.f32.gmra.mxu2 %vm20_vm1, %v3352_v30  ;;  %v3886_v4 = vld [vmem:[#allocation2 + $0x289] sm:$0xff] }
 0x49e   :  { %v3801_v48 = vadd.f32 %v3659_v53, %v3266_v61  ;;  %9622 = vmatmul.msk.f32.gmra.mxu1 %vm20_vm1, %v12272_v12  ;;  %v12286_v53 = vld [vmem:[#allocation2 + $0x242] sm:$0xff] }
 0x4a0   :  { %v12279_v15 = vadd.f32 %v4193_v17, %v3801_v48  ;;  %v3671_v17 = vpop.f32.mrf.mxu2  ;;  %v4205_v45 = vpop.f32.mrf.mxu3 }
 0x4a1   :  { %9759 = vmatmul.msk.f32.gmra.mxu3 %vm20_vm1, %v3886_v4 }
 0x4a2   :  { %16555 = vst [vmem:[#allocation76_spill] sm:$0xff] %v12279_v15  ;;  %v12284_v11 = vpop.f32.mrf.mxu0  ;;  %v3356_v15 = vld [vmem:[#allocation2 + $0x2b8] sm:$0xff] }
 0x4a3   :  { %v3127_v56 = vpop.f32.mrf.mxu1 }
 0x4a4   :  { %v3267_v13 = vadd.f32 %v3127_v56, %v2733_v2  ;;  %v3353_v2 = vld [vmem:[#allocation2 + $0x290] sm:$0xff] }
 0x4a5   :  { %9799 = vmatmul.msk.f32.gmra.mxu0 %vm20_vm1, %v11909_v26  ;;  %9694 = vmatmul.msk.f32.gmra.mxu2 %vm20_vm1, %v3353_v2 }
 0x4a6   :  { %v3802_v61 = vadd.f32 %v3662_v34, %v3267_v13  ;;  %9623 = vmatmul.msk.f32.gmra.mxu1 %vm20_vm1, %v12286_v53  ;;  %v12300_v34 = vld [vmem:[#allocation2 + $0x24a] sm:$0xff] }
 0x4a8   :  { %v12293_v48 = vadd.f32 %v4196_v1, %v3802_v61  ;;  %v3887_v1 = vld [vmem:[#allocation2 + $0x291] sm:$0xff]  ;;  %v3674_v4 = vpop.f32.mrf.mxu2  ;;  %v4208_v46 = vpop.f32.mrf.mxu3 }
 0x4a9   :  { %9760 = vmatmul.msk.f32.gmra.mxu3 %vm20_vm1, %v3887_v1  ;;  %v16565_v1 = vld [vmem:[#allocation109_spill] sm:$0xff] }
 0x4aa   :  { %16558 = vst [vmem:[#allocation35_spill] sm:$0xff] %v12293_v48  ;;  %v12298_v30 = vpop.f32.mrf.mxu0  ;;  %v2736_v43 = vadd.f32 %v16566_v31, %v16565_v1  ;;  %v16569_v1 = vld [vmem:[#allocation185_spill] sm:$0xff]  ;;  %v12340_v48 = vld [vmem:[#allocation2 + $0x272] sm:$0xff] }
 0x4ab   :  { %v3130_v56 = vpop.f32.mrf.mxu1 }
 0x4ac   :  { %v3268_v13 = vadd.f32 %v3130_v56, %v2734_v3  ;;  %v3354_v3 = vld [vmem:[#allocation2 + $0x2a0] sm:$0xff] }
 0x4ad   :  { %9800 = vmatmul.msk.f32.gmra.mxu0 %vm20_vm1, %v11930_v42  ;;  %9695 = vmatmul.msk.f32.gmra.mxu2 %vm20_vm1, %v3354_v3 }
 0x4ae   :  { %v3803_v26 = vadd.f32 %v3665_v39, %v3268_v13  ;;  %9624 = vmatmul.msk.f32.gmra.mxu1 %vm20_vm1, %v12300_v34  ;;  %v12314_v39 = vld [vmem:[#allocation2 + $0x25a] sm:$0xff] }
 0x4b0   :  { %v12307_v61 = vadd.f32 %v4199_v57, %v3803_v26  ;;  %v3888_v57 = vld [vmem:[#allocation2 + $0x2a1] sm:$0xff]  ;;  %v3677_v36 = vpop.f32.mrf.mxu2 }
 0x4b1   :  { %9761 = vmatmul.msk.f32.gmra.mxu3 %vm20_vm1, %v3888_v57  ;;  %v16568_v57 = vld [vmem:[#allocation111_spill] sm:$0xff] }
 0x4b2   :  { %16561 = vst [vmem:[#allocation36_spill] sm:$0xff] %v12307_v61  ;;  %v12312_v2 = vpop.f32.mrf.mxu0  ;;  %v2737_v31 = vadd.f32 %v16569_v1, %v16568_v57  ;;  %v16572_v57 = vld [vmem:[#allocation113_spill] sm:$0xff]  ;;  %v16573_v1 = vld [vmem:[#allocation188_spill] sm:$0xff] }
 0x4b3   :  { %v3133_v56 = vpop.f32.mrf.mxu1 }
 0x4b4   :  { %v3269_v13 = vadd.f32 %v3133_v56, %v2735_v9 }
 0x4b5   :  { %9801 = vmatmul.msk.f32.gmra.mxu0 %vm20_vm1, %v11951_v62  ;;  %9696 = vmatmul.msk.f32.gmra.mxu2 %vm20_vm1, %v3355_v52 }
 0x4b6   :  { %v3804_v42 = vadd.f32 %v3668_v63, %v3269_v13  ;;  %9625 = vmatmul.msk.f32.gmra.mxu1 %vm20_vm1, %v12314_v39  ;;  %v12328_v63 = vld [vmem:[#allocation2 + $0x262] sm:$0xff]  ;;  %v4211_v13 = vpop.f32.mrf.mxu3 }
 0x4b8   :  { %v12321_v26 = vadd.f32 %v4202_v50, %v3804_v42  ;;  %v3889_v50 = vld [vmem:[#allocation2 + $0x2a9] sm:$0xff] }
 0x4b9   :  { %9762 = vmatmul.msk.f32.gmra.mxu3 %vm20_vm1, %v3889_v50 }
 0x4ba   :  { %16564 = vst [vmem:[#allocation77_spill] sm:$0xff] %v12321_v26  ;;  %v12326_v56 = vpop.f32.mrf.mxu0 }
 0x4bb   :  { %v3136_v9 = vpop.f32.mrf.mxu1 }
 0x4bc   :  { %v3270_v3 = vadd.f32 %v3136_v9, %v2736_v43 }
 0x4bd   :  { %9802 = vmatmul.msk.f32.gmra.mxu0 %vm20_vm1, %v11971_v27  ;;  %9697 = vmatmul.msk.f32.gmra.mxu2 %vm20_vm1, %v3356_v15  ;;  %v12357_v15 = vld [vmem:[#allocation2 + $0x27a] sm:$0xff] }
 0x4be   :  { %v3805_v62 = vadd.f32 %v3671_v17, %v3270_v3  ;;  %9626 = vmatmul.msk.f32.gmra.mxu1 %vm20_vm1, %v12328_v63  ;;  %v3680_v3 = vpop.f32.mrf.mxu2 }
 0x4c0   :  { %v12335_v42 = vadd.f32 %v4205_v45, %v3805_v62  ;;  %v4214_v45 = vpop.f32.mrf.mxu3  ;;  %v3890_v62 = vld [vmem:[#allocation2 + $0x2b9] sm:$0xff] }
 0x4c1   :  { %9763 = vmatmul.msk.f32.gmra.mxu3 %vm20_vm1, %v3890_v62 }
 0x4c2   :  { %16567 = vst [vmem:[#allocation38_spill] sm:$0xff] %v12335_v42  ;;  %v4676_v9 = vpop.f32.mrf.mxu0 }
 0x4c3   :  { %v3139_v43 = vpop.f32.mrf.mxu1  ;;  %v12343_v17 = vadd.f32 %v4676_v9, %v11961_v19  ;;  %v3357_v19 = vld [vmem:[#allocation2 + $0x2c0] sm:$0xff] }
 0x4c4   :  { %v3271_v52 = vadd.f32 %v3139_v43, %v2737_v31  ;;  %v2738_v31 = vadd.f32 %v16573_v1, %v16572_v57  ;;  %v16574_v57 = vld [vmem:[#allocation115_spill] sm:$0xff] }
 0x4c5   :  { %16570 = vst [vmem:[#allocation39_spill] sm:$0xff] %v12343_v17  ;;  %9803 = vmatmul.msk.f32.gmra.mxu0 %vm20_vm1, %v11991_v6  ;;  %9698 = vmatmul.msk.f32.gmra.mxu2 %vm20_vm1, %v3357_v19  ;;  %v16575_v1 = vld [vmem:[#allocation191_spill] sm:$0xff] }
 0x4c6   :  { %v3806_v27 = vadd.f32 %v3674_v4, %v3271_v52  ;;  %9627 = vmatmul.msk.f32.gmra.mxu1 %vm20_vm1, %v12340_v48  ;;  %v3683_v6 = vpop.f32.mrf.mxu2  ;;  %v2739_v61 = vadd.f32 %v16575_v1, %v16574_v57  ;;  %v16577_v57 = vld [vmem:[#allocation117_spill] sm:$0xff]  ;;  %v16578_v1 = vld [vmem:[#allocation194_spill] sm:$0xff] }
 0x4c7   :  { %v2740_v26 = vadd.f32 %v16578_v1, %v16577_v57  ;;  %v16582_v57 = vld [vmem:[#allocation198_spill] sm:$0xff] }
 0x4c8   :  { %v12350_v50 = vadd.f32 %v4208_v46, %v3806_v27  ;;  %v3891_v46 = vld [vmem:[#allocation2 + $0x2c1] sm:$0xff]  ;;  %v4217_v62 = vpop.f32.mrf.mxu3 }
 0x4c9   :  { %9764 = vmatmul.msk.f32.gmra.mxu3 %vm20_vm1, %v3891_v46 }
 0x4ca   :  { %16571 = vst [vmem:[#allocation78_spill] sm:$0xff] %v12350_v50  ;;  %v12355_v9 = vpop.f32.mrf.mxu0  ;;  %v3360_v50 = vld [vmem:[#allocation2 + $0x2e8] sm:$0xff] }
 0x4cb   :  { %v3142_v43 = vpop.f32.mrf.mxu1 }
 0x4cc   :  { %v3272_v4 = vadd.f32 %v3142_v43, %v2738_v31  ;;  %v3358_v31 = vld [vmem:[#allocation2 + $0x2d0] sm:$0xff] }
 0x4cd   :  { %9804 = vmatmul.msk.f32.gmra.mxu0 %vm20_vm1, %v12011_v21  ;;  %9699 = vmatmul.msk.f32.gmra.mxu2 %vm20_vm1, %v3358_v31 }
 0x4ce   :  { %v3807_v52 = vadd.f32 %v3677_v36, %v3272_v4  ;;  %9628 = vmatmul.msk.f32.gmra.mxu1 %vm20_vm1, %v12357_v15  ;;  %v12371_v36 = vld [vmem:[#allocation2 + $0x28a] sm:$0xff]  ;;  %v3686_v46 = vpop.f32.mrf.mxu2 }
 0x4d0   :  { %v12364_v27 = vadd.f32 %v4211_v13, %v3807_v52  ;;  %v3892_v13 = vld [vmem:[#allocation2 + $0x2d1] sm:$0xff]  ;;  %v4220_v42 = vpop.f32.mrf.mxu3 }
 0x4d1   :  { %9765 = vmatmul.msk.f32.gmra.mxu3 %vm20_vm1, %v3892_v13  ;;  %v16581_v13 = vld [vmem:[#allocation119_spill] sm:$0xff] }
 0x4d2   :  { %v12369_v19 = vpop.f32.mrf.mxu0  ;;  %v2741_v1 = vadd.f32 %v16582_v57, %v16581_v13  ;;  %v16586_v13 = vld [vmem:[#allocation201_spill] sm:$0xff] }
 0x4d3   :  { %v3145_v43 = vpop.f32.mrf.mxu1 }
 0x4d4   :  { %v3273_v4 = vadd.f32 %v3145_v43, %v2739_v61  ;;  %v3359_v61 = vld [vmem:[#allocation2 + $0x2d8] sm:$0xff] }
 0x4d5   :  { %9805 = vmatmul.msk.f32.gmra.mxu0 %vm20_vm1, %v12031_v18  ;;  %9700 = vmatmul.msk.f32.gmra.mxu2 %vm20_vm1, %v3359_v61 }
 0x4d6   :  { %v3808_v21 = vadd.f32 %v3680_v3, %v3273_v4  ;;  %9629 = vmatmul.msk.f32.gmra.mxu1 %vm20_vm1, %v12371_v36  ;;  %v12385_v3 = vld [vmem:[#allocation2 + $0x292] sm:$0xff] }
 0x4d7   :  { %16579 = vst [vmem:[#allocation42_spill] sm:$0xff] %v12385_v3 }
 0x4d8   :  { %v12378_v52 = vadd.f32 %v4214_v45, %v3808_v21  ;;  %v3893_v45 = vld [vmem:[#allocation2 + $0x2d9] sm:$0xff] }
 0x4d9   :  { %9766 = vmatmul.msk.f32.gmra.mxu3 %vm20_vm1, %v3893_v45  ;;  %v16585_v45 = vld [vmem:[#allocation121_spill] sm:$0xff] }
 0x4da   :  { %16576 = vst [vmem:[#allocation41_spill] sm:$0xff] %v12378_v52  ;;  %v12383_v31 = vpop.f32.mrf.mxu0  ;;  %v3689_v52 = vpop.f32.mrf.mxu2  ;;  %v2742_v57 = vadd.f32 %v16586_v13, %v16585_v45  ;;  %v16590_v45 = vld [vmem:[#allocation205_spill] sm:$0xff] }
 0x4db   :  { %v3148_v43 = vpop.f32.mrf.mxu1 }
 0x4dc   :  { %v3274_v4 = vadd.f32 %v3148_v43, %v2740_v26 }
 0x4dd   :  { %9806 = vmatmul.msk.f32.gmra.mxu0 %vm20_vm1, %v12051_v20  ;;  %9701 = vmatmul.msk.f32.gmra.mxu2 %vm20_vm1, %v3360_v50 }
 0x4de   :  { %v3809_v18 = vadd.f32 %v3683_v6, %v3274_v4  ;;  %9630 = vmatmul.msk.f32.gmra.mxu1 %vm20_vm1, %v12385_v3  ;;  %v12399_v6 = vld [vmem:[#allocation2 + $0x2a2] sm:$0xff]  ;;  %v4223_v4 = vpop.f32.mrf.mxu3  ;;  %v12411_v3 = vld [vmem:[#allocation2 + $0x2aa] sm:$0xff] }
 0x4df   :  { %16583 = vst [vmem:[#allocation44_spill] sm:$0xff] %v12399_v6 }
 0x4e0   :  { %v12392_v21 = vadd.f32 %v4217_v62, %v3809_v18  ;;  %v3894_v62 = vld [vmem:[#allocation2 + $0x2e9] sm:$0xff]  ;;  %16587 = vst [vmem:[#allocation80_spill] sm:$0xff] %v12411_v3 }
 0x4e1   :  { %9767 = vmatmul.msk.f32.gmra.mxu3 %vm20_vm1, %v3894_v62  ;;  %v16589_v62 = vld [vmem:[#allocation123_spill] sm:$0xff] }
 0x4e2   :  { %16580 = vst [vmem:[#allocation79_spill] sm:$0xff] %v12392_v21  ;;  %v12397_v43 = vpop.f32.mrf.mxu0  ;;  %v3361_v21 = vld [vmem:[#allocation2 + $0x2f0] sm:$0xff]  ;;  %v2743_v13 = vadd.f32 %v16590_v45, %v16589_v62  ;;  %v16592_v62 = vld [vmem:[#allocation125_spill] sm:$0xff] }
 0x4e3   :  { %v3151_v26 = vpop.f32.mrf.mxu1  ;;  %v16593_v45 = vld [vmem:[#allocation209_spill] sm:$0xff] }
 0x4e4   :  { %v3275_v61 = vadd.f32 %v3151_v26, %v2741_v1 }
 0x4e5   :  { %9807 = vmatmul.msk.f32.gmra.mxu0 %vm20_vm1, %v12071_v25  ;;  %9702 = vmatmul.msk.f32.gmra.mxu2 %vm20_vm1, %v3361_v21  ;;  %v12423_v21 = vld [vmem:[#allocation2 + $0x2ba] sm:$0xff] }
 0x4e6   :  { %v3810_v20 = vadd.f32 %v3686_v46, %v3275_v61  ;;  %9631 = vmatmul.msk.f32.gmra.mxu1 %vm20_vm1, %v12399_v6  ;;  %v3692_v46 = vpop.f32.mrf.mxu2  ;;  %v4226_v25 = vpop.f32.mrf.mxu3  ;;  %16591 = vst [vmem:[#allocation48_spill] sm:$0xff] %v12423_v21  ;;  %v3363_v6 = vld [vmem:[#allocation2 + $0x308] sm:$0xff] }
 0x4e8   :  { %v12406_v18 = vadd.f32 %v4220_v42, %v3810_v20  ;;  %v3895_v42 = vld [vmem:[#allocation2 + $0x2f1] sm:$0xff] }
 0x4e9   :  { %9768 = vmatmul.msk.f32.gmra.mxu3 %vm20_vm1, %v3895_v42 }
 0x4ea   :  { %16584 = vst [vmem:[#allocation45_spill] sm:$0xff] %v12406_v18  ;;  %v4691_v26 = vpop.f32.mrf.mxu0 }
 0x4eb   :  { %v3154_v1 = vpop.f32.mrf.mxu1 }
 0x4ec   :  { %v3276_v50 = vadd.f32 %v3154_v1, %v2742_v57  ;;  %v3362_v57 = vld [vmem:[#allocation2 + $0x300] sm:$0xff] }
 0x4ed   :  { %9808 = vmatmul.msk.f32.gmra.mxu0 %vm20_vm1, %v12091_v10  ;;  %9703 = vmatmul.msk.f32.gmra.mxu2 %vm20_vm1, %v3362_v57  ;;  %v12434_v57 = vld [vmem:[#allocation2 + $0x2c2] sm:$0xff] }
 0x4ee   :  { %v3811_v61 = vadd.f32 %v3689_v52, %v3276_v50  ;;  %9632 = vmatmul.msk.f32.gmra.mxu1 %vm20_vm1, %v12411_v3  ;;  %v4404_v52 = vld [vmem:[#allocation2 + $0x19a] sm:$0xff]  ;;  %v3695_v10 = vpop.f32.mrf.mxu2  ;;  %v4229_v42 = vpop.f32.mrf.mxu3 }
 0x4f0   :  { %v12418_v20 = vadd.f32 %v4223_v4, %v3811_v61  ;;  %v3896_v4 = vld [vmem:[#allocation2 + $0x301] sm:$0xff] }
 0x4f1   :  { %9769 = vmatmul.msk.f32.gmra.mxu3 %vm20_vm1, %v3896_v4 }
 0x4f2   :  { %16588 = vst [vmem:[#allocation47_spill] sm:$0xff] %v12418_v20  ;;  %v4694_v18 = vpop.f32.mrf.mxu0  ;;  %v2744_v20 = vadd.f32 %v16593_v45, %v16592_v62 }
 0x4f3   :  { %v3157_v1 = vpop.f32.mrf.mxu1 }
 0x4f4   :  { %v3277_v50 = vadd.f32 %v3157_v1, %v2743_v13 }
 0x4f5   :  { %9809 = vmatmul.msk.f32.gmra.mxu0 %vm20_vm1, %v4404_v52  ;;  %9704 = vmatmul.msk.f32.gmra.mxu2 %vm20_vm1, %v3363_v6  ;;  %v3897_v52 = vld [vmem:[#allocation2 + $0x309] sm:$0xff]  ;;  %v16597_v6 = vld [vmem:[#allocation128_spill] sm:$0xff] }
 0x4f6   :  { %v3812_v3 = vadd.f32 %v3692_v46, %v3277_v50  ;;  %9633 = vmatmul.msk.f32.gmra.mxu1 %vm20_vm1, %v12423_v21  ;;  %v4405_v46 = vld [vmem:[#allocation2 + $0x1a2] sm:$0xff]  ;;  %v4232_v45 = vpop.f32.mrf.mxu3 }
 0x4f8   :  { %v12429_v61 = vadd.f32 %v4226_v25, %v3812_v3  ;;  %v12444_v25 = vadd.f32 %v4694_v18, %v12081_v47  ;;  %v12458_v47 = vadd.f32 %v12397_v43, %v12041_v35  ;;  %v12476_v35 = vadd.f32 %v12369_v19, %v12001_v0  ;;  %v3898_v43 = vld [vmem:[#allocation2 + $0x319] sm:$0xff] }
 0x4f9   :  { %9770 = vmatmul.msk.f32.gmra.mxu3 %vm20_vm1, %v3897_v52 }
 0x4fa   :  { %v4697_v1 = vpop.f32.mrf.mxu0  ;;  %16595 = vst [vmem:[#allocation81_spill] sm:$0xff] %v12444_v25 }
 0x4fb   :  { %v3160_v13 = vpop.f32.mrf.mxu1  ;;  %v12437_v21 = vadd.f32 %v4697_v1, %v12101_v59  ;;  %v12450_v59 = vadd.f32 %v4691_v26, %v12061_v51  ;;  %16599 = vst [vmem:[#allocation210_spill] sm:$0xff] %v12458_v47  ;;  %v12467_v26 = vadd.f32 %v12383_v31, %v12021_v54  ;;  %v3364_v1 = vld [vmem:[#allocation2 + $0x318] sm:$0xff]  ;;  %v12484_v54 = vadd.f32 %v12355_v9, %v11981_v23 }
 0x4fc   :  { %v3278_v50 = vadd.f32 %v3160_v13, %v2744_v20  ;;  %v3698_v20 = vpop.f32.mrf.mxu2  ;;  %v12463_v13 = vld [vmem:[#allocation2 + $0x2d2] sm:$0xff]  ;;  %16601 = vst [vmem:[#allocation51_spill] sm:$0xff] %v12476_v35  ;;  %v12497_v23 = vadd.f32 %v12326_v56, %v11941_v14  ;;  %v12514_v56 = vadd.f32 %v12298_v30, %v11899_v37  ;;  %v3902_v30 = vld [vmem:[#allocation2 + $0x349] sm:$0xff] }
 0x4fd   :  { %16594 = vst [vmem:[#allocation144_spill] sm:$0xff] %v12437_v21  ;;  %9810 = vmatmul.msk.f32.gmra.mxu0 %vm20_vm1, %v4405_v46  ;;  %4908 = vmatpush.msrb.mxu2 %v12437_v21  ;;  %v16603_v31 = vld [vmem:[#allocation131_spill] sm:$0xff]  ;;  %v3366_v37 = vld [vmem:[#allocation2 + $0x330] sm:$0xff] }
 0x4fe   :  { %v3813_v3 = vadd.f32 %v3695_v10, %v3278_v50  ;;  %9634 = vmatmul.msk.f32.gmra.mxu1 %vm20_vm1, %v12434_v57  ;;  %16596 = vst [vmem:[#allocation193_spill] sm:$0xff] %v12450_v59  ;;  %v16598_v10 = vld [vmem:[#allocation213_spill] sm:$0xff]  ;;  %9705 = vmatmul.msk.f32.gmra.mxu2 %vm20_vm1, %v3364_v1  ;;  %v4235_v9 = vpop.f32.mrf.mxu3  ;;  %v16667_v21 = vld [vmem:[#allocation99_spill] sm:$0xff] }
 0x4ff   :  { %4909 = vmatpush.msrb.mxu2 %v12444_v25  ;;  %v2745_v62 = vadd.f32 %v16598_v10, %v16597_v6  ;;  %16600 = vst [vmem:[#allocation50_spill] sm:$0xff] %v12467_v26  ;;  %v3365_v10 = vld [vmem:[#allocation2 + $0x320] sm:$0xff]  ;;  %v12574_v1 = vld [vmem:[#allocation2 + $0x30a] sm:$0xff] }
 0x500   :  { %v12447_v4 = vadd.f32 %v4229_v42, %v3813_v3  ;;  %16602 = vst [vmem:[#allocation148_spill] sm:$0xff] %v12484_v54  ;;  %v16604_v3 = vld [vmem:[#allocation217_spill] sm:$0xff]  ;;  %v16665_v25 = vld [vmem:[#allocation152_spill] sm:$0xff] }
 0x501   :  { %4910 = vmatpush.msrb.mxu2 %v12450_v59  ;;  %9771 = vmatmul.msk.f32.gmra.mxu3 %vm20_vm1, %v3898_v43  ;;  %16605 = vst [vmem:[#allocation82_spill] sm:$0xff] %v12497_v23  ;;  %v3903_v43 = vld [vmem:[#allocation2 + $0x351] sm:$0xff] }
 0x502   :  { %v12461_v42 = vpop.f32.mrf.mxu0  ;;  %16607 = vst [vmem:[#allocation214_spill] sm:$0xff] %v12514_v56  ;;  %v16664_v59 = vld [vmem:[#allocation103_spill] sm:$0xff] }
 0x503   :  { %v3163_v18 = vpop.f32.mrf.mxu1  ;;  %4911 = vmatpush.msrb.mxu2 %v12458_v47 }
 0x504   :  { %v3279_v51 = vadd.f32 %v3163_v18, %v2745_v62  ;;  %v3701_v52 = vpop.f32.mrf.mxu2  ;;  %v3899_v18 = vld [vmem:[#allocation2 + $0x321] sm:$0xff] }
 0x505   :  { %9811 = vmatmul.msk.f32.gmra.mxu0 %vm20_vm1, %v12145_v60  ;;  %4912 = vmatpush.msrb.mxu2 %v12467_v26  ;;  %v2746_v60 = vadd.f32 %v16604_v3, %v16603_v31  ;;  %v12582_v31 = vld [vmem:[#allocation2 + $0x31a] sm:$0xff] }
 0x506   :  { %v3814_v46 = vadd.f32 %v3698_v20, %v3279_v51  ;;  %9635 = vmatmul.msk.f32.gmra.mxu1 %vm20_vm1, %v12463_v13  ;;  %v12493_v20 = vld [vmem:[#allocation2 + $0x2da] sm:$0xff]  ;;  %9706 = vmatmul.msk.f32.gmra.mxu2 %vm20_vm1, %v3365_v10  ;;  %v12529_v51 = vadd.f32 %v12270_v7, %v11857_v28  ;;  %v12544_v28 = vadd.f32 %v12239_v24, %v11814_v16  ;;  %v3368_v24 = vld [vmem:[#allocation2 + $0x348] sm:$0xff] }
 0x507   :  { %4913 = vmatpush.msrb.mxu2 %v12476_v35  ;;  %v3367_v7 = vld [vmem:[#allocation2 + $0x338] sm:$0xff]  ;;  %v16660_v35 = vld [vmem:[#allocation106_spill] sm:$0xff] }
 0x508   :  { %v12479_v50 = vadd.f32 %v4232_v45, %v3814_v46  ;;  %v12506_v45 = vadd.f32 %v12312_v2, %v11920_v41  ;;  %v12525_v2 = vld [vmem:[#allocation2 + $0x2ea] sm:$0xff]  ;;  %16609 = vst [vmem:[#allocation54_spill] sm:$0xff] %v12529_v51  ;;  %v3901_v16 = vld [vmem:[#allocation2 + $0x339] sm:$0xff] }
 0x509   :  { %4914 = vmatpush.msrb.mxu2 %v12484_v54  ;;  %9772 = vmatmul.msk.f32.gmra.mxu3 %vm20_vm1, %v3899_v18  ;;  %16611 = vst [vmem:[#allocation83_spill] sm:$0xff] %v12544_v28  ;;  %v3369_v46 = vld [vmem:[#allocation2 + $0x350] sm:$0xff]  ;;  %v16661_v26 = vld [vmem:[#allocation155_spill] sm:$0xff] }
 0x50a   :  { %v12491_v19 = vpop.f32.mrf.mxu0  ;;  %16606 = vst [vmem:[#allocation197_spill] sm:$0xff] %v12506_v45 }
 0x50b   :  { %v3166_v0 = vpop.f32.mrf.mxu1  ;;  %4915 = vmatpush.msrb.mxu2 %v12343_v17  ;;  %v16657_v17 = vld [vmem:[#allocation4_spill] sm:$0xff] }
 0x50c   :  { %v3280_v6 = vadd.f32 %v3166_v0, %v2746_v60  ;;  %v12588_v60 = vld [vmem:[#allocation2 + $0x322] sm:$0xff] }
 0x50d   :  { %9812 = vmatmul.msk.f32.gmra.mxu0 %vm20_vm1, %v12165_v49  ;;  %4916 = vmatpush.msrb.mxu2 %v12497_v23  ;;  %v12520_v49 = vadd.f32 %v12284_v11, %v11879_v22  ;;  %v12538_v22 = vadd.f32 %v12255_v40, %v11836_v44  ;;  %v3900_v11 = vld [vmem:[#allocation2 + $0x331] sm:$0xff] }
 0x50e   :  { %v3815_v62 = vadd.f32 %v3701_v52, %v3280_v6  ;;  %9636 = vmatmul.msk.f32.gmra.mxu1 %vm20_vm1, %v12493_v20  ;;  %9707 = vmatmul.msk.f32.gmra.mxu2 %vm20_vm1, %v3366_v37  ;;  %v12555_v40 = vld [vmem:[#allocation2 + $0x2f2] sm:$0xff]  ;;  %v12603_v6 = vld [vmem:[#allocation2 + $0x33a] sm:$0xff] }
 0x50f   :  { %4917 = vmatpush.msrb.mxu2 %v12506_v45  ;;  %16608 = vst [vmem:[#allocation53_spill] sm:$0xff] %v12520_v49  ;;  %v12594_v52 = vld [vmem:[#allocation2 + $0x332] sm:$0xff] }
 0x510   :  { %v12509_v14 = vadd.f32 %v4235_v9, %v3815_v62  ;;  %16610 = vst [vmem:[#allocation151_spill] sm:$0xff] %v12538_v22 }
 0x511   :  { %4918 = vmatpush.msrb.mxu2 %v12514_v56  ;;  %9773 = vmatmul.msk.f32.gmra.mxu3 %vm20_vm1, %v3900_v11 }
 0x512   :  { %v12523_v41 = vpop.f32.mrf.mxu0 }
 0x513   :  { %4919 = vmatpush.msrb.mxu2 %v12520_v49 }
 0x515   :  { %9813 = vmatmul.msk.f32.gmra.mxu0 %vm20_vm1, %v12185_v5  ;;  %4920 = vmatpush.msrb.mxu2 %v12529_v51  ;;  %v12550_v5 = vadd.f32 %v12221_v38, %v11793_v32  ;;  %v12566_v38 = vld [vmem:[#allocation2 + $0x302] sm:$0xff] }
 0x516   :  { %9637 = vmatmul.msk.f32.gmra.mxu1 %vm20_vm1, %v12525_v2  ;;  %9708 = vmatmul.msk.f32.gmra.mxu2 %vm20_vm1, %v3367_v7 }
 0x517   :  { %4921 = vmatpush.msrb.mxu2 %v12538_v22  ;;  %16612 = vst [vmem:[#allocation200_spill] sm:$0xff] %v12550_v5 }
 0x519   :  { %4922 = vmatpush.msrb.mxu2 %v12544_v28  ;;  %9774 = vmatmul.msk.f32.gmra.mxu3 %vm20_vm1, %v3901_v16  ;;  %v16625_v16 = vld [vmem:[#allocation35_spill] sm:$0xff] }
 0x51a   :  { %v12553_v44 = vpop.f32.mrf.mxu0 }
 0x51b   :  { %4923 = vmatpush.msrb.mxu2 %v12550_v5 }
 0x51d   :  { %9814 = vmatmul.msk.f32.gmra.mxu0 %vm20_vm1, %v12205_v33 }
 0x51e   :  { %9638 = vmatmul.msk.f32.gmra.mxu1 %vm20_vm1, %v12555_v40  ;;  %9709 = vmatmul.msk.f32.gmra.mxu2 %vm20_vm1, %v3368_v24 }
 0x521   :  { %9775 = vmatmul.msk.f32.gmra.mxu3 %vm20_vm1, %v3902_v30  ;;  %v16627_v30 = vld [vmem:[#allocation44_spill] sm:$0xff] }
 0x522   :  { %v12564_v32 = vpop.f32.mrf.mxu0 }
 0x525   :  { %9815 = vmatmul.msk.f32.gmra.mxu0 %vm20_vm1, %v12223_v29 }
 0x526   :  { %9639 = vmatmul.msk.f32.gmra.mxu1 %vm20_vm1, %v12566_v38  ;;  %9710 = vmatmul.msk.f32.gmra.mxu2 %vm20_vm1, %v3369_v46  ;;  %v16628_v46 = vld [vmem:[#allocation76_spill] sm:$0xff] }
 0x529   :  { %9776 = vmatmul.msk.f32.gmra.mxu3 %vm20_vm1, %v3903_v43 }
 0x52a   :  { %v4715_v33 = vpop.f32.mrf.mxu0 }
 0x52d   :  { %9816 = vmatmul.msk.f32.gmra.mxu0 %vm20_vm1, %v12241_v58 }
 0x52e   :  { %9640 = vmatmul.msk.f32.gmra.mxu1 %vm20_vm1, %v12574_v1 }
 0x532   :  { %v4718_v29 = vpop.f32.mrf.mxu0 }
 0x535   :  { %9817 = vmatmul.msk.f32.gmra.mxu0 %vm20_vm1, %v12257_v55 }
 0x536   :  { %9641 = vmatmul.msk.f32.gmra.mxu1 %vm20_vm1, %v12582_v31 }
 0x53a   :  { %v4721_v3 = vpop.f32.mrf.mxu0 }
 0x53d   :  { %9818 = vmatmul.msk.f32.gmra.mxu0 %vm20_vm1, %v12272_v12 }
 0x53e   :  { %9642 = vmatmul.msk.f32.gmra.mxu1 %vm20_vm1, %v12588_v60 }
 0x542   :  { %v4724_v58 = vpop.f32.mrf.mxu0 }
 0x543   :  { %v12597_v0 = vadd.f32 %v4724_v58, %v12265_v8  ;;  %v12652_v58 = vpop.f32.mrf.mxu1 }
 0x545   :  { %16613 = vst [vmem:[#allocation218_spill] sm:$0xff] %v12597_v0  ;;  %9819 = vmatmul.msk.f32.gmra.mxu0 %vm20_vm1, %v12286_v53 }
 0x546   :  { %9643 = vmatmul.msk.f32.gmra.mxu1 %vm20_vm1, %v12594_v52 }
 0x54a   :  { %v4727_v55 = vpop.f32.mrf.mxu0 }
 0x54b   :  { %v12649_v43 = vadd.f32 %v4727_v55, %v16628_v46  ;;  %v16635_v55 = vld [vmem:[#allocation80_spill] sm:$0xff] }
 0x54d   :  { %9820 = vmatmul.msk.f32.gmra.mxu0 %vm20_vm1, %v12300_v34  ;;  %16629 = vst [vmem:[#allocation58_spill] sm:$0xff] %v12649_v43 }
 0x54e   :  { %9644 = vmatmul.msk.f32.gmra.mxu1 %vm20_vm1, %v12603_v6 }
 0x552   :  { %v4730_v12 = vpop.f32.mrf.mxu0 }
 0x553   :  { %v12643_v24 = vadd.f32 %v4730_v12, %v16625_v16  ;;  %v12661_v12 = vpop.f32.mrf.mxu2  ;;  %v16641_v16 = vld [vmem:[#allocation27_spill] sm:$0xff] }
 0x555   :  { %9821 = vmatmul.msk.f32.gmra.mxu0 %vm20_vm1, %v12314_v39  ;;  %v16615_v39 = vld [vmem:[#allocation78_spill] sm:$0xff]  ;;  %16626 = vst [vmem:[#allocation57_spill] sm:$0xff] %v12643_v24 }
 0x55a   :  { %v4733_v8 = vpop.f32.mrf.mxu0 }
 0x55d   :  { %9822 = vmatmul.msk.f32.gmra.mxu0 %vm20_vm1, %v12328_v63  ;;  %v16617_v63 = vld [vmem:[#allocation42_spill] sm:$0xff] }
 0x562   :  { %v4736_v9 = vpop.f32.mrf.mxu0 }
 0x565   :  { %9823 = vmatmul.msk.f32.gmra.mxu0 %vm20_vm1, %v12340_v48  ;;  %v16618_v48 = vld [vmem:[#allocation38_spill] sm:$0xff] }
 0x56a   :  { %v4739_v53 = vpop.f32.mrf.mxu0 }
 0x56b   :  { %v12629_v37 = vadd.f32 %v4739_v53, %v16618_v48  ;;  %v12673_v48 = vpop.f32.mrf.mxu3 }
 0x56d   :  { %9824 = vmatmul.msk.f32.gmra.mxu0 %vm20_vm1, %v12357_v15  ;;  %16619 = vst [vmem:[#allocation153_spill] sm:$0xff] %v12629_v37  ;;  %v16620_v15 = vld [vmem:[#allocation77_spill] sm:$0xff] }
 0x56e   :  { %v12633_v11 = vadd.f32 %v4736_v9, %v16620_v15  ;;  %v16631_v9 = vld [vmem:[#allocation33_spill] sm:$0xff] }
 0x56f   :  { %v12658_v53 = vadd.f32 %v4721_v3, %v16631_v9  ;;  %v16638_v3 = vld [vmem:[#allocation29_spill] sm:$0xff]  ;;  %v16645_v9 = vld [vmem:[#allocation48_spill] sm:$0xff] }
 0x570   :  { %16621 = vst [vmem:[#allocation84_spill] sm:$0xff] %v12633_v11  ;;  %v12677_v15 = vadd.f32 %v12564_v32, %v16638_v3  ;;  %v12696_v32 = vpop.f32.mrf.mxu2 }
 0x571   :  { %16632 = vst [vmem:[#allocation85_spill] sm:$0xff] %v12658_v53 }
 0x572   :  { %v4742_v10 = vpop.f32.mrf.mxu0  ;;  %16639 = vst [vmem:[#allocation60_spill] sm:$0xff] %v12677_v15 }
 0x573   :  { %v12623_v18 = vadd.f32 %v4742_v10, %v16615_v39  ;;  %v16633_v10 = vld [vmem:[#allocation32_spill] sm:$0xff]  ;;  %v16636_v39 = vld [vmem:[#allocation75_spill] sm:$0xff] }
 0x575   :  { %9825 = vmatmul.msk.f32.gmra.mxu0 %vm20_vm1, %v12371_v36  ;;  %16616 = vst [vmem:[#allocation56_spill] sm:$0xff] %v12623_v18  ;;  %v16623_v36 = vld [vmem:[#allocation36_spill] sm:$0xff] }
 0x576   :  { %v12639_v7 = vadd.f32 %v4733_v8, %v16623_v36 }
 0x578   :  { %16624 = vst [vmem:[#allocation221_spill] sm:$0xff] %v12639_v7 }
 0x57a   :  { %v4745_v34 = vpop.f32.mrf.mxu0 }
 0x57b   :  { %v12620_v62 = vadd.f32 %v4745_v34, %v12364_v27  ;;  %v12664_v34 = vadd.f32 %v4718_v29, %v16633_v10  ;;  %v12680_v29 = vpop.f32.mrf.mxu1  ;;  %v16646_v10 = vld [vmem:[#allocation23_spill] sm:$0xff] }
 0x57d   :  { %16614 = vst [vmem:[#allocation55_spill] sm:$0xff] %v12620_v62  ;;  %9826 = vmatmul.msk.f32.gmra.mxu0 %vm20_vm1, %v16617_v63  ;;  %4928 = vmatpush.msra.mxu2 %v12620_v62  ;;  %v12670_v63 = vadd.f32 %v4715_v33, %v16636_v39  ;;  %v16643_v33 = vld [vmem:[#allocation73_spill] sm:$0xff] }
 0x57e   :  { %16634 = vst [vmem:[#allocation208_spill] sm:$0xff] %v12664_v34  ;;  %v12691_v46 = vadd.f32 %v12523_v41, %v16643_v33  ;;  %v12708_v41 = vpop.f32.mrf.mxu3 }
 0x57f   :  { %4929 = vmatpush.msra.mxu2 %v12623_v18  ;;  %16637 = vst [vmem:[#allocation224_spill] sm:$0xff] %v12670_v63 }
 0x580   :  { %16644 = vst [vmem:[#allocation86_spill] sm:$0xff] %v12691_v46 }
 0x581   :  { %4930 = vmatpush.msra.mxu2 %v12629_v37  ;;  %v16663_v37 = vld [vmem:[#allocation102_spill] sm:$0xff] }
 0x582   :  { %v12636_v27 = vpop.f32.mrf.mxu0  ;;  %v1113_v18 = vadd.f32 %v16664_v59, %v16663_v37  ;;  %v16674_v59 = vld [vmem:[#allocation150_spill] sm:$0xff] }
 0x583   :  { %16622 = vst [vmem:[#allocation204_spill] sm:$0xff] %v12636_v27  ;;  %4931 = vmatpush.msra.mxu2 %v12633_v11 }
 0x585   :  { %9827 = vmatmul.msk.f32.gmra.mxu0 %vm20_vm1, %v16627_v30  ;;  %4932 = vmatpush.msra.mxu2 %v12639_v7  ;;  %v12686_v30 = vadd.f32 %v12553_v44, %v16641_v16  ;;  %v16648_v44 = vld [vmem:[#allocation21_spill] sm:$0xff]  ;;  %v12713_v16 = vpop.f32.mrf.mxu1 }
 0x586   :  { %v12705_v39 = vadd.f32 %v12461_v42, %v16648_v44 }
 0x587   :  { %4933 = vmatpush.msra.mxu2 %v12643_v24  ;;  %16642 = vst [vmem:[#allocation159_spill] sm:$0xff] %v12686_v30  ;;  %v16659_v24 = vld [vmem:[#allocation105_spill] sm:$0xff] }
 0x588   :  { %16649 = vst [vmem:[#allocation63_spill] sm:$0xff] %v12705_v39  ;;  %v1116_v7 = vadd.f32 %v16660_v35, %v16659_v24 }
 0x589   :  { %4934 = vmatpush.msra.mxu2 %v12649_v43  ;;  %v16658_v43 = vld [vmem:[#allocation108_spill] sm:$0xff] }
 0x58a   :  { %v12655_v8 = vpop.f32.mrf.mxu0  ;;  %v1119_v54 = vadd.f32 %v16658_v43, %v16657_v17  ;;  %v1685_v62 = vadd.f32 %v16665_v25, %v1116_v7  ;;  %v16669_v17 = vld [vmem:[#allocation149_spill] sm:$0xff] }
 0x58b   :  { %16630 = vst [vmem:[#allocation156_spill] sm:$0xff] %v12655_v8  ;;  %4935 = vmatpush.msra.mxu2 %v12597_v0  ;;  %v1684_v43 = vadd.f32 %v16669_v17, %v1113_v18  ;;  %v16675_v25 = vld [vmem:[#allocation9_spill] sm:$0xff]  ;;  %v16681_v17 = vld [vmem:[#allocation8_spill] sm:$0xff] }
 0x58c   :  { %v1686_v11 = vadd.f32 %v16661_v26, %v1119_v54  ;;  %v16671_v26 = vld [vmem:[#allocation96_spill] sm:$0xff]  ;;  %v16672_v54 = vld [vmem:[#allocation97_spill] sm:$0xff]  ;;  %v2219_v37 = vadd.f32 %v16674_v59, %v1685_v62  ;;  %v16684_v62 = vld [vmem:[#allocation139_spill] sm:$0xff] }
 0x58d   :  { %9828 = vmatmul.msk.f32.gmra.mxu0 %vm20_vm1, %v16635_v55  ;;  %4936 = vmatpush.msra.mxu2 %v12658_v53  ;;  %v12700_v55 = vadd.f32 %v12491_v19, %v16646_v10  ;;  %v12717_v19 = vpop.f32.mrf.mxu2  ;;  %v12725_v42 = vpop.f32.mrf.mxu1  ;;  %v1107_v24 = vadd.f32 %v16672_v54, %v16671_v26  ;;  %v16683_v26 = vld [vmem:[#allocation91_spill] sm:$0xff] }
 0x58f   :  { %4937 = vmatpush.msra.mxu2 %v12664_v34  ;;  %16647 = vst [vmem:[#allocation212_spill] sm:$0xff] %v12700_v55 }
 0x591   :  { %4938 = vmatpush.msra.mxu2 %v12670_v63 }
 0x592   :  { %v12682_v36 = vpop.f32.mrf.mxu0 }
 0x593   :  { %16640 = vst [vmem:[#allocation61_spill] sm:$0xff] %v12682_v36  ;;  %4939 = vmatpush.msra.mxu2 %v12677_v15  ;;  %v16682_v36 = vld [vmem:[#allocation90_spill] sm:$0xff] }
 0x594   :  { %v1101_v54 = vadd.f32 %v16683_v26, %v16682_v36 }
 0x595   :  { %9829 = vmatmul.msk.f32.gmra.mxu0 %vm20_vm1, %v16645_v9  ;;  %4940 = vmatpush.msra.mxu2 %v12686_v30  ;;  %v12721_v9 = vpop.f32.mrf.mxu3  ;;  %v12727_v10 = vpop.f32.mrf.mxu2 }
 0x597   :  { %4941 = vmatpush.msra.mxu2 %v12691_v46 }
 0x599   :  { %4942 = vmatpush.msra.mxu2 %v12700_v55 }
 0x59a   :  { %v12710_v3 = vpop.f32.mrf.mxu0 }
 0x59b   :  { %16650 = vst [vmem:[#allocation64_spill] sm:$0xff] %v12710_v3  ;;  %4943 = vmatpush.msra.mxu2 %v12705_v39  ;;  %v16686_v3 = vld [vmem:[#allocation59_spill] sm:$0xff] }
 0x59d   :  { %9830 = vmatmul.msk.f32.gmra.mxu0 %vm20_vm1, %v12434_v57  ;;  %v12733_v39 = vpop.f32.mrf.mxu3  ;;  %v12735_v57 = vpop.f32.mrf.mxu1 }
 0x59e   :  { %v12739_v55 = vpop.f32.mrf.mxu2 }
 0x5a2   :  { %v12719_v33 = vpop.f32.mrf.mxu0 }
 0x5a3   :  { %16651 = vst [vmem:[#allocation162_spill] sm:$0xff] %v12719_v33  ;;  %v16688_v33 = vld [vmem:[#allocation88_spill] sm:$0xff] }
 0x5a5   :  { %9831 = vmatmul.msk.f32.gmra.mxu0 %vm20_vm1, %v12463_v13  ;;  %v12743_v13 = vpop.f32.mrf.mxu3  ;;  %v3184_v28 = vpop.f32.mrf.mxu1 }
 0x5aa   :  { %v12729_v44 = vpop.f32.mrf.mxu0 }
 0x5ad   :  { %9832 = vmatmul.msk.f32.gmra.mxu0 %vm20_vm1, %v12493_v20  ;;  %v12749_v20 = vpop.f32.mrf.mxu2  ;;  %v12751_v22 = vpop.f32.mrf.mxu3 }
 0x5ae   :  { %v3187_v51 = vpop.f32.mrf.mxu1 }
 0x5b2   :  { %v12737_v5 = vpop.f32.mrf.mxu0 }
 0x5b5   :  { %9833 = vmatmul.msk.f32.gmra.mxu0 %vm20_vm1, %v12525_v2  ;;  %v3722_v15 = vpop.f32.mrf.mxu2  ;;  %v12759_v49 = vpop.f32.mrf.mxu3 }
 0x5b6   :  { %v3190_v63 = vpop.f32.mrf.mxu1 }
 0x5ba   :  { %v12745_v46 = vpop.f32.mrf.mxu0 }
 0x5bd   :  { %9834 = vmatmul.msk.f32.gmra.mxu0 %vm20_vm1, %v12555_v40  ;;  %v3725_v40 = vpop.f32.mrf.mxu2  ;;  %v4259_v34 = vpop.f32.mrf.mxu3 }
 0x5be   :  { %v12767_v45 = vpop.f32.mrf.mxu1 }
 0x5bf   :  { %16652 = vst [vmem:[#allocation89_spill] sm:$0xff] %v12767_v45 }
 0x5c2   :  { %v12753_v30 = vpop.f32.mrf.mxu0 }
 0x5c5   :  { %9835 = vmatmul.msk.f32.gmra.mxu0 %vm20_vm1, %v12566_v38  ;;  %v12771_v38 = vpop.f32.mrf.mxu2  ;;  %v12775_v23 = vpop.f32.mrf.mxu3 }
 0x5c6   :  { %16653 = vst [vmem:[#allocation216_spill] sm:$0xff] %v12771_v38 }
 0x5c7   :  { %16654 = vst [vmem:[#allocation66_spill] sm:$0xff] %v12775_v23  ;;  %v16668_v23 = vld [vmem:[#allocation100_spill] sm:$0xff] }
 0x5c8   :  { %v1110_v38 = vadd.f32 %v16668_v23, %v16667_v21  ;;  %v16679_v23 = vld [vmem:[#allocation142_spill] sm:$0xff] }
 0x5c9   :  { %v1682_v18 = vadd.f32 %v16679_v23, %v1107_v24  ;;  %v16689_v23 = vld [vmem:[#allocation136_spill] sm:$0xff] }
 0x5ca   :  { %v12757_v2 = vpop.f32.mrf.mxu0 }
 0x5cd   :  { %9836 = vmatmul.msk.f32.gmra.mxu0 %vm20_vm1, %v12574_v1  ;;  %v12777_v1 = vpop.f32.mrf.mxu1 }
 0x5ce   :  { %16655 = vst [vmem:[#allocation67_spill] sm:$0xff] %v12777_v1  ;;  %v16676_v1 = vld [vmem:[#allocation93_spill] sm:$0xff] }
 0x5d2   :  { %v12763_v56 = vpop.f32.mrf.mxu0 }
 0x5d5   :  { %9837 = vmatmul.msk.f32.gmra.mxu0 %vm20_vm1, %v12582_v31  ;;  %v12783_v31 = vpop.f32.mrf.mxu2 }
 0x5d6   :  { %16656 = vst [vmem:[#allocation165_spill] sm:$0xff] %v12783_v31  ;;  %v16670_v31 = vld [vmem:[#allocation154_spill] sm:$0xff] }
 0x5d7   :  { %v2220_v35 = vadd.f32 %v16670_v31, %v1686_v11  ;;  %v16680_v11 = vld [vmem:[#allocation146_spill] sm:$0xff] }
 0x5d8   :  { %v2218_v31 = vadd.f32 %v16680_v11, %v1684_v43  ;;  %v1680_v43 = vadd.f32 %v16689_v23, %v1101_v54  ;;  %v16696_v54 = vld [vmem:[#allocation130_spill] sm:$0xff] }
 0x5d9   :  { %v2754_v7 = vadd.f32 %v16675_v25, %v2220_v35  ;;  %v16685_v35 = vld [vmem:[#allocation141_spill] sm:$0xff] }
 0x5da   :  { %v12769_v53 = vpop.f32.mrf.mxu0 }
 0x5db   :  { %v3288_v8 = vadd.f32 %v3190_v63, %v2754_v7  ;;  %v16691_v63 = vld [vmem:[#allocation138_spill] sm:$0xff] }
 0x5dc   :  { %v16692_v7 = vld [vmem:[#allocation6_spill] sm:$0xff] }
 0x5dd   :  { %9838 = vmatmul.msk.f32.gmra.mxu0 %vm20_vm1, %v12588_v60  ;;  %v12790_v60 = vpop.f32.mrf.mxu3  ;;  %v12812_v21 = vpop.f32.mrf.mxu2  ;;  %v3823_v26 = vadd.f32 %v3725_v40, %v3288_v8 }
 0x5de   :  { %16662 = vst [vmem:[#allocation92_spill] sm:$0xff] %v12790_v60  ;;  %v16673_v60 = vld [vmem:[#allocation145_spill] sm:$0xff] }
 0x5df   :  { %v1683_v45 = vadd.f32 %v16673_v60, %v1110_v38  ;;  %16678 = vst [vmem:[#allocation69_spill] sm:$0xff] %v12812_v21  ;;  %v4436_v60 = vld [vmem:[#allocation2 + $0x34a] sm:$0xff]  ;;  %v16687_v21 = vld [vmem:[#allocation87_spill] sm:$0xff]  ;;  %v4357_v40 = vadd.f32 %v4259_v34, %v3823_v26 }
 0x5e0   :  { %v1098_v24 = vadd.f32 %v16688_v33, %v16687_v21 }
 0x5e1   :  { %v2217_v25 = vadd.f32 %v16685_v35, %v1683_v45  ;;  %v2214_v35 = vadd.f32 %v16696_v54, %v1680_v43  ;;  %v16729_v54 = vld [vmem:[#allocation156_spill] sm:$0xff] }
 0x5e2   :  { %v12779_v0 = vpop.f32.mrf.mxu0 }
 0x5e3   :  { %v2751_v36 = vadd.f32 %v16692_v7, %v2217_v25 }
 0x5e5   :  { %9839 = vmatmul.msk.f32.gmra.mxu0 %vm20_vm1, %v12594_v52  ;;  %v12797_v52 = vpop.f32.mrf.mxu1  ;;  %v12825_v11 = vpop.f32.mrf.mxu3  ;;  %v3285_v21 = vadd.f32 %v12735_v57, %v2751_v36 }
 0x5e6   :  { %16666 = vst [vmem:[#allocation219_spill] sm:$0xff] %v12797_v52  ;;  %v16677_v52 = vld [vmem:[#allocation94_spill] sm:$0xff] }
 0x5e7   :  { %v1104_v27 = vadd.f32 %v16677_v52, %v16676_v1  ;;  %v2752_v1 = vadd.f32 %v16686_v3, %v2218_v31  ;;  %16690 = vst [vmem:[#allocation70_spill] sm:$0xff] %v12825_v11  ;;  %v16695_v31 = vld [vmem:[#allocation5_spill] sm:$0xff]  ;;  %v16753_v11 = vld [vmem:[#allocation215_spill] sm:$0xff] }
 0x5e9   :  { %v1681_v59 = vadd.f32 %v16684_v62, %v1104_v27  ;;  %v16693_v27 = vld [vmem:[#allocation133_spill] sm:$0xff] }
 0x5ea   :  { %v12792_v47 = vpop.f32.mrf.mxu0  ;;  %v1679_v45 = vadd.f32 %v16693_v27, %v1098_v24 }
 0x5ed   :  { %9840 = vmatmul.msk.f32.gmra.mxu0 %vm20_vm1, %v12603_v6  ;;  %v2753_v6 = vadd.f32 %v16681_v17, %v2219_v37  ;;  %v2216_v37 = vadd.f32 %v16691_v63, %v1682_v18  ;;  %v3286_v17 = vadd.f32 %v3184_v28, %v2752_v1  ;;  %v12831_v62 = vpop.f32.mrf.mxu1  ;;  %v16697_v18 = vld [vmem:[#allocation225_spill] sm:$0xff]  ;;  %v16699_v1 = vld [vmem:[#allocation223_spill] sm:$0xff]  ;;  %v12842_v63 = vpop.f32.mrf.mxu2 }
 0x5ee   :  { %v2748_v24 = vadd.f32 %v16699_v1, %v2214_v35  ;;  %16700 = vst [vmem:[#allocation167_spill] sm:$0xff] %v12842_v63 }
 0x5ef   :  { %v3287_v52 = vadd.f32 %v3187_v51, %v2753_v6  ;;  %v16694_v51 = vld [vmem:[#allocation134_spill] sm:$0xff]  ;;  %v2750_v33 = vadd.f32 %v16695_v31, %v2216_v37  ;;  %v3821_v8 = vadd.f32 %v12749_v20, %v3286_v17  ;;  %v16723_v31 = vld [vmem:[#allocation64_spill] sm:$0xff] }
 0x5f0   :  { %v2215_v3 = vadd.f32 %v16694_v51, %v1681_v59  ;;  %v4437_v37 = vld [vmem:[#allocation2 + $0x352] sm:$0xff]  ;;  %v3282_v34 = vadd.f32 %v12680_v29, %v2748_v24  ;;  %v12906_v51 = vadd.f32 %v12745_v46, %v12509_v14 }
 0x5f1   :  { %v3822_v6 = vadd.f32 %v3722_v15, %v3287_v52  ;;  %v3284_v28 = vadd.f32 %v12725_v42, %v2750_v33  ;;  %v3820_v15 = vadd.f32 %v12739_v55, %v3285_v21  ;;  %v16702_v42 = vld [vmem:[#allocation220_spill] sm:$0xff]  ;;  %v4355_v36 = vadd.f32 %v12751_v22, %v3821_v8  ;;  %v16726_v21 = vld [vmem:[#allocation61_spill] sm:$0xff] }
 0x5f2   :  { %v4790_v38 = vpop.f32.mrf.mxu0  ;;  %v2749_v23 = vadd.f32 %v16697_v18, %v2215_v3  ;;  %16715 = vst [vmem:[#allocation111_spill] sm:$0xff] %v12906_v51  ;;  %v16718_v3 = vld [vmem:[#allocation162_spill] sm:$0xff] }
 0x5f3   :  { %v4356_v52 = vadd.f32 %v12759_v49, %v3822_v6  ;;  %v3819_v20 = vadd.f32 %v12727_v10, %v3284_v28  ;;  %v4354_v26 = vadd.f32 %v12743_v13, %v3820_v15  ;;  %v12863_v29 = vadd.f32 %v12792_v47, %v4355_v36  ;;  %v16732_v28 = vld [vmem:[#allocation204_spill] sm:$0xff] }
 0x5f4   :  { %v3283_v57 = vadd.f32 %v12713_v16, %v2749_v23  ;;  %v12857_v16 = vpop.f32.mrf.mxu3  ;;  %v3817_v10 = vadd.f32 %v12696_v32, %v3282_v34  ;;  %v12923_v14 = vadd.f32 %v16718_v3, %v12429_v61  ;;  %v16728_v61 = vld [vmem:[#allocation79_spill] sm:$0xff]  ;;  %v16731_v23 = vld [vmem:[#allocation41_spill] sm:$0xff] }
 0x5f5   :  { %9841 = vmatmul.msk.f32.gmra.mxu0 %vm20_vm1, %v4436_v60  ;;  %v16698_v60 = vld [vmem:[#allocation127_spill] sm:$0xff]  ;;  %v12853_v17 = vadd.f32 %v4790_v38, %v4356_v52  ;;  %16704 = vst [vmem:[#allocation170_spill] sm:$0xff] %v12857_v16  ;;  %v12866_v22 = vpop.f32.mrf.mxu1  ;;  %v4353_v38 = vadd.f32 %v12733_v39, %v3819_v20  ;;  %v12871_v27 = vadd.f32 %v12779_v0, %v4354_v26  ;;  %v16754_v16 = vld [vmem:[#allocation40_spill] sm:$0xff] }
 0x5f6   :  { %v2213_v25 = vadd.f32 %v16698_v60, %v1679_v45  ;;  %v3818_v55 = vadd.f32 %v12717_v19, %v3283_v57  ;;  %16705 = vst [vmem:[#allocation98_spill] sm:$0xff] %v12863_v29  ;;  %v12882_v45 = vpop.f32.mrf.mxu2  ;;  %v4351_v32 = vadd.f32 %v12708_v41, %v3817_v10  ;;  %v12944_v35 = vadd.f32 %v16729_v54, %v16728_v61 }
 0x5f7   :  { %16703 = vst [vmem:[#allocation222_spill] sm:$0xff] %v12853_v17  ;;  %v12879_v13 = vadd.f32 %v12769_v53, %v4353_v38  ;;  %v12951_v8 = vadd.f32 %v16732_v28, %v16731_v23 }
 0x5f8   :  { %v2747_v7 = vadd.f32 %v16702_v42, %v2213_v25  ;;  %16706 = vst [vmem:[#allocation172_spill] sm:$0xff] %v12871_v27  ;;  %v4352_v47 = vadd.f32 %v12721_v9, %v3818_v55 }
 0x5f9   :  { %16708 = vst [vmem:[#allocation175_spill] sm:$0xff] %v12879_v13 }
 0x5fa   :  { %v4793_v59 = vpop.f32.mrf.mxu0  ;;  %v3281_v49 = vadd.f32 %v12652_v58, %v2747_v7  ;;  %16709 = vst [vmem:[#allocation104_spill] sm:$0xff] %v12882_v45  ;;  %v12886_v0 = vadd.f32 %v12763_v56, %v4352_v47  ;;  %v16771_v45 = vld [vmem:[#allocation126_spill] sm:$0xff] }
 0x5fb   :  { %v12847_v43 = vadd.f32 %v4793_v59, %v4357_v40  ;;  %16719 = vst [vmem:[#allocation188_spill] sm:$0xff] %v12923_v14 }
 0x5fc   :  { %v3816_v19 = vadd.f32 %v12661_v12, %v3281_v49  ;;  %16710 = vst [vmem:[#allocation178_spill] sm:$0xff] %v12886_v0  ;;  %v12891_v12 = vadd.f32 %v12757_v2, %v4351_v32  ;;  %v12894_v53 = vpop.f32.mrf.mxu3  ;;  %v12918_v2 = vadd.f32 %v12729_v44, %v12447_v4  ;;  %v16725_v44 = vld [vmem:[#allocation45_spill] sm:$0xff] }
 0x5fd   :  { %16701 = vst [vmem:[#allocation95_spill] sm:$0xff] %v12847_v43  ;;  %9842 = vmatmul.msk.f32.gmra.mxu0 %vm20_vm1, %v4437_v37  ;;  %4948 = vmatpush.msra.mxu3 %v12847_v43  ;;  %v12900_v41 = vpop.f32.mrf.mxu1  ;;  %v12939_v6 = vadd.f32 %v16726_v21, %v16725_v44 }
 0x5fe   :  { %v4350_v39 = vadd.f32 %v12673_v48, %v3816_v19  ;;  %16711 = vst [vmem:[#allocation107_spill] sm:$0xff] %v12891_v12  ;;  %v12911_v48 = vadd.f32 %v12737_v5, %v12479_v50  ;;  %v16722_v5 = vld [vmem:[#allocation47_spill] sm:$0xff] }
 0x5ff   :  { %4949 = vmatpush.msra.mxu3 %v12853_v17  ;;  %16712 = vst [vmem:[#allocation180_spill] sm:$0xff] %v12894_v53  ;;  %v12932_v33 = vadd.f32 %v16723_v31, %v16722_v5  ;;  %v16749_v17 = vld [vmem:[#allocation206_spill] sm:$0xff] }
 0x600   :  { %v12897_v9 = vadd.f32 %v12753_v30, %v4350_v39  ;;  %16716 = vst [vmem:[#allocation185_spill] sm:$0xff] %v12911_v48  ;;  %v12914_v30 = vpop.f32.mrf.mxu2 }
 0x601   :  { %4950 = vmatpush.msra.mxu3 %v12863_v29  ;;  %16717 = vst [vmem:[#allocation113_spill] sm:$0xff] %v12918_v2 }
 0x602   :  { %v12874_v58 = vpop.f32.mrf.mxu0  ;;  %16713 = vst [vmem:[#allocation109_spill] sm:$0xff] %v12897_v9 }
 0x603   :  { %16707 = vst [vmem:[#allocation101_spill] sm:$0xff] %v12874_v58  ;;  %4951 = vmatpush.msra.mxu3 %v12871_v27  ;;  %v16748_v27 = vld [vmem:[#allocation140_spill] sm:$0xff] }
 0x604   :  { %v12926_v46 = vpop.f32.mrf.mxu3  ;;  %16724 = vst [vmem:[#allocation117_spill] sm:$0xff] %v12932_v33 }
 0x605   :  { %4952 = vmatpush.msra.mxu3 %v12879_v13  ;;  %16720 = vst [vmem:[#allocation115_spill] sm:$0xff] %v12926_v46  ;;  %v12935_v4 = vpop.f32.mrf.mxu1  ;;  %v16747_v13 = vld [vmem:[#allocation46_spill] sm:$0xff]  ;;  %v16761_v46 = vmov 1.0  }
 0x606   :  { %16727 = vst [vmem:[#allocation194_spill] sm:$0xff] %v12939_v6  ;;  %v1161_v29 = vadd.f32 %v16748_v27, %v16747_v13  ;;  %v16759_v13 = vld [vmem:[#allocation37_spill] sm:$0xff] }
 0x607   :  { %4953 = vmatpush.msra.mxu3 %v12886_v0  ;;  %16730 = vst [vmem:[#allocation119_spill] sm:$0xff] %v12944_v35 }
 0x608   :  { %v12947_v18 = vpop.f32.mrf.mxu2  ;;  %16733 = vst [vmem:[#allocation198_spill] sm:$0xff] %v12951_v8 }
 0x609   :  { %4954 = vmatpush.msra.mxu3 %v12891_v12 }
 0x60a   :  { %v12902_v56 = vpop.f32.mrf.mxu0 }
 0x60b   :  { %16714 = vst [vmem:[#allocation183_spill] sm:$0xff] %v12902_v56  ;;  %4955 = vmatpush.msra.mxu3 %v12897_v9  ;;  %v16746_v9 = vld [vmem:[#allocation211_spill] sm:$0xff] }
 0x60c   :  { %v12957_v60 = vpop.f32.mrf.mxu3 }
 0x60d   :  { %4956 = vmatpush.msra.mxu3 %v12906_v51  ;;  %16735 = vst [vmem:[#allocation201_spill] sm:$0xff] %v12957_v60  ;;  %v12959_v25 = vpop.f32.mrf.mxu1  ;;  %v16769_v60 = vld [vmem:[#allocation26_spill] sm:$0xff] }
 0x60f   :  { %4957 = vmatpush.msra.mxu3 %v12911_v48  ;;  %v16745_v48 = vld [vmem:[#allocation143_spill] sm:$0xff] }
 0x610   :  { %v12961_v1 = vpop.f32.mrf.mxu2 }
 0x611   :  { %4958 = vmatpush.msra.mxu3 %v12918_v2  ;;  %v16744_v2 = vld [vmem:[#allocation49_spill] sm:$0xff] }
 0x612   :  { %v12928_v50 = vpop.f32.mrf.mxu0  ;;  %v1164_v51 = vadd.f32 %v16745_v48, %v16744_v2  ;;  %v16755_v48 = vld [vmem:[#allocation135_spill] sm:$0xff] }
 0x613   :  { %16721 = vst [vmem:[#allocation191_spill] sm:$0xff] %v12928_v50  ;;  %4959 = vmatpush.msra.mxu3 %v12923_v14  ;;  %v16092_v14 = vmov 1.0   ;;  %v16752_v50 = vld [vmem:[#allocation202_spill] sm:$0xff]  ;;  %v1155_v2 = vadd.f32 %v16755_v48, %v16754_v16  ;;  %v16766_v16 = vld [vmem:[#allocation129_spill] sm:$0xff] }
 0x614   :  { %v12965_v59 = vpop.f32.mrf.mxu3  ;;  %4924 = vmatmul.f32.vlgmr.msrb.gmra.mxu2 %v16092_v14  ;;  %v1701_v43 = vadd.f32 %v16749_v17, %v1164_v51  ;;  %v16760_v17 = vld [vmem:[#allocation132_spill] sm:$0xff] }
 0x615   :  { %4960 = vmatpush.msra.mxu3 %v12932_v33  ;;  %16737 = vst [vmem:[#allocation205_spill] sm:$0xff] %v12965_v59  ;;  %v12967_v37 = vpop.f32.mrf.mxu1  ;;  %v1152_v51 = vadd.f32 %v16760_v17, %v16759_v13 }
 0x617   :  { %4961 = vmatpush.msra.mxu3 %v12939_v6 }
 0x618   :  { %v12971_v15 = vpop.f32.mrf.mxu2 }
 0x619   :  { %4962 = vmatpush.msra.mxu3 %v12944_v35  ;;  %v16743_v35 = vld [vmem:[#allocation147_spill] sm:$0xff] }
 0x61a   :  { %v12954_v40 = vpop.f32.mrf.mxu0 }
 0x61b   :  { %16734 = vst [vmem:[#allocation121_spill] sm:$0xff] %v12954_v40  ;;  %4963 = vmatpush.msra.mxu3 %v12951_v8  ;;  %v16742_v8 = vld [vmem:[#allocation52_spill] sm:$0xff]  ;;  %v1700_v40 = vadd.f32 %v16752_v50, %v1161_v29  ;;  %v16763_v29 = vld [vmem:[#allocation203_spill] sm:$0xff] }
 0x61c   :  { %v12973_v52 = vpop.f32.mrf.mxu3  ;;  %v1167_v6 = vadd.f32 %v16743_v35, %v16742_v8  ;;  %4964 = vmatmul.f32.vlgmr.msra.gmra.mxu3 %v16092_v14  ;;  %v16750_v35 = vld [vmem:[#allocation43_spill] sm:$0xff]  ;;  %v16751_v8 = vld [vmem:[#allocation137_spill] sm:$0xff]  ;;  %4944 = vmatmul.f32.vlgmr.msra.gmra.mxu2 %v16761_v46 }
 0x61d   :  { %v12975_v42 = vpop.f32.mrf.mxu1  ;;  %v1158_v56 = vadd.f32 %v16751_v8, %v16750_v35  ;;  %v16762_v35 = vld [vmem:[#allocation192_spill] sm:$0xff]  ;;  %v2234_v50 = vadd.f32 %v16763_v29, %v1700_v40  ;;  %v16770_v46 = vld [vmem:[#allocation31_spill] sm:$0xff] }
 0x61e   :  { %v1702_v12 = vadd.f32 %v16746_v9, %v1167_v6  ;;  %v16756_v9 = vld [vmem:[#allocation196_spill] sm:$0xff]  ;;  %v1698_v8 = vadd.f32 %v16762_v35, %v1155_v2  ;;  %v1146_v2 = vadd.f32 %v16771_v45, %v16770_v46  ;;  %v16772_v35 = vld [vmem:[#allocation186_spill] sm:$0xff]  ;;  %v16773_v29 = vld [vmem:[#allocation195_spill] sm:$0xff] }
 0x61f   :  { %v1699_v6 = vadd.f32 %v16756_v9, %v1158_v56  ;;  %v2768_v13 = vadd.f32 %v16769_v60, %v2234_v50  ;;  %v16780_v46 = vld [vmem:[#allocation25_spill] sm:$0xff] }
 0x620   :  { %v12979_v34 = vpop.f32.mrf.mxu2  ;;  %v2236_v14 = vadd.f32 %v16753_v11, %v1702_v12  ;;  %v16764_v11 = vld [vmem:[#allocation74_spill] sm:$0xff] }
 0x622   :  { %v12963_v24 = vpop.f32.mrf.mxu0 }
 0x623   :  { %16736 = vst [vmem:[#allocation123_spill] sm:$0xff] %v12963_v24 }
 0x624   :  { %v12981_v20 = vpop.f32.mrf.mxu3 }
 0x625   :  { %v12985_v49 = vpop.f32.mrf.mxu1 }
 0x628   :  { %v12987_v55 = vpop.f32.mrf.mxu2 }
 0x62a   :  { %v12969_v57 = vpop.f32.mrf.mxu0 }
 0x62b   :  { %16738 = vst [vmem:[#allocation125_spill] sm:$0xff] %v12969_v57  ;;  %v16757_v57 = vld [vmem:[#allocation207_spill] sm:$0xff] }
 0x62c   :  { %v12991_v10 = vpop.f32.mrf.mxu3  ;;  %v2235_v53 = vadd.f32 %v16757_v57, %v1701_v43  ;;  %v16767_v43 = vld [vmem:[#allocation189_spill] sm:$0xff] }
 0x62d   :  { %v12993_v38 = vpop.f32.mrf.mxu1  ;;  %v1697_v57 = vadd.f32 %v16767_v43, %v1152_v51  ;;  %v16777_v51 = vld [vmem:[#allocation182_spill] sm:$0xff] }
 0x62e   :  { %v2769_v12 = vadd.f32 %v16764_v11, %v2235_v53  ;;  %v2232_v53 = vadd.f32 %v16773_v29, %v1698_v8  ;;  %v1695_v43 = vadd.f32 %v16777_v51, %v1146_v2  ;;  %v16782_v8 = vld [vmem:[#allocation179_spill] sm:$0xff]  ;;  %v16787_v51 = vld [vmem:[#allocation176_spill] sm:$0xff] }
 0x630   :  { %v12995_v19 = vpop.f32.mrf.mxu2 }
 0x632   :  { %v12977_v7 = vpop.f32.mrf.mxu0 }
 0x633   :  { %16739 = vst [vmem:[#allocation209_spill] sm:$0xff] %v12977_v7  ;;  %v16758_v7 = vld [vmem:[#allocation30_spill] sm:$0xff] }
 0x634   :  { %v12999_v32 = vpop.f32.mrf.mxu3  ;;  %v2770_v27 = vadd.f32 %v16758_v7, %v2236_v14  ;;  %v16768_v14 = vld [vmem:[#allocation199_spill] sm:$0xff] }
 0x635   :  { %v3229_v39 = vpop.f32.mrf.mxu1  ;;  %v2233_v7 = vadd.f32 %v16768_v14, %v1699_v6  ;;  %v16778_v14 = vld [vmem:[#allocation190_spill] sm:$0xff] }
 0x636   :  { %v2231_v60 = vadd.f32 %v16778_v14, %v1697_v57 }
 0x638   :  { %v13003_v5 = vpop.f32.mrf.mxu2 }
 0x63a   :  { %v12983_v36 = vpop.f32.mrf.mxu0 }
 0x63b   :  { %16740 = vst [vmem:[#allocation128_spill] sm:$0xff] %v12983_v36  ;;  %v16765_v36 = vld [vmem:[#allocation34_spill] sm:$0xff] }
 0x63c   :  { %v13005_v31 = vpop.f32.mrf.mxu3  ;;  %v1149_v48 = vadd.f32 %v16766_v16, %v16765_v36  ;;  %v16775_v16 = vld [vmem:[#allocation28_spill] sm:$0xff] }
 0x63d   :  { %v3232_v44 = vpop.f32.mrf.mxu1 }
 0x63e   :  { %v1696_v40 = vadd.f32 %v16772_v35, %v1149_v48  ;;  %v3302_v11 = vadd.f32 %v3232_v44, %v2768_v13  ;;  %v16781_v48 = vld [vmem:[#allocation122_spill] sm:$0xff] }
 0x63f   :  { %v1140_v35 = vadd.f32 %v16781_v48, %v16780_v46  ;;  %v16794_v48 = vld [vmem:[#allocation18_spill] sm:$0xff] }
 0x640   :  { %v3767_v61 = vpop.f32.mrf.mxu2 }
 0x641   :  { %v3837_v13 = vadd.f32 %v3767_v61, %v3302_v11  ;;  %v16791_v61 = vld [vmem:[#allocation118_spill] sm:$0xff] }
 0x642   :  { %v12989_v26 = vpop.f32.mrf.mxu0 }
 0x643   :  { %16741 = vst [vmem:[#allocation213_spill] sm:$0xff] %v12989_v26  ;;  %v16776_v26 = vld [vmem:[#allocation124_spill] sm:$0xff] }
 0x644   :  { %v13009_v54 = vpop.f32.mrf.mxu3  ;;  %v1143_v59 = vadd.f32 %v16776_v26, %v16775_v16  ;;  %v16786_v16 = vld [vmem:[#allocation120_spill] sm:$0xff] }
 0x645   :  { %v3235_v28 = vpop.f32.mrf.mxu1 }
 0x646   :  { %v3303_v17 = vadd.f32 %v3235_v28, %v2769_v12  ;;  %v16779_v28 = vld [vmem:[#allocation72_spill] sm:$0xff]  ;;  %v1694_v29 = vadd.f32 %v16782_v8, %v1143_v59 }
 0x647   :  { %v2766_v50 = vadd.f32 %v16779_v28, %v2232_v53  ;;  %v1693_v53 = vadd.f32 %v16787_v51, %v1140_v35  ;;  %v16803_v51 = vld [vmem:[#allocation174_spill] sm:$0xff] }
 0x648   :  { %v3770_v33 = vpop.f32.mrf.mxu2 }
 0x649   :  { %v3838_v45 = vadd.f32 %v3770_v33, %v3303_v17  ;;  %v3300_v26 = vadd.f32 %v12993_v38, %v2766_v50  ;;  %v16789_v17 = vld [vmem:[#allocation71_spill] sm:$0xff]  ;;  %v16793_v50 = vld [vmem:[#allocation181_spill] sm:$0xff] }
 0x64a   :  { %v12997_v47 = vpop.f32.mrf.mxu0  ;;  %v16790_v38 = vld [vmem:[#allocation19_spill] sm:$0xff]  ;;  %v2228_v46 = vadd.f32 %v16793_v50, %v1694_v29  ;;  %v16799_v29 = vld [vmem:[#allocation17_spill] sm:$0xff] }
 0x64b   :  { %v1134_v11 = vadd.f32 %v16791_v61, %v16790_v38  ;;  %v3835_v8 = vadd.f32 %v12995_v19, %v3300_v26  ;;  %v16801_v26 = vld [vmem:[#allocation114_spill] sm:$0xff]  ;;  %v16809_v61 = vld [vmem:[#allocation15_spill] sm:$0xff] }
 0x64c   :  { %v4304_v58 = vpop.f32.mrf.mxu3 }
 0x64d   :  { %v3238_v24 = vpop.f32.mrf.mxu1  ;;  %v4372_v28 = vadd.f32 %v4304_v58, %v3838_v45  ;;  %v16795_v58 = vld [vmem:[#allocation16_spill] sm:$0xff]  ;;  %v16797_v45 = vld [vmem:[#allocation169_spill] sm:$0xff] }
 0x64e   :  { %v3304_v63 = vadd.f32 %v3238_v24, %v2770_v27  ;;  %v16774_v24 = vld [vmem:[#allocation24_spill] sm:$0xff] }
 0x64f   :  { %v2767_v27 = vadd.f32 %v16774_v24, %v2233_v7  ;;  %v16783_v7 = vld [vmem:[#allocation187_spill] sm:$0xff]  ;;  %v16785_v24 = vld [vmem:[#allocation22_spill] sm:$0xff] }
 0x650   :  { %v3773_v56 = vpop.f32.mrf.mxu2  ;;  %v2230_v44 = vadd.f32 %v16783_v7, %v1696_v40  ;;  %v1137_v57 = vadd.f32 %v16786_v16, %v16785_v24  ;;  %v16802_v16 = vld [vmem:[#allocation166_spill] sm:$0xff] }
 0x651   :  { %v3839_v36 = vadd.f32 %v3773_v56, %v3304_v63  ;;  %v3301_v12 = vadd.f32 %v3229_v39, %v2767_v27  ;;  %v16784_v63 = vld [vmem:[#allocation20_spill] sm:$0xff] }
 0x652   :  { %v13001_v3 = vpop.f32.mrf.mxu0  ;;  %v2765_v56 = vadd.f32 %v16784_v63, %v2231_v60  ;;  %v16788_v39 = vld [vmem:[#allocation184_spill] sm:$0xff]  ;;  %v2764_v27 = vadd.f32 %v16789_v17, %v2230_v44  ;;  %v1691_v44 = vadd.f32 %v16797_v45, %v1134_v11  ;;  %v16798_v63 = vld [vmem:[#allocation177_spill] sm:$0xff]  ;;  %v16805_v17 = vld [vmem:[#allocation10_spill] sm:$0xff] }
 0x653   :  { %v2229_v33 = vadd.f32 %v16788_v39, %v1695_v43  ;;  %v3836_v40 = vadd.f32 %v13003_v5, %v3301_v12  ;;  %v16796_v5 = vld [vmem:[#allocation116_spill] sm:$0xff] }
 0x654   :  { %v4307_v6 = vpop.f32.mrf.mxu3  ;;  %v3299_v59 = vadd.f32 %v12985_v49, %v2765_v56  ;;  %v3298_v43 = vadd.f32 %v12975_v42, %v2764_v27  ;;  %v4371_v49 = vadd.f32 %v13009_v54, %v3837_v13  ;;  %v1131_v12 = vadd.f32 %v16796_v5, %v16795_v58  ;;  %v16804_v39 = vld [vmem:[#allocation68_spill] sm:$0xff]  ;;  %v16815_v58 = vld [vmem:[#allocation158_spill] sm:$0xff] }
 0x655   :  { %v4373_v2 = vadd.f32 %v4307_v6, %v3839_v36  ;;  %v16792_v36 = vld [vmem:[#allocation173_spill] sm:$0xff]  ;;  %v2763_v35 = vadd.f32 %v16794_v48, %v2229_v33  ;;  %v2227_v56 = vadd.f32 %v16798_v63, %v1693_v53  ;;  %v4370_v19 = vadd.f32 %v13005_v31, %v3836_v40  ;;  %v16806_v27 = vld [vmem:[#allocation112_spill] sm:$0xff] }
 0x656   :  { %v1692_v6 = vadd.f32 %v16792_v36, %v1137_v57  ;;  %v3834_v42 = vadd.f32 %v12987_v55, %v3299_v59  ;;  %v1690_v57 = vadd.f32 %v16802_v16, %v1131_v12  ;;  %v3833_v55 = vadd.f32 %v12979_v34, %v3298_v43  ;;  %v16807_v59 = vld [vmem:[#allocation163_spill] sm:$0xff]  ;;  %v16816_v12 = vld [vmem:[#allocation164_spill] sm:$0xff] }
 0x657   :  { %v3297_v24 = vadd.f32 %v12967_v37, %v2763_v35  ;;  %v2761_v33 = vadd.f32 %v16804_v39, %v2227_v56  ;;  %v4369_v31 = vadd.f32 %v12999_v32, %v3835_v8  ;;  %v16810_v36 = vld [vmem:[#allocation7_spill] sm:$0xff]  ;;  %v16813_v35 = vld [vmem:[#allocation168_spill] sm:$0xff]  ;;  %v16814_v8 = vld [vmem:[#allocation14_spill] sm:$0xff] }
 0x658   :  { %v2226_v53 = vadd.f32 %v16803_v51, %v1692_v6  ;;  %v4368_v32 = vadd.f32 %v12991_v10, %v3834_v42  ;;  %v16811_v6 = vld [vmem:[#allocation110_spill] sm:$0xff]  ;;  %v2224_v43 = vadd.f32 %v16813_v35, %v1690_v57  ;;  %v4367_v10 = vadd.f32 %v12981_v20, %v3833_v55  ;;  %v16818_v20 = vld [vmem:[#allocation161_spill] sm:$0xff]  ;;  %v16824_v57 = vld [vmem:[#allocation219_spill] sm:$0xff] }
 0x659   :  { %v3832_v34 = vadd.f32 %v12971_v15, %v3297_v24  ;;  %v1122_v50 = vadd.f32 %v16811_v6, %v16810_v36  ;;  %v16835_v36 = vld [vmem:[#allocation180_spill] sm:$0xff] }
 0x65a   :  { %v13007_v21 = vpop.f32.mrf.mxu0  ;;  %v2760_v11 = vadd.f32 %v16809_v61, %v2226_v53  ;;  %v16825_v53 = vld [vmem:[#allocation104_spill] sm:$0xff] }
 0x65b   :  { %v1687_v5 = vadd.f32 %v16815_v58, %v1122_v50  ;;  %v16836_v50 = vld [vmem:[#allocation125_spill] sm:$0xff]  ;;  %v16841_v58 = vld [vmem:[#allocation70_spill] sm:$0xff] }
 0x662   :  { %v13011_v23 = vpop.f32.mrf.mxu0 }
 0x66a   :  { %v13020_v0 = vpop.f32.mrf.mxu0 }
 0x66b   :  { %v13090_v54 = vadd.f32 %v13020_v0, %v4371_v49  ;;  %v13102_v0 = vadd.f32 %v13011_v23, %v4370_v19  ;;  %v13114_v23 = vadd.f32 %v13007_v21, %v4369_v31  ;;  %v13126_v21 = vadd.f32 %v13001_v3, %v4368_v32 }
 0x672   :  { %v4838_v9 = vpop.f32.mrf.mxu0 }
 0x673   :  { %v13078_v7 = vadd.f32 %v4838_v9, %v4372_v28  ;;  %v16800_v9 = vld [vmem:[#allocation13_spill] sm:$0xff]  ;;  %v16808_v28 = vld [vmem:[#allocation171_spill] sm:$0xff] }
 0x674   :  { %v1128_v13 = vadd.f32 %v16801_v26, %v16800_v9  ;;  %v2225_v38 = vadd.f32 %v16808_v28, %v1691_v44  ;;  %v16817_v44 = vld [vmem:[#allocation65_spill] sm:$0xff] }
 0x675   :  { %v2758_v63 = vadd.f32 %v16817_v44, %v2224_v43  ;;  %v16820_v9 = vld [vmem:[#allocation205_spill] sm:$0xff]  ;;  %v16838_v43 = vld [vmem:[#allocation170_spill] sm:$0xff]  ;;  %v16843_v44 = vld [vmem:[#allocation92_spill] sm:$0xff] }
 0x676   :  { %v1689_v40 = vadd.f32 %v16807_v59, %v1128_v13  ;;  %v2759_v49 = vadd.f32 %v16814_v8, %v2225_v38  ;;  %v16832_v38 = vld [vmem:[#allocation209_spill] sm:$0xff] }
 0x677   :  { %v3292_v42 = vadd.f32 %v12831_v62, %v2758_v63  ;;  %v16827_v62 = vld [vmem:[#allocation128_spill] sm:$0xff] }
 0x678   :  { %v2223_v45 = vadd.f32 %v16816_v12, %v1689_v40  ;;  %v3293_v56 = vadd.f32 %v12866_v22, %v2759_v49  ;;  %v16821_v22 = vld [vmem:[#allocation213_spill] sm:$0xff]  ;;  %v16831_v40 = vld [vmem:[#allocation115_spill] sm:$0xff] }
 0x679   :  { %v16839_v49 = vld [vmem:[#allocation123_spill] sm:$0xff]  ;;  %v16842_v12 = vld [vmem:[#allocation121_spill] sm:$0xff] }
 0x67a   :  { %v4841_v14 = vpop.f32.mrf.mxu0  ;;  %v3828_v39 = vadd.f32 %v16825_v53, %v3293_v56  ;;  %v16844_v56 = vld [vmem:[#allocation191_spill] sm:$0xff]  ;;  %v16849_v53 = vld [vmem:[#allocation144_spill] sm:$0xff] }
 0x67b   :  { %v13068_v60 = vadd.f32 %v4841_v14, %v4373_v2  ;;  %v2762_v2 = vadd.f32 %v16799_v29, %v2228_v46  ;;  %v1125_v14 = vadd.f32 %v16806_v27, %v16805_v17  ;;  %v16812_v46 = vld [vmem:[#allocation160_spill] sm:$0xff]  ;;  %v16829_v17 = vld [vmem:[#allocation67_spill] sm:$0xff] }
 0x67c   :  { %v4362_v6 = vadd.f32 %v16835_v36, %v3828_v39 }
 0x67d   :  { %4968 = vmatpush.msrb.mxu1 %v13068_v60  ;;  %v3296_v37 = vadd.f32 %v12959_v25, %v2762_v2  ;;  %v3295_v25 = vadd.f32 %v12935_v4, %v2761_v33  ;;  %v1688_v48 = vadd.f32 %v16812_v46, %v1125_v14  ;;  %v3294_v4 = vadd.f32 %v12900_v41, %v2760_v11  ;;  %v16819_v2 = vld [vmem:[#allocation12_spill] sm:$0xff]  ;;  %v16826_v33 = vld [vmem:[#allocation201_spill] sm:$0xff]  ;;  %v16830_v14 = vld [vmem:[#allocation167_spill] sm:$0xff] }
 0x67e   :  { %v4366_v41 = vadd.f32 %v12973_v52, %v3832_v34  ;;  %v2757_v24 = vadd.f32 %v16819_v2, %v2223_v45  ;;  %v3827_v59 = vadd.f32 %v16830_v14, %v3292_v42  ;;  %v16833_v11 = vld [vmem:[#allocation89_spill] sm:$0xff] }
 0x67f   :  { %4969 = vmatpush.msrb.mxu1 %v13078_v7  ;;  %v3831_v15 = vadd.f32 %v12961_v1, %v3296_v37  ;;  %v3830_v29 = vadd.f32 %v12947_v18, %v3295_v25  ;;  %v13136_v1 = vadd.f32 %v12997_v47, %v4367_v10  ;;  %v2222_v3 = vadd.f32 %v16818_v20, %v1688_v48  ;;  %v16822_v18 = vld [vmem:[#allocation157_spill] sm:$0xff]  ;;  %v16823_v47 = vld [vmem:[#allocation11_spill] sm:$0xff] }
 0x680   :  { %v3829_v19 = vadd.f32 %v12914_v30, %v3294_v4  ;;  %v13145_v13 = vadd.f32 %v16821_v22, %v4366_v41  ;;  %v2221_v52 = vadd.f32 %v16822_v18, %v1687_v5  ;;  %v3291_v51 = vadd.f32 %v16824_v57, %v2757_v24  ;;  %v16828_v30 = vld [vmem:[#allocation62_spill] sm:$0xff]  ;;  %v16834_v34 = vld [vmem:[#allocation69_spill] sm:$0xff] }
 0x681   :  { %4970 = vmatpush.msrb.mxu1 %v13090_v54  ;;  %v4365_v26 = vadd.f32 %v16820_v9, %v3831_v15  ;;  %v2756_v16 = vadd.f32 %v16823_v47, %v2222_v3  ;;  %v4364_v37 = vadd.f32 %v16826_v33, %v3830_v29  ;;  %v16837_v48 = vld [vmem:[#allocation165_spill] sm:$0xff]  ;;  %v4361_v8 = vadd.f32 %v16838_v43, %v3827_v59  ;;  %v16840_v15 = vld [vmem:[#allocation216_spill] sm:$0xff]  ;;  %v16845_v41 = vld [vmem:[#allocation66_spill] sm:$0xff] }
 0x682   :  { %v2755_v31 = vadd.f32 %v16828_v30, %v2221_v52  ;;  %v4363_v28 = vadd.f32 %v16831_v40, %v3829_v19  ;;  %v3826_v32 = vadd.f32 %v16834_v34, %v3291_v51  ;;  %v13175_v4 = vadd.f32 %v16839_v49, %v4362_v6  ;;  %v16846_v3 = vld [vmem:[#allocation183_spill] sm:$0xff]  ;;  %v16847_v24 = vld [vmem:[#allocation101_spill] sm:$0xff]  ;;  %v16859_v6 = vld [vmem:[#allocation210_spill] sm:$0xff] }
 0x683   :  { %4971 = vmatpush.msrb.mxu1 %v13102_v0  ;;  %v13154_v55 = vadd.f32 %v16827_v62, %v4365_v26  ;;  %v3290_v27 = vadd.f32 %v16829_v17, %v2756_v16  ;;  %v13162_v61 = vadd.f32 %v16832_v38, %v4364_v37  ;;  %v13181_v45 = vadd.f32 %v16842_v12, %v4361_v8  ;;  %v16850_v33 = vld [vmem:[#allocation55_spill] sm:$0xff]  ;;  %v16855_v59 = vld [vmem:[#allocation193_spill] sm:$0xff]  ;;  %v16862_v43 = vld [vmem:[#allocation84_spill] sm:$0xff] }
 0x684   :  { %v3289_v25 = vadd.f32 %v16833_v11, %v2755_v31  ;;  %v13169_v46 = vadd.f32 %v16836_v50, %v4363_v28  ;;  %v4360_v5 = vadd.f32 %v16841_v58, %v3826_v32  ;;  %v16848_v19 = vmov 1.0   ;;  %v16851_v62 = vld [vmem:[#allocation95_spill] sm:$0xff]  ;;  %v16853_v31 = vld [vmem:[#allocation81_spill] sm:$0xff]  ;;  %v16856_v28 = vld [vmem:[#allocation222_spill] sm:$0xff] }
 0x685   :  { %4972 = vmatpush.msrb.mxu1 %v13114_v23  ;;  %v3825_v35 = vadd.f32 %v16837_v48, %v3290_v27  ;;  %v16854_v27 = vld [vmem:[#allocation56_spill] sm:$0xff]  ;;  %v16858_v11 = vld [vmem:[#allocation153_spill] sm:$0xff]  ;;  %v16860_v48 = vld [vmem:[#allocation98_spill] sm:$0xff] }
 0x686   :  { %v3824_v10 = vadd.f32 %v16840_v15, %v3289_v25  ;;  %v13186_v29 = vadd.f32 %v16844_v56, %v4360_v5  ;;  %v16864_v5 = vld [vmem:[#allocation172_spill] sm:$0xff] }
 0x687   :  { %4973 = vmatpush.msrb.mxu1 %v13126_v21  ;;  %v4359_v63 = vadd.f32 %v16843_v44, %v3825_v35 }
 0x688   :  { %v4358_v20 = vadd.f32 %v16845_v41, %v3824_v10  ;;  %v16863_v10 = vld [vmem:[#allocation50_spill] sm:$0xff] }
 0x689   :  { %4974 = vmatpush.msrb.mxu1 %v13136_v1  ;;  %v13191_v2 = vadd.f32 %v16846_v3, %v4359_v63  ;;  %v16866_v63 = vld [vmem:[#allocation221_spill] sm:$0xff]  ;;  %v16867_v3 = vld [vmem:[#allocation51_spill] sm:$0xff] }
 0x68a   :  { %v13195_v42 = vadd.f32 %v16847_v24, %v4358_v20 }
 0x68b   :  { %4975 = vmatpush.msrb.mxu1 %v13145_v13 }
 0x68d   :  { %4976 = vmatpush.msrb.mxu1 %v13154_v55 }
 0x68f   :  { %4977 = vmatpush.msrb.mxu1 %v13162_v61 }
 0x691   :  { %4978 = vmatpush.msrb.mxu1 %v13169_v46 }
 0x693   :  { %4979 = vmatpush.msrb.mxu1 %v13175_v4 }
 0x695   :  { %4980 = vmatpush.msrb.mxu1 %v13181_v45 }
 0x697   :  { %4981 = vmatpush.msrb.mxu1 %v13186_v29  ;;  %v4925_v9 = vpop.f32.mrf.mxu2 }
 0x699   :  { %4982 = vmatpush.msrb.mxu1 %v13191_v2 }
 0x69b   :  { %4983 = vmatpush.msrb.mxu1 %v13195_v42 }
 0x69c   :  { %4984 = vmatmul.f32.vlgmr.msrb.gmra.mxu1 %v16848_v19 }
 0x69f   :  { %v4945_v26 = vpop.f32.mrf.mxu2  ;;  %v4965_v18 = vpop.f32.mrf.mxu3 }
 0x6a0   :  { %v4946_v22 = vadd.f32 %v4945_v26, %v4925_v9  ;;  %v16868_v9 = vld [vmem:[#allocation175_spill] sm:$0xff] }
 0x6a2   :  { %v4966_v47 = vadd.f32 %v4965_v18, %v4946_v22  ;;  %v16870_v18 = vld [vmem:[#allocation57_spill] sm:$0xff] }
 0x719   :  { %v4985_v52 = vpop.f32.mrf.mxu1 }
 0x71a   :  { %v4986_v16 = vadd.f32 %v4985_v52, %v4966_v47 }
 0x71c   :  { %v4988_v57 = vmul.f32 0.001953125, %v4986_v16 }
 0x71e   :  { %v13200_v51 = vperm.slane %v4988_v57, 0  ;;  %v16871_v57 = vld [vmem:[#allocation148_spill] sm:$0xff] }
 0x720   :  { %v13204_v39 = vsub.f32 %v16849_v53, %v13200_v51  ;;  %v13208_v37 = vsub.f32 %v16850_v33, %v13200_v51  ;;  %v13212_v30 = vsub.f32 %v16851_v62, %v13200_v51  ;;  %v13216_v17 = vsub.f32 %v16853_v31, %v13200_v51  ;;  %v16872_v33 = vld [vmem:[#allocation178_spill] sm:$0xff] }
 0x721   :  { %v13220_v14 = vsub.f32 %v16854_v27, %v13200_v51  ;;  %v13224_v40 = vsub.f32 %v16855_v59, %v13200_v51  ;;  %v13228_v38 = vsub.f32 %v16856_v28, %v13200_v51  ;;  %v13232_v25 = vsub.f32 %v16858_v11, %v13200_v51  ;;  %v16874_v27 = vld [vmem:[#allocation58_spill] sm:$0xff] }
 0x722   :  { %16852 = vst [vmem:[#allocation131_spill] sm:$0xff] %v13212_v30  ;;  %v5069_v34 = vmul.f32 %v13204_v39, %v13204_v39  ;;  %v5085_v32 = vmul.f32 %v13208_v37, %v13208_v37  ;;  %v5101_v36 = vmul.f32 %v13212_v30, %v13212_v30  ;;  %v13242_v50 = vsub.f32 %v16859_v6, %v13200_v51  ;;  %v16897_v30 = vld [vmem:[#allocation151_spill] sm:$0xff] }
 0x723   :  { %16857 = vst [vmem:[#allocation217_spill] sm:$0xff] %v13228_v38  ;;  %v13246_v35 = vsub.f32 %v16860_v48, %v13200_v51  ;;  %v13250_v8 = vsub.f32 %v16862_v43, %v13200_v51  ;;  %v5068_v49 = vmul.f32 %v13216_v17, %v13216_v17  ;;  %v5084_v15 = vmul.f32 %v13220_v14, %v13220_v14  ;;  %v16878_v43 = vld [vmem:[#allocation218_spill] sm:$0xff] }
 0x724   :  { %5118 = vmatpush.msrb.mxu2 %v5069_v34  ;;  %5138 = vmatpush.msrb.mxu3 %v5085_v32  ;;  %v13258_v58 = vsub.f32 %v16863_v10, %v13200_v51  ;;  %v13262_v12 = vsub.f32 %v16864_v5, %v13200_v51  ;;  %v5100_v44 = vmul.f32 %v13228_v38, %v13228_v38  ;;  %v16875_v34 = vld [vmem:[#allocation39_spill] sm:$0xff]  ;;  %v16879_v5 = vld [vmem:[#allocation82_spill] sm:$0xff] }
 0x725   :  { %16861 = vst [vmem:[#allocation78_spill] sm:$0xff] %v13246_v35  ;;  %5158 = vmatpush.msra.mxu1 %v5101_v36  ;;  %v13268_v56 = vsub.f32 %v16866_v63, %v13200_v51  ;;  %v5067_v41 = vmul.f32 %v13224_v40, %v13224_v40  ;;  %v5083_v20 = vmul.f32 %v13232_v25, %v13232_v25  ;;  %v16876_v36 = vld [vmem:[#allocation107_spill] sm:$0xff]  ;;  %v16880_v63 = vld [vmem:[#allocation109_spill] sm:$0xff] }
 0x726   :  { %16865 = vst [vmem:[#allocation42_spill] sm:$0xff] %v13262_v12  ;;  %5119 = vmatpush.msrb.mxu2 %v5068_v49  ;;  %5139 = vmatpush.msrb.mxu3 %v5084_v15  ;;  %v13276_v24 = vsub.f32 %v16867_v3, %v13200_v51  ;;  %v13280_v26 = vsub.f32 %v16868_v9, %v13200_v51  ;;  %v16882_v3 = vld [vmem:[#allocation85_spill] sm:$0xff] }
 0x727   :  { %5159 = vmatpush.msra.mxu1 %v5100_v44  ;;  %v5099_v22 = vmul.f32 %v13246_v35, %v13246_v35  ;;  %v13286_v52 = vsub.f32 %v16870_v18, %v13200_v51  ;;  %v5066_v47 = vmul.f32 %v13242_v50, %v13242_v50  ;;  %v5082_v16 = vmul.f32 %v13250_v8, %v13250_v8 }
 0x728   :  { %16869 = vst [vmem:[#allocation38_spill] sm:$0xff] %v13280_v26  ;;  %5120 = vmatpush.msrb.mxu2 %v5067_v41  ;;  %5140 = vmatpush.msrb.mxu3 %v5083_v20  ;;  %v13294_v53 = vsub.f32 %v16871_v57, %v13200_v51  ;;  %v13298_v62 = vsub.f32 %v16872_v33, %v13200_v51  ;;  %v16884_v57 = vld [vmem:[#allocation111_spill] sm:$0xff] }
 0x729   :  { %5160 = vmatpush.msra.mxu1 %v5099_v22  ;;  %v5098_v31 = vmul.f32 %v13262_v12, %v13262_v12  ;;  %v13304_v59 = vsub.f32 %v16874_v27, %v13200_v51  ;;  %v5065_v28 = vmul.f32 %v13258_v58, %v13258_v58  ;;  %v5081_v11 = vmul.f32 %v13268_v56, %v13268_v56  ;;  %v16886_v27 = vld [vmem:[#allocation208_spill] sm:$0xff]  ;;  %v16900_v12 = vld [vmem:[#allocation83_spill] sm:$0xff] }
 0x72a   :  { %16873 = vst [vmem:[#allocation77_spill] sm:$0xff] %v13298_v62  ;;  %5121 = vmatpush.msrb.mxu2 %v5066_v47  ;;  %5141 = vmatpush.msrb.mxu3 %v5082_v16  ;;  %v13312_v32 = vsub.f32 %v16875_v34, %v13200_v51  ;;  %v13316_v6 = vsub.f32 %v16876_v36, %v13200_v51  ;;  %v16883_v47 = vld [vmem:[#allocation197_spill] sm:$0xff]  ;;  %v16887_v36 = vld [vmem:[#allocation214_spill] sm:$0xff] }
 0x72b   :  { %5161 = vmatpush.msra.mxu1 %v5098_v31  ;;  %v5097_v48 = vmul.f32 %v13280_v26, %v13280_v26  ;;  %v13322_v49 = vsub.f32 %v16878_v43, %v13200_v51  ;;  %v5064_v15 = vmul.f32 %v13276_v24, %v13276_v24  ;;  %v5080_v10 = vmul.f32 %v13286_v52, %v13286_v52  ;;  %v16888_v43 = vld [vmem:[#allocation185_spill] sm:$0xff] }
 0x72c   :  { %16877 = vst [vmem:[#allocation36_spill] sm:$0xff] %v13316_v6  ;;  %5122 = vmatpush.msrb.mxu2 %v5065_v28  ;;  %5142 = vmatpush.msrb.mxu3 %v5081_v11  ;;  %v13330_v44 = vsub.f32 %v16879_v5, %v13200_v51  ;;  %v13334_v41 = vsub.f32 %v16880_v63, %v13200_v51  ;;  %v16890_v5 = vld [vmem:[#allocation224_spill] sm:$0xff] }
 0x72d   :  { %5162 = vmatpush.msra.mxu1 %v5097_v48  ;;  %v5096_v20 = vmul.f32 %v13298_v62, %v13298_v62  ;;  %v13340_v9 = vsub.f32 %v16882_v3, %v13200_v51  ;;  %v5063_v22 = vmul.f32 %v13294_v53, %v13294_v53  ;;  %v5079_v18 = vmul.f32 %v13304_v59, %v13304_v59 }
 0x72e   :  { %16881 = vst [vmem:[#allocation35_spill] sm:$0xff] %v13334_v41  ;;  %5123 = vmatpush.msrb.mxu2 %v5064_v15  ;;  %5143 = vmatpush.msrb.mxu3 %v5080_v10  ;;  %v13348_v16 = vsub.f32 %v16883_v47, %v13200_v51  ;;  %v13352_v33 = vsub.f32 %v16884_v57, %v13200_v51  ;;  %v16892_v47 = vld [vmem:[#allocation113_spill] sm:$0xff] }
 0x72f   :  { %5163 = vmatpush.msra.mxu1 %v5096_v20  ;;  %v5095_v31 = vmul.f32 %v13316_v6, %v13316_v6  ;;  %v13358_v28 = vsub.f32 %v16886_v27, %v13200_v51  ;;  %v5062_v11 = vmul.f32 %v13312_v32, %v13312_v32  ;;  %v5078_v34 = vmul.f32 %v13322_v49, %v13322_v49  ;;  %v16893_v27 = vld [vmem:[#allocation60_spill] sm:$0xff] }
 0x730   :  { %16885 = vst [vmem:[#allocation44_spill] sm:$0xff] %v13352_v33  ;;  %5124 = vmatpush.msrb.mxu2 %v5063_v22  ;;  %5144 = vmatpush.msrb.mxu3 %v5079_v18  ;;  %v13366_v48 = vsub.f32 %v16887_v36, %v13200_v51  ;;  %v13370_v15 = vsub.f32 %v16888_v43, %v13200_v51  ;;  %v16891_v22 = vld [vmem:[#allocation53_spill] sm:$0xff]  ;;  %v16894_v43 = vld [vmem:[#allocation54_spill] sm:$0xff]  ;;  %v16903_v6 = vld [vmem:[#allocation200_spill] sm:$0xff] }
 0x731   :  { %5164 = vmatpush.msra.mxu1 %v5095_v31  ;;  %v5094_v10 = vmul.f32 %v13334_v41, %v13334_v41  ;;  %v13376_v63 = vsub.f32 %v16890_v5, %v13200_v51  ;;  %v5061_v20 = vmul.f32 %v13330_v44, %v13330_v44  ;;  %v5077_v3 = vmul.f32 %v13340_v9, %v13340_v9 }
 0x732   :  { %16889 = vst [vmem:[#allocation76_spill] sm:$0xff] %v13370_v15  ;;  %5125 = vmatpush.msrb.mxu2 %v5062_v11  ;;  %5145 = vmatpush.msrb.mxu3 %v5078_v34  ;;  %v13384_v18 = vsub.f32 %v16891_v22, %v13200_v51  ;;  %v13388_v57 = vsub.f32 %v16892_v47, %v13200_v51 }
 0x733   :  { %5165 = vmatpush.msra.mxu1 %v5094_v10  ;;  %v5093_v31 = vmul.f32 %v13352_v33, %v13352_v33  ;;  %v13394_v11 = vsub.f32 %v16893_v27, %v13200_v51  ;;  %v5060_v34 = vmul.f32 %v13348_v16, %v13348_v16  ;;  %v5076_v36 = vmul.f32 %v13358_v28, %v13358_v28  ;;  %v16895_v10 = vld [vmem:[#allocation188_spill] sm:$0xff] }
 0x734   :  { %5126 = vmatpush.msrb.mxu2 %v5061_v20  ;;  %5146 = vmatpush.msrb.mxu3 %v5077_v3  ;;  %v13402_v5 = vsub.f32 %v16894_v43, %v13200_v51  ;;  %v13406_v22 = vsub.f32 %v16895_v10, %v13200_v51  ;;  %v5092_v47 = vmul.f32 %v13370_v15, %v13370_v15  ;;  %v16896_v20 = vld [vmem:[#allocation159_spill] sm:$0xff]  ;;  %v16906_v15 = vld [vmem:[#allocation198_spill] sm:$0xff] }
 0x735   :  { %5166 = vmatpush.msra.mxu1 %v5093_v31  ;;  %v13412_v3 = vsub.f32 %v16896_v20, %v13200_v51  ;;  %v5059_v27 = vmul.f32 %v13366_v48, %v13366_v48  ;;  %v5075_v43 = vmul.f32 %v13376_v63, %v13376_v63  ;;  %v13420_v10 = vsub.f32 %v16897_v30, %v13200_v51  ;;  %v16898_v31 = vld [vmem:[#allocation117_spill] sm:$0xff] }
 0x736   :  { %5127 = vmatpush.msrb.mxu2 %v5060_v34  ;;  %5147 = vmatpush.msrb.mxu3 %v5076_v36  ;;  %v13424_v38 = vsub.f32 %v16898_v31, %v13200_v51  ;;  %v5091_v20 = vmul.f32 %v13388_v57, %v13388_v57  ;;  %v16899_v34 = vld [vmem:[#allocation86_spill] sm:$0xff]  ;;  %v5058_v35 = vmul.f32 %v13384_v18, %v13384_v18 }
 0x737   :  { %5167 = vmatpush.msra.mxu1 %v5092_v47  ;;  %v13430_v36 = vsub.f32 %v16899_v34, %v13200_v51  ;;  %v5074_v30 = vmul.f32 %v13394_v11, %v13394_v11  ;;  %v13438_v31 = vsub.f32 %v16900_v12, %v13200_v51  ;;  %v16901_v47 = vld [vmem:[#allocation194_spill] sm:$0xff]  ;;  %v5090_v34 = vmul.f32 %v13406_v22, %v13406_v22 }
 0x738   :  { %5128 = vmatpush.msrb.mxu2 %v5059_v27  ;;  %5148 = vmatpush.msrb.mxu3 %v5075_v43  ;;  %v13442_v26 = vsub.f32 %v16901_v47, %v13200_v51  ;;  %v16902_v27 = vld [vmem:[#allocation212_spill] sm:$0xff]  ;;  %v5057_v62 = vmul.f32 %v13402_v5, %v13402_v5  ;;  %v5073_v12 = vmul.f32 %v13412_v3, %v13412_v3 }
 0x739   :  { %5168 = vmatpush.msra.mxu1 %v5091_v20  ;;  %v13448_v43 = vsub.f32 %v16902_v27, %v13200_v51  ;;  %v13456_v47 = vsub.f32 %v16903_v6, %v13200_v51  ;;  %v16904_v20 = vld [vmem:[#allocation119_spill] sm:$0xff]  ;;  %v5089_v27 = vmul.f32 %v13424_v38, %v13424_v38  ;;  %v5056_v33 = vmul.f32 %v13420_v10, %v13420_v10 }
 0x73a   :  { %5129 = vmatpush.msrb.mxu2 %v5058_v35  ;;  %5149 = vmatpush.msrb.mxu3 %v5074_v30  ;;  %v13460_v41 = vsub.f32 %v16904_v20, %v13200_v51  ;;  %v16905_v35 = vld [vmem:[#allocation63_spill] sm:$0xff]  ;;  %v5072_v6 = vmul.f32 %v13430_v36, %v13430_v36  ;;  %v13474_v20 = vsub.f32 %v16906_v15, %v13200_v51 }
 0x73b   :  { %5169 = vmatpush.msra.mxu1 %v5090_v34  ;;  %v13466_v30 = vsub.f32 %v16905_v35, %v13200_v51  ;;  %v13478_v34 = vsub.f32 %v13068_v60, %v13200_v51  ;;  %v5088_v35 = vmul.f32 %v13442_v26, %v13442_v26  ;;  %v13488_v15 = vsub.f32 %v13078_v7, %v13200_v51 }
 0x73c   :  { %5130 = vmatpush.msrb.mxu2 %v5057_v62  ;;  %5150 = vmatpush.msrb.mxu3 %v5073_v12  ;;  %v5055_v62 = vmul.f32 %v13438_v31, %v13438_v31  ;;  %v5071_v12 = vmul.f32 %v13448_v43, %v13448_v43  ;;  %v5087_v60 = vmul.f32 %v13460_v41, %v13460_v41 }
 0x73d   :  { %5170 = vmatpush.msra.mxu1 %v5089_v27  ;;  %16907 = vst [vmem:[#allocation33_spill] sm:$0xff] %v13488_v15  ;;  %v5070_v27 = vmul.f32 %v13466_v30, %v13466_v30  ;;  %v5117_v7 = vmul.f32 %v13478_v34, %v13478_v34 }
 0x73e   :  { %5131 = vmatpush.msrb.mxu2 %v5056_v33  ;;  %5151 = vmatpush.msrb.mxu3 %v5072_v6  ;;  %v5054_v33 = vmul.f32 %v13456_v47, %v13456_v47  ;;  %v13498_v6 = vsub.f32 %v13090_v54, %v13200_v51  ;;  %v13514_v54 = vsub.f32 %v13114_v23, %v13200_v51 }
 0x73f   :  { %5171 = vmatpush.msra.mxu1 %v5088_v35  ;;  %v5086_v35 = vmul.f32 %v13474_v20, %v13474_v20 }
 0x740   :  { %5132 = vmatpush.msrb.mxu2 %v5055_v62  ;;  %5152 = vmatpush.msrb.mxu3 %v5071_v12  ;;  %16908 = vst [vmem:[#allocation32_spill] sm:$0xff] %v13498_v6  ;;  %v13506_v62 = vsub.f32 %v13102_v0, %v13200_v51  ;;  %v5116_v12 = vmul.f32 %v13488_v15, %v13488_v15 }
 0x741   :  { %5172 = vmatpush.msra.mxu1 %v5087_v60  ;;  %16910 = vst [vmem:[#allocation75_spill] sm:$0xff] %v13514_v54  ;;  %v5115_v60 = vmul.f32 %v13498_v6, %v13498_v6  ;;  %v13521_v0 = vsub.f32 %v13126_v21, %v13200_v51  ;;  %v5113_v23 = vmul.f32 %v13514_v54, %v13514_v54 }
 0x742   :  { %5133 = vmatpush.msrb.mxu2 %v5054_v33  ;;  %5153 = vmatpush.msrb.mxu3 %v5070_v27  ;;  %16909 = vst [vmem:[#allocation80_spill] sm:$0xff] %v13506_v62  ;;  %v5114_v33 = vmul.f32 %v13506_v62, %v13506_v62  ;;  %v13527_v27 = vsub.f32 %v13136_v1, %v13200_v51 }
 0x743   :  { %5173 = vmatpush.msra.mxu1 %v5086_v35  ;;  %5134 = vmatmul.f32.vlgmr.msrb.gmra.mxu2 %v16848_v19  ;;  %16911 = vst [vmem:[#allocation29_spill] sm:$0xff] %v13521_v0  ;;  %v5112_v21 = vmul.f32 %v13521_v0, %v13521_v0  ;;  %v13539_v35 = vsub.f32 %v13154_v55, %v13200_v51 }
 0x744   :  { %5178 = vmatpush.msra.mxu2 %v5117_v7  ;;  %5154 = vmatmul.f32.vlgmr.msrb.gmra.mxu3 %v16848_v19  ;;  %16912 = vst [vmem:[#allocation27_spill] sm:$0xff] %v13527_v27  ;;  %v13533_v7 = vsub.f32 %v13145_v13, %v13200_v51  ;;  %v5111_v1 = vmul.f32 %v13527_v27, %v13527_v27 }
 0x745   :  { %5174 = vmatmul.f32.vlgmr.msra.gmra.mxu1 %v16848_v19  ;;  %16914 = vst [vmem:[#allocation48_spill] sm:$0xff] %v13539_v35  ;;  %v5109_v55 = vmul.f32 %v13539_v35, %v13539_v35 }
 0x746   :  { %5179 = vmatpush.msra.mxu2 %v5116_v12  ;;  %16913 = vst [vmem:[#allocation73_spill] sm:$0xff] %v13533_v7  ;;  %v13545_v12 = vsub.f32 %v13162_v61, %v13200_v51  ;;  %v5110_v13 = vmul.f32 %v13533_v7, %v13533_v7 }
 0x748   :  { %5180 = vmatpush.msra.mxu2 %v5115_v60  ;;  %v13551_v60 = vsub.f32 %v13169_v46, %v13200_v51  ;;  %v5108_v61 = vmul.f32 %v13545_v12, %v13545_v12 }
 0x74a   :  { %5181 = vmatpush.msra.mxu2 %v5114_v33  ;;  %v13557_v33 = vsub.f32 %v13175_v4, %v13200_v51  ;;  %v5107_v46 = vmul.f32 %v13551_v60, %v13551_v60 }
 0x74c   :  { %5182 = vmatpush.msra.mxu2 %v5113_v23  ;;  %v13563_v23 = vsub.f32 %v13181_v45, %v13200_v51  ;;  %v5106_v4 = vmul.f32 %v13557_v33, %v13557_v33 }
 0x74e   :  { %5183 = vmatpush.msra.mxu2 %v5112_v21  ;;  %v13569_v21 = vsub.f32 %v13186_v29, %v13200_v51  ;;  %v5105_v45 = vmul.f32 %v13563_v23, %v13563_v23 }
 0x750   :  { %5184 = vmatpush.msra.mxu2 %v5111_v1  ;;  %v13575_v1 = vsub.f32 %v13191_v2, %v13200_v51  ;;  %v5104_v29 = vmul.f32 %v13569_v21, %v13569_v21 }
 0x752   :  { %5185 = vmatpush.msra.mxu2 %v5110_v13  ;;  %v13581_v13 = vsub.f32 %v13195_v42, %v13200_v51  ;;  %v9858_v42 = vld [vmem:[%s16032_s2 + $0xf8] sm:$0xff] }
 0x753   :  { %v5632_v51 = vld [vmem:[%s16032_s2 + $0x78] sm:$0xff]  ;;  %5714 = vmatpush.msra.mxu3 %v9858_v42 }
 0x754   :  { %5186 = vmatpush.msra.mxu2 %v5109_v55  ;;  %v5103_v55 = vmul.f32 %v13575_v1, %v13575_v1  ;;  %v5102_v2 = vmul.f32 %v13581_v13, %v13581_v13  ;;  %5923 = vmatpush.msrb.mxu1 %v5632_v51 }
 0x756   :  { %5187 = vmatpush.msra.mxu2 %v5108_v61  ;;  %v9874_v61 = vld [vmem:[%s16032_s2 + $0x178] sm:$0xff] }
 0x758   :  { %5188 = vmatpush.msra.mxu2 %v5107_v46  ;;  %v9857_v46 = vld [vmem:[%s16032_s2 + $0xf0] sm:$0xff] }
 0x759   :  { %5715 = vmatpush.msra.mxu3 %v9857_v46  ;;  %v5199_v46 = vld [vmem:[%s16033_s3] sm:$0x1] }
 0x75a   :  { %5189 = vmatpush.msra.mxu2 %v5106_v4  ;;  %v5631_v4 = vld [vmem:[%s16032_s2 + $0x70] sm:$0xff] }
 0x75b   :  { %5924 = vmatpush.msrb.mxu1 %v5631_v4 }
 0x75c   :  { %5190 = vmatpush.msra.mxu2 %v5105_v45  ;;  %v9873_v45 = vld [vmem:[%s16032_s2 + $0x170] sm:$0xff] }
 0x75e   :  { %5191 = vmatpush.msra.mxu2 %v5104_v29 }
 0x760   :  { %5192 = vmatpush.msra.mxu2 %v5103_v55 }
 0x762   :  { %5193 = vmatpush.msra.mxu2 %v5102_v2 }
 0x763   :  { %5194 = vmatmul.f32.vlgmr.msra.gmra.mxu2 %v16848_v19 }
 0x764   :  { %6213 = vmatpush.msrb.mxu2 %v9874_v61 }
 0x766   :  { %6214 = vmatpush.msrb.mxu2 %v9873_v45 }
 0x7c2   :  { %v5175_v42 = vpop.f32.mrf.mxu1 }
 0x7c6   :  { %v5135_v29 = vpop.f32.mrf.mxu2 }
 0x7c7   :  { %v5155_v55 = vpop.f32.mrf.mxu3 }
 0x7c8   :  { %v5156_v2 = vadd.f32 %v5155_v55, %v5135_v29  ;;  %v9854_v55 = vld [vmem:[%s16032_s2 + $0xd8] sm:$0xff] }
 0x7ca   :  { %v5176_v51 = vadd.f32 %v5175_v42, %v5156_v2  ;;  %v9870_v2 = vld [vmem:[%s16032_s2 + $0x158] sm:$0xff] }
 0x7e6   :  { %v5195_v61 = vpop.f32.mrf.mxu2 }
 0x7e7   :  { %v5196_v19 = vadd.f32 %v5195_v61, %v5176_v51  ;;  %v9853_v51 = vld [vmem:[%s16032_s2 + $0xd0] sm:$0xff] }
 0x7e9   :  { %v5198_v15 = vmul.f32 0.001953125, %v5196_v19  ;;  %v9856_v19 = vld [vmem:[%s16032_s2 + $0xe8] sm:$0xff] }
 0x7ea   :  { %5716 = vmatpush.msra.mxu3 %v9856_v19 }
 0x7eb   :  { %v5200_v6 = vadd.f32 1e-05, %v5198_v15  ;;  %v9872_v15 = vld [vmem:[%s16032_s2 + $0x168] sm:$0xff] }
 0x7ec   :  { %6215 = vmatpush.msrb.mxu2 %v9872_v15 }
 0x7ed   :  { %9977 = vrsqrt.f32 %v5200_v6  ;;  %vm5207_vm5 = vweird.f32 %v5200_v6 }
 0x7f3   :  { %v9978_v62 = vpop.eup %9977 }
 0x7f4   :  { %v5202_v54 = vmul.f32 %v9978_v62, %v5200_v6  ;;  %vm5208_vm4 = vweird.f32 %v9978_v62  ;;  %v9855_v6 = vld [vmem:[%s16032_s2 + $0xe0] sm:$0xff] }
 0x7f5   :  { %vm5209_vm6 = vmor %vm5207_vm5, %vm5208_vm4  ;;  %5717 = vmatpush.msra.mxu3 %v9855_v6 }
 0x7f6   :  { %v5203_v0 = vmul.f32 %v9978_v62, %v5202_v54 }
 0x7f7   :  { %5718 = vmatpush.msra.mxu3 %v9854_v55  ;;  %v9851_v55 = vld [vmem:[%s16032_s2 + $0xc0] sm:$0xff] }
 0x7f8   :  { %v5204_v27 = vmul.f32 0.5, %v5203_v0 }
 0x7f9   :  { %5719 = vmatpush.msra.mxu3 %v9853_v51 }
 0x7fa   :  { %v5205_v7 = vsub.f32 1.5, %v5204_v27 }
 0x7fc   :  { %v5206_v35 = vmul.f32 %v9978_v62, %v5205_v7 }
 0x7fe   :  { %v5210_v4 = vsel %vm5209_vm6, %v9978_v62, %v5206_v35  ;;  %v13625_v62 = vld [vmem:[%s16031_s4] ss:$0 sm:$0xff] }
 0x7ff   :  { %v5211_v45 = vmul.f32 %v5210_v4, %v5199_v46  ;;  %v9871_v35 = vld [vmem:[%s16032_s2 + $0x160] sm:$0xff]  ;;  %v9869_v4 = vld [vmem:[%s16032_s2 + $0x150] sm:$0xff] }
 0x800   :  { %6216 = vmatpush.msrb.mxu2 %v9871_v35 }
 0x801   :  { %v13611_v29 = vperm.slane %v5211_v45, 0 }
 0x802   :  { %6217 = vmatpush.msrb.mxu2 %v9870_v2  ;;  %v9867_v2 = vld [vmem:[%s16032_s2 + $0x140] sm:$0xff] }
 0x803   :  { %v5215_v54 = vmul.f32 %v13611_v29, %v13456_v47  ;;  %v5216_v0 = vmul.f32 %v13611_v29, %v13438_v31  ;;  %v5217_v27 = vmul.f32 %v13611_v29, %v13420_v10  ;;  %v5218_v7 = vmul.f32 %v13611_v29, %v13402_v5  ;;  %v5630_v5 = vld [vmem:[%s16032_s2 + $0x68] sm:$0xff] }
 0x804   :  { %v5219_v47 = vmul.f32 %v13611_v29, %v13384_v18  ;;  %v5220_v10 = vmul.f32 %v13611_v29, %v13366_v48  ;;  %v5278_v31 = vmul.f32 %v13611_v29, %v13478_v34  ;;  %v5221_v42 = vmul.f32 %v13611_v29, %v13348_v16  ;;  %5925 = vmatpush.msrb.mxu1 %v5630_v5  ;;  %v5629_v16 = vld [vmem:[%s16032_s2 + $0x60] sm:$0xff]  ;;  %v5627_v5 = vld [vmem:[%s16032_s2 + $0x50] sm:$0xff] }
 0x805   :  { %v13656_v18 = vadd.f32 %v13625_v62, %v5215_v54  ;;  %v13659_v48 = vadd.f32 %v13625_v62, %v5216_v0  ;;  %v13662_v34 = vadd.f32 %v13625_v62, %v5217_v27  ;;  %v5222_v61 = vmul.f32 %v13611_v29, %v13330_v44  ;;  %v9852_v44 = vld [vmem:[%s16032_s2 + $0xc8] sm:$0xff]  ;;  %6218 = vmatpush.msrb.mxu2 %v9869_v4 }
 0x806   :  { %v13670_v46 = vadd.f32 %v13625_v62, %v5218_v7  ;;  %v5223_v45 = vmul.f32 %v13611_v29, %v13312_v32  ;;  %v13681_v19 = vadd.f32 %v13625_v62, %v5219_v47  ;;  %5926 = vmatpush.msrb.mxu1 %v5629_v16  ;;  %v5224_v15 = vmul.f32 %v13611_v29, %v13294_v53  ;;  %v5628_v32 = vld [vmem:[%s16032_s2 + $0x58] sm:$0xff]  ;;  %v9868_v27 = vld [vmem:[%s16032_s2 + $0x148] sm:$0xff] }
 0x807   :  { %v5225_v6 = vmul.f32 %v13611_v29, %v13276_v24  ;;  %v13691_v54 = vadd.f32 %v13625_v62, %v5220_v10  ;;  %v13694_v0 = vadd.f32 %v13625_v62, %v5278_v31  ;;  %v13703_v53 = vadd.f32 %v13625_v62, %v5221_v42  ;;  %5720 = vmatpush.msra.mxu3 %v9852_v44 }
 0x808   :  { %v16130_v24 = vmax.f32 %v13656_v18, 0.0  ;;  %v16128_v7 = vmax.f32 %v13659_v48, 0.0  ;;  %v16126_v35 = vmax.f32 %v13662_v34, 0.0  ;;  %5927 = vmatpush.msrb.mxu1 %v5628_v32  ;;  %v5226_v47 = vmul.f32 %v13611_v29, %v13258_v58  ;;  %6219 = vmatpush.msrb.mxu2 %v9868_v27 }
 0x809   :  { %v13714_v10 = vadd.f32 %v13625_v62, %v5222_v61  ;;  %v16124_v31 = vmax.f32 %v13670_v46, 0.0  ;;  %v5227_v42 = vmul.f32 %v13611_v29, %v13242_v50  ;;  %v13726_v51 = vadd.f32 %v13625_v62, %v5223_v45  ;;  %v9850_v61 = vld [vmem:[%s16032_s2 + $0xb8] sm:$0xff]  ;;  %v5626_v45 = vld [vmem:[%s16032_s2 + $0x48] sm:$0xff]  ;;  %5721 = vmatpush.msra.mxu3 %v9851_v55 }
 0x80a   :  { %v16123_v58 = vmax.f32 %v13681_v19, 0.0  ;;  %5489 = vst [vmem:[#allocation3 + $0x19] sm:$0xff] %v16130_v24  ;;  %5928 = vmatpush.msrb.mxu1 %v5627_v5  ;;  %v5228_v16 = vmul.f32 %v13611_v29, %v13224_v40  ;;  %v13737_v4 = vadd.f32 %v13625_v62, %v5224_v15  ;;  %v16113_v50 = vmax.f32 %v13691_v54, 0.0  ;;  %6220 = vmatpush.msrb.mxu2 %v9867_v2  ;;  %v9866_v15 = vld [vmem:[%s16032_s2 + $0x138] sm:$0xff] }
 0x80b   :  { %5490 = vst [vmem:[#allocation3 + $0x21] sm:$0xff] %v16128_v7  ;;  %v5229_v44 = vmul.f32 %v13611_v29, %v13216_v17  ;;  %v13748_v32 = vadd.f32 %v13625_v62, %v5225_v6  ;;  %v16114_v40 = vmax.f32 %v13703_v53, 0.0  ;;  %v5230_v27 = vmul.f32 %v13611_v29, %v13204_v39  ;;  %v5625_v6 = vld [vmem:[%s16032_s2 + $0x40] sm:$0xff]  ;;  %5722 = vmatpush.msra.mxu3 %v9850_v61 }
 0x80c   :  { %5491 = vst [vmem:[#allocation3 + $0x31] sm:$0xff] %v16126_v35  ;;  %5929 = vmatpush.msrb.mxu1 %v5626_v45  ;;  %v13759_v55 = vadd.f32 %v13625_v62, %v5226_v47  ;;  %v16115_v17 = vmax.f32 %v13714_v10, 0.0  ;;  %v5231_v5 = vmul.f32 %v13611_v29, %v13466_v30  ;;  %v13770_v2 = vadd.f32 %v13625_v62, %v5227_v42  ;;  %v9849_v47 = vld [vmem:[%s16032_s2 + $0xb0] sm:$0xff]  ;;  %v5624_v42 = vld [vmem:[%s16032_s2 + $0x38] sm:$0xff] }
 0x80d   :  { %5492 = vst [vmem:[#allocation3 + $0x39] sm:$0xff] %v16124_v31  ;;  %v16116_v39 = vmax.f32 %v13726_v51, 0.0  ;;  %6221 = vmatpush.msrb.mxu2 %v9866_v15  ;;  %v5232_v61 = vmul.f32 %v13611_v29, %v13448_v43  ;;  %v13781_v45 = vadd.f32 %v13625_v62, %v5228_v16  ;;  %v16117_v30 = vmax.f32 %v13737_v4, 0.0  ;;  %5723 = vmatpush.msra.mxu3 %v9849_v47  ;;  %v9865_v16 = vld [vmem:[%s16032_s2 + $0x130] sm:$0xff] }
 0x80e   :  { %5493 = vst [vmem:[#allocation3 + $0x49] sm:$0xff] %v16123_v58  ;;  %5930 = vmatpush.msrb.mxu1 %v5625_v6  ;;  %v5233_v15 = vmul.f32 %v13611_v29, %v13430_v36  ;;  %v13792_v6 = vadd.f32 %v13625_v62, %v5229_v44  ;;  %v16118_v43 = vmax.f32 %v13748_v32, 0.0  ;;  %v13803_v47 = vadd.f32 %v13625_v62, %v5230_v27  ;;  %v9890_v44 = vld [vmem:[%s16032_s2 + $0x1f8] sm:$0xff]  ;;  %v5623_v27 = vld [vmem:[%s16032_s2 + $0x30] sm:$0xff] }
 0x80f   :  { %5494 = vst [vmem:[#allocation3 + $0x51] sm:$0xff] %v16113_v50  ;;  %v5234_v50 = vmul.f32 %v13611_v29, %v13412_v3  ;;  %v16119_v36 = vmax.f32 %v13759_v55, 0.0  ;;  %6222 = vmatpush.msrb.mxu2 %v9865_v16  ;;  %v16120_v3 = vmax.f32 %v13770_v2, 0.0  ;;  %6567 = vmatpush.msrb.mxu0 %v9890_v44  ;;  %v13825_v16 = vadd.f32 %v13625_v62, %v5232_v61  ;;  %v9848_v61 = vld [vmem:[%s16032_s2 + $0xa8] sm:$0xff]  ;;  %v9846_v58 = vld [vmem:[%s16032_s2 + $0x98] sm:$0xff] }
 0x810   :  { %5495 = vst [vmem:[#allocation3 + $0x61] sm:$0xff] %v16114_v40  ;;  %5931 = vmatpush.msrb.mxu1 %v5624_v42  ;;  %v5235_v42 = vmul.f32 %v13611_v29, %v13394_v11  ;;  %v13814_v40 = vadd.f32 %v13625_v62, %v5231_v5  ;;  %v16121_v11 = vmax.f32 %v13781_v45, 0.0  ;;  %v9889_v5 = vld [vmem:[%s16032_s2 + $0x1f0] sm:$0xff]  ;;  %v5237_v44 = vmul.f32 %v13611_v29, %v13358_v28 }
 0x811   :  { %5496 = vst [vmem:[#allocation3 + $0x69] sm:$0xff] %v16115_v17  ;;  %v5236_v17 = vmul.f32 %v13611_v29, %v13376_v63  ;;  %v16122_v63 = vmax.f32 %v13792_v6, 0.0  ;;  %6568 = vmatpush.msrb.mxu0 %v9889_v5  ;;  %v16125_v28 = vmax.f32 %v13803_v47, 0.0  ;;  %5724 = vmatpush.msra.mxu3 %v9848_v61  ;;  %v5239_v5 = vmul.f32 %v13611_v29, %v13322_v49 }
 0x812   :  { %5497 = vst [vmem:[#allocation3 + $0x79] sm:$0xff] %v16116_v39  ;;  %5932 = vmatpush.msrb.mxu1 %v5623_v27  ;;  %v13836_v39 = vadd.f32 %v13625_v62, %v5233_v15  ;;  %v5238_v27 = vmul.f32 %v13611_v29, %v13340_v9  ;;  %v5622_v15 = vld [vmem:[%s16032_s2 + $0x28] sm:$0xff]  ;;  %v16127_v9 = vmax.f32 %v13814_v40, 0.0  ;;  %v5240_v61 = vmul.f32 %v13611_v29, %v13304_v59 }
 0x813   :  { %5498 = vst [vmem:[#allocation3 + $0x81] sm:$0xff] %v16117_v30  ;;  %v13847_v30 = vadd.f32 %v13625_v62, %v5234_v50  ;;  %v9864_v50 = vld [vmem:[%s16032_s2 + $0x128] sm:$0xff]  ;;  %v16129_v49 = vmax.f32 %v13825_v16, 0.0  ;;  %v13914_v31 = vadd.f32 %v13625_v62, %v5239_v5  ;;  %v5244_v5 = vmul.f32 %v13611_v29, %v13232_v25  ;;  %v9885_v25 = vld [vmem:[%s16032_s2 + $0x1d0] sm:$0xff] }
 0x814   :  { %5499 = vst [vmem:[#allocation3 + $0x91] sm:$0xff] %v16118_v43  ;;  %v13858_v43 = vadd.f32 %v13625_v62, %v5235_v42  ;;  %5933 = vmatpush.msrb.mxu1 %v5622_v15  ;;  %6223 = vmatpush.msrb.mxu2 %v9864_v50  ;;  %v9888_v42 = vld [vmem:[%s16032_s2 + $0x1e8] sm:$0xff]  ;;  %v5241_v15 = vmul.f32 %v13611_v29, %v13286_v52  ;;  %v16131_v59 = vmax.f32 %v13836_v39, 0.0  ;;  %v5621_v50 = vld [vmem:[%s16032_s2 + $0x20] sm:$0xff] }
 0x815   :  { %5500 = vst [vmem:[#allocation3 + $0x99] sm:$0xff] %v16119_v36  ;;  %v13869_v36 = vadd.f32 %v13625_v62, %v5236_v17  ;;  %6569 = vmatpush.msrb.mxu0 %v9888_v42  ;;  %v9847_v17 = vld [vmem:[%s16032_s2 + $0xa0] sm:$0xff]  ;;  %v16132_v42 = vmax.f32 %v13847_v30, 0.0  ;;  %v13931_v35 = vadd.f32 %v13625_v62, %v5240_v61  ;;  %v5245_v61 = vmul.f32 %v13611_v29, %v13220_v14 }
 0x816   :  { %5501 = vst [vmem:[#allocation3 + $0xa9] sm:$0xff] %v16120_v3  ;;  %v13880_v3 = vadd.f32 %v13625_v62, %v5237_v44  ;;  %v9863_v52 = vld [vmem:[%s16032_s2 + $0x120] sm:$0xff]  ;;  %v5242_v44 = vmul.f32 %v13611_v29, %v13268_v56  ;;  %5725 = vmatpush.msra.mxu3 %v9847_v17  ;;  %5934 = vmatpush.msrb.mxu1 %v5621_v50  ;;  %v5620_v56 = vld [vmem:[%s16032_s2 + $0x18] sm:$0xff]  ;;  %v16133_v17 = vmax.f32 %v13858_v43, 0.0 }
 0x817   :  { %5502 = vst [vmem:[#allocation3 + $0xb1] sm:$0xff] %v16121_v11  ;;  %v13897_v11 = vadd.f32 %v13625_v62, %v5238_v27  ;;  %v5243_v27 = vmul.f32 %v13611_v29, %v13250_v8  ;;  %6224 = vmatpush.msrb.mxu2 %v9863_v52  ;;  %v9862_v50 = vld [vmem:[%s16032_s2 + $0x118] sm:$0xff]  ;;  %v9845_v8 = vld [vmem:[%s16032_s2 + $0x90] sm:$0xff]  ;;  %v13948_v7 = vadd.f32 %v13625_v62, %v5241_v15 }
 0x818   :  { %5503 = vst [vmem:[#allocation3 + $0xc1] sm:$0xff] %v16122_v63  ;;  %v9887_v63 = vld [vmem:[%s16032_s2 + $0x1e0] sm:$0xff]  ;;  %5726 = vmatpush.msra.mxu3 %v9846_v58  ;;  %5935 = vmatpush.msrb.mxu1 %v5620_v56  ;;  %v5619_v52 = vld [vmem:[%s16032_s2 + $0x10] sm:$0xff]  ;;  %v16137_v58 = vmax.f32 %v13880_v3, 0.0  ;;  %v9844_v56 = vld [vmem:[%s16032_s2 + $0x88] sm:$0xff]  ;;  %v5246_v14 = vmul.f32 %v13611_v29, %v13208_v37  ;;  %v13962_v15 = vadd.f32 %v13625_v62, %v5242_v44 }
 0x819   :  { %5504 = vst [vmem:[#allocation3 + $0xc9] sm:$0xff] %v16125_v28  ;;  %6570 = vmatpush.msrb.mxu0 %v9887_v63  ;;  %v9886_v28 = vld [vmem:[%s16032_s2 + $0x1d8] sm:$0xff]  ;;  %v16134_v63 = vmax.f32 %v13869_v36, 0.0  ;;  %6225 = vmatpush.msrb.mxu2 %v9862_v50  ;;  %v16135_v24 = vmax.f32 %v13897_v11, 0.0  ;;  %v9884_v50 = vld [vmem:[%s16032_s2 + $0x1c8] sm:$0xff]  ;;  %v5247_v37 = vmul.f32 %v13611_v29, %v13474_v20  ;;  %v13976_v44 = vadd.f32 %v13625_v62, %v5243_v27 }
 0x81a   :  { %5505 = vst [vmem:[#allocation3 + $0xd9] sm:$0xff] %v16127_v9  ;;  %v9861_v9 = vld [vmem:[%s16032_s2 + $0x110] sm:$0xff]  ;;  %5727 = vmatpush.msra.mxu3 %v9845_v8  ;;  %5936 = vmatpush.msrb.mxu1 %v5619_v52  ;;  %v9843_v8 = vld [vmem:[%s16032_s2 + $0x80] sm:$0xff]  ;;  %v5248_v20 = vmul.f32 %v13611_v29, %v13460_v41  ;;  %v13990_v27 = vadd.f32 %v13625_v62, %v5244_v5 }
 0x81b   :  { %5506 = vst [vmem:[#allocation3 + $0xe1] sm:$0xff] %v16129_v49  ;;  %6571 = vmatpush.msrb.mxu0 %v9886_v28  ;;  %v5618_v49 = vld [vmem:[%s16032_s2 + $0x8] sm:$0xff]  ;;  %6226 = vmatpush.msrb.mxu2 %v9861_v9  ;;  %v5617_v52 = vld [vmem:[%s16032_s2] sm:$0xff]  ;;  %v5249_v41 = vmul.f32 %v13611_v29, %v13442_v26  ;;  %v5313_v5 = vadd.f32 %v13625_v62, %v5245_v61  ;;  %v9882_v61 = vld [vmem:[%s16032_s2 + $0x1b8] sm:$0xff] }
 0x81c   :  { %5507 = vst [vmem:[#allocation3 + $0xf1] sm:$0xff] %v16131_v59  ;;  %v9860_v28 = vld [vmem:[%s16032_s2 + $0x108] sm:$0xff]  ;;  %v16136_v59 = vmax.f32 %v13914_v31, 0.0  ;;  %5728 = vmatpush.msra.mxu3 %v9844_v56  ;;  %5937 = vmatpush.msrb.mxu1 %v5618_v49  ;;  %v9859_v9 = vld [vmem:[%s16032_s2 + $0x100] sm:$0xff]  ;;  %v5250_v56 = vmul.f32 %v13611_v29, %v13424_v38  ;;  %v16140_v38 = vmax.f32 %v13976_v44, 0.0 }
 0x81d   :  { %16915 = vst [vmem:[#allocation23_spill] sm:$0xff] %v13962_v15  ;;  %6572 = vmatpush.msrb.mxu0 %v9885_v25  ;;  %v9883_v25 = vld [vmem:[%s16032_s2 + $0x1c0] sm:$0xff]  ;;  %6227 = vmatpush.msrb.mxu2 %v9860_v28  ;;  %v5251_v28 = vmul.f32 %v13611_v29, %v13406_v22 }
 0x81e   :  { %5508 = vst [vmem:[#allocation3 + $0xf9] sm:$0xff] %v16132_v42  ;;  %v5633_v49 = vld [vmem:[#allocation3 + $0x1] sm:$0xff]  ;;  %v16139_v42 = vmax.f32 %v13962_v15, 0.0  ;;  %5729 = vmatpush.msra.mxu3 %v9843_v8  ;;  %5938 = vmatpush.msrb.mxu1 %v5617_v52  ;;  %v5316_v8 = vadd.f32 %v13625_v62, %v5248_v20  ;;  %v16142_v52 = vmax.f32 %v13990_v27, 0.0  ;;  %v5377_v20 = vmax.f32 %v5313_v5, 0.0  ;;  %v16925_v15 = vld [vmem:[#allocation42_spill] sm:$0xff] }
 0x81f   :  { %16916 = vst [vmem:[#allocation21_spill] sm:$0xff] %v13976_v44  ;;  %6573 = vmatpush.msrb.mxu0 %v9884_v50  ;;  %v6132_v26 = vld [vmem:[#allocation3 + $0x2] sm:$0xff]  ;;  %v5315_v50 = vadd.f32 %v13625_v62, %v5247_v37  ;;  %6228 = vmatpush.msrb.mxu2 %v9859_v9  ;;  %v9881_v37 = vld [vmem:[%s16032_s2 + $0x1b0] sm:$0xff]  ;;  %v9878_v44 = vld [vmem:[%s16032_s2 + $0x198] sm:$0xff] }
 0x820   :  { %5509 = vst [vmem:[#allocation3 + $0x109] sm:$0xff] %v16133_v17  ;;  %v16138_v17 = vmax.f32 %v13948_v7, 0.0  ;;  %5730 = vmatmul.f32.vlgmr.msra.gmra.mxu3 %v5633_v49  ;;  %v14028_v22 = vld [vmem:[#allocation3] sm:$0xff]  ;;  %6229 = vmatmul.f32.vlgmr.msrb.gmra.mxu2 %v6132_v26 }
 0x821   :  { %16917 = vst [vmem:[#allocation4_spill] sm:$0xff] %v13990_v27  ;;  %6574 = vmatpush.msrb.mxu0 %v9883_v25  ;;  %5939 = vmatmul.f32.vlgmr.msrb.gmra.mxu1 %v14028_v22  ;;  %v16919_v9 = vld [vmem:[#allocation76_spill] sm:$0xff]  ;;  %v5379_v26 = vmax.f32 %v5315_v50, 0.0 }
 0x822   :  { %5510 = vst [vmem:[#allocation3 + $0x111] sm:$0xff] %v16134_v63  ;;  %v5314_v63 = vadd.f32 %v13625_v62, %v5246_v14  ;;  %v5252_v14 = vmul.f32 %v13611_v29, %v13388_v57  ;;  %v5253_v25 = vmul.f32 %v13611_v29, %v16919_v9  ;;  %v5317_v57 = vadd.f32 %v13625_v62, %v5249_v41  ;;  %v9880_v9 = vld [vmem:[%s16032_s2 + $0x1a8] sm:$0xff]  ;;  %v16921_v41 = vld [vmem:[#allocation35_spill] sm:$0xff] }
 0x823   :  { %5511 = vst [vmem:[#allocation3 + $0x121] sm:$0xff] %v16137_v58  ;;  %6575 = vmatpush.msrb.mxu0 %v9882_v61  ;;  %v5255_v5 = vmul.f32 %v13611_v29, %v16921_v41  ;;  %v16922_v61 = vld [vmem:[#allocation36_spill] sm:$0xff] }
 0x824   :  { %5512 = vst [vmem:[#allocation3 + $0x129] sm:$0xff] %v16135_v24  ;;  %v16918_v24 = vmax.f32 %v13931_v35, 0.0  ;;  %v5378_v58 = vmax.f32 %v5314_v63, 0.0  ;;  %v5256_v63 = vmul.f32 %v13611_v29, %v16922_v61  ;;  %v9879_v41 = vld [vmem:[%s16032_s2 + $0x1a0] sm:$0xff]  ;;  %v5321_v50 = vadd.f32 %v13625_v62, %v5253_v25  ;;  %v16924_v61 = vld [vmem:[#allocation38_spill] sm:$0xff] }
 0x825   :  { %5513 = vst [vmem:[#allocation3 + $0x139] sm:$0xff] %v16136_v59  ;;  %v5318_v59 = vadd.f32 %v13625_v62, %v5250_v56  ;;  %6576 = vmatpush.msrb.mxu0 %v9881_v37  ;;  %v5320_v56 = vadd.f32 %v13625_v62, %v5252_v14  ;;  %v5634_v37 = vld [vmem:[#allocation3 + $0x9] sm:$0xff]  ;;  %v5258_v14 = vmul.f32 %v13611_v29, %v16924_v61 }
 0x826   :  { %5514 = vst [vmem:[#allocation3 + $0x141] sm:$0xff] %v16918_v24  ;;  %v16920_v24 = vld [vmem:[#allocation44_spill] sm:$0xff]  ;;  %v5323_v25 = vadd.f32 %v13625_v62, %v5255_v5  ;;  %v5263_v61 = vmul.f32 %v13611_v29, %v13581_v13 }
 0x827   :  { %5515 = vst [vmem:[#allocation3 + $0x151] sm:$0xff] %v16138_v17  ;;  %v5254_v49 = vmul.f32 %v13611_v29, %v16920_v24  ;;  %v5319_v17 = vadd.f32 %v13625_v62, %v5251_v28  ;;  %v5380_v24 = vmax.f32 %v5316_v8, 0.0  ;;  %6577 = vmatpush.msrb.mxu0 %v9880_v9  ;;  %v5382_v27 = vmax.f32 %v5318_v59, 0.0 }
 0x828   :  { %5516 = vst [vmem:[#allocation3 + $0x159] sm:$0xff] %v16139_v42  ;;  %v16923_v42 = vld [vmem:[#allocation77_spill] sm:$0xff]  ;;  %v5384_v59 = vmax.f32 %v5320_v56, 0.0  ;;  %5733 = vmatmul.f32.gmra.mxu3 %v5634_v37  ;;  %v5326_v56 = vadd.f32 %v13625_v62, %v5258_v14  ;;  %v5265_v14 = vmul.f32 %v13611_v29, %v13569_v21 }
 0x829   :  { %5517 = vst [vmem:[#allocation3 + $0x169] sm:$0xff] %v16140_v38  ;;  %v5257_v28 = vmul.f32 %v13611_v29, %v16923_v42  ;;  %v5381_v38 = vmax.f32 %v5317_v57, 0.0  ;;  %v5322_v8 = vadd.f32 %v13625_v62, %v5254_v49  ;;  %v5259_v42 = vmul.f32 %v13611_v29, %v16925_v15  ;;  %6578 = vmatpush.msrb.mxu0 %v9879_v41  ;;  %v16927_v15 = vld [vmem:[#allocation217_spill] sm:$0xff]  ;;  %v16928_v41 = vld [vmem:[#allocation131_spill] sm:$0xff] }
 0x82a   :  { %5518 = vst [vmem:[#allocation3 + $0x171] sm:$0xff] %v16142_v52  ;;  %v6133_v52 = vld [vmem:[#allocation3 + $0xa] sm:$0xff]  ;;  %v5383_v57 = vmax.f32 %v5319_v17, 0.0  ;;  %v5324_v49 = vadd.f32 %v13625_v62, %v5256_v63  ;;  %5942 = vmatmul.f32.gmra.mxu1 %v14028_v22  ;;  %v5261_v5 = vmul.f32 %v13611_v29, %v16927_v15  ;;  %v5262_v63 = vmul.f32 %v13611_v29, %v16928_v41 }
 0x82b   :  { %5519 = vst [vmem:[#allocation3 + $0x181] sm:$0xff] %v5377_v20  ;;  %v16926_v20 = vld [vmem:[#allocation78_spill] sm:$0xff]  ;;  %v5325_v17 = vadd.f32 %v13625_v62, %v5257_v28  ;;  %6232 = vmatmul.f32.gmra.mxu2 %v6133_v52  ;;  %6579 = vmatpush.msrb.mxu0 %v9878_v44  ;;  %v9876_v37 = vld [vmem:[%s16032_s2 + $0x188] sm:$0xff]  ;;  %v5327_v28 = vadd.f32 %v13625_v62, %v5259_v42  ;;  %v5555_v42 = vld [vmem:[#allocation3 + $0x18] sm:$0xff] }
 0x82c   :  { %5520 = vst [vmem:[#allocation3 + $0x189] sm:$0xff] %v5378_v58  ;;  %v5260_v9 = vmul.f32 %v13611_v29, %v16926_v20  ;;  %v9877_v58 = vld [vmem:[%s16032_s2 + $0x190] sm:$0xff]  ;;  %v5264_v44 = vmul.f32 %v13611_v29, %v13575_v1  ;;  %v5388_v52 = vmax.f32 %v5324_v49, 0.0  ;;  %v5329_v13 = vadd.f32 %v13625_v62, %v5261_v5  ;;  %v6134_v20 = vld [vmem:[#allocation3 + $0x1a] sm:$0xff] }
 0x82d   :  { %5521 = vst [vmem:[#allocation3 + $0x1c9] sm:$0xff] %v5379_v26  ;;  %v5385_v26 = vmax.f32 %v5321_v50, 0.0  ;;  %v5387_v50 = vmax.f32 %v5323_v25, 0.0  ;;  %6580 = vmatpush.msrb.mxu0 %v9877_v58  ;;  %v5266_v1 = vmul.f32 %v13611_v29, %v13563_v23  ;;  %v5330_v25 = vadd.f32 %v13625_v62, %v5262_v63 }
 0x82e   :  { %5522 = vst [vmem:[#allocation3 + $0x1d1] sm:$0xff] %v5380_v24  ;;  %v5386_v24 = vmax.f32 %v5322_v8, 0.0  ;;  %v5389_v8 = vmax.f32 %v5325_v17, 0.0  ;;  %v5331_v49 = vadd.f32 %v13625_v62, %v5263_v61  ;;  %v5391_v21 = vmax.f32 %v5327_v28, 0.0 }
 0x82f   :  { %5523 = vst [vmem:[#allocation3 + $0x1e1] sm:$0xff] %v5381_v38  ;;  %v5328_v38 = vadd.f32 %v13625_v62, %v5260_v9  ;;  %6581 = vmatpush.msrb.mxu0 %v9876_v37  ;;  %v5267_v9 = vmul.f32 %v13611_v29, %v13557_v33  ;;  %v5332_v58 = vadd.f32 %v13625_v62, %v5264_v44  ;;  %v16929_v23 = vmax.f32 %v13656_v18, 0.0  ;;  %v16933_v44 = vld [vmem:[#allocation29_spill] sm:$0xff] }
 0x830   :  { %5524 = vst [vmem:[#allocation3 + $0x1e9] sm:$0xff] %v5382_v27  ;;  %v9875_v27 = vld [vmem:[%s16032_s2 + $0x180] sm:$0xff]  ;;  %v5269_v5 = vmul.f32 %v13611_v29, %v13545_v12  ;;  %v5333_v33 = vadd.f32 %v13625_v62, %v5265_v14  ;;  %v5393_v17 = vmax.f32 %v5329_v13, 0.0  ;;  %v5334_v41 = vadd.f32 %v13625_v62, %v5266_v1  ;;  %v16932_v12 = vld [vmem:[#allocation27_spill] sm:$0xff] }
 0x831   :  { %5525 = vst [vmem:[#allocation3 + $0x1f9] sm:$0xff] %v5383_v57  ;;  %v5390_v57 = vmax.f32 %v5326_v56, 0.0  ;;  %6582 = vmatpush.msrb.mxu0 %v9875_v27  ;;  %v5392_v15 = vmax.f32 %v5328_v38, 0.0  ;;  %5736 = vmatmul.f32.gmra.mxu3 %v16929_v23  ;;  %v5394_v63 = vmax.f32 %v5330_v25, 0.0  ;;  %v16931_v56 = vld [vmem:[#allocation73_spill] sm:$0xff]  ;;  %v5395_v37 = vmax.f32 %v5331_v49, 0.0 }
 0x832   :  { %5526 = vst [vmem:[#allocation3 + $0x201] sm:$0xff] %v5384_v59  ;;  %v5268_v59 = vmul.f32 %v13611_v29, %v13551_v60  ;;  %5945 = vmatmul.f32.gmra.mxu1 %v5555_v42  ;;  %6583 = vmatmul.f32.vlgmr.msrb.gmra.mxu0 %v5555_v42  ;;  %v5271_v18 = vmul.f32 %v13611_v29, %v16931_v56  ;;  %v5397_v27 = vmax.f32 %v5333_v33, 0.0  ;;  %v16934_v14 = vld [vmem:[#allocation75_spill] sm:$0xff]  ;;  %v5398_v42 = vmax.f32 %v5334_v41, 0.0  ;;  %v16935_v1 = vld [vmem:[#allocation80_spill] sm:$0xff] }
 0x833   :  { %5527 = vst [vmem:[#allocation3 + $0x211] sm:$0xff] %v5385_v26  ;;  %6235 = vmatmul.f32.gmra.mxu2 %v6134_v20  ;;  %v16930_v26 = vld [vmem:[#allocation48_spill] sm:$0xff]  ;;  %v5272_v61 = vmul.f32 %v13611_v29, %v16932_v12  ;;  %v5273_v38 = vmul.f32 %v13611_v29, %v16933_v44  ;;  %v5274_v13 = vmul.f32 %v13611_v29, %v16934_v14  ;;  %v6136_v44 = vld [vmem:[#allocation3 + $0x32] sm:$0xff]  ;;  %v5559_v14 = vld [vmem:[#allocation3 + $0x48] sm:$0xff] }
 0x834   :  { %5528 = vst [vmem:[#allocation3 + $0x219] sm:$0xff] %v5386_v24  ;;  %v5270_v60 = vmul.f32 %v13611_v29, %v16930_v26  ;;  %v5335_v24 = vadd.f32 %v13625_v62, %v5267_v9  ;;  %v5336_v28 = vadd.f32 %v13625_v62, %v5268_v59  ;;  %v5275_v25 = vmul.f32 %v13611_v29, %v16935_v1  ;;  %v5556_v9 = vld [vmem:[#allocation3 + $0x20] sm:$0xff]  ;;  %v6139_v1 = vld [vmem:[#allocation3 + $0x52] sm:$0xff] }
 0x835   :  { %5529 = vst [vmem:[#allocation3 + $0x229] sm:$0xff] %v5387_v50  ;;  %v5396_v50 = vmax.f32 %v5332_v58, 0.0  ;;  %v16936_v49 = vld [vmem:[#allocation32_spill] sm:$0xff]  ;;  %v5340_v59 = vadd.f32 %v13625_v62, %v5272_v61  ;;  %v5557_v61 = vld [vmem:[#allocation3 + $0x30] sm:$0xff] }
 0x836   :  { %5530 = vst [vmem:[#allocation3 + $0x231] sm:$0xff] %v5388_v52  ;;  %v5337_v52 = vadd.f32 %v13625_v62, %v5269_v5  ;;  %v5399_v20 = vmax.f32 %v5335_v24, 0.0  ;;  %v5400_v58 = vmax.f32 %v5336_v28, 0.0  ;;  %v6135_v23 = vld [vmem:[#allocation3 + $0x22] sm:$0xff] }
 0x837   :  { %5531 = vst [vmem:[#allocation3 + $0x241] sm:$0xff] %v5389_v8  ;;  %v5338_v8 = vadd.f32 %v13625_v62, %v5270_v60  ;;  %v16938_v5 = vld [vmem:[#allocation33_spill] sm:$0xff]  ;;  %v5342_v60 = vadd.f32 %v13625_v62, %v5274_v13  ;;  %v16941_v13 = vmax.f32 %v13681_v19, 0.0 }
 0x838   :  { %5532 = vst [vmem:[#allocation3 + $0x249] sm:$0xff] %v5390_v57  ;;  %v5339_v57 = vadd.f32 %v13625_v62, %v5271_v18  ;;  %v5277_v33 = vmul.f32 %v13611_v29, %v16938_v5  ;;  %v5401_v26 = vmax.f32 %v5337_v52, 0.0  ;;  %v5404_v18 = vmax.f32 %v5340_v59, 0.0  ;;  %v5558_v52 = vld [vmem:[#allocation3 + $0x38] sm:$0xff]  ;;  %v5562_v19 = vld [vmem:[#allocation3 + $0x68] sm:$0xff] }
 0x839   :  { %5533 = vst [vmem:[#allocation3 + $0x259] sm:$0xff] %v5391_v21  ;;  %v5276_v21 = vmul.f32 %v13611_v29, %v16936_v49  ;;  %v5402_v41 = vmax.f32 %v5338_v8, 0.0  ;;  %v6138_v8 = vld [vmem:[#allocation3 + $0x4a] sm:$0xff]  ;;  %v16945_v49 = vmax.f32 %v13726_v51, 0.0  ;;  %v16946_v59 = vmax.f32 %v13737_v4, 0.0  ;;  %v5566_v51 = vld [vmem:[#allocation3 + $0x98] sm:$0xff] }
 0x83a   :  { %5534 = vst [vmem:[#allocation3 + $0x261] sm:$0xff] %v5392_v15  ;;  %v16937_v15 = vmax.f32 %v13659_v48, 0.0  ;;  %5948 = vmatmul.f32.gmra.mxu1 %v5556_v9  ;;  %6586 = vmatmul.f32.gmra.mxu0 %v5556_v9  ;;  %v5403_v56 = vmax.f32 %v5339_v57, 0.0  ;;  %v5345_v29 = vadd.f32 %v13625_v62, %v5277_v33  ;;  %v6140_v57 = vld [vmem:[#allocation3 + $0x62] sm:$0xff]  ;;  %v6141_v9 = vld [vmem:[#allocation3 + $0x6a] sm:$0xff]  ;;  %v16948_v5 = vmax.f32 %v13759_v55, 0.0 }
 0x83b   :  { %5535 = vst [vmem:[#allocation3 + $0x271] sm:$0xff] %v5393_v17  ;;  %v5341_v17 = vadd.f32 %v13625_v62, %v5273_v38  ;;  %6238 = vmatmul.f32.gmra.mxu2 %v6135_v23  ;;  %v5344_v48 = vadd.f32 %v13625_v62, %v5276_v21  ;;  %v6142_v21 = vld [vmem:[#allocation3 + $0x7a] sm:$0xff]  ;;  %v6144_v23 = vld [vmem:[#allocation3 + $0x92] sm:$0xff]  ;;  %v5567_v4 = vld [vmem:[#allocation3 + $0xa8] sm:$0xff] }
 0x83c   :  { %5536 = vst [vmem:[#allocation3 + $0x279] sm:$0xff] %v5394_v63  ;;  %5739 = vmatmul.f32.gmra.mxu3 %v16937_v15  ;;  %v5343_v63 = vadd.f32 %v13625_v62, %v5275_v25  ;;  %v5409_v38 = vmax.f32 %v5345_v29, 0.0  ;;  %v5410_v62 = vmax.f32 %v13694_v0, 0.0  ;;  %v5560_v0 = vld [vmem:[#allocation3 + $0x50] sm:$0xff]  ;;  %v16943_v25 = vmax.f32 %v13703_v53, 0.0  ;;  %v5564_v53 = vld [vmem:[#allocation3 + $0x80] sm:$0xff] }
 0x83d   :  { %5537 = vst [vmem:[#allocation3 + $0x289] sm:$0xff] %v5395_v37  ;;  %v5405_v24 = vmax.f32 %v5341_v17, 0.0  ;;  %v5406_v37 = vmax.f32 %v5342_v60, 0.0  ;;  %v5408_v28 = vmax.f32 %v5344_v48, 0.0  ;;  %v16947_v15 = vmax.f32 %v13748_v32, 0.0  ;;  %v6145_v33 = vld [vmem:[#allocation3 + $0x9a] sm:$0xff] }
 0x83e   :  { %5538 = vst [vmem:[#allocation3 + $0x291] sm:$0xff] %v5396_v50  ;;  %v5407_v12 = vmax.f32 %v5343_v63, 0.0  ;;  %v16939_v50 = vmax.f32 %v13662_v34, 0.0  ;;  %v6137_v34 = vld [vmem:[#allocation3 + $0x3a] sm:$0xff]  ;;  %v16949_v17 = vmax.f32 %v13770_v2, 0.0  ;;  %v5568_v32 = vld [vmem:[#allocation3 + $0xb0] sm:$0xff] }
 0x83f   :  { %5539 = vst [vmem:[#allocation3 + $0x2a1] sm:$0xff] %v5397_v27  ;;  %v16940_v27 = vmax.f32 %v13670_v46, 0.0  ;;  %v5561_v46 = vld [vmem:[#allocation3 + $0x60] sm:$0xff]  ;;  %v16950_v60 = vmax.f32 %v13781_v45, 0.0  ;;  %v5570_v45 = vld [vmem:[#allocation3 + $0xc8] sm:$0xff] }
 0x840   :  { %5540 = vst [vmem:[#allocation3 + $0x2a9] sm:$0xff] %v5398_v42  ;;  %v16942_v42 = vmax.f32 %v13691_v54, 0.0  ;;  %v5563_v54 = vld [vmem:[#allocation3 + $0x78] sm:$0xff]  ;;  %v5569_v63 = vld [vmem:[#allocation3 + $0xc0] sm:$0xff] }
 0x841   :  { %5541 = vst [vmem:[#allocation3 + $0x2b9] sm:$0xff] %v5399_v20  ;;  %v16944_v20 = vmax.f32 %v13714_v10, 0.0  ;;  %v5565_v10 = vld [vmem:[#allocation3 + $0x90] sm:$0xff]  ;;  %v6148_v2 = vld [vmem:[#allocation3 + $0xc2] sm:$0xff] }
 0x842   :  { %5542 = vst [vmem:[#allocation3 + $0x2c1] sm:$0xff] %v5400_v58  ;;  %5951 = vmatmul.f32.gmra.mxu1 %v5557_v61  ;;  %6589 = vmatmul.f32.gmra.mxu0 %v5557_v61  ;;  %v6143_v58 = vld [vmem:[#allocation3 + $0x82] sm:$0xff]  ;;  %v6149_v61 = vld [vmem:[#allocation3 + $0xca] sm:$0xff] }
 0x843   :  { %5543 = vst [vmem:[#allocation3 + $0x2d1] sm:$0xff] %v5401_v26  ;;  %6241 = vmatmul.f32.gmra.mxu2 %v6136_v44  ;;  %v6146_v26 = vld [vmem:[#allocation3 + $0xaa] sm:$0xff] }
 0x844   :  { %5544 = vst [vmem:[#allocation3 + $0x2d9] sm:$0xff] %v5402_v41  ;;  %5742 = vmatmul.f32.gmra.mxu3 %v16939_v50  ;;  %v6147_v41 = vld [vmem:[#allocation3 + $0xb2] sm:$0xff] }
 0x845   :  { %5545 = vst [vmem:[#allocation3 + $0x2e9] sm:$0xff] %v5403_v56  ;;  %v16951_v56 = vmax.f32 %v13792_v6, 0.0 }
 0x846   :  { %5546 = vst [vmem:[#allocation3 + $0x2f1] sm:$0xff] %v5404_v18 }
 0x847   :  { %5547 = vst [vmem:[#allocation3 + $0x301] sm:$0xff] %v5405_v24 }
 0x848   :  { %5548 = vst [vmem:[#allocation3 + $0x309] sm:$0xff] %v5406_v37 }
 0x849   :  { %5549 = vst [vmem:[#allocation3 + $0x319] sm:$0xff] %v5407_v12  ;;  %v16952_v12 = vmax.f32 %v13803_v47, 0.0 }
 0x84a   :  { %5550 = vst [vmem:[#allocation3 + $0x321] sm:$0xff] %v5408_v28  ;;  %5954 = vmatmul.f32.gmra.mxu1 %v5558_v52  ;;  %6592 = vmatmul.f32.gmra.mxu0 %v5558_v52  ;;  %v5571_v52 = vld [vmem:[#allocation3 + $0xd8] sm:$0xff] }
 0x84b   :  { %5551 = vst [vmem:[#allocation3 + $0x331] sm:$0xff] %v5409_v38  ;;  %6244 = vmatmul.f32.gmra.mxu2 %v6137_v34  ;;  %v6150_v34 = vld [vmem:[#allocation3 + $0xda] sm:$0xff] }
 0x84c   :  { %5552 = vst [vmem:[#allocation3 + $0x339] sm:$0xff] %v5410_v62  ;;  %5745 = vmatmul.f32.gmra.mxu3 %v16940_v27  ;;  %v16953_v27 = vmax.f32 %v13814_v40, 0.0 }
 0x852   :  { %5957 = vmatmul.f32.gmra.mxu1 %v5559_v14  ;;  %6595 = vmatmul.f32.gmra.mxu0 %v5559_v14 }
 0x853   :  { %6247 = vmatmul.f32.gmra.mxu2 %v6138_v8 }
 0x854   :  { %5748 = vmatmul.f32.gmra.mxu3 %v16941_v13 }
 0x85a   :  { %5960 = vmatmul.f32.gmra.mxu1 %v5560_v0  ;;  %6598 = vmatmul.f32.gmra.mxu0 %v5560_v0 }
 0x85b   :  { %6250 = vmatmul.f32.gmra.mxu2 %v6139_v1  ;;  %v5572_v1 = vld [vmem:[#allocation3 + $0xe0] sm:$0xff] }
 0x85c   :  { %5751 = vmatmul.f32.gmra.mxu3 %v16942_v42 }
 0x862   :  { %5963 = vmatmul.f32.gmra.mxu1 %v5561_v46  ;;  %6601 = vmatmul.f32.gmra.mxu0 %v5561_v46  ;;  %v16954_v46 = vmax.f32 %v13825_v16, 0.0 }
 0x863   :  { %6253 = vmatmul.f32.gmra.mxu2 %v6140_v57 }
 0x864   :  { %5754 = vmatmul.f32.gmra.mxu3 %v16943_v25  ;;  %v6151_v25 = vld [vmem:[#allocation3 + $0xe2] sm:$0xff] }
 0x86a   :  { %5966 = vmatmul.f32.gmra.mxu1 %v5562_v19  ;;  %6604 = vmatmul.f32.gmra.mxu0 %v5562_v19 }
 0x86b   :  { %6256 = vmatmul.f32.gmra.mxu2 %v6141_v9 }
 0x86c   :  { %5757 = vmatmul.f32.gmra.mxu3 %v16944_v20 }
 0x872   :  { %5969 = vmatmul.f32.gmra.mxu1 %v5563_v54  ;;  %6607 = vmatmul.f32.gmra.mxu0 %v5563_v54 }
 0x873   :  { %6259 = vmatmul.f32.gmra.mxu2 %v6142_v21  ;;  %v16955_v21 = vmax.f32 %v13836_v39, 0.0 }
 0x874   :  { %5760 = vmatmul.f32.gmra.mxu3 %v16945_v49  ;;  %v5573_v49 = vld [vmem:[#allocation3 + $0xf0] sm:$0xff] }
 0x87a   :  { %5972 = vmatmul.f32.gmra.mxu1 %v5564_v53  ;;  %6610 = vmatmul.f32.gmra.mxu0 %v5564_v53  ;;  %v6152_v53 = vld [vmem:[#allocation3 + $0xf2] sm:$0xff] }
 0x87b   :  { %6262 = vmatmul.f32.gmra.mxu2 %v6143_v58 }
 0x87c   :  { %5763 = vmatmul.f32.gmra.mxu3 %v16946_v59 }
 0x882   :  { %5975 = vmatmul.f32.gmra.mxu1 %v5565_v10  ;;  %6613 = vmatmul.f32.gmra.mxu0 %v5565_v10 }
 0x883   :  { %6265 = vmatmul.f32.gmra.mxu2 %v6144_v23 }
 0x884   :  { %5766 = vmatmul.f32.gmra.mxu3 %v16947_v15 }
 0x88a   :  { %5978 = vmatmul.f32.gmra.mxu1 %v5566_v51  ;;  %6616 = vmatmul.f32.gmra.mxu0 %v5566_v51  ;;  %v5574_v51 = vld [vmem:[#allocation3 + $0xf8] sm:$0xff] }
 0x88b   :  { %6268 = vmatmul.f32.gmra.mxu2 %v6145_v33  ;;  %v6153_v33 = vld [vmem:[#allocation3 + $0xfa] sm:$0xff] }
 0x88c   :  { %5769 = vmatmul.f32.gmra.mxu3 %v16948_v5  ;;  %v16956_v5 = vmax.f32 %v13847_v30, 0.0 }
 0x892   :  { %5981 = vmatmul.f32.gmra.mxu1 %v5567_v4  ;;  %6619 = vmatmul.f32.gmra.mxu0 %v5567_v4 }
 0x893   :  { %6271 = vmatmul.f32.gmra.mxu2 %v6146_v26 }
 0x894   :  { %5772 = vmatmul.f32.gmra.mxu3 %v16949_v17 }
 0x89a   :  { %5984 = vmatmul.f32.gmra.mxu1 %v5568_v32  ;;  %6622 = vmatmul.f32.gmra.mxu0 %v5568_v32 }
 0x89b   :  { %6274 = vmatmul.f32.gmra.mxu2 %v6147_v41  ;;  %v5575_v41 = vld [vmem:[#allocation3 + $0x108] sm:$0xff] }
 0x89c   :  { %5775 = vmatmul.f32.gmra.mxu3 %v16950_v60 }
 0x89e   :  { %v5940_v55 = vpop.f32.mrf.mxu1 }
 0x8a2   :  { %5987 = vmatmul.f32.gmra.mxu1 %v5569_v63  ;;  %6625 = vmatmul.f32.gmra.mxu0 %v5569_v63  ;;  %v6154_v63 = vld [vmem:[#allocation3 + $0x10a] sm:$0xff] }
 0x8a3   :  { %6277 = vmatmul.f32.gmra.mxu2 %v6148_v2  ;;  %v5731_v48 = vpop.f32.mrf.mxu3  ;;  %v6230_v29 = vpop.f32.mrf.mxu2 }
 0x8a4   :  { %5778 = vmatmul.f32.gmra.mxu3 %v16951_v56  ;;  %v5941_v18 = vadd.f32 %v5940_v55, %v5731_v48  ;;  %v16957_v55 = vmax.f32 %v13858_v43, 0.0 }
 0x8a6   :  { %v14171_v37 = vadd.f32 %v6230_v29, %v5941_v18 }
 0x8a7   :  { %v5943_v24 = vpop.f32.mrf.mxu1 }
 0x8aa   :  { %5990 = vmatmul.f32.gmra.mxu1 %v5570_v45  ;;  %6628 = vmatmul.f32.gmra.mxu0 %v5570_v45  ;;  %v16958_v45 = vmax.f32 %v13869_v36, 0.0 }
 0x8ab   :  { %6280 = vmatmul.f32.gmra.mxu2 %v6149_v61  ;;  %v5734_v6 = vpop.f32.mrf.mxu3 }
 0x8ac   :  { %5781 = vmatmul.f32.gmra.mxu3 %v16952_v12  ;;  %v5944_v28 = vadd.f32 %v5943_v24, %v5734_v6  ;;  %v5576_v24 = vld [vmem:[#allocation3 + $0x110] sm:$0xff] }
 0x8ad   :  { %v6155_v12 = vld [vmem:[#allocation3 + $0x112] sm:$0xff] }
 0x8ae   :  { %v6233_v50 = vpop.f32.mrf.mxu2 }
 0x8af   :  { %v5946_v44 = vpop.f32.mrf.mxu1  ;;  %v14175_v38 = vadd.f32 %v6233_v50, %v5944_v28  ;;  %v14177_v62 = vpop.f32.mrf.mxu0 }
 0x8b2   :  { %5993 = vmatmul.f32.gmra.mxu1 %v5571_v52  ;;  %6631 = vmatmul.f32.gmra.mxu0 %v5571_v52  ;;  %v5577_v52 = vld [vmem:[#allocation3 + $0x120] sm:$0xff] }
 0x8b3   :  { %6283 = vmatmul.f32.gmra.mxu2 %v6150_v34  ;;  %v6156_v34 = vld [vmem:[#allocation3 + $0x122] sm:$0xff] }
 0x8b4   :  { %5784 = vmatmul.f32.gmra.mxu3 %v16953_v27  ;;  %v5737_v47 = vpop.f32.mrf.mxu3  ;;  %v16959_v27 = vmax.f32 %v13880_v3, 0.0 }
 0x8b5   :  { %v5947_v14 = vadd.f32 %v5946_v44, %v5737_v47 }
 0x8b6   :  { %v6236_v13 = vpop.f32.mrf.mxu2 }
 0x8b7   :  { %v5949_v8 = vpop.f32.mrf.mxu1  ;;  %v14181_v0 = vadd.f32 %v6236_v13, %v5947_v14  ;;  %v14183_v42 = vpop.f32.mrf.mxu0 }
 0x8ba   :  { %5996 = vmatmul.f32.gmra.mxu1 %v5572_v1  ;;  %6634 = vmatmul.f32.gmra.mxu0 %v5572_v1 }
 0x8bb   :  { %6286 = vmatmul.f32.gmra.mxu2 %v6151_v25  ;;  %v16960_v25 = vmax.f32 %v13897_v11, 0.0 }
 0x8bc   :  { %5787 = vmatmul.f32.gmra.mxu3 %v16954_v46  ;;  %v5578_v46 = vld [vmem:[#allocation3 + $0x128] sm:$0xff] }
 0x8be   :  { %v6239_v19 = vpop.f32.mrf.mxu2 }
 0x8bf   :  { %v5740_v40 = vpop.f32.mrf.mxu3  ;;  %v5952_v20 = vpop.f32.mrf.mxu1 }
 0x8c0   :  { %v5950_v57 = vadd.f32 %v5949_v8, %v5740_v40  ;;  %v14189_v54 = vpop.f32.mrf.mxu0  ;;  %v6157_v40 = vld [vmem:[#allocation3 + $0x12a] sm:$0xff] }
 0x8c2   :  { %v14187_v9 = vadd.f32 %v6239_v19, %v5950_v57  ;;  %5999 = vmatmul.f32.gmra.mxu1 %v5573_v49  ;;  %6637 = vmatmul.f32.gmra.mxu0 %v5573_v49 }
 0x8c3   :  { %6289 = vmatmul.f32.gmra.mxu2 %v6152_v53  ;;  %v5579_v53 = vld [vmem:[#allocation3 + $0x138] sm:$0xff] }
 0x8c4   :  { %5790 = vmatmul.f32.gmra.mxu3 %v16955_v21 }
 0x8c6   :  { %v6242_v58 = vpop.f32.mrf.mxu2 }
 0x8c7   :  { %v5743_v16 = vpop.f32.mrf.mxu3  ;;  %v5955_v10 = vpop.f32.mrf.mxu1 }
 0x8c8   :  { %v5953_v59 = vadd.f32 %v5952_v20, %v5743_v16  ;;  %v14195_v23 = vpop.f32.mrf.mxu0  ;;  %v16961_v16 = vmax.f32 %v13914_v31, 0.0 }
 0x8ca   :  { %v14193_v15 = vadd.f32 %v6242_v58, %v5953_v59  ;;  %6002 = vmatmul.f32.gmra.mxu1 %v5574_v51  ;;  %6640 = vmatmul.f32.gmra.mxu0 %v5574_v51  ;;  %v6158_v59 = vld [vmem:[#allocation3 + $0x13a] sm:$0xff] }
 0x8cb   :  { %6292 = vmatmul.f32.gmra.mxu2 %v6153_v33 }
 0x8cc   :  { %5793 = vmatmul.f32.gmra.mxu3 %v16956_v5 }
 0x8ce   :  { %v6245_v17 = vpop.f32.mrf.mxu2 }
 0x8cf   :  { %v5746_v39 = vpop.f32.mrf.mxu3  ;;  %v5958_v26 = vpop.f32.mrf.mxu1 }
 0x8d0   :  { %v5956_v4 = vadd.f32 %v5955_v10, %v5746_v39  ;;  %v14201_v60 = vpop.f32.mrf.mxu0  ;;  %v5580_v39 = vld [vmem:[#allocation3 + $0x140] sm:$0xff] }
 0x8d2   :  { %v14199_v32 = vadd.f32 %v6245_v17, %v5956_v4  ;;  %6005 = vmatmul.f32.gmra.mxu1 %v5575_v41  ;;  %6643 = vmatmul.f32.gmra.mxu0 %v5575_v41  ;;  %v16962_v4 = vmax.f32 %v13931_v35, 0.0  ;;  %v6159_v17 = vld [vmem:[#allocation3 + $0x142] sm:$0xff] }
 0x8d3   :  { %6295 = vmatmul.f32.gmra.mxu2 %v6154_v63 }
 0x8d4   :  { %5796 = vmatmul.f32.gmra.mxu3 %v16957_v55 }
 0x8d6   :  { %v6248_v2 = vpop.f32.mrf.mxu2 }
 0x8d7   :  { %v5749_v30 = vpop.f32.mrf.mxu3  ;;  %v5961_v48 = vpop.f32.mrf.mxu1 }
 0x8d8   :  { %v5959_v56 = vadd.f32 %v5958_v26, %v5749_v30  ;;  %v14207_v29 = vpop.f32.mrf.mxu0 }
 0x8da   :  { %v14205_v18 = vadd.f32 %v6248_v2, %v5959_v56  ;;  %6008 = vmatmul.f32.gmra.mxu1 %v5576_v24  ;;  %6646 = vmatmul.f32.gmra.mxu0 %v5576_v24  ;;  %v5581_v56 = vld [vmem:[#allocation3 + $0x150] sm:$0xff]  ;;  %v16963_v2 = vmax.f32 %v13948_v7, 0.0 }
 0x8db   :  { %6298 = vmatmul.f32.gmra.mxu2 %v6155_v12 }
 0x8dc   :  { %5799 = vmatmul.f32.gmra.mxu3 %v16958_v45 }
 0x8de   :  { %v6251_v6 = vpop.f32.mrf.mxu2 }
 0x8df   :  { %v5752_v43 = vpop.f32.mrf.mxu3  ;;  %v5964_v28 = vpop.f32.mrf.mxu1 }
 0x8e0   :  { %v5962_v61 = vadd.f32 %v5961_v48, %v5752_v43  ;;  %v14213_v44 = vpop.f32.mrf.mxu0  ;;  %v6160_v48 = vld [vmem:[#allocation3 + $0x152] sm:$0xff] }
 0x8e2   :  { %v14211_v50 = vadd.f32 %v6251_v6, %v5962_v61  ;;  %6011 = vmatmul.f32.gmra.mxu1 %v5577_v52  ;;  %6649 = vmatmul.f32.gmra.mxu0 %v5577_v52  ;;  %v5582_v6 = vld [vmem:[#allocation3 + $0x158] sm:$0xff] }
 0x8e3   :  { %6301 = vmatmul.f32.gmra.mxu2 %v6156_v34 }
 0x8e4   :  { %5802 = vmatmul.f32.gmra.mxu3 %v16959_v27  ;;  %v6161_v27 = vld [vmem:[#allocation3 + $0x15a] sm:$0xff] }
 0x8e6   :  { %v6254_v14 = vpop.f32.mrf.mxu2 }
 0x8e7   :  { %v5755_v36 = vpop.f32.mrf.mxu3  ;;  %v5967_v13 = vpop.f32.mrf.mxu1 }
 0x8e8   :  { %v5965_v47 = vadd.f32 %v5964_v28, %v5755_v36  ;;  %v14219_v1 = vpop.f32.mrf.mxu0  ;;  %v16964_v28 = vld [vmem:[#allocation23_spill] sm:$0xff] }
 0x8e9   :  { %v16965_v52 = vmax.f32 %v16964_v28, 0.0 }
 0x8ea   :  { %v14217_v8 = vadd.f32 %v6254_v14, %v5965_v47  ;;  %6014 = vmatmul.f32.gmra.mxu1 %v5578_v46  ;;  %6652 = vmatmul.f32.gmra.mxu0 %v5578_v46  ;;  %v5583_v46 = vld [vmem:[#allocation3 + $0x168] sm:$0xff] }
 0x8eb   :  { %6304 = vmatmul.f32.gmra.mxu2 %v6157_v40 }
 0x8ec   :  { %5805 = vmatmul.f32.gmra.mxu3 %v16960_v25  ;;  %v16966_v25 = vld [vmem:[#allocation21_spill] sm:$0xff] }
 0x8ed   :  { %v16967_v40 = vmax.f32 %v16966_v25, 0.0 }
 0x8ee   :  { %v6257_v19 = vpop.f32.mrf.mxu2 }
 0x8ef   :  { %v5758_v3 = vpop.f32.mrf.mxu3  ;;  %v5970_v20 = vpop.f32.mrf.mxu1 }
 0x8f0   :  { %v5968_v57 = vadd.f32 %v5967_v13, %v5758_v3  ;;  %v14225_v21 = vpop.f32.mrf.mxu0  ;;  %v6162_v3 = vld [vmem:[#allocation3 + $0x16a] sm:$0xff] }
 0x8f2   :  { %v14223_v49 = vadd.f32 %v6257_v19, %v5968_v57  ;;  %6017 = vmatmul.f32.gmra.mxu1 %v5579_v53  ;;  %6655 = vmatmul.f32.gmra.mxu0 %v5579_v53 }
 0x8f3   :  { %6307 = vmatmul.f32.gmra.mxu2 %v6158_v59 }
 0x8f4   :  { %5808 = vmatmul.f32.gmra.mxu3 %v16961_v16 }
 0x8f6   :  { %v6260_v10 = vpop.f32.mrf.mxu2 }
 0x8f7   :  { %v5761_v11 = vpop.f32.mrf.mxu3  ;;  %v5973_v51 = vpop.f32.mrf.mxu1 }
 0x8f8   :  { %v5971_v58 = vadd.f32 %v5970_v20, %v5761_v11  ;;  %v14231_v33 = vpop.f32.mrf.mxu0  ;;  %v5584_v11 = vld [vmem:[#allocation3 + $0x170] sm:$0xff] }
 0x8fa   :  { %v14229_v5 = vadd.f32 %v6260_v10, %v5971_v58  ;;  %6020 = vmatmul.f32.gmra.mxu1 %v5580_v39  ;;  %6658 = vmatmul.f32.gmra.mxu0 %v5580_v39  ;;  %v16968_v58 = vld [vmem:[#allocation4_spill] sm:$0xff] }
 0x8fb   :  { %6310 = vmatmul.f32.gmra.mxu2 %v6159_v17  ;;  %v16969_v10 = vmax.f32 %v16968_v58, 0.0 }
 0x8fc   :  { %5811 = vmatmul.f32.gmra.mxu3 %v16962_v4 }
 0x8fe   :  { %v6263_v41 = vpop.f32.mrf.mxu2 }
 0x8ff   :  { %v5764_v31 = vpop.f32.mrf.mxu3  ;;  %v5976_v55 = vpop.f32.mrf.mxu1 }
 0x900   :  { %v5974_v26 = vadd.f32 %v5973_v51, %v5764_v31  ;;  %v14237_v30 = vpop.f32.mrf.mxu0  ;;  %v6163_v51 = vld [vmem:[#allocation3 + $0x172] sm:$0xff] }
 0x902   :  { %v14235_v63 = vadd.f32 %v6263_v41, %v5974_v26  ;;  %6023 = vmatmul.f32.gmra.mxu1 %v5581_v56  ;;  %6661 = vmatmul.f32.gmra.mxu0 %v5581_v56  ;;  %v5665_v26 = vld [vmem:[#allocation3 + $0x1b1] sm:$0xff] }
 0x903   :  { %6313 = vmatmul.f32.gmra.mxu2 %v6160_v48  ;;  %v6164_v56 = vld [vmem:[#allocation3 + $0x1b2] sm:$0xff] }
 0x904   :  { %5814 = vmatmul.f32.gmra.mxu3 %v16963_v2  ;;  %v6516_v2 = vld [vmem:[#allocation3 + $0x180] sm:$0xff] }
 0x906   :  { %v6266_v45 = vpop.f32.mrf.mxu2 }
 0x907   :  { %v5767_v35 = vpop.f32.mrf.mxu3  ;;  %v5979_v12 = vpop.f32.mrf.mxu1 }
 0x908   :  { %v5977_v24 = vadd.f32 %v5976_v55, %v5767_v35  ;;  %v14243_v61 = vpop.f32.mrf.mxu0 }
 0x90a   :  { %v14241_v43 = vadd.f32 %v6266_v45, %v5977_v24  ;;  %6026 = vmatmul.f32.gmra.mxu1 %v5582_v6  ;;  %6664 = vmatmul.f32.gmra.mxu0 %v5582_v6 }
 0x90b   :  { %6316 = vmatmul.f32.gmra.mxu2 %v6161_v27  ;;  %v6517_v27 = vld [vmem:[#allocation3 + $0x188] sm:$0xff] }
 0x90c   :  { %5817 = vmatmul.f32.gmra.mxu3 %v16965_v52  ;;  %v6165_v52 = vld [vmem:[#allocation3 + $0x1ba] sm:$0xff] }
 0x90e   :  { %v6269_v36 = vpop.f32.mrf.mxu2 }
 0x90f   :  { %v5770_v7 = vpop.f32.mrf.mxu3  ;;  %v5982_v47 = vpop.f32.mrf.mxu1 }
 0x910   :  { %v5980_v34 = vadd.f32 %v5979_v12, %v5770_v7  ;;  %v14249_v13 = vpop.f32.mrf.mxu0  ;;  %v5666_v12 = vld [vmem:[#allocation3 + $0x1b9] sm:$0xff] }
 0x912   :  { %v14247_v14 = vadd.f32 %v6269_v36, %v5980_v34  ;;  %6029 = vmatmul.f32.gmra.mxu1 %v5583_v46  ;;  %6667 = vmatmul.f32.gmra.mxu0 %v5583_v46 }
 0x913   :  { %6319 = vmatmul.f32.gmra.mxu2 %v6162_v3  ;;  %v5587_v3 = vld [vmem:[#allocation3 + $0x1c8] sm:$0xff] }
 0x914   :  { %5820 = vmatmul.f32.gmra.mxu3 %v16967_v40  ;;  %v5667_v40 = vld [vmem:[#allocation3 + $0x1c9] sm:$0xff] }
 0x916   :  { %v6272_v20 = vpop.f32.mrf.mxu2 }
 0x917   :  { %v5773_v57 = vpop.f32.mrf.mxu3  ;;  %v5985_v53 = vpop.f32.mrf.mxu1 }
 0x918   :  { %v5983_v19 = vadd.f32 %v5982_v47, %v5773_v57  ;;  %v14255_v59 = vpop.f32.mrf.mxu0  ;;  %v6166_v57 = vld [vmem:[#allocation3 + $0x1ca] sm:$0xff] }
 0x91a   :  { %v14253_v16 = vadd.f32 %v6272_v20, %v5983_v19  ;;  %6032 = vmatmul.f32.gmra.mxu1 %v5584_v11  ;;  %6670 = vmatmul.f32.gmra.mxu0 %v5584_v11 }
 0x91b   :  { %6322 = vmatmul.f32.gmra.mxu2 %v6163_v51  ;;  %v5588_v51 = vld [vmem:[#allocation3 + $0x1d0] sm:$0xff] }
 0x91c   :  { %5823 = vmatmul.f32.gmra.mxu3 %v16969_v10  ;;  %v5668_v10 = vld [vmem:[#allocation3 + $0x1d1] sm:$0xff] }
 0x91e   :  { %v6275_v17 = vpop.f32.mrf.mxu2 }
 0x91f   :  { %v5776_v39 = vpop.f32.mrf.mxu3  ;;  %v5988_v31 = vpop.f32.mrf.mxu1 }
 0x920   :  { %v5986_v4 = vadd.f32 %v5985_v53, %v5776_v39  ;;  %v14261_v55 = vpop.f32.mrf.mxu0  ;;  %v6167_v39 = vld [vmem:[#allocation3 + $0x1d2] sm:$0xff] }
 0x922   :  { %v14259_v41 = vadd.f32 %v6275_v17, %v5986_v4  ;;  %6035 = vmatmul.f32.gmra.mxu1 %v14028_v22  ;;  %6673 = vmatmul.f32.gmra.mxu0 %v6516_v2 }
 0x923   :  { %6325 = vmatmul.f32.gmra.mxu2 %v6164_v56 }
 0x924   :  { %5826 = vmatmul.f32.gmra.mxu3 %v5665_v26 }
 0x926   :  { %v6278_v24 = vpop.f32.mrf.mxu2 }
 0x927   :  { %v5779_v48 = vpop.f32.mrf.mxu3  ;;  %v5991_v45 = vpop.f32.mrf.mxu1 }
 0x928   :  { %v5989_v35 = vadd.f32 %v5988_v31, %v5779_v48  ;;  %v14266_v28 = vpop.f32.mrf.mxu0  ;;  %v5669_v48 = vld [vmem:[#allocation3 + $0x1e1] sm:$0xff] }
 0x92a   :  { %v14264_v6 = vadd.f32 %v6278_v24, %v5989_v35  ;;  %6038 = vmatmul.f32.gmra.mxu1 %v14028_v22  ;;  %6676 = vmatmul.f32.gmra.mxu0 %v6517_v27  ;;  %v5589_v35 = vld [vmem:[#allocation3 + $0x1e0] sm:$0xff] }
 0x92b   :  { %6328 = vmatmul.f32.gmra.mxu2 %v6165_v52  ;;  %v6168_v24 = vld [vmem:[#allocation3 + $0x1e2] sm:$0xff] }
 0x92c   :  { %5829 = vmatmul.f32.gmra.mxu3 %v5666_v12 }
 0x92e   :  { %v6281_v36 = vpop.f32.mrf.mxu2 }
 0x92f   :  { %v5782_v7 = vpop.f32.mrf.mxu3  ;;  %v5994_v47 = vpop.f32.mrf.mxu1 }
 0x930   :  { %v5992_v34 = vadd.f32 %v5991_v45, %v5782_v7  ;;  %v14271_v25 = vpop.f32.mrf.mxu0 }
 0x932   :  { %v14269_v46 = vadd.f32 %v6281_v36, %v5992_v34  ;;  %6041 = vmatmul.f32.gmra.mxu1 %v5587_v3  ;;  %6679 = vmatmul.f32.gmra.mxu0 %v5587_v3  ;;  %v5670_v36 = vld [vmem:[#allocation3 + $0x1e9] sm:$0xff] }
 0x933   :  { %6331 = vmatmul.f32.gmra.mxu2 %v6166_v57 }
 0x934   :  { %5832 = vmatmul.f32.gmra.mxu3 %v5667_v40  ;;  %v6169_v40 = vld [vmem:[#allocation3 + $0x1ea] sm:$0xff] }
 0x936   :  { %v6284_v20 = vpop.f32.mrf.mxu2 }
 0x937   :  { %v5785_v19 = vpop.f32.mrf.mxu3  ;;  %v5997_v53 = vpop.f32.mrf.mxu1 }
 0x938   :  { %v5995_v22 = vadd.f32 %v5994_v47, %v5785_v19  ;;  %v14275_v58 = vpop.f32.mrf.mxu0  ;;  %v5590_v47 = vld [vmem:[#allocation3 + $0x1e8] sm:$0xff] }
 0x93a   :  { %v14273_v11 = vadd.f32 %v6284_v20, %v5995_v22  ;;  %6044 = vmatmul.f32.gmra.mxu1 %v5588_v51  ;;  %6682 = vmatmul.f32.gmra.mxu0 %v5588_v51  ;;  %v5591_v51 = vld [vmem:[#allocation3 + $0x1f8] sm:$0xff] }
 0x93b   :  { %6334 = vmatmul.f32.gmra.mxu2 %v6167_v39  ;;  %v6170_v39 = vld [vmem:[#allocation3 + $0x1fa] sm:$0xff] }
 0x93c   :  { %5835 = vmatmul.f32.gmra.mxu3 %v5668_v10  ;;  %v5671_v10 = vld [vmem:[#allocation3 + $0x1f9] sm:$0xff] }
 0x93e   :  { %v6287_v31 = vpop.f32.mrf.mxu2 }
 0x93f   :  { %v5788_v4 = vpop.f32.mrf.mxu3  ;;  %v6000_v26 = vpop.f32.mrf.mxu1 }
 0x940   :  { %v5998_v17 = vadd.f32 %v5997_v53, %v5788_v4  ;;  %v14279_v2 = vpop.f32.mrf.mxu0 }
 0x942   :  { %v14277_v56 = vadd.f32 %v6287_v31, %v5998_v17  ;;  %6047 = vmatmul.f32.gmra.mxu1 %v5589_v35  ;;  %6685 = vmatmul.f32.gmra.mxu0 %v5589_v35 }
 0x943   :  { %6337 = vmatmul.f32.gmra.mxu2 %v6168_v24  ;;  %v5672_v24 = vld [vmem:[#allocation3 + $0x201] sm:$0xff] }
 0x944   :  { %5838 = vmatmul.f32.gmra.mxu3 %v5669_v48 }
 0x946   :  { %v6290_v52 = vpop.f32.mrf.mxu2 }
 0x947   :  { %v5791_v45 = vpop.f32.mrf.mxu3  ;;  %v6003_v27 = vpop.f32.mrf.mxu1 }
 0x948   :  { %v6001_v12 = vadd.f32 %v6000_v26, %v5791_v45  ;;  %v14283_v34 = vpop.f32.mrf.mxu0  ;;  %v5592_v45 = vld [vmem:[#allocation3 + $0x200] sm:$0xff] }
 0x94a   :  { %v14281_v7 = vadd.f32 %v6290_v52, %v6001_v12  ;;  %6050 = vmatmul.f32.gmra.mxu1 %v5590_v47  ;;  %6688 = vmatmul.f32.gmra.mxu0 %v5590_v47  ;;  %v6171_v12 = vld [vmem:[#allocation3 + $0x202] sm:$0xff] }
 0x94b   :  { %6340 = vmatmul.f32.gmra.mxu2 %v6169_v40 }
 0x94c   :  { %5841 = vmatmul.f32.gmra.mxu3 %v5670_v36 }
 0x94e   :  { %v6293_v19 = vpop.f32.mrf.mxu2 }
 0x94f   :  { %v5794_v3 = vpop.f32.mrf.mxu3  ;;  %v6006_v22 = vpop.f32.mrf.mxu1 }
 0x950   :  { %v6004_v57 = vadd.f32 %v6003_v27, %v5794_v3  ;;  %v14287_v53 = vpop.f32.mrf.mxu0 }
 0x952   :  { %v14285_v20 = vadd.f32 %v6293_v19, %v6004_v57  ;;  %6053 = vmatmul.f32.gmra.mxu1 %v5591_v51  ;;  %6691 = vmatmul.f32.gmra.mxu0 %v5591_v51  ;;  %v5673_v57 = vld [vmem:[#allocation3 + $0x211] sm:$0xff] }
 0x953   :  { %6343 = vmatmul.f32.gmra.mxu2 %v6170_v39  ;;  %v5593_v19 = vld [vmem:[#allocation3 + $0x210] sm:$0xff] }
 0x954   :  { %5844 = vmatmul.f32.gmra.mxu3 %v5671_v10 }
 0x956   :  { %v6296_v31 = vpop.f32.mrf.mxu2 }
 0x957   :  { %v5797_v4 = vpop.f32.mrf.mxu3  ;;  %v6009_v26 = vpop.f32.mrf.mxu1 }
 0x958   :  { %v6007_v17 = vadd.f32 %v6006_v22, %v5797_v4  ;;  %v14291_v35 = vpop.f32.mrf.mxu0  ;;  %v6172_v22 = vld [vmem:[#allocation3 + $0x212] sm:$0xff] }
 0x95a   :  { %v14289_v48 = vadd.f32 %v6296_v31, %v6007_v17  ;;  %6056 = vmatmul.f32.gmra.mxu1 %v5592_v45  ;;  %6694 = vmatmul.f32.gmra.mxu0 %v5592_v45  ;;  %v6173_v45 = vld [vmem:[#allocation3 + $0x21a] sm:$0xff] }
 0x95b   :  { %6346 = vmatmul.f32.gmra.mxu2 %v6171_v12 }
 0x95c   :  { %5847 = vmatmul.f32.gmra.mxu3 %v5672_v24  ;;  %v5594_v24 = vld [vmem:[#allocation3 + $0x218] sm:$0xff] }
 0x95e   :  { %v6299_v36 = vpop.f32.mrf.mxu2 }
 0x95f   :  { %v5800_v52 = vpop.f32.mrf.mxu3  ;;  %v6012_v47 = vpop.f32.mrf.mxu1 }
 0x960   :  { %v6010_v27 = vadd.f32 %v6009_v26, %v5800_v52  ;;  %v14295_v3 = vpop.f32.mrf.mxu0  ;;  %v5674_v26 = vld [vmem:[#allocation3 + $0x219] sm:$0xff] }
 0x962   :  { %v14293_v40 = vadd.f32 %v6299_v36, %v6010_v27  ;;  %6059 = vmatmul.f32.gmra.mxu1 %v5593_v19  ;;  %6697 = vmatmul.f32.gmra.mxu0 %v5593_v19  ;;  %v5675_v19 = vld [vmem:[#allocation3 + $0x229] sm:$0xff] }
 0x963   :  { %6349 = vmatmul.f32.gmra.mxu2 %v6172_v22  ;;  %v5595_v22 = vld [vmem:[#allocation3 + $0x228] sm:$0xff] }
 0x964   :  { %5850 = vmatmul.f32.gmra.mxu3 %v5673_v57 }
 0x966   :  { %v6302_v39 = vpop.f32.mrf.mxu2 }
 0x967   :  { %v5803_v10 = vpop.f32.mrf.mxu3  ;;  %v6015_v4 = vpop.f32.mrf.mxu1 }
 0x968   :  { %v6013_v51 = vadd.f32 %v6012_v47, %v5803_v10  ;;  %v14299_v31 = vpop.f32.mrf.mxu0  ;;  %v6174_v10 = vld [vmem:[#allocation3 + $0x22a] sm:$0xff] }
 0x96a   :  { %v14297_v17 = vadd.f32 %v6302_v39, %v6013_v51  ;;  %6062 = vmatmul.f32.gmra.mxu1 %v5594_v24  ;;  %6700 = vmatmul.f32.gmra.mxu0 %v5594_v24 }
 0x96b   :  { %6352 = vmatmul.f32.gmra.mxu2 %v6173_v45 }
 0x96c   :  { %16970 = vst [vmem:[#allocation108_spill] sm:$0xff] %v14297_v17  ;;  %5853 = vmatmul.f32.gmra.mxu3 %v5674_v26  ;;  %v5612_v17 = vld [vmem:[#allocation3 + $0x2f0] sm:$0xff] }
 0x96e   :  { %v6305_v27 = vpop.f32.mrf.mxu2 }
 0x96f   :  { %v5806_v12 = vpop.f32.mrf.mxu3  ;;  %v6018_v36 = vpop.f32.mrf.mxu1 }
 0x970   :  { %v6016_v52 = vadd.f32 %v6015_v4, %v5806_v12  ;;  %v14303_v47 = vpop.f32.mrf.mxu0  ;;  %v5676_v12 = vld [vmem:[#allocation3 + $0x231] sm:$0xff] }
 0x971   :  { %16972 = vst [vmem:[#allocation106_spill] sm:$0xff] %v14303_v47 }
 0x972   :  { %v14301_v57 = vadd.f32 %v6305_v27, %v6016_v52  ;;  %6065 = vmatmul.f32.gmra.mxu1 %v5595_v22  ;;  %6703 = vmatmul.f32.gmra.mxu0 %v5595_v22  ;;  %v5596_v52 = vld [vmem:[#allocation3 + $0x230] sm:$0xff] }
 0x973   :  { %6355 = vmatmul.f32.gmra.mxu2 %v6174_v10  ;;  %v6175_v27 = vld [vmem:[#allocation3 + $0x232] sm:$0xff] }
 0x974   :  { %16971 = vst [vmem:[#allocation105_spill] sm:$0xff] %v14301_v57  ;;  %5856 = vmatmul.f32.gmra.mxu3 %v5675_v19 }
 0x976   :  { %v6308_v26 = vpop.f32.mrf.mxu2 }
 0x977   :  { %v5809_v51 = vpop.f32.mrf.mxu3  ;;  %v6021_v45 = vpop.f32.mrf.mxu1 }
 0x978   :  { %v6019_v39 = vadd.f32 %v6018_v36, %v5809_v51  ;;  %v14307_v4 = vpop.f32.mrf.mxu0  ;;  %v5677_v51 = vld [vmem:[#allocation3 + $0x241] sm:$0xff] }
 0x979   :  { %16974 = vst [vmem:[#allocation102_spill] sm:$0xff] %v14307_v4 }
 0x97a   :  { %v14305_v24 = vadd.f32 %v6308_v26, %v6019_v39  ;;  %6068 = vmatmul.f32.gmra.mxu1 %v5596_v52  ;;  %6706 = vmatmul.f32.gmra.mxu0 %v5596_v52  ;;  %v5597_v39 = vld [vmem:[#allocation3 + $0x240] sm:$0xff] }
 0x97b   :  { %6358 = vmatmul.f32.gmra.mxu2 %v6175_v27  ;;  %v6176_v26 = vld [vmem:[#allocation3 + $0x242] sm:$0xff] }
 0x97c   :  { %16973 = vst [vmem:[#allocation155_spill] sm:$0xff] %v14305_v24  ;;  %5859 = vmatmul.f32.gmra.mxu3 %v5676_v12 }
 0x97e   :  { %v6311_v47 = vpop.f32.mrf.mxu2 }
 0x97f   :  { %v5812_v19 = vpop.f32.mrf.mxu3  ;;  %v6024_v10 = vpop.f32.mrf.mxu1 }
 0x980   :  { %v6022_v57 = vadd.f32 %v6021_v45, %v5812_v19  ;;  %v14311_v36 = vpop.f32.mrf.mxu0  ;;  %v5678_v19 = vld [vmem:[#allocation3 + $0x249] sm:$0xff] }
 0x981   :  { %16976 = vst [vmem:[#allocation152_spill] sm:$0xff] %v14311_v36 }
 0x982   :  { %v14309_v22 = vadd.f32 %v6311_v47, %v6022_v57  ;;  %6071 = vmatmul.f32.gmra.mxu1 %v5597_v39  ;;  %6709 = vmatmul.f32.gmra.mxu0 %v5597_v39  ;;  %v5598_v57 = vld [vmem:[#allocation3 + $0x248] sm:$0xff] }
 0x983   :  { %6361 = vmatmul.f32.gmra.mxu2 %v6176_v26  ;;  %v6177_v47 = vld [vmem:[#allocation3 + $0x24a] sm:$0xff] }
 0x984   :  { %16975 = vst [vmem:[#allocation103_spill] sm:$0xff] %v14309_v22  ;;  %5862 = vmatmul.f32.gmra.mxu3 %v5677_v51 }
 0x986   :  { %v6314_v4 = vpop.f32.mrf.mxu2 }
 0x987   :  { %v5815_v12 = vpop.f32.mrf.mxu3  ;;  %v6027_v27 = vpop.f32.mrf.mxu1 }
 0x988   :  { %v6025_v24 = vadd.f32 %v6024_v10, %v5815_v12  ;;  %v14315_v45 = vpop.f32.mrf.mxu0  ;;  %v5679_v12 = vld [vmem:[#allocation3 + $0x259] sm:$0xff] }
 0x989   :  { %16978 = vst [vmem:[#allocation100_spill] sm:$0xff] %v14315_v45 }
 0x98a   :  { %v14313_v52 = vadd.f32 %v6314_v4, %v6025_v24  ;;  %6074 = vmatmul.f32.gmra.mxu1 %v5598_v57  ;;  %6712 = vmatmul.f32.gmra.mxu0 %v5598_v57  ;;  %v5599_v24 = vld [vmem:[#allocation3 + $0x258] sm:$0xff] }
 0x98b   :  { %6364 = vmatmul.f32.gmra.mxu2 %v6177_v47  ;;  %v6178_v4 = vld [vmem:[#allocation3 + $0x25a] sm:$0xff] }
 0x98c   :  { %16977 = vst [vmem:[#allocation99_spill] sm:$0xff] %v14313_v52  ;;  %5865 = vmatmul.f32.gmra.mxu3 %v5678_v19 }
 0x98e   :  { %v6317_v36 = vpop.f32.mrf.mxu2 }
 0x98f   :  { %v5818_v51 = vpop.f32.mrf.mxu3  ;;  %v6030_v26 = vpop.f32.mrf.mxu1 }
 0x990   :  { %v6028_v22 = vadd.f32 %v6027_v27, %v5818_v51  ;;  %v14319_v10 = vpop.f32.mrf.mxu0  ;;  %v5680_v51 = vld [vmem:[#allocation3 + $0x261] sm:$0xff] }
 0x991   :  { %16980 = vst [vmem:[#allocation154_spill] sm:$0xff] %v14319_v10 }
 0x992   :  { %v14317_v39 = vadd.f32 %v6317_v36, %v6028_v22  ;;  %6077 = vmatmul.f32.gmra.mxu1 %v5599_v24  ;;  %6715 = vmatmul.f32.gmra.mxu0 %v5599_v24  ;;  %v5600_v22 = vld [vmem:[#allocation3 + $0x260] sm:$0xff] }
 0x993   :  { %6367 = vmatmul.f32.gmra.mxu2 %v6178_v4  ;;  %v6179_v36 = vld [vmem:[#allocation3 + $0x262] sm:$0xff] }
 0x994   :  { %16979 = vst [vmem:[#allocation149_spill] sm:$0xff] %v14317_v39  ;;  %5868 = vmatmul.f32.gmra.mxu3 %v5679_v12 }
 0x996   :  { %v6320_v45 = vpop.f32.mrf.mxu2 }
 0x997   :  { %v5821_v19 = vpop.f32.mrf.mxu3  ;;  %v6033_v47 = vpop.f32.mrf.mxu1 }
 0x998   :  { %v6031_v52 = vadd.f32 %v6030_v26, %v5821_v19  ;;  %v14323_v27 = vpop.f32.mrf.mxu0  ;;  %v5681_v19 = vld [vmem:[#allocation3 + $0x271] sm:$0xff] }
 0x999   :  { %16982 = vst [vmem:[#allocation97_spill] sm:$0xff] %v14323_v27 }
 0x99a   :  { %v14321_v57 = vadd.f32 %v6320_v45, %v6031_v52  ;;  %6080 = vmatmul.f32.gmra.mxu1 %v5600_v22  ;;  %6718 = vmatmul.f32.gmra.mxu0 %v5600_v22  ;;  %v5601_v52 = vld [vmem:[#allocation3 + $0x270] sm:$0xff] }
 0x99b   :  { %6370 = vmatmul.f32.gmra.mxu2 %v6179_v36  ;;  %v6180_v45 = vld [vmem:[#allocation3 + $0x272] sm:$0xff] }
 0x99c   :  { %16981 = vst [vmem:[#allocation96_spill] sm:$0xff] %v14321_v57  ;;  %5871 = vmatmul.f32.gmra.mxu3 %v5680_v51 }
 0x99e   :  { %v6323_v10 = vpop.f32.mrf.mxu2 }
 0x99f   :  { %v5824_v12 = vpop.f32.mrf.mxu3  ;;  %v6036_v4 = vpop.f32.mrf.mxu1 }
 0x9a0   :  { %v6034_v39 = vadd.f32 %v6033_v47, %v5824_v12  ;;  %v14327_v26 = vpop.f32.mrf.mxu0  ;;  %v5682_v12 = vld [vmem:[#allocation3 + $0x279] sm:$0xff] }
 0x9a1   :  { %16984 = vst [vmem:[#allocation150_spill] sm:$0xff] %v14327_v26 }
 0x9a2   :  { %v14325_v24 = vadd.f32 %v6323_v10, %v6034_v39  ;;  %6083 = vmatmul.f32.gmra.mxu1 %v5601_v52  ;;  %6721 = vmatmul.f32.gmra.mxu0 %v5601_v52  ;;  %v5602_v39 = vld [vmem:[#allocation3 + $0x278] sm:$0xff] }
 0x9a3   :  { %6373 = vmatmul.f32.gmra.mxu2 %v6180_v45  ;;  %v6181_v10 = vld [vmem:[#allocation3 + $0x27a] sm:$0xff] }
 0x9a4   :  { %16983 = vst [vmem:[#allocation145_spill] sm:$0xff] %v14325_v24  ;;  %5874 = vmatmul.f32.gmra.mxu3 %v5681_v19 }
 0x9a6   :  { %v6326_v27 = vpop.f32.mrf.mxu2 }
 0x9a7   :  { %v5827_v51 = vpop.f32.mrf.mxu3  ;;  %v6039_v36 = vpop.f32.mrf.mxu1 }
 0x9a8   :  { %v6037_v57 = vadd.f32 %v6036_v4, %v5827_v51  ;;  %v14331_v47 = vpop.f32.mrf.mxu0  ;;  %v5683_v51 = vld [vmem:[#allocation3 + $0x289] sm:$0xff] }
 0x9a9   :  { %16986 = vst [vmem:[#allocation93_spill] sm:$0xff] %v14331_v47 }
 0x9aa   :  { %v14329_v22 = vadd.f32 %v6326_v27, %v6037_v57  ;;  %6086 = vmatmul.f32.gmra.mxu1 %v5602_v39  ;;  %6724 = vmatmul.f32.gmra.mxu0 %v5602_v39  ;;  %v5603_v57 = vld [vmem:[#allocation3 + $0x288] sm:$0xff] }
 0x9ab   :  { %6376 = vmatmul.f32.gmra.mxu2 %v6181_v10  ;;  %v6182_v27 = vld [vmem:[#allocation3 + $0x28a] sm:$0xff] }
 0x9ac   :  { %16985 = vst [vmem:[#allocation9_spill] sm:$0xff] %v14329_v22  ;;  %5877 = vmatmul.f32.gmra.mxu3 %v5682_v12 }
 0x9ae   :  { %v6329_v26 = vpop.f32.mrf.mxu2 }
 0x9af   :  { %v5830_v19 = vpop.f32.mrf.mxu3  ;;  %v6042_v45 = vpop.f32.mrf.mxu1 }
 0x9b0   :  { %v6040_v24 = vadd.f32 %v6039_v36, %v5830_v19  ;;  %v14335_v4 = vpop.f32.mrf.mxu0  ;;  %v5684_v19 = vld [vmem:[#allocation3 + $0x291] sm:$0xff] }
 0x9b1   :  { %16988 = vst [vmem:[#allocation142_spill] sm:$0xff] %v14335_v4 }
 0x9b2   :  { %v14333_v52 = vadd.f32 %v6329_v26, %v6040_v24  ;;  %6089 = vmatmul.f32.gmra.mxu1 %v5603_v57  ;;  %6727 = vmatmul.f32.gmra.mxu0 %v5603_v57  ;;  %v5604_v24 = vld [vmem:[#allocation3 + $0x290] sm:$0xff] }
 0x9b3   :  { %6379 = vmatmul.f32.gmra.mxu2 %v6182_v27  ;;  %v6183_v26 = vld [vmem:[#allocation3 + $0x292] sm:$0xff] }
 0x9b4   :  { %16987 = vst [vmem:[#allocation94_spill] sm:$0xff] %v14333_v52  ;;  %5880 = vmatmul.f32.gmra.mxu3 %v5683_v51 }
 0x9b6   :  { %v6332_v47 = vpop.f32.mrf.mxu2 }
 0x9b7   :  { %v5833_v12 = vpop.f32.mrf.mxu3  ;;  %v6045_v10 = vpop.f32.mrf.mxu1 }
 0x9b8   :  { %v6043_v22 = vadd.f32 %v6042_v45, %v5833_v12  ;;  %v14339_v36 = vpop.f32.mrf.mxu0  ;;  %v5685_v12 = vld [vmem:[#allocation3 + $0x2a1] sm:$0xff] }
 0x9b9   :  { %16990 = vst [vmem:[#allocation8_spill] sm:$0xff] %v14339_v36 }
 0x9ba   :  { %v14337_v39 = vadd.f32 %v6332_v47, %v6043_v22  ;;  %6092 = vmatmul.f32.gmra.mxu1 %v5604_v24  ;;  %6730 = vmatmul.f32.gmra.mxu0 %v5604_v24  ;;  %v5605_v22 = vld [vmem:[#allocation3 + $0x2a0] sm:$0xff] }
 0x9bb   :  { %6382 = vmatmul.f32.gmra.mxu2 %v6183_v26  ;;  %v6184_v47 = vld [vmem:[#allocation3 + $0x2a2] sm:$0xff] }
 0x9bc   :  { %16989 = vst [vmem:[#allocation146_spill] sm:$0xff] %v14337_v39  ;;  %5883 = vmatmul.f32.gmra.mxu3 %v5684_v19 }
 0x9be   :  { %v6335_v4 = vpop.f32.mrf.mxu2 }
 0x9bf   :  { %v5836_v51 = vpop.f32.mrf.mxu3  ;;  %v6048_v27 = vpop.f32.mrf.mxu1 }
 0x9c0   :  { %v6046_v52 = vadd.f32 %v6045_v10, %v5836_v51  ;;  %v14343_v45 = vpop.f32.mrf.mxu0  ;;  %v5686_v51 = vld [vmem:[#allocation3 + $0x2a9] sm:$0xff] }
 0x9c1   :  { %16992 = vst [vmem:[#allocation91_spill] sm:$0xff] %v14343_v45 }
 0x9c2   :  { %v14341_v57 = vadd.f32 %v6335_v4, %v6046_v52  ;;  %6095 = vmatmul.f32.gmra.mxu1 %v5605_v22  ;;  %6733 = vmatmul.f32.gmra.mxu0 %v5605_v22  ;;  %v5606_v52 = vld [vmem:[#allocation3 + $0x2a8] sm:$0xff] }
 0x9c3   :  { %6385 = vmatmul.f32.gmra.mxu2 %v6184_v47  ;;  %v6185_v4 = vld [vmem:[#allocation3 + $0x2aa] sm:$0xff] }
 0x9c4   :  { %16991 = vst [vmem:[#allocation90_spill] sm:$0xff] %v14341_v57  ;;  %5886 = vmatmul.f32.gmra.mxu3 %v5685_v12  ;;  %v9906_v12 = vld [vmem:[%s16032_s2 + $0x278] sm:$0xff] }
 0x9c5   :  { %6921 = vmatpush.msrb.mxu3 %v9906_v12 }
 0x9c6   :  { %v6338_v36 = vpop.f32.mrf.mxu2 }
 0x9c7   :  { %v5839_v19 = vpop.f32.mrf.mxu3  ;;  %v6051_v26 = vpop.f32.mrf.mxu1 }
 0x9c8   :  { %v6049_v39 = vadd.f32 %v6048_v27, %v5839_v19  ;;  %v14347_v10 = vpop.f32.mrf.mxu0 }
 0x9c9   :  { %16994 = vst [vmem:[#allocation141_spill] sm:$0xff] %v14347_v10  ;;  %v5607_v10 = vld [vmem:[#allocation3 + $0x2b8] sm:$0xff] }
 0x9ca   :  { %v14345_v24 = vadd.f32 %v6338_v36, %v6049_v39  ;;  %6098 = vmatmul.f32.gmra.mxu1 %v5606_v52  ;;  %6736 = vmatmul.f32.gmra.mxu0 %v5606_v52 }
 0x9cb   :  { %6388 = vmatmul.f32.gmra.mxu2 %v6185_v4 }
 0x9cc   :  { %16993 = vst [vmem:[#allocation139_spill] sm:$0xff] %v14345_v24  ;;  %5889 = vmatmul.f32.gmra.mxu3 %v5686_v51  ;;  %v5687_v24 = vld [vmem:[#allocation3 + $0x2b9] sm:$0xff] }
 0x9cd   :  { %v6186_v51 = vld [vmem:[#allocation3 + $0x2ba] sm:$0xff] }
 0x9ce   :  { %v6341_v47 = vpop.f32.mrf.mxu2 }
 0x9cf   :  { %v5842_v22 = vpop.f32.mrf.mxu3  ;;  %v6054_v19 = vpop.f32.mrf.mxu1 }
 0x9d0   :  { %v6052_v27 = vadd.f32 %v6051_v26, %v5842_v22  ;;  %v14354_v36 = vpop.f32.mrf.mxu0  ;;  %v5688_v22 = vld [vmem:[#allocation3 + $0x2c1] sm:$0xff] }
 0x9d1   :  { %16996 = vst [vmem:[#allocation87_spill] sm:$0xff] %v14354_v36 }
 0x9d2   :  { %v14352_v39 = vadd.f32 %v6341_v47, %v6052_v27  ;;  %6101 = vmatmul.f32.gmra.mxu1 %v5607_v10  ;;  %6739 = vmatmul.f32.gmra.mxu0 %v5607_v10  ;;  %v5608_v27 = vld [vmem:[#allocation3 + $0x2c0] sm:$0xff] }
 0x9d3   :  { %6391 = vmatmul.f32.gmra.mxu2 %v6186_v51  ;;  %v6187_v47 = vld [vmem:[#allocation3 + $0x2c2] sm:$0xff] }
 0x9d4   :  { %16995 = vst [vmem:[#allocation59_spill] sm:$0xff] %v14352_v39  ;;  %5892 = vmatmul.f32.gmra.mxu3 %v5687_v24 }
 0x9d6   :  { %v6344_v57 = vpop.f32.mrf.mxu2 }
 0x9d7   :  { %v5845_v52 = vpop.f32.mrf.mxu3  ;;  %v6057_v45 = vpop.f32.mrf.mxu1 }
 0x9d8   :  { %v6055_v4 = vadd.f32 %v6054_v19, %v5845_v52  ;;  %v14358_v26 = vpop.f32.mrf.mxu0  ;;  %v5689_v52 = vld [vmem:[#allocation3 + $0x2d1] sm:$0xff] }
 0x9d9   :  { %16998 = vst [vmem:[#allocation136_spill] sm:$0xff] %v14358_v26  ;;  %v5611_v26 = vld [vmem:[#allocation3 + $0x2e8] sm:$0xff] }
 0x9da   :  { %v14356_v12 = vadd.f32 %v6344_v57, %v6055_v4  ;;  %6104 = vmatmul.f32.gmra.mxu1 %v5608_v27  ;;  %6742 = vmatmul.f32.gmra.mxu0 %v5608_v27  ;;  %v5609_v57 = vld [vmem:[#allocation3 + $0x2d0] sm:$0xff] }
 0x9db   :  { %6394 = vmatmul.f32.gmra.mxu2 %v6187_v47  ;;  %v6188_v4 = vld [vmem:[#allocation3 + $0x2d2] sm:$0xff] }
 0x9dc   :  { %16997 = vst [vmem:[#allocation88_spill] sm:$0xff] %v14356_v12  ;;  %5895 = vmatmul.f32.gmra.mxu3 %v5688_v22  ;;  %v9922_v22 = vld [vmem:[%s16032_s2 + $0x2f8] sm:$0xff]  ;;  %v5691_v12 = vld [vmem:[#allocation3 + $0x2e9] sm:$0xff] }
 0x9dd   :  { %7275 = vmatpush.msra.mxu1 %v9922_v22  ;;  %v9904_v22 = vld [vmem:[%s16032_s2 + $0x268] sm:$0xff] }
 0x9de   :  { %v6347_v36 = vpop.f32.mrf.mxu2 }
 0x9df   :  { %v5848_v24 = vpop.f32.mrf.mxu3  ;;  %v6060_v51 = vpop.f32.mrf.mxu1 }
 0x9e0   :  { %v6058_v39 = vadd.f32 %v6057_v45, %v5848_v24  ;;  %v14362_v19 = vpop.f32.mrf.mxu0  ;;  %v9938_v45 = vld [vmem:[%s16032_s2 + $0x378] sm:$0xff] }
 0x9e1   :  { %17000 = vst [vmem:[#allocation6_spill] sm:$0xff] %v14362_v19  ;;  %7630 = vmatpush.msra.mxu2 %v9938_v45  ;;  %v5610_v19 = vld [vmem:[#allocation3 + $0x2d8] sm:$0xff] }
 0x9e2   :  { %v14360_v10 = vadd.f32 %v6347_v36, %v6058_v39  ;;  %6107 = vmatmul.f32.gmra.mxu1 %v5609_v57  ;;  %6745 = vmatmul.f32.gmra.mxu0 %v5609_v57  ;;  %v9905_v57 = vld [vmem:[%s16032_s2 + $0x270] sm:$0xff]  ;;  %v6189_v45 = vld [vmem:[#allocation3 + $0x2da] sm:$0xff] }
 0x9e3   :  { %6397 = vmatmul.f32.gmra.mxu2 %v6188_v4  ;;  %v5690_v4 = vld [vmem:[#allocation3 + $0x2d9] sm:$0xff]  ;;  %6922 = vmatpush.msrb.mxu3 %v9905_v57 }
 0x9e4   :  { %16999 = vst [vmem:[#allocation138_spill] sm:$0xff] %v14360_v10  ;;  %5898 = vmatmul.f32.gmra.mxu3 %v5689_v52  ;;  %v9921_v10 = vld [vmem:[%s16032_s2 + $0x2f0] sm:$0xff]  ;;  %v9902_v57 = vld [vmem:[%s16032_s2 + $0x258] sm:$0xff] }
 0x9e5   :  { %7276 = vmatpush.msra.mxu1 %v9921_v10  ;;  %v9936_v10 = vld [vmem:[%s16032_s2 + $0x368] sm:$0xff]  ;;  %6923 = vmatpush.msrb.mxu3 %v9904_v22 }
 0x9e6   :  { %v6350_v27 = vpop.f32.mrf.mxu2 }
 0x9e7   :  { %v5851_v39 = vpop.f32.mrf.mxu3  ;;  %v6063_v47 = vpop.f32.mrf.mxu1 }
 0x9e8   :  { %v6061_v36 = vadd.f32 %v6060_v51, %v5851_v39  ;;  %v14372_v52 = vpop.f32.mrf.mxu0  ;;  %v9937_v51 = vld [vmem:[%s16032_s2 + $0x370] sm:$0xff]  ;;  %v9920_v39 = vld [vmem:[%s16032_s2 + $0x2e8] sm:$0xff] }
 0x9e9   :  { %17002 = vst [vmem:[#allocation134_spill] sm:$0xff] %v14372_v52  ;;  %7631 = vmatpush.msra.mxu2 %v9937_v51  ;;  %7277 = vmatpush.msra.mxu1 %v9920_v39  ;;  %v9918_v51 = vld [vmem:[%s16032_s2 + $0x2d8] sm:$0xff] }
 0x9ea   :  { %v14370_v24 = vadd.f32 %v6350_v27, %v6061_v36  ;;  %6110 = vmatmul.f32.gmra.mxu1 %v5610_v19  ;;  %6748 = vmatmul.f32.gmra.mxu0 %v5610_v19  ;;  %v9903_v36 = vld [vmem:[%s16032_s2 + $0x260] sm:$0xff] }
 0x9eb   :  { %6400 = vmatmul.f32.gmra.mxu2 %v6189_v45  ;;  %v9919_v27 = vld [vmem:[%s16032_s2 + $0x2e0] sm:$0xff]  ;;  %6924 = vmatpush.msrb.mxu3 %v9903_v36  ;;  %v6190_v36 = vld [vmem:[#allocation3 + $0x2ea] sm:$0xff] }
 0x9ec   :  { %17001 = vst [vmem:[#allocation133_spill] sm:$0xff] %v14370_v24  ;;  %5901 = vmatmul.f32.gmra.mxu3 %v5690_v4  ;;  %v9935_v19 = vld [vmem:[%s16032_s2 + $0x360] sm:$0xff]  ;;  %7632 = vmatpush.msra.mxu2 %v9936_v10  ;;  %v9901_v10 = vld [vmem:[%s16032_s2 + $0x250] sm:$0xff] }
 0x9ed   :  { %7278 = vmatpush.msra.mxu1 %v9919_v27  ;;  %6925 = vmatpush.msrb.mxu3 %v9902_v57  ;;  %v9933_v27 = vld [vmem:[%s16032_s2 + $0x350] sm:$0xff] }
 0x9ee   :  { %v6353_v24 = vpop.f32.mrf.mxu2  ;;  %7633 = vmatpush.msra.mxu2 %v9935_v19  ;;  %v9954_v19 = vld [vmem:[%s16032_s2 + $0x3f8] sm:$0xff] }
 0x9ef   :  { %v5854_v4 = vpop.f32.mrf.mxu3  ;;  %v6066_v22 = vpop.f32.mrf.mxu1  ;;  %7279 = vmatpush.msra.mxu1 %v9918_v51  ;;  %6926 = vmatpush.msrb.mxu3 %v9901_v10  ;;  %v9915_v10 = vld [vmem:[%s16032_s2 + $0x2c0] sm:$0xff] }
 0x9f0   :  { %v6064_v45 = vadd.f32 %v6063_v47, %v5854_v4  ;;  %v14409_v39 = vpop.f32.mrf.mxu0  ;;  %v9934_v47 = vld [vmem:[%s16032_s2 + $0x358] sm:$0xff]  ;;  %v9900_v4 = vld [vmem:[%s16032_s2 + $0x248] sm:$0xff]  ;;  %7984 = vmatpush.msra.mxu0 %v9954_v19  ;;  %v9953_v19 = vld [vmem:[%s16032_s2 + $0x3f0] sm:$0xff] }
 0x9f1   :  { %17004 = vst [vmem:[#allocation130_spill] sm:$0xff] %v14409_v39  ;;  %7634 = vmatpush.msra.mxu2 %v9934_v47  ;;  %6927 = vmatpush.msrb.mxu3 %v9900_v4  ;;  %v5692_v39 = vld [vmem:[#allocation3 + $0x2f1] sm:$0xff] }
 0x9f2   :  { %v14407_v52 = vadd.f32 %v6353_v24, %v6064_v45  ;;  %6113 = vmatmul.f32.gmra.mxu1 %v5611_v26  ;;  %v9917_v24 = vld [vmem:[%s16032_s2 + $0x2d0] sm:$0xff]  ;;  %6751 = vmatmul.f32.gmra.mxu0 %v5611_v26  ;;  %v9932_v26 = vld [vmem:[%s16032_s2 + $0x348] sm:$0xff]  ;;  %v9899_v45 = vld [vmem:[%s16032_s2 + $0x240] sm:$0xff] }
 0x9f3   :  { %6403 = vmatmul.f32.gmra.mxu2 %v6190_v36  ;;  %7280 = vmatpush.msra.mxu1 %v9917_v24  ;;  %v6191_v4 = vld [vmem:[#allocation3 + $0x2f2] sm:$0xff] }
 0x9f4   :  { %17003 = vst [vmem:[#allocation5_spill] sm:$0xff] %v14407_v52  ;;  %5904 = vmatmul.f32.gmra.mxu3 %v5691_v12  ;;  %v9916_v12 = vld [vmem:[%s16032_s2 + $0x2c8] sm:$0xff]  ;;  %7635 = vmatpush.msra.mxu2 %v9933_v27  ;;  %v9898_v27 = vld [vmem:[%s16032_s2 + $0x238] sm:$0xff] }
 0x9f5   :  { %7281 = vmatpush.msra.mxu1 %v9916_v12  ;;  %6928 = vmatpush.msrb.mxu3 %v9899_v45  ;;  %v9914_v12 = vld [vmem:[%s16032_s2 + $0x2b8] sm:$0xff]  ;;  %v9952_v45 = vld [vmem:[%s16032_s2 + $0x3e8] sm:$0xff] }
 0x9f6   :  { %v6356_v47 = vpop.f32.mrf.mxu2  ;;  %7636 = vmatpush.msra.mxu2 %v9932_v26  ;;  %v9913_v26 = vld [vmem:[%s16032_s2 + $0x2b0] sm:$0xff]  ;;  %7985 = vmatpush.msra.mxu0 %v9953_v19 }
 0x9f7   :  { %v5857_v57 = vpop.f32.mrf.mxu3  ;;  %v6069_v36 = vpop.f32.mrf.mxu1  ;;  %7282 = vmatpush.msra.mxu1 %v9915_v10  ;;  %6929 = vmatpush.msrb.mxu3 %v9898_v27  ;;  %v9912_v27 = vld [vmem:[%s16032_s2 + $0x2a8] sm:$0xff] }
 0x9f8   :  { %v6067_v51 = vadd.f32 %v6066_v22, %v5857_v57  ;;  %v14443_v52 = vpop.f32.mrf.mxu0  ;;  %v9931_v22 = vld [vmem:[%s16032_s2 + $0x340] sm:$0xff]  ;;  %v9930_v57 = vld [vmem:[%s16032_s2 + $0x338] sm:$0xff]  ;;  %7986 = vmatpush.msra.mxu0 %v9952_v45 }
 0x9f9   :  { %17006 = vst [vmem:[#allocation127_spill] sm:$0xff] %v14443_v52  ;;  %7637 = vmatpush.msra.mxu2 %v9931_v22  ;;  %7283 = vmatpush.msra.mxu1 %v9914_v12  ;;  %v5693_v52 = vld [vmem:[#allocation3 + $0x301] sm:$0xff] }
 0x9fa   :  { %v14441_v24 = vadd.f32 %v6356_v47, %v6067_v51  ;;  %6116 = vmatmul.f32.gmra.mxu1 %v5612_v17  ;;  %6754 = vmatmul.f32.gmra.mxu0 %v5612_v17  ;;  %v9929_v17 = vld [vmem:[%s16032_s2 + $0x330] sm:$0xff]  ;;  %v9896_v47 = vld [vmem:[%s16032_s2 + $0x228] sm:$0xff]  ;;  %v9911_v45 = vld [vmem:[%s16032_s2 + $0x2a0] sm:$0xff] }
 0x9fb   :  { %6406 = vmatmul.f32.gmra.mxu2 %v6191_v4  ;;  %v9951_v4 = vld [vmem:[%s16032_s2 + $0x3e0] sm:$0xff]  ;;  %7284 = vmatpush.msra.mxu1 %v9913_v26 }
 0x9fc   :  { %17005 = vst [vmem:[#allocation225_spill] sm:$0xff] %v14441_v24  ;;  %5907 = vmatmul.f32.gmra.mxu3 %v5692_v39  ;;  %v9897_v39 = vld [vmem:[%s16032_s2 + $0x230] sm:$0xff]  ;;  %7638 = vmatpush.msra.mxu2 %v9930_v57  ;;  %v9928_v57 = vld [vmem:[%s16032_s2 + $0x328] sm:$0xff] }
 0x9fd   :  { %6930 = vmatpush.msrb.mxu3 %v9897_v39  ;;  %7285 = vmatpush.msra.mxu1 %v9912_v27  ;;  %v9895_v39 = vld [vmem:[%s16032_s2 + $0x220] sm:$0xff]  ;;  %v9926_v27 = vld [vmem:[%s16032_s2 + $0x318] sm:$0xff] }
 0x9fe   :  { %v6359_v22 = vpop.f32.mrf.mxu2  ;;  %7639 = vmatpush.msra.mxu2 %v9929_v17  ;;  %7987 = vmatpush.msra.mxu0 %v9951_v4  ;;  %v6192_v26 = vld [vmem:[#allocation3 + $0x302] sm:$0xff]  ;;  %v9893_v4 = vld [vmem:[%s16032_s2 + $0x210] sm:$0xff] }
 0x9ff   :  { %v5860_v51 = vpop.f32.mrf.mxu3  ;;  %v6072_v12 = vpop.f32.mrf.mxu1  ;;  %6931 = vmatpush.msrb.mxu3 %v9896_v47  ;;  %v9927_v17 = vld [vmem:[%s16032_s2 + $0x320] sm:$0xff]  ;;  %v9910_v47 = vld [vmem:[%s16032_s2 + $0x298] sm:$0xff]  ;;  %7286 = vmatpush.msra.mxu1 %v9911_v45 }
 0xa00   :  { %v6070_v10 = vadd.f32 %v6069_v36, %v5860_v51  ;;  %v14483_v24 = vpop.f32.mrf.mxu0  ;;  %v5613_v36 = vld [vmem:[#allocation3 + $0x300] sm:$0xff]  ;;  %v9950_v51 = vld [vmem:[%s16032_s2 + $0x3d8] sm:$0xff]  ;;  %7640 = vmatpush.msra.mxu2 %v9928_v57 }
 0xa01   :  { %17008 = vst [vmem:[#allocation220_spill] sm:$0xff] %v14483_v24  ;;  %6932 = vmatpush.msrb.mxu3 %v9895_v39  ;;  %7988 = vmatpush.msra.mxu0 %v9950_v51  ;;  %v9909_v39 = vld [vmem:[%s16032_s2 + $0x290] sm:$0xff] }
 0xa02   :  { %v14481_v19 = vadd.f32 %v6359_v22, %v6070_v10  ;;  %6119 = vmatmul.f32.gmra.mxu1 %v5613_v36  ;;  %6757 = vmatmul.f32.gmra.mxu0 %v5613_v36  ;;  %v9949_v10 = vld [vmem:[%s16032_s2 + $0x3d0] sm:$0xff] }
 0xa03   :  { %6409 = vmatmul.f32.gmra.mxu2 %v6192_v26  ;;  %v9948_v26 = vld [vmem:[%s16032_s2 + $0x3c8] sm:$0xff]  ;;  %7287 = vmatpush.msra.mxu1 %v9910_v47 }
 0xa04   :  { %17007 = vst [vmem:[#allocation223_spill] sm:$0xff] %v14481_v19  ;;  %5910 = vmatmul.f32.gmra.mxu3 %v5693_v52  ;;  %v9894_v52 = vld [vmem:[%s16032_s2 + $0x218] sm:$0xff]  ;;  %7641 = vmatpush.msra.mxu2 %v9927_v17  ;;  %v5694_v24 = vld [vmem:[#allocation3 + $0x309] sm:$0xff] }
 0xa05   :  { %6933 = vmatpush.msrb.mxu3 %v9894_v52  ;;  %7989 = vmatpush.msra.mxu0 %v9949_v10  ;;  %v9925_v17 = vld [vmem:[%s16032_s2 + $0x310] sm:$0xff]  ;;  %v9892_v52 = vld [vmem:[%s16032_s2 + $0x208] sm:$0xff] }
 0xa06   :  { %v6362_v57 = vpop.f32.mrf.mxu2  ;;  %7642 = vmatpush.msra.mxu2 %v9926_v27  ;;  %7288 = vmatpush.msra.mxu1 %v9909_v39  ;;  %v6193_v47 = vld [vmem:[#allocation3 + $0x30a] sm:$0xff]  ;;  %v9923_v39 = vld [vmem:[%s16032_s2 + $0x300] sm:$0xff] }
 0xa07   :  { %v5863_v22 = vpop.f32.mrf.mxu3  ;;  %v6075_v45 = vpop.f32.mrf.mxu1  ;;  %6934 = vmatpush.msrb.mxu3 %v9893_v4  ;;  %7990 = vmatpush.msra.mxu0 %v9948_v26  ;;  %v9908_v10 = vld [vmem:[%s16032_s2 + $0x288] sm:$0xff]  ;;  %v9907_v4 = vld [vmem:[%s16032_s2 + $0x280] sm:$0xff] }
 0xa08   :  { %v6073_v36 = vadd.f32 %v6072_v12, %v5863_v22  ;;  %v14523_v19 = vpop.f32.mrf.mxu0  ;;  %v5614_v12 = vld [vmem:[#allocation3 + $0x308] sm:$0xff]  ;;  %v9947_v22 = vld [vmem:[%s16032_s2 + $0x3c0] sm:$0xff]  ;;  %7643 = vmatpush.msra.mxu2 %v9925_v17  ;;  %7289 = vmatpush.msra.mxu1 %v9908_v10  ;;  %v9945_v17 = vld [vmem:[%s16032_s2 + $0x3b0] sm:$0xff] }
 0xa09   :  { %17010 = vst [vmem:[#allocation47_spill] sm:$0xff] %v14523_v19  ;;  %v9924_v27 = vld [vmem:[%s16032_s2 + $0x308] sm:$0xff]  ;;  %6935 = vmatpush.msrb.mxu3 %v9892_v52  ;;  %7991 = vmatpush.msra.mxu0 %v9947_v22  ;;  %v5695_v10 = vld [vmem:[#allocation3 + $0x319] sm:$0xff] }
 0xa0a   :  { %v14521_v51 = vadd.f32 %v6362_v57, %v6073_v36  ;;  %6122 = vmatmul.f32.gmra.mxu1 %v5614_v12  ;;  %6760 = vmatmul.f32.gmra.mxu0 %v5614_v12  ;;  %v9946_v36 = vld [vmem:[%s16032_s2 + $0x3b8] sm:$0xff] }
 0xa0b   :  { %6412 = vmatmul.f32.gmra.mxu2 %v6193_v47  ;;  %7290 = vmatpush.msra.mxu1 %v9907_v4  ;;  %v5615_v19 = vld [vmem:[#allocation3 + $0x318] sm:$0xff] }
 0xa0c   :  { %17009 = vst [vmem:[#allocation162_spill] sm:$0xff] %v14521_v51  ;;  %5913 = vmatmul.f32.gmra.mxu3 %v5694_v24  ;;  %v9891_v24 = vld [vmem:[%s16032_s2 + $0x200] sm:$0xff]  ;;  %7644 = vmatpush.msra.mxu2 %v9924_v27  ;;  %v9942_v4 = vld [vmem:[%s16032_s2 + $0x398] sm:$0xff] }
 0xa0d   :  { %6936 = vmatpush.msrb.mxu3 %v9891_v24  ;;  %7992 = vmatpush.msra.mxu0 %v9946_v36  ;;  %v6194_v22 = vld [vmem:[#allocation3 + $0x31a] sm:$0xff] }
 0xa0e   :  { %v6365_v12 = vpop.f32.mrf.mxu2  ;;  %7645 = vmatpush.msra.mxu2 %v9923_v39  ;;  %v9943_v27 = vld [vmem:[%s16032_s2 + $0x3a0] sm:$0xff] }
 0xa0f   :  { %v5866_v57 = vpop.f32.mrf.mxu3  ;;  %v6078_v52 = vpop.f32.mrf.mxu1  ;;  %7993 = vmatpush.msra.mxu0 %v9945_v17  ;;  %v5616_v17 = vld [vmem:[#allocation3 + $0x320] sm:$0xff] }
 0xa10   :  { %v6076_v26 = vadd.f32 %v6075_v45, %v5866_v57  ;;  %v14557_v51 = vpop.f32.mrf.mxu0  ;;  %v9944_v45 = vld [vmem:[%s16032_s2 + $0x3a8] sm:$0xff] }
 0xa11   :  { %17012 = vst [vmem:[#allocation45_spill] sm:$0xff] %v14557_v51  ;;  %7994 = vmatpush.msra.mxu0 %v9944_v45  ;;  %v6195_v45 = vld [vmem:[#allocation3 + $0x322] sm:$0xff] }
 0xa12   :  { %v14555_v47 = vadd.f32 %v6365_v12, %v6076_v26  ;;  %6125 = vmatmul.f32.gmra.mxu1 %v5615_v19  ;;  %6763 = vmatmul.f32.gmra.mxu0 %v5615_v19  ;;  %v5696_v19 = vld [vmem:[#allocation3 + $0x321] sm:$0xff] }
 0xa13   :  { %6415 = vmatmul.f32.gmra.mxu2 %v6194_v22  ;;  %7995 = vmatpush.msra.mxu0 %v9943_v27  ;;  %v9939_v27 = vld [vmem:[%s16032_s2 + $0x380] sm:$0xff] }
 0xa14   :  { %17011 = vst [vmem:[#allocation64_spill] sm:$0xff] %v14555_v47  ;;  %5916 = vmatmul.f32.gmra.mxu3 %v5695_v10  ;;  %v9941_v10 = vld [vmem:[%s16032_s2 + $0x390] sm:$0xff] }
 0xa15   :  { %7996 = vmatpush.msra.mxu0 %v9942_v4 }
 0xa16   :  { %v6368_v57 = vpop.f32.mrf.mxu2 }
 0xa17   :  { %v5869_v24 = vpop.f32.mrf.mxu3  ;;  %v6081_v39 = vpop.f32.mrf.mxu1  ;;  %7997 = vmatpush.msra.mxu0 %v9941_v10  ;;  %v7549_v10 = vld [vmem:[#allocation3 + $0x30] sm:$0xff] }
 0xa18   :  { %v6079_v36 = vadd.f32 %v6078_v52, %v5869_v24  ;;  %v14570_v12 = vpop.f32.mrf.mxu0  ;;  %v9940_v52 = vld [vmem:[%s16032_s2 + $0x388] sm:$0xff] }
 0xa19   :  { %17014 = vst [vmem:[#allocation79_spill] sm:$0xff] %v14570_v12  ;;  %7998 = vmatpush.msra.mxu0 %v9940_v52 }
 0xa1a   :  { %v14568_v26 = vadd.f32 %v6368_v57, %v6079_v36  ;;  %6128 = vmatmul.f32.gmra.mxu1 %v5616_v17  ;;  %6766 = vmatmul.f32.gmra.mxu0 %v5616_v17  ;;  %v6840_v17 = vld [vmem:[#allocation3 + $0x19] sm:$0xff] }
 0xa1b   :  { %6418 = vmatmul.f32.gmra.mxu2 %v6195_v45  ;;  %7999 = vmatpush.msra.mxu0 %v9939_v27  ;;  %v7194_v45 = vld [vmem:[#allocation3 + $0x1a] sm:$0xff] }
 0xa1c   :  { %17013 = vst [vmem:[#allocation61_spill] sm:$0xff] %v14568_v26  ;;  %5919 = vmatmul.f32.gmra.mxu3 %v5696_v19  ;;  %v6548_v26 = vld [vmem:[#allocation3 + $0x330] sm:$0xff]  ;;  %v7550_v27 = vld [vmem:[#allocation3 + $0x38] sm:$0xff] }
 0xa1e   :  { %v6371_v4 = vpop.f32.mrf.mxu2 }
 0xa1f   :  { %v5872_v22 = vpop.f32.mrf.mxu3  ;;  %v6084_v36 = vpop.f32.mrf.mxu1 }
 0xa20   :  { %v6082_v24 = vadd.f32 %v6081_v39, %v5872_v22  ;;  %v14583_v19 = vpop.f32.mrf.mxu0 }
 0xa21   :  { %17016 = vst [vmem:[#allocation41_spill] sm:$0xff] %v14583_v19 }
 0xa22   :  { %v14581_v57 = vadd.f32 %v6371_v4, %v6082_v24  ;;  %7291 = vmatmul.f32.vlgmr.msra.gmra.mxu1 %v7194_v45  ;;  %6769 = vmatmul.f32.gmra.mxu0 %v6548_v26  ;;  %v6841_v24 = vld [vmem:[#allocation3 + $0x21] sm:$0xff] }
 0xa23   :  { %7646 = vmatmul.f32.vlgmr.msra.gmra.mxu2 %v7549_v10  ;;  %v7195_v4 = vld [vmem:[#allocation3 + $0x22] sm:$0xff] }
 0xa24   :  { %17015 = vst [vmem:[#allocation156_spill] sm:$0xff] %v14581_v57  ;;  %6937 = vmatmul.f32.vlgmr.msrb.gmra.mxu3 %v6840_v17  ;;  %v6549_v57 = vld [vmem:[#allocation3 + $0x338] sm:$0xff] }
 0xa26   :  { %v6374_v51 = vpop.f32.mrf.mxu2 }
 0xa27   :  { %v5875_v12 = vpop.f32.mrf.mxu3  ;;  %v6087_v39 = vpop.f32.mrf.mxu1 }
 0xa28   :  { %v6085_v47 = vadd.f32 %v6084_v36, %v5875_v12  ;;  %v14587_v52 = vpop.f32.mrf.mxu0  ;;  %v7551_v36 = vld [vmem:[#allocation3 + $0x48] sm:$0xff] }
 0xa2a   :  { %v14585_v22 = vadd.f32 %v6374_v51, %v6085_v47  ;;  %7294 = vmatmul.f32.gmra.mxu1 %v7195_v4  ;;  %6772 = vmatmul.f32.gmra.mxu0 %v6549_v57  ;;  %v6842_v51 = vld [vmem:[#allocation3 + $0x31] sm:$0xff] }
 0xa2b   :  { %7649 = vmatmul.f32.gmra.mxu2 %v7550_v27  ;;  %v7196_v47 = vld [vmem:[#allocation3 + $0x32] sm:$0xff] }
 0xa2c   :  { %17017 = vst [vmem:[#allocation204_spill] sm:$0xff] %v14585_v22  ;;  %6940 = vmatmul.f32.gmra.mxu3 %v6841_v24 }
 0xa2e   :  { %v6377_v26 = vpop.f32.mrf.mxu2 }
 0xa2f   :  { %v5878_v17 = vpop.f32.mrf.mxu3  ;;  %v6090_v10 = vpop.f32.mrf.mxu1 }
 0xa30   :  { %v6088_v45 = vadd.f32 %v6087_v39, %v5878_v17  ;;  %v14591_v12 = vpop.f32.mrf.mxu0  ;;  %v6843_v17 = vld [vmem:[#allocation3 + $0x39] sm:$0xff] }
 0xa31   :  { %17019 = vst [vmem:[#allocation147_spill] sm:$0xff] %v14591_v12 }
 0xa32   :  { %v14589_v19 = vadd.f32 %v6377_v26, %v6088_v45  ;;  %7297 = vmatmul.f32.gmra.mxu1 %v7196_v47  ;;  %8000 = vmatmul.f32.vlgmr.msra.gmra.mxu0 %v6842_v51  ;;  %v7197_v45 = vld [vmem:[#allocation3 + $0x3a] sm:$0xff]  ;;  %v7552_v26 = vld [vmem:[#allocation3 + $0x50] sm:$0xff] }
 0xa33   :  { %7652 = vmatmul.f32.gmra.mxu2 %v7551_v36 }
 0xa34   :  { %17018 = vst [vmem:[#allocation52_spill] sm:$0xff] %v14589_v19  ;;  %6943 = vmatmul.f32.gmra.mxu3 %v6842_v51 }
 0xa36   :  { %v6380_v22 = vpop.f32.mrf.mxu2 }
 0xa37   :  { %v5881_v24 = vpop.f32.mrf.mxu3  ;;  %v6093_v57 = vpop.f32.mrf.mxu1 }
 0xa38   :  { %v6091_v4 = vadd.f32 %v6090_v10, %v5881_v24  ;;  %v14595_v39 = vpop.f32.mrf.mxu0  ;;  %v6844_v24 = vld [vmem:[#allocation3 + $0x49] sm:$0xff] }
 0xa39   :  { %17021 = vst [vmem:[#allocation143_spill] sm:$0xff] %v14595_v39 }
 0xa3a   :  { %v14593_v27 = vadd.f32 %v6380_v22, %v6091_v4  ;;  %7300 = vmatmul.f32.gmra.mxu1 %v7197_v45  ;;  %8003 = vmatmul.f32.gmra.mxu0 %v6843_v17  ;;  %v7198_v22 = vld [vmem:[#allocation3 + $0x4a] sm:$0xff]  ;;  %v7553_v4 = vld [vmem:[#allocation3 + $0x60] sm:$0xff] }
 0xa3b   :  { %7655 = vmatmul.f32.gmra.mxu2 %v7552_v26 }
 0xa3c   :  { %17020 = vst [vmem:[#allocation49_spill] sm:$0xff] %v14593_v27  ;;  %6946 = vmatmul.f32.gmra.mxu3 %v6843_v17 }
 0xa3e   :  { %v6383_v12 = vpop.f32.mrf.mxu2 }
 0xa3f   :  { %v5884_v19 = vpop.f32.mrf.mxu3  ;;  %v6096_v36 = vpop.f32.mrf.mxu1 }
 0xa40   :  { %v6094_v47 = vadd.f32 %v6093_v57, %v5884_v19  ;;  %v14599_v10 = vpop.f32.mrf.mxu0  ;;  %v6845_v57 = vld [vmem:[#allocation3 + $0x51] sm:$0xff] }
 0xa41   :  { %17023 = vst [vmem:[#allocation46_spill] sm:$0xff] %v14599_v10 }
 0xa42   :  { %v14597_v51 = vadd.f32 %v6383_v12, %v6094_v47  ;;  %7303 = vmatmul.f32.gmra.mxu1 %v7198_v22  ;;  %8006 = vmatmul.f32.gmra.mxu0 %v6844_v24  ;;  %v7199_v12 = vld [vmem:[#allocation3 + $0x52] sm:$0xff]  ;;  %v7554_v47 = vld [vmem:[#allocation3 + $0x68] sm:$0xff] }
 0xa43   :  { %7658 = vmatmul.f32.gmra.mxu2 %v7553_v4 }
 0xa44   :  { %17022 = vst [vmem:[#allocation211_spill] sm:$0xff] %v14597_v51  ;;  %6949 = vmatmul.f32.gmra.mxu3 %v6844_v24 }
 0xa46   :  { %v6386_v39 = vpop.f32.mrf.mxu2 }
 0xa47   :  { %v5887_v27 = vpop.f32.mrf.mxu3  ;;  %v6099_v26 = vpop.f32.mrf.mxu1 }
 0xa48   :  { %v6097_v45 = vadd.f32 %v6096_v36, %v5887_v27  ;;  %v14603_v19 = vpop.f32.mrf.mxu0  ;;  %v6846_v36 = vld [vmem:[#allocation3 + $0x61] sm:$0xff] }
 0xa49   :  { %17025 = vst [vmem:[#allocation206_spill] sm:$0xff] %v14603_v19 }
 0xa4a   :  { %v14601_v17 = vadd.f32 %v6386_v39, %v6097_v45  ;;  %7306 = vmatmul.f32.gmra.mxu1 %v7199_v12  ;;  %8009 = vmatmul.f32.gmra.mxu0 %v6845_v57  ;;  %v7200_v39 = vld [vmem:[#allocation3 + $0x62] sm:$0xff]  ;;  %v7555_v45 = vld [vmem:[#allocation3 + $0x78] sm:$0xff] }
 0xa4b   :  { %7661 = vmatmul.f32.gmra.mxu2 %v7554_v47 }
 0xa4c   :  { %17024 = vst [vmem:[#allocation140_spill] sm:$0xff] %v14601_v17  ;;  %6952 = vmatmul.f32.gmra.mxu3 %v6845_v57 }
 0xa4e   :  { %v6389_v10 = vpop.f32.mrf.mxu2 }
 0xa4f   :  { %v5890_v51 = vpop.f32.mrf.mxu3  ;;  %v6102_v4 = vpop.f32.mrf.mxu1 }
 0xa50   :  { %v6100_v22 = vadd.f32 %v6099_v26, %v5890_v51  ;;  %v14607_v27 = vpop.f32.mrf.mxu0  ;;  %v6847_v26 = vld [vmem:[#allocation3 + $0x69] sm:$0xff] }
 0xa51   :  { %17027 = vst [vmem:[#allocation137_spill] sm:$0xff] %v14607_v27 }
 0xa52   :  { %v14605_v24 = vadd.f32 %v6389_v10, %v6100_v22  ;;  %7309 = vmatmul.f32.gmra.mxu1 %v7200_v39  ;;  %8012 = vmatmul.f32.gmra.mxu0 %v6846_v36  ;;  %v7201_v10 = vld [vmem:[#allocation3 + $0x6a] sm:$0xff]  ;;  %v7556_v22 = vld [vmem:[#allocation3 + $0x80] sm:$0xff] }
 0xa53   :  { %7664 = vmatmul.f32.gmra.mxu2 %v7555_v45 }
 0xa54   :  { %17026 = vst [vmem:[#allocation43_spill] sm:$0xff] %v14605_v24  ;;  %6955 = vmatmul.f32.gmra.mxu3 %v6846_v36 }
 0xa56   :  { %v6392_v19 = vpop.f32.mrf.mxu2 }
 0xa57   :  { %v5893_v17 = vpop.f32.mrf.mxu3  ;;  %v6105_v47 = vpop.f32.mrf.mxu1 }
 0xa58   :  { %v6103_v12 = vadd.f32 %v6102_v4, %v5893_v17  ;;  %v14611_v51 = vpop.f32.mrf.mxu0  ;;  %v6848_v4 = vld [vmem:[#allocation3 + $0x79] sm:$0xff] }
 0xa59   :  { %17029 = vst [vmem:[#allocation215_spill] sm:$0xff] %v14611_v51 }
 0xa5a   :  { %v14609_v57 = vadd.f32 %v6392_v19, %v6103_v12  ;;  %7312 = vmatmul.f32.gmra.mxu1 %v7201_v10  ;;  %8015 = vmatmul.f32.gmra.mxu0 %v6847_v26  ;;  %v7202_v19 = vld [vmem:[#allocation3 + $0x7a] sm:$0xff]  ;;  %v7557_v12 = vld [vmem:[#allocation3 + $0x90] sm:$0xff] }
 0xa5b   :  { %7667 = vmatmul.f32.gmra.mxu2 %v7556_v22 }
 0xa5c   :  { %17028 = vst [vmem:[#allocation202_spill] sm:$0xff] %v14609_v57  ;;  %6958 = vmatmul.f32.gmra.mxu3 %v6847_v26 }
 0xa5e   :  { %v6395_v27 = vpop.f32.mrf.mxu2 }
 0xa5f   :  { %v5896_v24 = vpop.f32.mrf.mxu3  ;;  %v6108_v45 = vpop.f32.mrf.mxu1 }
 0xa60   :  { %v6106_v39 = vadd.f32 %v6105_v47, %v5896_v24  ;;  %v14615_v17 = vpop.f32.mrf.mxu0  ;;  %v6849_v47 = vld [vmem:[#allocation3 + $0x81] sm:$0xff] }
 0xa61   :  { %17031 = vst [vmem:[#allocation135_spill] sm:$0xff] %v14615_v17 }
 0xa62   :  { %v14613_v36 = vadd.f32 %v6395_v27, %v6106_v39  ;;  %7315 = vmatmul.f32.gmra.mxu1 %v7202_v19  ;;  %8018 = vmatmul.f32.gmra.mxu0 %v6848_v4  ;;  %v7203_v27 = vld [vmem:[#allocation3 + $0x82] sm:$0xff]  ;;  %v7558_v39 = vld [vmem:[#allocation3 + $0x98] sm:$0xff] }
 0xa63   :  { %7670 = vmatmul.f32.gmra.mxu2 %v7557_v12 }
 0xa64   :  { %17030 = vst [vmem:[#allocation40_spill] sm:$0xff] %v14613_v36  ;;  %6961 = vmatmul.f32.gmra.mxu3 %v6848_v4 }
 0xa66   :  { %v6398_v51 = vpop.f32.mrf.mxu2 }
 0xa67   :  { %v5899_v57 = vpop.f32.mrf.mxu3  ;;  %v6111_v22 = vpop.f32.mrf.mxu1 }
 0xa68   :  { %v6109_v10 = vadd.f32 %v6108_v45, %v5899_v57  ;;  %v14619_v24 = vpop.f32.mrf.mxu0  ;;  %v6850_v45 = vld [vmem:[#allocation3 + $0x91] sm:$0xff] }
 0xa69   :  { %17033 = vst [vmem:[#allocation207_spill] sm:$0xff] %v14619_v24 }
 0xa6a   :  { %v14617_v26 = vadd.f32 %v6398_v51, %v6109_v10  ;;  %7318 = vmatmul.f32.gmra.mxu1 %v7203_v27  ;;  %8021 = vmatmul.f32.gmra.mxu0 %v6849_v47  ;;  %v7204_v51 = vld [vmem:[#allocation3 + $0x92] sm:$0xff]  ;;  %v7559_v10 = vld [vmem:[#allocation3 + $0xa8] sm:$0xff] }
 0xa6b   :  { %7673 = vmatmul.f32.gmra.mxu2 %v7558_v39 }
 0xa6c   :  { %17032 = vst [vmem:[#allocation196_spill] sm:$0xff] %v14617_v26  ;;  %6964 = vmatmul.f32.gmra.mxu3 %v6849_v47 }
 0xa6e   :  { %v6401_v17 = vpop.f32.mrf.mxu2 }
 0xa6f   :  { %v5902_v36 = vpop.f32.mrf.mxu3  ;;  %v6114_v12 = vpop.f32.mrf.mxu1 }
 0xa70   :  { %v6112_v19 = vadd.f32 %v6111_v22, %v5902_v36  ;;  %v14623_v57 = vpop.f32.mrf.mxu0  ;;  %v6851_v22 = vld [vmem:[#allocation3 + $0x99] sm:$0xff] }
 0xa71   :  { %17035 = vst [vmem:[#allocation37_spill] sm:$0xff] %v14623_v57 }
 0xa72   :  { %v14621_v4 = vadd.f32 %v6401_v17, %v6112_v19  ;;  %7321 = vmatmul.f32.gmra.mxu1 %v7204_v51  ;;  %8024 = vmatmul.f32.gmra.mxu0 %v6850_v45  ;;  %v7205_v17 = vld [vmem:[#allocation3 + $0x9a] sm:$0xff]  ;;  %v7560_v19 = vld [vmem:[#allocation3 + $0xb0] sm:$0xff] }
 0xa73   :  { %7676 = vmatmul.f32.gmra.mxu2 %v7559_v10 }
 0xa74   :  { %17034 = vst [vmem:[#allocation30_spill] sm:$0xff] %v14621_v4  ;;  %6967 = vmatmul.f32.gmra.mxu3 %v6850_v45 }
 0xa76   :  { %v6404_v24 = vpop.f32.mrf.mxu2 }
 0xa77   :  { %v5905_v26 = vpop.f32.mrf.mxu3  ;;  %v6117_v39 = vpop.f32.mrf.mxu1 }
 0xa78   :  { %v6115_v27 = vadd.f32 %v6114_v12, %v5905_v26  ;;  %v14627_v36 = vpop.f32.mrf.mxu0  ;;  %v6852_v12 = vld [vmem:[#allocation3 + $0xa9] sm:$0xff] }
 0xa79   :  { %17037 = vst [vmem:[#allocation192_spill] sm:$0xff] %v14627_v36 }
 0xa7a   :  { %v14625_v47 = vadd.f32 %v6404_v24, %v6115_v27  ;;  %7324 = vmatmul.f32.gmra.mxu1 %v7205_v17  ;;  %8027 = vmatmul.f32.gmra.mxu0 %v6851_v22  ;;  %v7206_v24 = vld [vmem:[#allocation3 + $0xaa] sm:$0xff]  ;;  %v7561_v27 = vld [vmem:[#allocation3 + $0xc0] sm:$0xff] }
 0xa7b   :  { %7679 = vmatmul.f32.gmra.mxu2 %v7560_v19 }
 0xa7c   :  { %17036 = vst [vmem:[#allocation132_spill] sm:$0xff] %v14625_v47  ;;  %6970 = vmatmul.f32.gmra.mxu3 %v6851_v22 }
 0xa7e   :  { %v6407_v57 = vpop.f32.mrf.mxu2 }
 0xa7f   :  { %v5908_v4 = vpop.f32.mrf.mxu3  ;;  %v6120_v10 = vpop.f32.mrf.mxu1 }
 0xa80   :  { %v6118_v51 = vadd.f32 %v6117_v39, %v5908_v4  ;;  %v14631_v26 = vpop.f32.mrf.mxu0  ;;  %v6853_v39 = vld [vmem:[#allocation3 + $0xb1] sm:$0xff] }
 0xa81   :  { %17039 = vst [vmem:[#allocation74_spill] sm:$0xff] %v14631_v26 }
 0xa82   :  { %v14629_v45 = vadd.f32 %v6407_v57, %v6118_v51  ;;  %7327 = vmatmul.f32.gmra.mxu1 %v7206_v24  ;;  %8030 = vmatmul.f32.gmra.mxu0 %v6852_v12  ;;  %v7207_v57 = vld [vmem:[#allocation3 + $0xb2] sm:$0xff]  ;;  %v7562_v51 = vld [vmem:[#allocation3 + $0xc8] sm:$0xff] }
 0xa83   :  { %7682 = vmatmul.f32.gmra.mxu2 %v7561_v27 }
 0xa84   :  { %17038 = vst [vmem:[#allocation203_spill] sm:$0xff] %v14629_v45  ;;  %6973 = vmatmul.f32.gmra.mxu3 %v6852_v12 }
 0xa86   :  { %v6410_v36 = vpop.f32.mrf.mxu2 }
 0xa87   :  { %v5911_v47 = vpop.f32.mrf.mxu3  ;;  %v6123_v19 = vpop.f32.mrf.mxu1 }
 0xa88   :  { %v6121_v17 = vadd.f32 %v6120_v10, %v5911_v47  ;;  %v14635_v4 = vpop.f32.mrf.mxu0  ;;  %v6854_v10 = vld [vmem:[#allocation3 + $0xc1] sm:$0xff] }
 0xa89   :  { %17041 = vst [vmem:[#allocation129_spill] sm:$0xff] %v14635_v4 }
 0xa8a   :  { %v14633_v22 = vadd.f32 %v6410_v36, %v6121_v17  ;;  %7330 = vmatmul.f32.gmra.mxu1 %v7207_v57  ;;  %8033 = vmatmul.f32.gmra.mxu0 %v6853_v39  ;;  %v7208_v36 = vld [vmem:[#allocation3 + $0xc2] sm:$0xff]  ;;  %v7563_v17 = vld [vmem:[#allocation3 + $0xd8] sm:$0xff] }
 0xa8b   :  { %7685 = vmatmul.f32.gmra.mxu2 %v7562_v51 }
 0xa8c   :  { %17040 = vst [vmem:[#allocation34_spill] sm:$0xff] %v14633_v22  ;;  %6976 = vmatmul.f32.gmra.mxu3 %v6853_v39 }
 0xa8e   :  { %v6413_v26 = vpop.f32.mrf.mxu2 }
 0xa8f   :  { %v5914_v45 = vpop.f32.mrf.mxu3  ;;  %v6126_v27 = vpop.f32.mrf.mxu1 }
 0xa90   :  { %v6124_v24 = vadd.f32 %v6123_v19, %v5914_v45  ;;  %v14639_v47 = vpop.f32.mrf.mxu0  ;;  %v6855_v19 = vld [vmem:[#allocation3 + $0xc9] sm:$0xff] }
 0xa91   :  { %17043 = vst [vmem:[#allocation199_spill] sm:$0xff] %v14639_v47 }
 0xa92   :  { %v14637_v12 = vadd.f32 %v6413_v26, %v6124_v24  ;;  %7333 = vmatmul.f32.gmra.mxu1 %v7208_v36  ;;  %8036 = vmatmul.f32.gmra.mxu0 %v6854_v10  ;;  %v7209_v26 = vld [vmem:[#allocation3 + $0xca] sm:$0xff]  ;;  %v7564_v24 = vld [vmem:[#allocation3 + $0xe0] sm:$0xff] }
 0xa93   :  { %7688 = vmatmul.f32.gmra.mxu2 %v7563_v17 }
 0xa94   :  { %17042 = vst [vmem:[#allocation189_spill] sm:$0xff] %v14637_v12  ;;  %6979 = vmatmul.f32.gmra.mxu3 %v6854_v10 }
 0xa96   :  { %v6416_v4 = vpop.f32.mrf.mxu2 }
 0xa97   :  { %v5917_v22 = vpop.f32.mrf.mxu3  ;;  %v6129_v51 = vpop.f32.mrf.mxu1 }
 0xa98   :  { %v6127_v57 = vadd.f32 %v6126_v27, %v5917_v22  ;;  %v14643_v45 = vpop.f32.mrf.mxu0  ;;  %v6856_v27 = vld [vmem:[#allocation3 + $0xd9] sm:$0xff] }
 0xa99   :  { %17045 = vst [vmem:[#allocation31_spill] sm:$0xff] %v14643_v45 }
 0xa9a   :  { %v14641_v39 = vadd.f32 %v6416_v4, %v6127_v57  ;;  %7336 = vmatmul.f32.gmra.mxu1 %v7209_v26  ;;  %8039 = vmatmul.f32.gmra.mxu0 %v6855_v19  ;;  %v7210_v4 = vld [vmem:[#allocation3 + $0xda] sm:$0xff]  ;;  %v7565_v57 = vld [vmem:[#allocation3 + $0xf0] sm:$0xff]  ;;  %v6776_v26 = vadd.f32 %v14177_v62, %v14171_v37 }
 0xa9b   :  { %7691 = vmatmul.f32.gmra.mxu2 %v7564_v24 }
 0xa9c   :  { %17044 = vst [vmem:[#allocation26_spill] sm:$0xff] %v14641_v39  ;;  %6982 = vmatmul.f32.gmra.mxu3 %v6855_v19 }
 0xa9e   :  { %v6419_v47 = vpop.f32.mrf.mxu2 }
 0xa9f   :  { %v5920_v12 = vpop.f32.mrf.mxu3  ;;  %v7292_v17 = vpop.f32.mrf.mxu1 }
 0xaa0   :  { %v6130_v36 = vadd.f32 %v6129_v51, %v5920_v12  ;;  %v14647_v22 = vpop.f32.mrf.mxu0 }
 0xaa1   :  { %17047 = vst [vmem:[#allocation186_spill] sm:$0xff] %v14647_v22 }
 0xaa2   :  { %v14645_v10 = vadd.f32 %v6419_v47, %v6130_v36  ;;  %7339 = vmatmul.f32.gmra.mxu1 %v7210_v4  ;;  %8042 = vmatmul.f32.gmra.mxu0 %v6856_v27  ;;  %v6857_v47 = vld [vmem:[#allocation3 + $0xe1] sm:$0xff]  ;;  %v7566_v4 = vld [vmem:[#allocation3 + $0xf8] sm:$0xff] }
 0xaa3   :  { %7694 = vmatmul.f32.gmra.mxu2 %v7565_v57  ;;  %v7211_v36 = vld [vmem:[#allocation3 + $0xe2] sm:$0xff] }
 0xaa4   :  { %17046 = vst [vmem:[#allocation126_spill] sm:$0xff] %v14645_v10  ;;  %6985 = vmatmul.f32.gmra.mxu3 %v6856_v27  ;;  %v6777_v27 = vadd.f32 %v14183_v42, %v14175_v38 }
 0xaa6   :  { %v7647_v39 = vpop.f32.mrf.mxu2 }
 0xaa7   :  { %v6938_v24 = vpop.f32.mrf.mxu3  ;;  %v7295_v12 = vpop.f32.mrf.mxu1 }
 0xaa8   :  { %v7130_v19 = vadd.f32 %v6938_v24, %v6776_v26  ;;  %v14651_v45 = vpop.f32.mrf.mxu0 }
 0xaa9   :  { %17048 = vst [vmem:[#allocation195_spill] sm:$0xff] %v14651_v45  ;;  %v7212_v45 = vld [vmem:[#allocation3 + $0xf2] sm:$0xff] }
 0xaaa   :  { %v7484_v51 = vadd.f32 %v7292_v17, %v7130_v19  ;;  %7342 = vmatmul.f32.gmra.mxu1 %v7211_v36  ;;  %8045 = vmatmul.f32.gmra.mxu0 %v6857_v47  ;;  %v6858_v19 = vld [vmem:[#allocation3 + $0xf1] sm:$0xff] }
 0xaab   :  { %7697 = vmatmul.f32.gmra.mxu2 %v7566_v4 }
 0xaac   :  { %v14653_v10 = vadd.f32 %v7647_v39, %v7484_v51  ;;  %6988 = vmatmul.f32.gmra.mxu3 %v6857_v47  ;;  %v7567_v39 = vld [vmem:[#allocation3 + $0x108] sm:$0xff]  ;;  %v6778_v51 = vadd.f32 %v14189_v54, %v14181_v0 }
 0xaae   :  { %v7650_v57 = vpop.f32.mrf.mxu2 }
 0xaaf   :  { %v6941_v37 = vpop.f32.mrf.mxu3  ;;  %v7298_v26 = vpop.f32.mrf.mxu1 }
 0xab0   :  { %v7131_v62 = vadd.f32 %v6941_v37, %v6777_v27  ;;  %v14657_v17 = vpop.f32.mrf.mxu0  ;;  %v6859_v27 = vld [vmem:[#allocation3 + $0xf9] sm:$0xff] }
 0xab1   :  { %v7213_v37 = vld [vmem:[#allocation3 + $0xfa] sm:$0xff] }
 0xab2   :  { %v7485_v24 = vadd.f32 %v7295_v12, %v7131_v62  ;;  %7345 = vmatmul.f32.gmra.mxu1 %v7212_v45  ;;  %8048 = vmatmul.f32.gmra.mxu0 %v6858_v19  ;;  %v7568_v45 = vld [vmem:[#allocation3 + $0x110] sm:$0xff] }
 0xab3   :  { %7700 = vmatmul.f32.gmra.mxu2 %v7567_v39 }
 0xab4   :  { %v14659_v22 = vadd.f32 %v7650_v57, %v7485_v24  ;;  %6991 = vmatmul.f32.gmra.mxu3 %v6858_v19  ;;  %v6779_v57 = vadd.f32 %v14195_v23, %v14187_v9 }
 0xab6   :  { %v7653_v47 = vpop.f32.mrf.mxu2 }
 0xab7   :  { %v6944_v38 = vpop.f32.mrf.mxu3  ;;  %v7301_v36 = vpop.f32.mrf.mxu1 }
 0xab8   :  { %v7132_v42 = vadd.f32 %v6944_v38, %v6778_v51  ;;  %v14663_v12 = vpop.f32.mrf.mxu0  ;;  %v6860_v51 = vld [vmem:[#allocation3 + $0x109] sm:$0xff] }
 0xab9   :  { %v7214_v38 = vld [vmem:[#allocation3 + $0x10a] sm:$0xff] }
 0xaba   :  { %v7486_v4 = vadd.f32 %v7298_v26, %v7132_v42  ;;  %7348 = vmatmul.f32.gmra.mxu1 %v7213_v37  ;;  %8051 = vmatmul.f32.gmra.mxu0 %v6859_v27 }
 0xabb   :  { %7703 = vmatmul.f32.gmra.mxu2 %v7568_v45 }
 0xabc   :  { %v14665_v62 = vadd.f32 %v7653_v47, %v7486_v4  ;;  %6994 = vmatmul.f32.gmra.mxu3 %v6859_v27  ;;  %v7569_v47 = vld [vmem:[#allocation3 + $0x120] sm:$0xff]  ;;  %v6780_v4 = vadd.f32 %v14201_v60, %v14193_v15 }
 0xabe   :  { %v7656_v24 = vpop.f32.mrf.mxu2 }
 0xabf   :  { %v6947_v0 = vpop.f32.mrf.mxu3  ;;  %v7304_v19 = vpop.f32.mrf.mxu1 }
 0xac0   :  { %v7133_v54 = vadd.f32 %v6947_v0, %v6779_v57  ;;  %v14669_v26 = vpop.f32.mrf.mxu0  ;;  %v6861_v57 = vld [vmem:[#allocation3 + $0x111] sm:$0xff] }
 0xac1   :  { %v7215_v0 = vld [vmem:[#allocation3 + $0x112] sm:$0xff] }
 0xac2   :  { %v7487_v39 = vadd.f32 %v7301_v36, %v7133_v54  ;;  %7351 = vmatmul.f32.gmra.mxu1 %v7214_v38  ;;  %8054 = vmatmul.f32.gmra.mxu0 %v6860_v51 }
 0xac3   :  { %7706 = vmatmul.f32.gmra.mxu2 %v7569_v47 }
 0xac4   :  { %v14671_v42 = vadd.f32 %v7656_v24, %v7487_v39  ;;  %6997 = vmatmul.f32.gmra.mxu3 %v6860_v51  ;;  %v7570_v24 = vld [vmem:[#allocation3 + $0x128] sm:$0xff]  ;;  %v6781_v39 = vadd.f32 %v14207_v29, %v14199_v32 }
 0xac6   :  { %v7659_v27 = vpop.f32.mrf.mxu2 }
 0xac7   :  { %v6950_v9 = vpop.f32.mrf.mxu3  ;;  %v7307_v37 = vpop.f32.mrf.mxu1 }
 0xac8   :  { %v7134_v23 = vadd.f32 %v6950_v9, %v6780_v4  ;;  %v14675_v36 = vpop.f32.mrf.mxu0  ;;  %v6862_v4 = vld [vmem:[#allocation3 + $0x121] sm:$0xff] }
 0xac9   :  { %v7216_v9 = vld [vmem:[#allocation3 + $0x122] sm:$0xff] }
 0xaca   :  { %v7488_v45 = vadd.f32 %v7304_v19, %v7134_v23  ;;  %7354 = vmatmul.f32.gmra.mxu1 %v7215_v0  ;;  %8057 = vmatmul.f32.gmra.mxu0 %v6861_v57 }
 0xacb   :  { %7709 = vmatmul.f32.gmra.mxu2 %v7570_v24 }
 0xacc   :  { %v14677_v54 = vadd.f32 %v7659_v27, %v7488_v45  ;;  %7000 = vmatmul.f32.gmra.mxu3 %v6861_v57  ;;  %v7571_v27 = vld [vmem:[#allocation3 + $0x138] sm:$0xff]  ;;  %v6782_v45 = vadd.f32 %v14213_v44, %v14205_v18 }
 0xace   :  { %v7662_v51 = vpop.f32.mrf.mxu2 }
 0xacf   :  { %v6953_v15 = vpop.f32.mrf.mxu3  ;;  %v7310_v38 = vpop.f32.mrf.mxu1 }
 0xad0   :  { %v7135_v60 = vadd.f32 %v6953_v15, %v6781_v39  ;;  %v14681_v19 = vpop.f32.mrf.mxu0  ;;  %v6863_v39 = vld [vmem:[#allocation3 + $0x129] sm:$0xff] }
 0xad1   :  { %v7217_v15 = vld [vmem:[#allocation3 + $0x12a] sm:$0xff] }
 0xad2   :  { %v7489_v47 = vadd.f32 %v7307_v37, %v7135_v60  ;;  %7357 = vmatmul.f32.gmra.mxu1 %v7216_v9  ;;  %8060 = vmatmul.f32.gmra.mxu0 %v6862_v4 }
 0xad3   :  { %7712 = vmatmul.f32.gmra.mxu2 %v7571_v27 }
 0xad4   :  { %v14683_v23 = vadd.f32 %v7662_v51, %v7489_v47  ;;  %7003 = vmatmul.f32.gmra.mxu3 %v6862_v4  ;;  %v7572_v51 = vld [vmem:[#allocation3 + $0x140] sm:$0xff]  ;;  %v6783_v47 = vadd.f32 %v14219_v1, %v14211_v50 }
 0xad6   :  { %v7665_v57 = vpop.f32.mrf.mxu2 }
 0xad7   :  { %v6956_v32 = vpop.f32.mrf.mxu3  ;;  %v7313_v0 = vpop.f32.mrf.mxu1 }
 0xad8   :  { %v7136_v29 = vadd.f32 %v6956_v32, %v6782_v45  ;;  %v14687_v37 = vpop.f32.mrf.mxu0  ;;  %v6864_v45 = vld [vmem:[#allocation3 + $0x139] sm:$0xff] }
 0xad9   :  { %v7218_v32 = vld [vmem:[#allocation3 + $0x13a] sm:$0xff] }
 0xada   :  { %v7490_v24 = vadd.f32 %v7310_v38, %v7136_v29  ;;  %7360 = vmatmul.f32.gmra.mxu1 %v7217_v15  ;;  %8063 = vmatmul.f32.gmra.mxu0 %v6863_v39 }
 0xadb   :  { %7715 = vmatmul.f32.gmra.mxu2 %v7572_v51 }
 0xadc   :  { %v14689_v60 = vadd.f32 %v7665_v57, %v7490_v24  ;;  %7006 = vmatmul.f32.gmra.mxu3 %v6863_v39  ;;  %v7573_v57 = vld [vmem:[#allocation3 + $0x150] sm:$0xff]  ;;  %v6784_v24 = vadd.f32 %v14225_v21, %v14217_v8 }
 0xade   :  { %v7668_v4 = vpop.f32.mrf.mxu2 }
 0xadf   :  { %v6959_v18 = vpop.f32.mrf.mxu3  ;;  %v7316_v9 = vpop.f32.mrf.mxu1 }
 0xae0   :  { %v7137_v44 = vadd.f32 %v6959_v18, %v6783_v47  ;;  %v14693_v38 = vpop.f32.mrf.mxu0  ;;  %v6865_v47 = vld [vmem:[#allocation3 + $0x141] sm:$0xff] }
 0xae1   :  { %v7219_v18 = vld [vmem:[#allocation3 + $0x142] sm:$0xff] }
 0xae2   :  { %v7491_v27 = vadd.f32 %v7313_v0, %v7137_v44  ;;  %7363 = vmatmul.f32.gmra.mxu1 %v7218_v32  ;;  %8066 = vmatmul.f32.gmra.mxu0 %v6864_v45 }
 0xae3   :  { %7718 = vmatmul.f32.gmra.mxu2 %v7573_v57 }
 0xae4   :  { %v14695_v29 = vadd.f32 %v7668_v4, %v7491_v27  ;;  %7009 = vmatmul.f32.gmra.mxu3 %v6864_v45  ;;  %v7574_v4 = vld [vmem:[#allocation3 + $0x158] sm:$0xff]  ;;  %v6785_v27 = vadd.f32 %v14231_v33, %v14223_v49 }
 0xae6   :  { %v7671_v39 = vpop.f32.mrf.mxu2 }
 0xae7   :  { %v6962_v50 = vpop.f32.mrf.mxu3  ;;  %v7319_v15 = vpop.f32.mrf.mxu1 }
 0xae8   :  { %v7138_v1 = vadd.f32 %v6962_v50, %v6784_v24  ;;  %v14699_v0 = vpop.f32.mrf.mxu0  ;;  %v6866_v24 = vld [vmem:[#allocation3 + $0x151] sm:$0xff] }
 0xae9   :  { %v7220_v50 = vld [vmem:[#allocation3 + $0x152] sm:$0xff] }
 0xaea   :  { %v7492_v51 = vadd.f32 %v7316_v9, %v7138_v1  ;;  %7366 = vmatmul.f32.gmra.mxu1 %v7219_v18  ;;  %8069 = vmatmul.f32.gmra.mxu0 %v6865_v47 }
 0xaeb   :  { %7721 = vmatmul.f32.gmra.mxu2 %v7574_v4 }
 0xaec   :  { %v14701_v44 = vadd.f32 %v7671_v39, %v7492_v51  ;;  %7012 = vmatmul.f32.gmra.mxu3 %v6865_v47  ;;  %v7575_v39 = vld [vmem:[#allocation3 + $0x168] sm:$0xff]  ;;  %v6786_v51 = vadd.f32 %v14237_v30, %v14229_v5 }
 0xaee   :  { %v7674_v45 = vpop.f32.mrf.mxu2 }
 0xaef   :  { %v6965_v8 = vpop.f32.mrf.mxu3  ;;  %v7322_v32 = vpop.f32.mrf.mxu1 }
 0xaf0   :  { %v7139_v21 = vadd.f32 %v6965_v8, %v6785_v27  ;;  %v14705_v9 = vpop.f32.mrf.mxu0  ;;  %v6867_v27 = vld [vmem:[#allocation3 + $0x159] sm:$0xff] }
 0xaf1   :  { %v7221_v8 = vld [vmem:[#allocation3 + $0x15a] sm:$0xff] }
 0xaf2   :  { %v7493_v57 = vadd.f32 %v7319_v15, %v7139_v21  ;;  %7369 = vmatmul.f32.gmra.mxu1 %v7220_v50  ;;  %8072 = vmatmul.f32.gmra.mxu0 %v6866_v24 }
 0xaf3   :  { %7724 = vmatmul.f32.gmra.mxu2 %v7575_v39 }
 0xaf4   :  { %v14707_v1 = vadd.f32 %v7674_v45, %v7493_v57  ;;  %7015 = vmatmul.f32.gmra.mxu3 %v6866_v24  ;;  %v7576_v45 = vld [vmem:[#allocation3 + $0x170] sm:$0xff]  ;;  %v6787_v57 = vadd.f32 %v14243_v61, %v14235_v63 }
 0xaf6   :  { %17049 = vst [vmem:[#allocation24_spill] sm:$0xff] %v14707_v1  ;;  %v7677_v47 = vpop.f32.mrf.mxu2  ;;  %v7227_v1 = vld [vmem:[#allocation3 + $0x1d2] sm:$0xff] }
 0xaf7   :  { %v6968_v49 = vpop.f32.mrf.mxu3  ;;  %v7325_v18 = vpop.f32.mrf.mxu1 }
 0xaf8   :  { %v7140_v33 = vadd.f32 %v6968_v49, %v6786_v51  ;;  %v14711_v15 = vpop.f32.mrf.mxu0  ;;  %v6868_v51 = vld [vmem:[#allocation3 + $0x169] sm:$0xff] }
 0xaf9   :  { %17050 = vst [vmem:[#allocation28_spill] sm:$0xff] %v14711_v15  ;;  %v7222_v49 = vld [vmem:[#allocation3 + $0x16a] sm:$0xff] }
 0xafa   :  { %v7494_v4 = vadd.f32 %v7322_v32, %v7140_v33  ;;  %7372 = vmatmul.f32.gmra.mxu1 %v7221_v8  ;;  %8075 = vmatmul.f32.gmra.mxu0 %v6867_v27  ;;  %v6873_v15 = vld [vmem:[#allocation3 + $0x1d1] sm:$0xff] }
 0xafb   :  { %7727 = vmatmul.f32.gmra.mxu2 %v7576_v45 }
 0xafc   :  { %v14713_v21 = vadd.f32 %v7677_v47, %v7494_v4  ;;  %7018 = vmatmul.f32.gmra.mxu3 %v6867_v27  ;;  %v7577_v47 = vld [vmem:[#allocation3 + $0x180] sm:$0xff]  ;;  %v6788_v4 = vadd.f32 %v14249_v13, %v14241_v43 }
 0xafe   :  { %v7680_v24 = vpop.f32.mrf.mxu2 }
 0xaff   :  { %v6971_v5 = vpop.f32.mrf.mxu3  ;;  %v7328_v50 = vpop.f32.mrf.mxu1 }
 0xb00   :  { %v7141_v30 = vadd.f32 %v6971_v5, %v6787_v57  ;;  %v14717_v32 = vpop.f32.mrf.mxu0  ;;  %v6869_v57 = vld [vmem:[#allocation3 + $0x171] sm:$0xff] }
 0xb01   :  { %v7223_v5 = vld [vmem:[#allocation3 + $0x172] sm:$0xff] }
 0xb02   :  { %v7495_v39 = vadd.f32 %v7325_v18, %v7141_v30  ;;  %7375 = vmatmul.f32.gmra.mxu1 %v7222_v49  ;;  %8078 = vmatmul.f32.gmra.mxu0 %v6868_v51 }
 0xb03   :  { %7730 = vmatmul.f32.gmra.mxu2 %v7577_v47 }
 0xb04   :  { %v14719_v33 = vadd.f32 %v7680_v24, %v7495_v39  ;;  %7021 = vmatmul.f32.gmra.mxu3 %v6868_v51  ;;  %v7578_v24 = vld [vmem:[#allocation3 + $0x188] sm:$0xff]  ;;  %v6789_v39 = vadd.f32 %v14255_v59, %v14247_v14  ;;  %v6790_v14 = vadd.f32 %v14261_v55, %v14253_v16 }
 0xb06   :  { %v7683_v27 = vpop.f32.mrf.mxu2 }
 0xb07   :  { %v6974_v63 = vpop.f32.mrf.mxu3  ;;  %v7331_v8 = vpop.f32.mrf.mxu1 }
 0xb08   :  { %v7142_v61 = vadd.f32 %v6974_v63, %v6788_v4  ;;  %v14723_v18 = vpop.f32.mrf.mxu0  ;;  %v6870_v4 = vld [vmem:[#allocation3 + $0x181] sm:$0xff] }
 0xb09   :  { %v7224_v63 = vld [vmem:[#allocation3 + $0x182] sm:$0xff] }
 0xb0a   :  { %v7496_v45 = vadd.f32 %v7328_v50, %v7142_v61  ;;  %7378 = vmatmul.f32.gmra.mxu1 %v7223_v5  ;;  %8081 = vmatmul.f32.gmra.mxu0 %v6869_v57 }
 0xb0b   :  { %7733 = vmatmul.f32.gmra.mxu2 %v7578_v24 }
 0xb0c   :  { %v14725_v30 = vadd.f32 %v7683_v27, %v7496_v45  ;;  %7024 = vmatmul.f32.gmra.mxu3 %v6869_v57  ;;  %v14733_v27 = vld [vmem:[#allocation3] sm:$0xff] }
 0xb0e   :  { %v7686_v51 = vpop.f32.mrf.mxu2 }
 0xb0f   :  { %v6977_v43 = vpop.f32.mrf.mxu3  ;;  %v7334_v49 = vpop.f32.mrf.mxu1 }
 0xb10   :  { %v7143_v13 = vadd.f32 %v6977_v43, %v6789_v39  ;;  %v14729_v50 = vpop.f32.mrf.mxu0  ;;  %v6871_v39 = vld [vmem:[#allocation3 + $0x189] sm:$0xff] }
 0xb11   :  { %v7225_v43 = vld [vmem:[#allocation3 + $0x18a] sm:$0xff] }
 0xb12   :  { %v7497_v47 = vadd.f32 %v7331_v8, %v7143_v13  ;;  %7381 = vmatmul.f32.gmra.mxu1 %v7224_v63  ;;  %8084 = vmatmul.f32.gmra.mxu0 %v6870_v4 }
 0xb13   :  { %7736 = vmatmul.f32.gmra.mxu2 %v14733_v27 }
 0xb14   :  { %v14731_v61 = vadd.f32 %v7686_v51, %v7497_v47  ;;  %7027 = vmatmul.f32.gmra.mxu3 %v6870_v4  ;;  %v6791_v51 = vadd.f32 %v14266_v28, %v14259_v41  ;;  %v6792_v41 = vadd.f32 %v14271_v25, %v14264_v6  ;;  %v6793_v6 = vadd.f32 %v14275_v58, %v14269_v46 }
 0xb16   :  { %v7689_v57 = vpop.f32.mrf.mxu2 }
 0xb17   :  { %v6980_v59 = vpop.f32.mrf.mxu3  ;;  %v7337_v8 = vpop.f32.mrf.mxu1 }
 0xb18   :  { %v7144_v45 = vadd.f32 %v6980_v59, %v6790_v14  ;;  %v14738_v24 = vpop.f32.mrf.mxu0  ;;  %v7933_v14 = vld [vmem:[#allocation3 + $0x199] sm:$0xff]  ;;  %v6872_v59 = vld [vmem:[#allocation3 + $0x1c9] sm:$0xff] }
 0xb1a   :  { %v7498_v5 = vadd.f32 %v7334_v49, %v7144_v45  ;;  %7384 = vmatmul.f32.gmra.mxu1 %v7225_v43  ;;  %8087 = vmatmul.f32.gmra.mxu0 %v6871_v39  ;;  %v7226_v45 = vld [vmem:[#allocation3 + $0x1ca] sm:$0xff] }
 0xb1b   :  { %7739 = vmatmul.f32.gmra.mxu2 %v14733_v27 }
 0xb1c   :  { %v14740_v13 = vadd.f32 %v7689_v57, %v7498_v5  ;;  %7030 = vmatmul.f32.gmra.mxu3 %v6871_v39  ;;  %v7581_v5 = vld [vmem:[#allocation3 + $0x1e0] sm:$0xff] }
 0xb1e   :  { %v7692_v47 = vpop.f32.mrf.mxu2 }
 0xb1f   :  { %v6983_v16 = vpop.f32.mrf.mxu3  ;;  %v7340_v4 = vpop.f32.mrf.mxu1 }
 0xb20   :  { %v7145_v55 = vadd.f32 %v6983_v16, %v6791_v51  ;;  %v14745_v49 = vpop.f32.mrf.mxu0 }
 0xb22   :  { %v7499_v63 = vadd.f32 %v7337_v8, %v7145_v55  ;;  %7387 = vmatmul.f32.gmra.mxu1 %v7226_v45  ;;  %8090 = vmatmul.f32.gmra.mxu0 %v7933_v14  ;;  %v7934_v55 = vld [vmem:[#allocation3 + $0x1a1] sm:$0xff] }
 0xb23   :  { %7742 = vmatmul.f32.gmra.mxu2 %v7581_v5 }
 0xb24   :  { %v14747_v57 = vadd.f32 %v7692_v47, %v7499_v63  ;;  %7033 = vmatmul.f32.gmra.mxu3 %v6872_v59  ;;  %v7582_v63 = vld [vmem:[#allocation3 + $0x1e8] sm:$0xff] }
 0xb26   :  { %v7695_v43 = vpop.f32.mrf.mxu2 }
 0xb27   :  { %v6986_v28 = vpop.f32.mrf.mxu3  ;;  %v7343_v51 = vpop.f32.mrf.mxu1 }
 0xb28   :  { %v7146_v39 = vadd.f32 %v6986_v28, %v6792_v41  ;;  %v14751_v16 = vpop.f32.mrf.mxu0  ;;  %v6874_v41 = vld [vmem:[#allocation3 + $0x1e1] sm:$0xff] }
 0xb29   :  { %v7228_v28 = vld [vmem:[#allocation3 + $0x1e2] sm:$0xff] }
 0xb2a   :  { %v7500_v8 = vadd.f32 %v7340_v4, %v7146_v39  ;;  %7390 = vmatmul.f32.gmra.mxu1 %v7227_v1  ;;  %8093 = vmatmul.f32.gmra.mxu0 %v7934_v55  ;;  %v7583_v1 = vld [vmem:[#allocation3 + $0x1f8] sm:$0xff] }
 0xb2b   :  { %7745 = vmatmul.f32.gmra.mxu2 %v7582_v63  ;;  %v6875_v63 = vld [vmem:[#allocation3 + $0x1e9] sm:$0xff] }
 0xb2c   :  { %v14753_v47 = vadd.f32 %v7695_v43, %v7500_v8  ;;  %7036 = vmatmul.f32.gmra.mxu3 %v6873_v15  ;;  %v6794_v15 = vadd.f32 %v14279_v2, %v14273_v11 }
 0xb2e   :  { %v7698_v59 = vpop.f32.mrf.mxu2 }
 0xb2f   :  { %v6989_v25 = vpop.f32.mrf.mxu3  ;;  %v7346_v45 = vpop.f32.mrf.mxu1 }
 0xb30   :  { %v7147_v14 = vadd.f32 %v6989_v25, %v6793_v6  ;;  %v14757_v5 = vpop.f32.mrf.mxu0  ;;  %v7229_v6 = vld [vmem:[#allocation3 + $0x1ea] sm:$0xff] }
 0xb32   :  { %v7501_v4 = vadd.f32 %v7343_v51, %v7147_v14  ;;  %7393 = vmatmul.f32.gmra.mxu1 %v7228_v28  ;;  %8096 = vmatmul.f32.gmra.mxu0 %v6874_v41  ;;  %v7584_v14 = vld [vmem:[#allocation3 + $0x200] sm:$0xff] }
 0xb33   :  { %7748 = vmatmul.f32.gmra.mxu2 %v7583_v1  ;;  %v6876_v1 = vld [vmem:[#allocation3 + $0x1f9] sm:$0xff] }
 0xb34   :  { %v14759_v39 = vadd.f32 %v7698_v59, %v7501_v4  ;;  %7039 = vmatmul.f32.gmra.mxu3 %v6874_v41  ;;  %v6795_v59 = vadd.f32 %v14283_v34, %v14277_v56 }
 0xb36   :  { %v7701_v43 = vpop.f32.mrf.mxu2 }
 0xb37   :  { %v6992_v46 = vpop.f32.mrf.mxu3  ;;  %v7349_v8 = vpop.f32.mrf.mxu1 }
 0xb38   :  { %v7148_v58 = vadd.f32 %v6992_v46, %v6794_v15  ;;  %v14763_v51 = vpop.f32.mrf.mxu0  ;;  %v7230_v15 = vld [vmem:[#allocation3 + $0x1fa] sm:$0xff] }
 0xb3a   :  { %v7502_v55 = vadd.f32 %v7346_v45, %v7148_v58  ;;  %7396 = vmatmul.f32.gmra.mxu1 %v7229_v6  ;;  %8099 = vmatmul.f32.gmra.mxu0 %v6875_v63  ;;  %v7585_v58 = vld [vmem:[#allocation3 + $0x210] sm:$0xff] }
 0xb3b   :  { %7751 = vmatmul.f32.gmra.mxu2 %v7584_v14  ;;  %v6877_v14 = vld [vmem:[#allocation3 + $0x201] sm:$0xff] }
 0xb3c   :  { %v14765_v25 = vadd.f32 %v7701_v43, %v7502_v55  ;;  %7042 = vmatmul.f32.gmra.mxu3 %v6875_v63  ;;  %v6796_v43 = vadd.f32 %v14287_v53, %v14281_v7 }
 0xb3e   :  { %v7704_v4 = vpop.f32.mrf.mxu2 }
 0xb3f   :  { %v6995_v11 = vpop.f32.mrf.mxu3  ;;  %v7352_v41 = vpop.f32.mrf.mxu1 }
 0xb40   :  { %v7149_v2 = vadd.f32 %v6995_v11, %v6795_v59  ;;  %v14769_v45 = vpop.f32.mrf.mxu0  ;;  %v7231_v59 = vld [vmem:[#allocation3 + $0x202] sm:$0xff] }
 0xb42   :  { %v7503_v28 = vadd.f32 %v7349_v8, %v7149_v2  ;;  %7399 = vmatmul.f32.gmra.mxu1 %v7230_v15  ;;  %8102 = vmatmul.f32.gmra.mxu0 %v6876_v1  ;;  %v7586_v2 = vld [vmem:[#allocation3 + $0x218] sm:$0xff] }
 0xb43   :  { %7754 = vmatmul.f32.gmra.mxu2 %v7585_v58  ;;  %v6878_v58 = vld [vmem:[#allocation3 + $0x211] sm:$0xff] }
 0xb44   :  { %v14771_v46 = vadd.f32 %v7704_v4, %v7503_v28  ;;  %7045 = vmatmul.f32.gmra.mxu3 %v6876_v1  ;;  %v6797_v4 = vadd.f32 %v14291_v35, %v14285_v20 }
 0xb46   :  { %v7707_v55 = vpop.f32.mrf.mxu2 }
 0xb47   :  { %v6998_v56 = vpop.f32.mrf.mxu3  ;;  %v7355_v63 = vpop.f32.mrf.mxu1 }
 0xb48   :  { %v7150_v34 = vadd.f32 %v6998_v56, %v6796_v43  ;;  %v14775_v8 = vpop.f32.mrf.mxu0  ;;  %v7232_v43 = vld [vmem:[#allocation3 + $0x212] sm:$0xff] }
 0xb4a   :  { %v7504_v6 = vadd.f32 %v7352_v41, %v7150_v34  ;;  %7402 = vmatmul.f32.gmra.mxu1 %v7231_v59  ;;  %8105 = vmatmul.f32.gmra.mxu0 %v6877_v14  ;;  %v7587_v34 = vld [vmem:[#allocation3 + $0x228] sm:$0xff] }
 0xb4b   :  { %7757 = vmatmul.f32.gmra.mxu2 %v7586_v2  ;;  %v6879_v2 = vld [vmem:[#allocation3 + $0x219] sm:$0xff] }
 0xb4c   :  { %v14777_v11 = vadd.f32 %v7707_v55, %v7504_v6  ;;  %7048 = vmatmul.f32.gmra.mxu3 %v6877_v14  ;;  %v6798_v55 = vadd.f32 %v14295_v3, %v14289_v48 }
 0xb4e   :  { %v7710_v28 = vpop.f32.mrf.mxu2 }
 0xb4f   :  { %v7001_v7 = vpop.f32.mrf.mxu3  ;;  %v7358_v1 = vpop.f32.mrf.mxu1 }
 0xb50   :  { %v7151_v53 = vadd.f32 %v7001_v7, %v6797_v4  ;;  %v14781_v41 = vpop.f32.mrf.mxu0  ;;  %v7233_v4 = vld [vmem:[#allocation3 + $0x21a] sm:$0xff] }
 0xb52   :  { %v7505_v15 = vadd.f32 %v7355_v63, %v7151_v53  ;;  %7405 = vmatmul.f32.gmra.mxu1 %v7232_v43  ;;  %8108 = vmatmul.f32.gmra.mxu0 %v6878_v58  ;;  %v7588_v53 = vld [vmem:[#allocation3 + $0x230] sm:$0xff] }
 0xb53   :  { %7760 = vmatmul.f32.gmra.mxu2 %v7587_v34  ;;  %v6880_v34 = vld [vmem:[#allocation3 + $0x229] sm:$0xff] }
 0xb54   :  { %v14783_v56 = vadd.f32 %v7710_v28, %v7505_v15  ;;  %7051 = vmatmul.f32.gmra.mxu3 %v6878_v58  ;;  %v6799_v28 = vadd.f32 %v14299_v31, %v14293_v40 }
 0xb56   :  { %v7713_v6 = vpop.f32.mrf.mxu2 }
 0xb57   :  { %v7004_v20 = vpop.f32.mrf.mxu3  ;;  %v7361_v14 = vpop.f32.mrf.mxu1 }
 0xb58   :  { %v7152_v35 = vadd.f32 %v7004_v20, %v6798_v55  ;;  %v14787_v63 = vpop.f32.mrf.mxu0  ;;  %v7234_v55 = vld [vmem:[#allocation3 + $0x22a] sm:$0xff] }
 0xb5a   :  { %v7506_v59 = vadd.f32 %v7358_v1, %v7152_v35  ;;  %7408 = vmatmul.f32.gmra.mxu1 %v7233_v4  ;;  %8111 = vmatmul.f32.gmra.mxu0 %v6879_v2  ;;  %v7589_v35 = vld [vmem:[#allocation3 + $0x240] sm:$0xff] }
 0xb5b   :  { %7763 = vmatmul.f32.gmra.mxu2 %v7588_v53 }
 0xb5c   :  { %v14789_v7 = vadd.f32 %v7713_v6, %v7506_v59  ;;  %7054 = vmatmul.f32.gmra.mxu3 %v6879_v2  ;;  %v17054_v6 = vld [vmem:[#allocation108_spill] sm:$0xff]  ;;  %v17055_v59 = vld [vmem:[#allocation106_spill] sm:$0xff] }
 0xb5d   :  { %v6800_v2 = vadd.f32 %v17055_v59, %v17054_v6 }
 0xb5e   :  { %17051 = vst [vmem:[#allocation124_spill] sm:$0xff] %v14789_v7  ;;  %v7716_v15 = vpop.f32.mrf.mxu2 }
 0xb5f   :  { %v7007_v48 = vpop.f32.mrf.mxu3  ;;  %v7364_v58 = vpop.f32.mrf.mxu1 }
 0xb60   :  { %v7153_v3 = vadd.f32 %v7007_v48, %v6799_v28  ;;  %v14793_v1 = vpop.f32.mrf.mxu0  ;;  %v6881_v48 = vld [vmem:[#allocation3 + $0x231] sm:$0xff] }
 0xb61   :  { %17052 = vst [vmem:[#allocation182_spill] sm:$0xff] %v14793_v1 }
 0xb62   :  { %v7507_v43 = vadd.f32 %v7361_v14, %v7153_v3  ;;  %7411 = vmatmul.f32.gmra.mxu1 %v7234_v55  ;;  %8114 = vmatmul.f32.gmra.mxu0 %v6880_v34  ;;  %v7235_v3 = vld [vmem:[#allocation3 + $0x232] sm:$0xff] }
 0xb63   :  { %7766 = vmatmul.f32.gmra.mxu2 %v7589_v35 }
 0xb64   :  { %v14795_v20 = vadd.f32 %v7716_v15, %v7507_v43  ;;  %7057 = vmatmul.f32.gmra.mxu3 %v6880_v34  ;;  %v7590_v15 = vld [vmem:[#allocation3 + $0x248] sm:$0xff]  ;;  %v17059_v34 = vld [vmem:[#allocation102_spill] sm:$0xff] }
 0xb65   :  { %v17058_v43 = vld [vmem:[#allocation105_spill] sm:$0xff] }
 0xb66   :  { %17053 = vst [vmem:[#allocation190_spill] sm:$0xff] %v14795_v20  ;;  %v7719_v4 = vpop.f32.mrf.mxu2  ;;  %v6801_v55 = vadd.f32 %v17059_v34, %v17058_v43 }
 0xb67   :  { %v7010_v40 = vpop.f32.mrf.mxu3  ;;  %v7367_v53 = vpop.f32.mrf.mxu1 }
 0xb68   :  { %v7154_v31 = vadd.f32 %v7010_v40, %v6800_v2  ;;  %v14799_v14 = vpop.f32.mrf.mxu0 }
 0xb69   :  { %17056 = vst [vmem:[#allocation72_spill] sm:$0xff] %v14799_v14  ;;  %v7236_v14 = vld [vmem:[#allocation3 + $0x242] sm:$0xff] }
 0xb6a   :  { %v7508_v28 = vadd.f32 %v7364_v58, %v7154_v31  ;;  %7414 = vmatmul.f32.gmra.mxu1 %v7235_v3  ;;  %8117 = vmatmul.f32.gmra.mxu0 %v6881_v48  ;;  %v6882_v31 = vld [vmem:[#allocation3 + $0x241] sm:$0xff] }
 0xb6b   :  { %7769 = vmatmul.f32.gmra.mxu2 %v7590_v15 }
 0xb6c   :  { %v14801_v1 = vadd.f32 %v7719_v4, %v7508_v28  ;;  %7060 = vmatmul.f32.gmra.mxu3 %v6881_v48  ;;  %v7591_v4 = vld [vmem:[#allocation3 + $0x258] sm:$0xff]  ;;  %v17063_v48 = vld [vmem:[#allocation152_spill] sm:$0xff] }
 0xb6d   :  { %v17062_v28 = vld [vmem:[#allocation155_spill] sm:$0xff] }
 0xb6e   :  { %17057 = vst [vmem:[#allocation25_spill] sm:$0xff] %v14801_v1  ;;  %v7722_v59 = vpop.f32.mrf.mxu2  ;;  %v6802_v3 = vadd.f32 %v17063_v48, %v17062_v28 }
 0xb6f   :  { %v7013_v35 = vpop.f32.mrf.mxu3  ;;  %v7370_v2 = vpop.f32.mrf.mxu1 }
 0xb70   :  { %v7155_v6 = vadd.f32 %v7013_v35, %v6801_v55  ;;  %v14805_v58 = vpop.f32.mrf.mxu0 }
 0xb71   :  { %17060 = vst [vmem:[#allocation122_spill] sm:$0xff] %v14805_v58  ;;  %v7237_v58 = vld [vmem:[#allocation3 + $0x24a] sm:$0xff] }
 0xb72   :  { %v7509_v40 = vadd.f32 %v7367_v53, %v7155_v6  ;;  %7417 = vmatmul.f32.gmra.mxu1 %v7236_v14  ;;  %8120 = vmatmul.f32.gmra.mxu0 %v6882_v31  ;;  %v6883_v6 = vld [vmem:[#allocation3 + $0x249] sm:$0xff]  ;;  %v7592_v14 = vld [vmem:[#allocation3 + $0x260] sm:$0xff] }
 0xb73   :  { %7772 = vmatmul.f32.gmra.mxu2 %v7591_v4 }
 0xb74   :  { %v14807_v20 = vadd.f32 %v7722_v59, %v7509_v40  ;;  %7063 = vmatmul.f32.gmra.mxu3 %v6882_v31  ;;  %v17066_v59 = vld [vmem:[#allocation103_spill] sm:$0xff]  ;;  %v17067_v40 = vld [vmem:[#allocation100_spill] sm:$0xff] }
 0xb75   :  { %v6803_v31 = vadd.f32 %v17067_v40, %v17066_v59 }
 0xb76   :  { %17061 = vst [vmem:[#allocation179_spill] sm:$0xff] %v14807_v20  ;;  %v7725_v34 = vpop.f32.mrf.mxu2 }
 0xb77   :  { %v7016_v15 = vpop.f32.mrf.mxu3  ;;  %v7373_v55 = vpop.f32.mrf.mxu1 }
 0xb78   :  { %v7156_v43 = vadd.f32 %v7016_v15, %v6802_v3  ;;  %v14811_v53 = vpop.f32.mrf.mxu0 }
 0xb79   :  { %17064 = vst [vmem:[#allocation187_spill] sm:$0xff] %v14811_v53  ;;  %v7238_v53 = vld [vmem:[#allocation3 + $0x25a] sm:$0xff] }
 0xb7a   :  { %v7510_v35 = vadd.f32 %v7370_v2, %v7156_v43  ;;  %7420 = vmatmul.f32.gmra.mxu1 %v7237_v58  ;;  %8123 = vmatmul.f32.gmra.mxu0 %v6883_v6  ;;  %v6884_v43 = vld [vmem:[#allocation3 + $0x259] sm:$0xff]  ;;  %v7593_v58 = vld [vmem:[#allocation3 + $0x270] sm:$0xff] }
 0xb7b   :  { %7775 = vmatmul.f32.gmra.mxu2 %v7592_v14 }
 0xb7c   :  { %v14813_v1 = vadd.f32 %v7725_v34, %v7510_v35  ;;  %7066 = vmatmul.f32.gmra.mxu3 %v6883_v6  ;;  %v17070_v34 = vld [vmem:[#allocation99_spill] sm:$0xff]  ;;  %v17071_v35 = vld [vmem:[#allocation154_spill] sm:$0xff] }
 0xb7d   :  { %v6804_v6 = vadd.f32 %v17071_v35, %v17070_v34 }
 0xb7e   :  { %17065 = vst [vmem:[#allocation20_spill] sm:$0xff] %v14813_v1  ;;  %v7728_v48 = vpop.f32.mrf.mxu2 }
 0xb7f   :  { %v7019_v4 = vpop.f32.mrf.mxu3  ;;  %v7376_v3 = vpop.f32.mrf.mxu1 }
 0xb80   :  { %v7157_v28 = vadd.f32 %v7019_v4, %v6803_v31  ;;  %v14817_v2 = vpop.f32.mrf.mxu0 }
 0xb81   :  { %17068 = vst [vmem:[#allocation22_spill] sm:$0xff] %v14817_v2  ;;  %v7239_v2 = vld [vmem:[#allocation3 + $0x262] sm:$0xff] }
 0xb82   :  { %v7511_v15 = vadd.f32 %v7373_v55, %v7157_v28  ;;  %7423 = vmatmul.f32.gmra.mxu1 %v7238_v53  ;;  %8126 = vmatmul.f32.gmra.mxu0 %v6884_v43  ;;  %v6885_v28 = vld [vmem:[#allocation3 + $0x261] sm:$0xff]  ;;  %v7594_v53 = vld [vmem:[#allocation3 + $0x278] sm:$0xff] }
 0xb83   :  { %7778 = vmatmul.f32.gmra.mxu2 %v7593_v58 }
 0xb84   :  { %v14819_v20 = vadd.f32 %v7728_v48, %v7511_v15  ;;  %7069 = vmatmul.f32.gmra.mxu3 %v6884_v43  ;;  %v17074_v48 = vld [vmem:[#allocation149_spill] sm:$0xff] }
 0xb85   :  { %v17075_v15 = vld [vmem:[#allocation97_spill] sm:$0xff] }
 0xb86   :  { %17069 = vst [vmem:[#allocation120_spill] sm:$0xff] %v14819_v20  ;;  %v7731_v40 = vpop.f32.mrf.mxu2  ;;  %v6805_v43 = vadd.f32 %v17075_v15, %v17074_v48 }
 0xb87   :  { %v7022_v14 = vpop.f32.mrf.mxu3  ;;  %v7379_v31 = vpop.f32.mrf.mxu1 }
 0xb88   :  { %v7158_v59 = vadd.f32 %v7022_v14, %v6804_v6  ;;  %v14823_v55 = vpop.f32.mrf.mxu0 }
 0xb89   :  { %17072 = vst [vmem:[#allocation176_spill] sm:$0xff] %v14823_v55  ;;  %v7240_v55 = vld [vmem:[#allocation3 + $0x272] sm:$0xff] }
 0xb8a   :  { %v7512_v4 = vadd.f32 %v7376_v3, %v7158_v59  ;;  %7426 = vmatmul.f32.gmra.mxu1 %v7239_v2  ;;  %8129 = vmatmul.f32.gmra.mxu0 %v6885_v28  ;;  %v6886_v59 = vld [vmem:[#allocation3 + $0x271] sm:$0xff]  ;;  %v7595_v2 = vld [vmem:[#allocation3 + $0x288] sm:$0xff] }
 0xb8b   :  { %7781 = vmatmul.f32.gmra.mxu2 %v7594_v53 }
 0xb8c   :  { %v14825_v1 = vadd.f32 %v7731_v40, %v7512_v4  ;;  %7072 = vmatmul.f32.gmra.mxu3 %v6885_v28  ;;  %v17078_v40 = vld [vmem:[#allocation96_spill] sm:$0xff]  ;;  %v17079_v4 = vld [vmem:[#allocation150_spill] sm:$0xff] }
 0xb8d   :  { %v6806_v28 = vadd.f32 %v17079_v4, %v17078_v40 }
 0xb8e   :  { %17073 = vst [vmem:[#allocation184_spill] sm:$0xff] %v14825_v1  ;;  %v7734_v35 = vpop.f32.mrf.mxu2 }
 0xb8f   :  { %v7025_v58 = vpop.f32.mrf.mxu3  ;;  %v7382_v6 = vpop.f32.mrf.mxu1 }
 0xb90   :  { %v7159_v34 = vadd.f32 %v7025_v58, %v6805_v43  ;;  %v14829_v3 = vpop.f32.mrf.mxu0 }
 0xb91   :  { %17076 = vst [vmem:[#allocation71_spill] sm:$0xff] %v14829_v3  ;;  %v7241_v3 = vld [vmem:[#allocation3 + $0x27a] sm:$0xff] }
 0xb92   :  { %v7513_v14 = vadd.f32 %v7379_v31, %v7159_v34  ;;  %7429 = vmatmul.f32.gmra.mxu1 %v7240_v55  ;;  %8132 = vmatmul.f32.gmra.mxu0 %v6886_v59  ;;  %v6887_v34 = vld [vmem:[#allocation3 + $0x279] sm:$0xff]  ;;  %v7596_v55 = vld [vmem:[#allocation3 + $0x290] sm:$0xff] }
 0xb93   :  { %7784 = vmatmul.f32.gmra.mxu2 %v7595_v2 }
 0xb94   :  { %v14831_v20 = vadd.f32 %v7734_v35, %v7513_v14  ;;  %7075 = vmatmul.f32.gmra.mxu3 %v6886_v59  ;;  %v17082_v35 = vld [vmem:[#allocation145_spill] sm:$0xff] }
 0xb95   :  { %v17083_v14 = vld [vmem:[#allocation93_spill] sm:$0xff] }
 0xb96   :  { %17077 = vst [vmem:[#allocation19_spill] sm:$0xff] %v14831_v20  ;;  %v7737_v15 = vpop.f32.mrf.mxu2  ;;  %v6807_v59 = vadd.f32 %v17083_v14, %v17082_v35 }
 0xb97   :  { %v7028_v53 = vpop.f32.mrf.mxu3  ;;  %v7385_v43 = vpop.f32.mrf.mxu1 }
 0xb98   :  { %v7160_v48 = vadd.f32 %v7028_v53, %v6806_v28  ;;  %v14835_v31 = vpop.f32.mrf.mxu0 }
 0xb99   :  { %17080 = vst [vmem:[#allocation118_spill] sm:$0xff] %v14835_v31  ;;  %v7242_v31 = vld [vmem:[#allocation3 + $0x28a] sm:$0xff] }
 0xb9a   :  { %v7514_v58 = vadd.f32 %v7382_v6, %v7160_v48  ;;  %7432 = vmatmul.f32.gmra.mxu1 %v7241_v3  ;;  %8135 = vmatmul.f32.gmra.mxu0 %v6887_v34  ;;  %v6888_v48 = vld [vmem:[#allocation3 + $0x289] sm:$0xff]  ;;  %v7597_v3 = vld [vmem:[#allocation3 + $0x2a0] sm:$0xff] }
 0xb9b   :  { %7787 = vmatmul.f32.gmra.mxu2 %v7596_v55 }
 0xb9c   :  { %v14837_v1 = vadd.f32 %v7737_v15, %v7514_v58  ;;  %7078 = vmatmul.f32.gmra.mxu3 %v6887_v34  ;;  %v17086_v15 = vld [vmem:[#allocation9_spill] sm:$0xff]  ;;  %v17087_v58 = vld [vmem:[#allocation142_spill] sm:$0xff] }
 0xb9d   :  { %v6808_v34 = vadd.f32 %v17087_v58, %v17086_v15 }
 0xb9e   :  { %17081 = vst [vmem:[#allocation173_spill] sm:$0xff] %v14837_v1  ;;  %v7740_v4 = vpop.f32.mrf.mxu2 }
 0xb9f   :  { %v7031_v2 = vpop.f32.mrf.mxu3  ;;  %v7388_v28 = vpop.f32.mrf.mxu1 }
 0xba0   :  { %v7161_v40 = vadd.f32 %v7031_v2, %v6807_v59  ;;  %v14841_v6 = vpop.f32.mrf.mxu0 }
 0xba1   :  { %17084 = vst [vmem:[#allocation181_spill] sm:$0xff] %v14841_v6  ;;  %v7243_v6 = vld [vmem:[#allocation3 + $0x292] sm:$0xff] }
 0xba2   :  { %v7515_v53 = vadd.f32 %v7385_v43, %v7161_v40  ;;  %7435 = vmatmul.f32.gmra.mxu1 %v7242_v31  ;;  %8138 = vmatmul.f32.gmra.mxu0 %v6888_v48  ;;  %v6889_v40 = vld [vmem:[#allocation3 + $0x291] sm:$0xff]  ;;  %v7598_v31 = vld [vmem:[#allocation3 + $0x2a8] sm:$0xff] }
 0xba3   :  { %7790 = vmatmul.f32.gmra.mxu2 %v7597_v3 }
 0xba4   :  { %v14843_v20 = vadd.f32 %v7740_v4, %v7515_v53  ;;  %7081 = vmatmul.f32.gmra.mxu3 %v6888_v48  ;;  %v17090_v4 = vld [vmem:[#allocation94_spill] sm:$0xff]  ;;  %v17091_v53 = vld [vmem:[#allocation8_spill] sm:$0xff] }
 0xba5   :  { %v6809_v48 = vadd.f32 %v17091_v53, %v17090_v4 }
 0xba6   :  { %17085 = vst [vmem:[#allocation18_spill] sm:$0xff] %v14843_v20  ;;  %v7743_v14 = vpop.f32.mrf.mxu2 }
 0xba7   :  { %v7034_v55 = vpop.f32.mrf.mxu3  ;;  %v7391_v59 = vpop.f32.mrf.mxu1 }
 0xba8   :  { %v7162_v35 = vadd.f32 %v7034_v55, %v6808_v34  ;;  %v14847_v43 = vpop.f32.mrf.mxu0 }
 0xba9   :  { %17088 = vst [vmem:[#allocation16_spill] sm:$0xff] %v14847_v43  ;;  %v7244_v43 = vld [vmem:[#allocation3 + $0x2a2] sm:$0xff] }
 0xbaa   :  { %v7516_v2 = vadd.f32 %v7388_v28, %v7162_v35  ;;  %7438 = vmatmul.f32.gmra.mxu1 %v7243_v6  ;;  %8141 = vmatmul.f32.gmra.mxu0 %v6889_v40  ;;  %v6890_v35 = vld [vmem:[#allocation3 + $0x2a1] sm:$0xff]  ;;  %v7599_v6 = vld [vmem:[#allocation3 + $0x2b8] sm:$0xff] }
 0xbab   :  { %7793 = vmatmul.f32.gmra.mxu2 %v7598_v31 }
 0xbac   :  { %v14849_v1 = vadd.f32 %v7743_v14, %v7516_v2  ;;  %7084 = vmatmul.f32.gmra.mxu3 %v6889_v40  ;;  %v17094_v14 = vld [vmem:[#allocation146_spill] sm:$0xff]  ;;  %v17095_v2 = vld [vmem:[#allocation91_spill] sm:$0xff] }
 0xbad   :  { %v6810_v40 = vadd.f32 %v17095_v2, %v17094_v14 }
 0xbae   :  { %17089 = vst [vmem:[#allocation116_spill] sm:$0xff] %v14849_v1  ;;  %v7746_v58 = vpop.f32.mrf.mxu2 }
 0xbaf   :  { %v7037_v3 = vpop.f32.mrf.mxu3  ;;  %v7394_v34 = vpop.f32.mrf.mxu1 }
 0xbb0   :  { %v7163_v15 = vadd.f32 %v7037_v3, %v6809_v48  ;;  %v14853_v28 = vpop.f32.mrf.mxu0 }
 0xbb1   :  { %17092 = vst [vmem:[#allocation169_spill] sm:$0xff] %v14853_v28  ;;  %v7245_v28 = vld [vmem:[#allocation3 + $0x2aa] sm:$0xff] }
 0xbb2   :  { %v7517_v55 = vadd.f32 %v7391_v59, %v7163_v15  ;;  %7441 = vmatmul.f32.gmra.mxu1 %v7244_v43  ;;  %8144 = vmatmul.f32.gmra.mxu0 %v6890_v35  ;;  %v6891_v15 = vld [vmem:[#allocation3 + $0x2a9] sm:$0xff]  ;;  %v7600_v43 = vld [vmem:[#allocation3 + $0x2c0] sm:$0xff] }
 0xbb3   :  { %7796 = vmatmul.f32.gmra.mxu2 %v7599_v6 }
 0xbb4   :  { %v14855_v20 = vadd.f32 %v7746_v58, %v7517_v55  ;;  %7087 = vmatmul.f32.gmra.mxu3 %v6890_v35  ;;  %v17098_v58 = vld [vmem:[#allocation90_spill] sm:$0xff]  ;;  %v17099_v55 = vld [vmem:[#allocation141_spill] sm:$0xff] }
 0xbb5   :  { %v6811_v35 = vadd.f32 %v17099_v55, %v17098_v58 }
 0xbb6   :  { %17093 = vst [vmem:[#allocation177_spill] sm:$0xff] %v14855_v20  ;;  %v7749_v53 = vpop.f32.mrf.mxu2 }
 0xbb7   :  { %v7040_v31 = vpop.f32.mrf.mxu3  ;;  %v7397_v48 = vpop.f32.mrf.mxu1 }
 0xbb8   :  { %v7164_v4 = vadd.f32 %v7040_v31, %v6810_v40  ;;  %v14859_v59 = vpop.f32.mrf.mxu0 }
 0xbb9   :  { %17096 = vst [vmem:[#allocation17_spill] sm:$0xff] %v14859_v59  ;;  %v7246_v59 = vld [vmem:[#allocation3 + $0x2ba] sm:$0xff] }
 0xbba   :  { %v7518_v3 = vadd.f32 %v7394_v34, %v7164_v4  ;;  %7444 = vmatmul.f32.gmra.mxu1 %v7245_v28  ;;  %8147 = vmatmul.f32.gmra.mxu0 %v6891_v15  ;;  %v6892_v4 = vld [vmem:[#allocation3 + $0x2b9] sm:$0xff]  ;;  %v7601_v28 = vld [vmem:[#allocation3 + $0x2d0] sm:$0xff] }
 0xbbb   :  { %7799 = vmatmul.f32.gmra.mxu2 %v7600_v43 }
 0xbbc   :  { %v14861_v1 = vadd.f32 %v7749_v53, %v7518_v3  ;;  %7090 = vmatmul.f32.gmra.mxu3 %v6891_v15  ;;  %v17102_v53 = vld [vmem:[#allocation139_spill] sm:$0xff] }
 0xbbd   :  { %v17103_v3 = vld [vmem:[#allocation87_spill] sm:$0xff] }
 0xbbe   :  { %17097 = vst [vmem:[#allocation13_spill] sm:$0xff] %v14861_v1  ;;  %v7752_v2 = vpop.f32.mrf.mxu2  ;;  %v6812_v15 = vadd.f32 %v17103_v3, %v17102_v53 }
 0xbbf   :  { %v7043_v6 = vpop.f32.mrf.mxu3  ;;  %v7400_v40 = vpop.f32.mrf.mxu1 }
 0xbc0   :  { %v7165_v14 = vadd.f32 %v7043_v6, %v6811_v35  ;;  %v14865_v34 = vpop.f32.mrf.mxu0 }
 0xbc1   :  { %17100 = vst [vmem:[#allocation114_spill] sm:$0xff] %v14865_v34  ;;  %v7247_v34 = vld [vmem:[#allocation3 + $0x2c2] sm:$0xff] }
 0xbc2   :  { %v7519_v31 = vadd.f32 %v7397_v48, %v7165_v14  ;;  %7447 = vmatmul.f32.gmra.mxu1 %v7246_v59  ;;  %8150 = vmatmul.f32.gmra.mxu0 %v6892_v4  ;;  %v6893_v14 = vld [vmem:[#allocation3 + $0x2c1] sm:$0xff]  ;;  %v7602_v59 = vld [vmem:[#allocation3 + $0x2d8] sm:$0xff] }
 0xbc3   :  { %7802 = vmatmul.f32.gmra.mxu2 %v7601_v28 }
 0xbc4   :  { %v14867_v20 = vadd.f32 %v7752_v2, %v7519_v31  ;;  %7093 = vmatmul.f32.gmra.mxu3 %v6892_v4  ;;  %v9970_v2 = vld [vmem:[%s16032_s2 + $0x478] sm:$0xff]  ;;  %v17107_v4 = vld [vmem:[#allocation136_spill] sm:$0xff] }
 0xbc5   :  { %v17106_v31 = vld [vmem:[#allocation59_spill] sm:$0xff]  ;;  %8338 = vmatpush.msra.mxu3 %v9970_v2 }
 0xbc6   :  { %17101 = vst [vmem:[#allocation166_spill] sm:$0xff] %v14867_v20  ;;  %v7755_v55 = vpop.f32.mrf.mxu2  ;;  %v6813_v28 = vadd.f32 %v17107_v4, %v17106_v31 }
 0xbc7   :  { %v7046_v43 = vpop.f32.mrf.mxu3  ;;  %v7403_v35 = vpop.f32.mrf.mxu1 }
 0xbc8   :  { %v7166_v58 = vadd.f32 %v7046_v43, %v6812_v15  ;;  %v14871_v48 = vpop.f32.mrf.mxu0 }
 0xbc9   :  { %17104 = vst [vmem:[#allocation174_spill] sm:$0xff] %v14871_v48 }
 0xbca   :  { %v7520_v6 = vadd.f32 %v7400_v40, %v7166_v58  ;;  %7450 = vmatmul.f32.gmra.mxu1 %v7247_v34  ;;  %8153 = vmatmul.f32.gmra.mxu0 %v6893_v14  ;;  %v7248_v34 = vld [vmem:[#allocation3 + $0x2d2] sm:$0xff] }
 0xbcb   :  { %7805 = vmatmul.f32.gmra.mxu2 %v7602_v59  ;;  %v17110_v59 = vld [vmem:[#allocation88_spill] sm:$0xff] }
 0xbcc   :  { %v14873_v1 = vadd.f32 %v7755_v55, %v7520_v6  ;;  %7096 = vmatmul.f32.gmra.mxu3 %v6893_v14  ;;  %v6894_v55 = vld [vmem:[#allocation3 + $0x2d1] sm:$0xff]  ;;  %v7603_v14 = vld [vmem:[#allocation3 + $0x2e8] sm:$0xff] }
 0xbce   :  { %17105 = vst [vmem:[#allocation68_spill] sm:$0xff] %v14873_v1  ;;  %v7758_v3 = vpop.f32.mrf.mxu2  ;;  %v17111_v1 = vld [vmem:[#allocation6_spill] sm:$0xff] }
 0xbcf   :  { %v7049_v40 = vpop.f32.mrf.mxu3  ;;  %v7406_v15 = vpop.f32.mrf.mxu1  ;;  %v6814_v31 = vadd.f32 %v17111_v1, %v17110_v59 }
 0xbd0   :  { %v7167_v53 = vadd.f32 %v7049_v40, %v6813_v28  ;;  %v14880_v58 = vpop.f32.mrf.mxu0 }
 0xbd1   :  { %17108 = vst [vmem:[#allocation10_spill] sm:$0xff] %v14880_v58  ;;  %v7249_v58 = vld [vmem:[#allocation3 + $0x2da] sm:$0xff] }
 0xbd2   :  { %v7521_v43 = vadd.f32 %v7403_v35, %v7167_v53  ;;  %7453 = vmatmul.f32.gmra.mxu1 %v7248_v34  ;;  %8156 = vmatmul.f32.gmra.mxu0 %v6894_v55  ;;  %v6895_v53 = vld [vmem:[#allocation3 + $0x2d9] sm:$0xff] }
 0xbd3   :  { %7808 = vmatmul.f32.gmra.mxu2 %v7603_v14 }
 0xbd4   :  { %v14882_v6 = vadd.f32 %v7758_v3, %v7521_v43  ;;  %7099 = vmatmul.f32.gmra.mxu3 %v6894_v55  ;;  %v7604_v3 = vld [vmem:[#allocation3 + $0x2f0] sm:$0xff] }
 0xbd5   :  { %v17114_v43 = vld [vmem:[#allocation138_spill] sm:$0xff] }
 0xbd6   :  { %17109 = vst [vmem:[#allocation112_spill] sm:$0xff] %v14882_v6  ;;  %v7761_v28 = vpop.f32.mrf.mxu2  ;;  %v17115_v55 = vld [vmem:[#allocation134_spill] sm:$0xff] }
 0xbd7   :  { %v7052_v2 = vpop.f32.mrf.mxu3  ;;  %v7409_v40 = vpop.f32.mrf.mxu1  ;;  %v6815_v34 = vadd.f32 %v17115_v55, %v17114_v43 }
 0xbd8   :  { %v7168_v4 = vadd.f32 %v7052_v2, %v6814_v31  ;;  %v14886_v35 = vpop.f32.mrf.mxu0 }
 0xbd9   :  { %17112 = vst [vmem:[#allocation163_spill] sm:$0xff] %v14886_v35  ;;  %v14894_v35 = vld [vmem:[#allocation3 + $0x2ea] sm:$0xff] }
 0xbda   :  { %v7522_v48 = vadd.f32 %v7406_v15, %v7168_v4  ;;  %7456 = vmatmul.f32.gmra.mxu1 %v7249_v58  ;;  %8159 = vmatmul.f32.gmra.mxu0 %v6895_v53  ;;  %v6896_v4 = vld [vmem:[#allocation3 + $0x2e9] sm:$0xff]  ;;  %17117 = vst [vmem:[#allocation7_spill] sm:$0xff] %v14894_v35  ;;  %v7605_v58 = vld [vmem:[#allocation3 + $0x300] sm:$0xff] }
 0xbdb   :  { %7811 = vmatmul.f32.gmra.mxu2 %v7604_v3 }
 0xbdc   :  { %v14888_v20 = vadd.f32 %v7761_v28, %v7522_v48  ;;  %7102 = vmatmul.f32.gmra.mxu3 %v6895_v53  ;;  %v17119_v28 = vld [vmem:[#allocation133_spill] sm:$0xff]  ;;  %v17120_v53 = vld [vmem:[#allocation130_spill] sm:$0xff] }
 0xbdd   :  { %v6816_v3 = vadd.f32 %v17120_v53, %v17119_v28  ;;  %v17125_v28 = vld [vmem:[#allocation127_spill] sm:$0xff] }
 0xbde   :  { %17113 = vst [vmem:[#allocation171_spill] sm:$0xff] %v14888_v20  ;;  %v7764_v59 = vpop.f32.mrf.mxu2 }
 0xbdf   :  { %v7055_v1 = vpop.f32.mrf.mxu3  ;;  %v7412_v31 = vpop.f32.mrf.mxu1 }
 0xbe0   :  { %v7169_v14 = vadd.f32 %v7055_v1, %v6815_v34  ;;  %v14892_v15 = vpop.f32.mrf.mxu0 }
 0xbe1   :  { %17116 = vst [vmem:[#allocation15_spill] sm:$0xff] %v14892_v15  ;;  %v14905_v15 = vld [vmem:[#allocation3 + $0x2f2] sm:$0xff] }
 0xbe2   :  { %v7523_v2 = vadd.f32 %v7409_v40, %v7169_v14  ;;  %7459 = vmatmul.f32.gmra.mxu1 %v14894_v35  ;;  %8162 = vmatmul.f32.gmra.mxu0 %v6896_v4  ;;  %v6897_v14 = vld [vmem:[#allocation3 + $0x2f1] sm:$0xff]  ;;  %17123 = vst [vmem:[#allocation14_spill] sm:$0xff] %v14905_v15 }
 0xbe3   :  { %7814 = vmatmul.f32.gmra.mxu2 %v7605_v58  ;;  %v17124_v58 = vld [vmem:[#allocation5_spill] sm:$0xff] }
 0xbe4   :  { %v14896_v48 = vadd.f32 %v7764_v59, %v7523_v2  ;;  %7105 = vmatmul.f32.gmra.mxu3 %v6896_v4  ;;  %v7606_v59 = vld [vmem:[#allocation3 + $0x308] sm:$0xff]  ;;  %v9969_v2 = vld [vmem:[%s16032_s2 + $0x470] sm:$0xff]  ;;  %v6817_v53 = vadd.f32 %v17125_v28, %v17124_v58 }
 0xbe5   :  { %v9968_v4 = vld [vmem:[%s16032_s2 + $0x468] sm:$0xff]  ;;  %8339 = vmatpush.msra.mxu3 %v9969_v2 }
 0xbe6   :  { %17118 = vst [vmem:[#allocation110_spill] sm:$0xff] %v14896_v48  ;;  %v7767_v34 = vpop.f32.mrf.mxu2  ;;  %v6898_v58 = vld [vmem:[#allocation3 + $0x301] sm:$0xff] }
 0xbe7   :  { %v7058_v43 = vpop.f32.mrf.mxu3  ;;  %v14901_v40 = vpop.f32.mrf.mxu1  ;;  %8340 = vmatpush.msra.mxu3 %v9968_v4  ;;  %v14927_v2 = vld [vmem:[#allocation3 + $0x302] sm:$0xff] }
 0xbe8   :  { %v7170_v55 = vadd.f32 %v7058_v43, %v6816_v3  ;;  %17121 = vst [vmem:[#allocation160_spill] sm:$0xff] %v14901_v40  ;;  %v14903_v1 = vpop.f32.mrf.mxu0  ;;  %v9967_v40 = vld [vmem:[%s16032_s2 + $0x460] sm:$0xff] }
 0xbe9   :  { %17122 = vst [vmem:[#allocation168_spill] sm:$0xff] %v14903_v1  ;;  %8341 = vmatpush.msra.mxu3 %v9967_v40  ;;  %v17131_v40 = vld [vmem:[#allocation225_spill] sm:$0xff] }
 0xbea   :  { %7462 = vmatmul.f32.gmra.mxu1 %v14905_v15  ;;  %8165 = vmatmul.f32.gmra.mxu0 %v6897_v14  ;;  %v7524_v3 = vadd.f32 %v7412_v31, %v7170_v55  ;;  %17130 = vst [vmem:[#allocation12_spill] sm:$0xff] %v14927_v2  ;;  %v9966_v31 = vld [vmem:[%s16032_s2 + $0x458] sm:$0xff] }
 0xbeb   :  { %7817 = vmatmul.f32.gmra.mxu2 %v7606_v59  ;;  %v7607_v55 = vld [vmem:[#allocation3 + $0x318] sm:$0xff]  ;;  %8342 = vmatpush.msra.mxu3 %v9966_v31  ;;  %v9963_v31 = vld [vmem:[%s16032_s2 + $0x440] sm:$0xff] }
 0xbec   :  { %7108 = vmatmul.f32.gmra.mxu3 %v6897_v14  ;;  %v7879_v14 = vadd.f32 %v7767_v34, %v7524_v3  ;;  %v9965_v34 = vld [vmem:[%s16032_s2 + $0x450] sm:$0xff] }
 0xbed   :  { %8343 = vmatpush.msra.mxu3 %v9965_v34  ;;  %v9962_v34 = vld [vmem:[%s16032_s2 + $0x438] sm:$0xff] }
 0xbee   :  { %v14921_v48 = vpop.f32.mrf.mxu2 }
 0xbef   :  { %v7061_v43 = vpop.f32.mrf.mxu3  ;;  %17127 = vst [vmem:[#allocation164_spill] sm:$0xff] %v14921_v48  ;;  %v14923_v59 = vpop.f32.mrf.mxu1  ;;  %v14949_v48 = vld [vmem:[#allocation3 + $0x30a] sm:$0xff] }
 0xbf0   :  { %v14919_v1 = vadd.f32 %v7061_v43, %v6817_v53  ;;  %17128 = vst [vmem:[#allocation65_spill] sm:$0xff] %v14923_v59  ;;  %v8121_v15 = vpop.f32.mrf.mxu0  ;;  %v9964_v53 = vld [vmem:[%s16032_s2 + $0x448] sm:$0xff]  ;;  %v6900_v59 = vld [vmem:[#allocation3 + $0x319] sm:$0xff] }
 0xbf1   :  { %v14925_v20 = vadd.f32 %v8121_v15, %v7879_v14  ;;  %v17132_v15 = vld [vmem:[#allocation220_spill] sm:$0xff]  ;;  %8344 = vmatpush.msra.mxu3 %v9964_v53  ;;  %17137 = vst [vmem:[#allocation219_spill] sm:$0xff] %v14949_v48 }
 0xbf2   :  { %17126 = vst [vmem:[#allocation158_spill] sm:$0xff] %v14919_v1  ;;  %7465 = vmatmul.f32.gmra.mxu1 %v14927_v2  ;;  %8168 = vmatmul.f32.gmra.mxu0 %v6898_v58  ;;  %v6818_v4 = vadd.f32 %v17132_v15, %v17131_v40  ;;  %v7608_v40 = vld [vmem:[#allocation3 + $0x320] sm:$0xff]  ;;  %v17138_v15 = vld [vmem:[#allocation223_spill] sm:$0xff] }
 0xbf3   :  { %17129 = vst [vmem:[#allocation161_spill] sm:$0xff] %v14925_v20  ;;  %7820 = vmatmul.f32.gmra.mxu2 %v7607_v55  ;;  %v6899_v55 = vld [vmem:[#allocation3 + $0x309] sm:$0xff]  ;;  %8345 = vmatpush.msra.mxu3 %v9963_v31 }
 0xbf4   :  { %7111 = vmatmul.f32.gmra.mxu3 %v6898_v58  ;;  %v9960_v31 = vld [vmem:[%s16032_s2 + $0x428] sm:$0xff] }
 0xbf5   :  { %8346 = vmatpush.msra.mxu3 %v9962_v34  ;;  %v9959_v34 = vld [vmem:[%s16032_s2 + $0x420] sm:$0xff] }
 0xbf6   :  { %v14943_v43 = vpop.f32.mrf.mxu2 }
 0xbf7   :  { %v7064_v28 = vpop.f32.mrf.mxu3  ;;  %17134 = vst [vmem:[#allocation213_spill] sm:$0xff] %v14943_v43  ;;  %v14945_v14 = vpop.f32.mrf.mxu1 }
 0xbf8   :  { %v14941_v3 = vadd.f32 %v7064_v28, %v6818_v4  ;;  %17135 = vst [vmem:[#allocation157_spill] sm:$0xff] %v14945_v14  ;;  %v14947_v58 = vpop.f32.mrf.mxu0  ;;  %v17139_v4 = vld [vmem:[#allocation47_spill] sm:$0xff] }
 0xbf9   :  { %17136 = vst [vmem:[#allocation11_spill] sm:$0xff] %v14947_v58  ;;  %v6819_v28 = vadd.f32 %v17139_v4, %v17138_v15  ;;  %v9961_v58 = vld [vmem:[%s16032_s2 + $0x430] sm:$0xff] }
 0xbfa   :  { %17133 = vst [vmem:[#allocation205_spill] sm:$0xff] %v14941_v3  ;;  %7468 = vmatmul.f32.gmra.mxu1 %v14949_v48  ;;  %8171 = vmatmul.f32.gmra.mxu0 %v6899_v55  ;;  %v14971_v3 = vld [vmem:[#allocation3 + $0x31a] sm:$0xff]  ;;  %v7609_v15 = vld [vmem:[#allocation3 + $0x330] sm:$0xff] }
 0xbfb   :  { %7823 = vmatmul.f32.gmra.mxu2 %v7608_v40  ;;  %8347 = vmatpush.msra.mxu3 %v9961_v58  ;;  %17144 = vst [vmem:[#allocation67_spill] sm:$0xff] %v14971_v3  ;;  %v17145_v4 = vld [vmem:[#allocation162_spill] sm:$0xff] }
 0xbfc   :  { %7114 = vmatmul.f32.gmra.mxu3 %v6899_v55 }
 0xbfd   :  { %8348 = vmatpush.msra.mxu3 %v9960_v31  ;;  %v9957_v31 = vld [vmem:[%s16032_s2 + $0x410] sm:$0xff] }
 0xbfe   :  { %v14965_v1 = vpop.f32.mrf.mxu2 }
 0xbff   :  { %v7067_v53 = vpop.f32.mrf.mxu3  ;;  %17141 = vst [vmem:[#allocation201_spill] sm:$0xff] %v14965_v1  ;;  %v14967_v40 = vpop.f32.mrf.mxu1  ;;  %8349 = vmatpush.msra.mxu3 %v9959_v34  ;;  %v9956_v34 = vld [vmem:[%s16032_s2 + $0x408] sm:$0xff] }
 0xc00   :  { %v14963_v43 = vadd.f32 %v7067_v53, %v6819_v28  ;;  %17142 = vst [vmem:[#allocation128_spill] sm:$0xff] %v14967_v40  ;;  %v14969_v55 = vpop.f32.mrf.mxu0  ;;  %v17146_v28 = vld [vmem:[#allocation45_spill] sm:$0xff] }
 0xc01   :  { %17143 = vst [vmem:[#allocation62_spill] sm:$0xff] %v14969_v55  ;;  %v6820_v58 = vadd.f32 %v17146_v28, %v17145_v4  ;;  %v9958_v55 = vld [vmem:[%s16032_s2 + $0x418] sm:$0xff]  ;;  %v14993_v40 = vld [vmem:[#allocation3 + $0x322] sm:$0xff] }
 0xc02   :  { %17140 = vst [vmem:[#allocation104_spill] sm:$0xff] %v14963_v43  ;;  %7471 = vmatmul.f32.gmra.mxu1 %v14971_v3  ;;  %8174 = vmatmul.f32.gmra.mxu0 %v6900_v59  ;;  %v6901_v43 = vld [vmem:[#allocation3 + $0x321] sm:$0xff]  ;;  %v7610_v4 = vld [vmem:[#allocation3 + $0x338] sm:$0xff] }
 0xc03   :  { %7826 = vmatmul.f32.gmra.mxu2 %v7609_v15  ;;  %8350 = vmatpush.msra.mxu3 %v9958_v55  ;;  %17151 = vst [vmem:[#allocation69_spill] sm:$0xff] %v14993_v40  ;;  %v17152_v28 = vld [vmem:[#allocation64_spill] sm:$0xff] }
 0xc04   :  { %7117 = vmatmul.f32.gmra.mxu3 %v6900_v59 }
 0xc05   :  { %8351 = vmatpush.msra.mxu3 %v9957_v31  ;;  %v17159_v31 = vld [vmem:[#allocation61_spill] sm:$0xff] }
 0xc06   :  { %v14987_v14 = vpop.f32.mrf.mxu2 }
 0xc07   :  { %v7070_v53 = vpop.f32.mrf.mxu3  ;;  %17148 = vst [vmem:[#allocation115_spill] sm:$0xff] %v14987_v14  ;;  %v14989_v15 = vpop.f32.mrf.mxu1  ;;  %8352 = vmatpush.msra.mxu3 %v9956_v34 }
 0xc08   :  { %v14985_v1 = vadd.f32 %v7070_v53, %v6820_v58  ;;  %17149 = vst [vmem:[#allocation209_spill] sm:$0xff] %v14989_v15  ;;  %v14991_v59 = vpop.f32.mrf.mxu0  ;;  %v17153_v58 = vld [vmem:[#allocation79_spill] sm:$0xff] }
 0xc09   :  { %17150 = vst [vmem:[#allocation89_spill] sm:$0xff] %v14991_v59  ;;  %v6821_v55 = vadd.f32 %v17153_v58, %v17152_v28  ;;  %v9955_v59 = vld [vmem:[%s16032_s2 + $0x400] sm:$0xff]  ;;  %v6902_v15 = vld [vmem:[#allocation3 + $0x331] sm:$0xff]  ;;  %v17160_v28 = vld [vmem:[#allocation41_spill] sm:$0xff] }
 0xc0a   :  { %17147 = vst [vmem:[#allocation167_spill] sm:$0xff] %v14985_v1  ;;  %7474 = vmatmul.f32.gmra.mxu1 %v14993_v40  ;;  %8177 = vmatmul.f32.gmra.mxu0 %v6901_v43  ;;  %v15015_v40 = vld [vmem:[#allocation3 + $0x332] sm:$0xff]  ;;  %v6822_v58 = vadd.f32 %v17160_v28, %v17159_v31 }
 0xc0b   :  { %7829 = vmatmul.f32.gmra.mxu2 %v7610_v4  ;;  %8353 = vmatpush.msra.mxu3 %v9955_v59  ;;  %17158 = vst [vmem:[#allocation123_spill] sm:$0xff] %v15015_v40 }
 0xc0c   :  { %7120 = vmatmul.f32.gmra.mxu3 %v6901_v43 }
 0xc0e   :  { %v15009_v1 = vpop.f32.mrf.mxu2 }
 0xc0f   :  { %v7073_v53 = vpop.f32.mrf.mxu3  ;;  %17155 = vst [vmem:[#allocation125_spill] sm:$0xff] %v15009_v1  ;;  %v15011_v4 = vpop.f32.mrf.mxu1 }
 0xc10   :  { %v15007_v14 = vadd.f32 %v7073_v53, %v6821_v55  ;;  %17156 = vst [vmem:[#allocation165_spill] sm:$0xff] %v15011_v4  ;;  %v15013_v43 = vpop.f32.mrf.mxu0 }
 0xc11   :  { %17157 = vst [vmem:[#allocation170_spill] sm:$0xff] %v15013_v43  ;;  %v6903_v43 = vld [vmem:[#allocation3 + $0x339] sm:$0xff] }
 0xc12   :  { %17154 = vst [vmem:[#allocation180_spill] sm:$0xff] %v15007_v14  ;;  %7477 = vmatmul.f32.gmra.mxu1 %v15015_v40  ;;  %8180 = vmatmul.f32.gmra.mxu0 %v6902_v15  ;;  %v15029_v14 = vld [vmem:[#allocation3 + $0x33a] sm:$0xff] }
 0xc13   :  { %7832 = vmatmul.f32.gmra.mxu2 %v14733_v27  ;;  %17165 = vst [vmem:[#allocation191_spill] sm:$0xff] %v15029_v14  ;;  %v9983_v27 = vld [vmem:[#allocation3] sm:$0xff] }
 0xc14   :  { %7123 = vmatmul.f32.gmra.mxu3 %v6902_v15  ;;  %v17166_v15 = vld [vmem:[#allocation156_spill] sm:$0xff] }
 0xc15   :  { %v6823_v31 = vadd.f32 %v14587_v52, %v17166_v15 }
 0xc16   :  { %v15023_v34 = vpop.f32.mrf.mxu2 }
 0xc17   :  { %v7076_v55 = vpop.f32.mrf.mxu3  ;;  %17162 = vst [vmem:[#allocation70_spill] sm:$0xff] %v15023_v34  ;;  %v15025_v1 = vpop.f32.mrf.mxu1 }
 0xc18   :  { %v15021_v53 = vadd.f32 %v7076_v55, %v6822_v58  ;;  %17163 = vst [vmem:[#allocation121_spill] sm:$0xff] %v15025_v1  ;;  %v15027_v59 = vpop.f32.mrf.mxu0  ;;  %v17170_v1 = vld [vmem:[#allocation204_spill] sm:$0xff] }
 0xc19   :  { %17164 = vst [vmem:[#allocation92_spill] sm:$0xff] %v15027_v59  ;;  %v7965_v59 = vld [vmem:[#allocation3 + $0x349] sm:$0xff] }
 0xc1a   :  { %17161 = vst [vmem:[#allocation216_spill] sm:$0xff] %v15021_v53  ;;  %7480 = vmatmul.f32.gmra.mxu1 %v15029_v14  ;;  %8183 = vmatmul.f32.gmra.mxu0 %v6903_v43  ;;  %v8257_v53 = vld [vmem:[#allocation3 + $0x32] sm:$0xff] }
 0xc1b   :  { %7835 = vmatmul.f32.gmra.mxu2 %v9983_v27  ;;  %v17171_v14 = vld [vmem:[#allocation147_spill] sm:$0xff] }
 0xc1c   :  { %7126 = vmatmul.f32.gmra.mxu3 %v6903_v43  ;;  %v6824_v43 = vadd.f32 %v17171_v14, %v17170_v1 }
 0xc1e   :  { %v15036_v55 = vpop.f32.mrf.mxu2 }
 0xc1f   :  { %v7079_v28 = vpop.f32.mrf.mxu3  ;;  %17168 = vst [vmem:[#allocation183_spill] sm:$0xff] %v15036_v55  ;;  %v7436_v34 = vpop.f32.mrf.mxu1 }
 0xc20   :  { %v15034_v58 = vadd.f32 %v7079_v28, %v6823_v31  ;;  %v15038_v4 = vpop.f32.mrf.mxu0  ;;  %v7966_v31 = vld [vmem:[#allocation3 + $0x351] sm:$0xff]  ;;  %v8258_v28 = vld [vmem:[#allocation3 + $0x3a] sm:$0xff] }
 0xc21   :  { %17169 = vst [vmem:[#allocation101_spill] sm:$0xff] %v15038_v4  ;;  %v17173_v4 = vld [vmem:[#allocation52_spill] sm:$0xff] }
 0xc22   :  { %17167 = vst [vmem:[#allocation66_spill] sm:$0xff] %v15034_v58  ;;  %8186 = vmatmul.f32.gmra.mxu0 %v7965_v59  ;;  %v17174_v58 = vld [vmem:[#allocation143_spill] sm:$0xff] }
 0xc23   :  { %v6825_v20 = vadd.f32 %v17174_v58, %v17173_v4 }
 0xc24   :  { %8354 = vmatmul.f32.vlgmr.msra.gmra.mxu3 %v8257_v53 }
 0xc26   :  { %v7791_v3 = vpop.f32.mrf.mxu2 }
 0xc27   :  { %v7082_v40 = vpop.f32.mrf.mxu3  ;;  %v7439_v48 = vpop.f32.mrf.mxu1 }
 0xc28   :  { %v7178_v27 = vadd.f32 %v7082_v40, %v6824_v43  ;;  %v15042_v15 = vpop.f32.mrf.mxu0  ;;  %v8259_v43 = vld [vmem:[#allocation3 + $0x4a] sm:$0xff] }
 0xc29   :  { %17172 = vst [vmem:[#allocation144_spill] sm:$0xff] %v15042_v15  ;;  %v17177_v15 = vld [vmem:[#allocation46_spill] sm:$0xff] }
 0xc2a   :  { %v7532_v52 = vadd.f32 %v7436_v34, %v7178_v27  ;;  %8189 = vmatmul.f32.gmra.mxu0 %v7966_v31  ;;  %v17176_v27 = vld [vmem:[#allocation49_spill] sm:$0xff] }
 0xc2b   :  { %v6826_v6 = vadd.f32 %v17177_v15, %v17176_v27 }
 0xc2c   :  { %v7887_v55 = vadd.f32 %v7791_v3, %v7532_v52  ;;  %8357 = vmatmul.f32.gmra.mxu3 %v8258_v28 }
 0xc2e   :  { %v7794_v2 = vpop.f32.mrf.mxu2 }
 0xc2f   :  { %v7085_v53 = vpop.f32.mrf.mxu3  ;;  %v7442_v35 = vpop.f32.mrf.mxu1 }
 0xc30   :  { %v7179_v59 = vadd.f32 %v7085_v53, %v6825_v20  ;;  %v8145_v14 = vpop.f32.mrf.mxu0  ;;  %v8260_v20 = vld [vmem:[#allocation3 + $0x52] sm:$0xff] }
 0xc31   :  { %v15046_v40 = vadd.f32 %v8145_v14, %v7887_v55  ;;  %v17180_v55 = vld [vmem:[#allocation206_spill] sm:$0xff] }
 0xc32   :  { %v7533_v1 = vadd.f32 %v7439_v48, %v7179_v59  ;;  %v17179_v48 = vld [vmem:[#allocation211_spill] sm:$0xff] }
 0xc33   :  { %17175 = vst [vmem:[#allocation55_spill] sm:$0xff] %v15046_v40  ;;  %v6827_v59 = vadd.f32 %v17180_v55, %v17179_v48 }
 0xc34   :  { %v7888_v34 = vadd.f32 %v7794_v2, %v7533_v1  ;;  %8360 = vmatmul.f32.gmra.mxu3 %v8259_v43 }
 0xc36   :  { %v7797_v31 = vpop.f32.mrf.mxu2 }
 0xc37   :  { %v7088_v3 = vpop.f32.mrf.mxu3  ;;  %v7445_v28 = vpop.f32.mrf.mxu1 }
 0xc38   :  { %v7180_v52 = vadd.f32 %v7088_v3, %v6826_v6  ;;  %v8148_v4 = vpop.f32.mrf.mxu0  ;;  %v8261_v6 = vld [vmem:[#allocation3 + $0x62] sm:$0xff] }
 0xc39   :  { %v15050_v58 = vadd.f32 %v8148_v4, %v7888_v34  ;;  %v17183_v34 = vld [vmem:[#allocation137_spill] sm:$0xff] }
 0xc3a   :  { %v7534_v7 = vadd.f32 %v7442_v35, %v7180_v52  ;;  %v17182_v35 = vld [vmem:[#allocation140_spill] sm:$0xff] }
 0xc3b   :  { %17178 = vst [vmem:[#allocation95_spill] sm:$0xff] %v15050_v58  ;;  %v6828_v52 = vadd.f32 %v17183_v34, %v17182_v35 }
 0xc3c   :  { %v7889_v53 = vadd.f32 %v7797_v31, %v7534_v7  ;;  %8363 = vmatmul.f32.gmra.mxu3 %v8260_v20 }
 0xc3e   :  { %v7800_v1 = vpop.f32.mrf.mxu2 }
 0xc3f   :  { %v7091_v14 = vpop.f32.mrf.mxu3  ;;  %v7448_v43 = vpop.f32.mrf.mxu1 }
 0xc40   :  { %v7181_v2 = vadd.f32 %v7091_v14, %v6827_v59  ;;  %v8151_v15 = vpop.f32.mrf.mxu0  ;;  %v8262_v59 = vld [vmem:[#allocation3 + $0x6a] sm:$0xff] }
 0xc41   :  { %v15054_v27 = vadd.f32 %v8151_v15, %v7889_v53  ;;  %v17186_v53 = vld [vmem:[#allocation215_spill] sm:$0xff] }
 0xc42   :  { %v7535_v40 = vadd.f32 %v7445_v28, %v7181_v2  ;;  %v17185_v28 = vld [vmem:[#allocation43_spill] sm:$0xff] }
 0xc43   :  { %17181 = vst [vmem:[#allocation81_spill] sm:$0xff] %v15054_v27  ;;  %v6829_v2 = vadd.f32 %v17186_v53, %v17185_v28  ;;  %v8264_v53 = vld [vmem:[#allocation3 + $0x82] sm:$0xff] }
 0xc44   :  { %v7890_v3 = vadd.f32 %v7800_v1, %v7535_v40  ;;  %8366 = vmatmul.f32.gmra.mxu3 %v8261_v6 }
 0xc46   :  { %v7803_v31 = vpop.f32.mrf.mxu2 }
 0xc47   :  { %v7094_v4 = vpop.f32.mrf.mxu3  ;;  %v7451_v20 = vpop.f32.mrf.mxu1 }
 0xc48   :  { %v7182_v7 = vadd.f32 %v7094_v4, %v6828_v52  ;;  %v8154_v48 = vpop.f32.mrf.mxu0  ;;  %v8263_v52 = vld [vmem:[#allocation3 + $0x7a] sm:$0xff] }
 0xc49   :  { %v15058_v55 = vadd.f32 %v8154_v48, %v7890_v3  ;;  %v17189_v3 = vld [vmem:[#allocation135_spill] sm:$0xff] }
 0xc4a   :  { %v7536_v58 = vadd.f32 %v7448_v43, %v7182_v7  ;;  %v17188_v43 = vld [vmem:[#allocation202_spill] sm:$0xff] }
 0xc4b   :  { %17184 = vst [vmem:[#allocation56_spill] sm:$0xff] %v15058_v55  ;;  %v6830_v7 = vadd.f32 %v17189_v3, %v17188_v43  ;;  %v8265_v3 = vld [vmem:[#allocation3 + $0x92] sm:$0xff] }
 0xc4c   :  { %v7891_v14 = vadd.f32 %v7803_v31, %v7536_v58  ;;  %8369 = vmatmul.f32.gmra.mxu3 %v8262_v59 }
 0xc4e   :  { %v7806_v1 = vpop.f32.mrf.mxu2 }
 0xc4f   :  { %v7097_v15 = vpop.f32.mrf.mxu3  ;;  %v7454_v35 = vpop.f32.mrf.mxu1 }
 0xc50   :  { %v7183_v40 = vadd.f32 %v7097_v15, %v6829_v2  ;;  %v8157_v27 = vpop.f32.mrf.mxu0  ;;  %v17191_v15 = vld [vmem:[#allocation40_spill] sm:$0xff] }
 0xc51   :  { %v15062_v34 = vadd.f32 %v8157_v27, %v7891_v14  ;;  %v17192_v27 = vld [vmem:[#allocation207_spill] sm:$0xff] }
 0xc52   :  { %v7537_v6 = vadd.f32 %v7451_v20, %v7183_v40  ;;  %v6831_v14 = vadd.f32 %v17192_v27, %v17191_v15  ;;  %v8266_v27 = vld [vmem:[#allocation3 + $0x9a] sm:$0xff] }
 0xc53   :  { %17187 = vst [vmem:[#allocation193_spill] sm:$0xff] %v15062_v34 }
 0xc54   :  { %v7892_v4 = vadd.f32 %v7806_v1, %v7537_v6  ;;  %8372 = vmatmul.f32.gmra.mxu3 %v8263_v52 }
 0xc56   :  { %v7809_v31 = vpop.f32.mrf.mxu2 }
 0xc57   :  { %v7100_v48 = vpop.f32.mrf.mxu3  ;;  %v7457_v20 = vpop.f32.mrf.mxu1 }
 0xc58   :  { %v7184_v58 = vadd.f32 %v7100_v48, %v6830_v7  ;;  %v8160_v55 = vpop.f32.mrf.mxu0 }
 0xc59   :  { %v15066_v28 = vadd.f32 %v8160_v55, %v7892_v4  ;;  %v17194_v55 = vld [vmem:[#allocation37_spill] sm:$0xff] }
 0xc5a   :  { %v7538_v59 = vadd.f32 %v7454_v35, %v7184_v58  ;;  %v17193_v35 = vld [vmem:[#allocation196_spill] sm:$0xff] }
 0xc5b   :  { %17190 = vst [vmem:[#allocation222_spill] sm:$0xff] %v15066_v28  ;;  %v6832_v4 = vadd.f32 %v17194_v55, %v17193_v35  ;;  %v17198_v35 = vld [vmem:[#allocation132_spill] sm:$0xff]  ;;  %v17199_v55 = vld [vmem:[#allocation74_spill] sm:$0xff] }
 0xc5c   :  { %v7893_v2 = vadd.f32 %v7809_v31, %v7538_v59  ;;  %8375 = vmatmul.f32.gmra.mxu3 %v8264_v53 }
 0xc5e   :  { %v7812_v6 = vpop.f32.mrf.mxu2 }
 0xc5f   :  { %v7103_v40 = vpop.f32.mrf.mxu3  ;;  %v7460_v48 = vpop.f32.mrf.mxu1 }
 0xc60   :  { %v7185_v1 = vadd.f32 %v7103_v40, %v6831_v14  ;;  %v8163_v34 = vpop.f32.mrf.mxu0 }
 0xc61   :  { %v15070_v43 = vadd.f32 %v8163_v34, %v7893_v2  ;;  %v17196_v34 = vld [vmem:[#allocation192_spill] sm:$0xff] }
 0xc62   :  { %v7539_v52 = vadd.f32 %v7457_v20, %v7185_v1  ;;  %v17195_v20 = vld [vmem:[#allocation30_spill] sm:$0xff] }
 0xc63   :  { %v6833_v2 = vadd.f32 %v17196_v34, %v17195_v20  ;;  %v8269_v20 = vld [vmem:[#allocation3 + $0xc2] sm:$0xff]  ;;  %v17204_v34 = vld [vmem:[#allocation199_spill] sm:$0xff] }
 0xc64   :  { %v7894_v7 = vadd.f32 %v7812_v6, %v7539_v52  ;;  %8378 = vmatmul.f32.gmra.mxu3 %v8265_v3  ;;  %v8267_v3 = vld [vmem:[#allocation3 + $0xaa] sm:$0xff] }
 0xc66   :  { %v7815_v59 = vpop.f32.mrf.mxu2 }
 0xc67   :  { %v7106_v58 = vpop.f32.mrf.mxu3 }
 0xc68   :  { %v7186_v31 = vadd.f32 %v7106_v58, %v6832_v4  ;;  %v8166_v28 = vpop.f32.mrf.mxu0  ;;  %v6834_v4 = vadd.f32 %v17199_v55, %v17198_v35  ;;  %v17201_v58 = vld [vmem:[#allocation203_spill] sm:$0xff]  ;;  %v17205_v35 = vld [vmem:[#allocation189_spill] sm:$0xff] }
 0xc69   :  { %v15074_v15 = vadd.f32 %v8166_v28, %v7894_v7  ;;  %v8268_v7 = vld [vmem:[#allocation3 + $0xb2] sm:$0xff] }
 0xc6a   :  { %v7540_v53 = vadd.f32 %v7460_v48, %v7186_v31  ;;  %v17202_v31 = vld [vmem:[#allocation129_spill] sm:$0xff]  ;;  %v17206_v55 = vld [vmem:[#allocation31_spill] sm:$0xff] }
 0xc6c   :  { %v7895_v14 = vadd.f32 %v7815_v59, %v7540_v53  ;;  %8381 = vmatmul.f32.gmra.mxu3 %v8266_v27  ;;  %v6835_v59 = vadd.f32 %v17202_v31, %v17201_v58  ;;  %v8271_v58 = vld [vmem:[#allocation3 + $0xda] sm:$0xff]  ;;  %v17207_v31 = vld [vmem:[#allocation26_spill] sm:$0xff] }
 0xc6f   :  { %v7109_v40 = vpop.f32.mrf.mxu3 }
 0xc70   :  { %v15078_v1 = vadd.f32 %v7109_v40, %v6833_v2  ;;  %v8169_v6 = vpop.f32.mrf.mxu0 }
 0xc71   :  { %v15080_v52 = vadd.f32 %v8169_v6, %v7895_v14  ;;  %v17203_v14 = vld [vmem:[#allocation34_spill] sm:$0xff] }
 0xc72   :  { %17197 = vst [vmem:[#allocation153_spill] sm:$0xff] %v15078_v1  ;;  %v6836_v2 = vadd.f32 %v17204_v34, %v17203_v14  ;;  %v8272_v14 = vld [vmem:[#allocation3 + $0xe2] sm:$0xff]  ;;  %v17209_v34 = vld [vmem:[#allocation126_spill] sm:$0xff] }
 0xc74   :  { %8384 = vmatmul.f32.gmra.mxu3 %v8267_v3  ;;  %v8270_v3 = vld [vmem:[#allocation3 + $0xca] sm:$0xff] }
 0xc77   :  { %v7112_v48 = vpop.f32.mrf.mxu3 }
 0xc78   :  { %v15084_v28 = vadd.f32 %v7112_v48, %v6834_v4  ;;  %v6837_v4 = vadd.f32 %v17206_v55, %v17205_v35  ;;  %v8273_v35 = vld [vmem:[#allocation3 + $0xf2] sm:$0xff]  ;;  %v8193_v55 = vadd.f32 %v14657_v17, %v14653_v10  ;;  %v8196_v17 = vadd.f32 %v14675_v36, %v14671_v42  ;;  %v8279_v42 = vld [vmem:[#allocation3 + $0x13a] sm:$0xff] }
 0xc79   :  { %v8276_v10 = vld [vmem:[#allocation3 + $0x112] sm:$0xff]  ;;  %v8199_v36 = vadd.f32 %v14693_v38, %v14689_v60  ;;  %v8282_v60 = vld [vmem:[#allocation3 + $0x15a] sm:$0xff] }
 0xc7a   :  { %17200 = vst [vmem:[#allocation210_spill] sm:$0xff] %v15084_v28 }
 0xc7c   :  { %8387 = vmatmul.f32.gmra.mxu3 %v8268_v7 }
 0xc7f   :  { %v7115_v53 = vpop.f32.mrf.mxu3 }
 0xc80   :  { %v15088_v27 = vadd.f32 %v7115_v53, %v6835_v59  ;;  %v17208_v59 = vld [vmem:[#allocation186_spill] sm:$0xff] }
 0xc81   :  { %v6838_v53 = vadd.f32 %v17208_v59, %v17207_v31  ;;  %v8194_v31 = vadd.f32 %v14663_v12, %v14659_v22  ;;  %v8277_v22 = vld [vmem:[#allocation3 + $0x122] sm:$0xff]  ;;  %v8197_v12 = vadd.f32 %v14681_v19, %v14677_v54  ;;  %v8200_v19 = vadd.f32 %v14699_v0, %v14695_v29 }
 0xc82   :  { %v8280_v54 = vld [vmem:[#allocation3 + $0x142] sm:$0xff] }
 0xc83   :  { %v8285_v0 = vld [vmem:[#allocation3 + $0x182] sm:$0xff] }
 0xc84   :  { %8390 = vmatmul.f32.gmra.mxu3 %v8269_v20 }
 0xc87   :  { %v7118_v40 = vpop.f32.mrf.mxu3 }
 0xc88   :  { %v15092_v6 = vadd.f32 %v7118_v40, %v6836_v2  ;;  %v17210_v2 = vld [vmem:[#allocation195_spill] sm:$0xff] }
 0xc89   :  { %v6839_v40 = vadd.f32 %v17210_v2, %v17209_v34 }
 0xc8c   :  { %8393 = vmatmul.f32.gmra.mxu3 %v8270_v3 }
 0xc8f   :  { %v7121_v48 = vpop.f32.mrf.mxu3 }
 0xc90   :  { %v15096_v7 = vadd.f32 %v7121_v48, %v6837_v4 }
 0xc94   :  { %8396 = vmatmul.f32.gmra.mxu3 %v8271_v58  ;;  %v8274_v58 = vld [vmem:[#allocation3 + $0xfa] sm:$0xff] }
 0xc97   :  { %v7124_v20 = vpop.f32.mrf.mxu3 }
 0xc98   :  { %v15100_v1 = vadd.f32 %v7124_v20, %v6838_v53  ;;  %v8275_v20 = vld [vmem:[#allocation3 + $0x10a] sm:$0xff] }
 0xc9c   :  { %8399 = vmatmul.f32.gmra.mxu3 %v8272_v14  ;;  %v8195_v14 = vadd.f32 %v14669_v26, %v14665_v62  ;;  %v8278_v62 = vld [vmem:[#allocation3 + $0x12a] sm:$0xff]  ;;  %v8198_v26 = vadd.f32 %v14687_v37, %v14683_v23  ;;  %v8281_v23 = vld [vmem:[#allocation3 + $0x152] sm:$0xff]  ;;  %v8201_v37 = vadd.f32 %v14705_v9, %v14701_v44  ;;  %v8288_v9 = vld [vmem:[#allocation3 + $0x1a2] sm:$0xff] }
 0xc9f   :  { %v7127_v3 = vpop.f32.mrf.mxu3 }
 0xca0   :  { %v15104_v28 = vadd.f32 %v7127_v3, %v6839_v40 }
 0xca4   :  { %8402 = vmatmul.f32.gmra.mxu3 %v8273_v35 }
 0xca7   :  { %v8355_v4 = vpop.f32.mrf.mxu3 }
 0xca8   :  { %v15108_v48 = vadd.f32 %v8355_v4, %v8193_v55 }
 0xcaa   :  { %17211 = vst [vmem:[#allocation98_spill] sm:$0xff] %v15108_v48 }
 0xcac   :  { %8405 = vmatmul.f32.gmra.mxu3 %v8274_v58 }
 0xcaf   :  { %v8358_v59 = vpop.f32.mrf.mxu3 }
 0xcb0   :  { %v15112_v53 = vadd.f32 %v8358_v59, %v8194_v31 }
 0xcb2   :  { %17212 = vst [vmem:[#allocation84_spill] sm:$0xff] %v15112_v53 }
 0xcb4   :  { %8408 = vmatmul.f32.gmra.mxu3 %v8275_v20 }
 0xcb7   :  { %v8361_v34 = vpop.f32.mrf.mxu3 }
 0xcb8   :  { %v15116_v2 = vadd.f32 %v8361_v34, %v8195_v14 }
 0xcba   :  { %17213 = vst [vmem:[#allocation50_spill] sm:$0xff] %v15116_v2 }
 0xcbc   :  { %8411 = vmatmul.f32.gmra.mxu3 %v8276_v10 }
 0xcbf   :  { %v8364_v40 = vpop.f32.mrf.mxu3 }
 0xcc0   :  { %v15120_v3 = vadd.f32 %v8364_v40, %v8196_v17  ;;  %v8283_v17 = vld [vmem:[#allocation3 + $0x16a] sm:$0xff] }
 0xcc2   :  { %17214 = vst [vmem:[#allocation172_spill] sm:$0xff] %v15120_v3 }
 0xcc4   :  { %8414 = vmatmul.f32.gmra.mxu3 %v8277_v22  ;;  %v8284_v22 = vld [vmem:[#allocation3 + $0x172] sm:$0xff] }
 0xcc7   :  { %v8367_v35 = vpop.f32.mrf.mxu3 }
 0xcc8   :  { %v15124_v55 = vadd.f32 %v8367_v35, %v8197_v12  ;;  %v8286_v35 = vld [vmem:[#allocation3 + $0x18a] sm:$0xff] }
 0xcca   :  { %17215 = vst [vmem:[#allocation221_spill] sm:$0xff] %v15124_v55 }
 0xccc   :  { %8417 = vmatmul.f32.gmra.mxu3 %v8278_v62 }
 0xccf   :  { %v8370_v4 = vpop.f32.mrf.mxu3 }
 0xcd0   :  { %v15128_v58 = vadd.f32 %v8370_v4, %v8198_v26  ;;  %v8287_v26 = vld [vmem:[#allocation3 + $0x19a] sm:$0xff]  ;;  %v8208_v4 = vadd.f32 %v14751_v16, %v14747_v57  ;;  %v8203_v57 = vadd.f32 %v14717_v32, %v14713_v21  ;;  %v8210_v21 = vadd.f32 %v14763_v51, %v14759_v39  ;;  %v8292_v51 = vld [vmem:[#allocation3 + $0x202] sm:$0xff] }
 0xcd1   :  { %v17222_v16 = vld [vmem:[#allocation24_spill] sm:$0xff] }
 0xcd2   :  { %17216 = vst [vmem:[#allocation51_spill] sm:$0xff] %v15128_v58 }
 0xcd4   :  { %8420 = vmatmul.f32.gmra.mxu3 %v8279_v42 }
 0xcd7   :  { %v8373_v31 = vpop.f32.mrf.mxu3 }
 0xcd8   :  { %v15132_v59 = vadd.f32 %v8373_v31, %v8199_v36  ;;  %v8207_v36 = vadd.f32 %v14745_v49, %v14740_v13  ;;  %v8204_v13 = vadd.f32 %v14723_v18, %v14719_v33  ;;  %v8209_v49 = vadd.f32 %v14757_v5, %v14753_v47  ;;  %v8290_v47 = vld [vmem:[#allocation3 + $0x1ea] sm:$0xff] }
 0xcda   :  { %17217 = vst [vmem:[#allocation175_spill] sm:$0xff] %v15132_v59 }
 0xcdc   :  { %8423 = vmatmul.f32.gmra.mxu3 %v8280_v54  ;;  %v8206_v54 = vadd.f32 %v14738_v24, %v14731_v61 }
 0xcdf   :  { %v8376_v20 = vpop.f32.mrf.mxu3 }
 0xce0   :  { %v15136_v14 = vadd.f32 %v8376_v20, %v8200_v19  ;;  %v8289_v20 = vld [vmem:[#allocation3 + $0x1e2] sm:$0xff] }
 0xce2   :  { %17218 = vst [vmem:[#allocation57_spill] sm:$0xff] %v15136_v14 }
 0xce4   :  { %8426 = vmatmul.f32.gmra.mxu3 %v8281_v23  ;;  %v8205_v23 = vadd.f32 %v14729_v50, %v14725_v30 }
 0xce7   :  { %v8379_v34 = vpop.f32.mrf.mxu3 }
 0xce8   :  { %v15140_v10 = vadd.f32 %v8379_v34, %v8201_v37  ;;  %v17223_v34 = vld [vmem:[#allocation28_spill] sm:$0xff] }
 0xce9   :  { %v8202_v33 = vadd.f32 %v17223_v34, %v17222_v16 }
 0xcea   :  { %17219 = vst [vmem:[#allocation148_spill] sm:$0xff] %v15140_v10 }
 0xcec   :  { %8429 = vmatmul.f32.gmra.mxu3 %v8282_v60 }
 0xcef   :  { %v8382_v38 = vpop.f32.mrf.mxu3 }
 0xcf0   :  { %v15177_v5 = vadd.f32 %v8382_v38, %v8202_v33  ;;  %v8211_v38 = vadd.f32 %v14769_v45, %v14765_v25  ;;  %v17229_v45 = vmov 1.0  }
 0xcf2   :  { %17225 = vst [vmem:[#allocation107_spill] sm:$0xff] %v15177_v5 }
 0xcf4   :  { %8432 = vmatmul.f32.gmra.mxu3 %v8283_v17  ;;  %v8291_v17 = vld [vmem:[#allocation3 + $0x1fa] sm:$0xff] }
 0xcf7   :  { %v8385_v40 = vpop.f32.mrf.mxu3 }
 0xcf8   :  { %v15174_v18 = vadd.f32 %v8385_v40, %v8203_v57  ;;  %v17239_v57 = vld [vmem:[#allocation122_spill] sm:$0xff] }
 0xcfa   :  { %17224 = vst [vmem:[#allocation39_spill] sm:$0xff] %v15174_v18 }
 0xcfc   :  { %8435 = vmatmul.f32.gmra.mxu3 %v8284_v22  ;;  %v8212_v22 = vadd.f32 %v14775_v8, %v14771_v46  ;;  %v8214_v46 = vadd.f32 %v14787_v63, %v14783_v56  ;;  %v8297_v56 = vld [vmem:[#allocation3 + $0x242] sm:$0xff] }
 0xcfd   :  { %v17238_v63 = vld [vmem:[#allocation25_spill] sm:$0xff] }
 0xcfe   :  { %v8217_v16 = vadd.f32 %v17239_v57, %v17238_v63  ;;  %v17247_v63 = vld [vmem:[#allocation184_spill] sm:$0xff]  ;;  %v17248_v57 = vld [vmem:[#allocation71_spill] sm:$0xff] }
 0xcff   :  { %v8388_v29 = vpop.f32.mrf.mxu3 }
 0xd00   :  { %v15167_v30 = vadd.f32 %v8388_v29, %v8204_v13 }
 0xd02   :  { %17220 = vst [vmem:[#allocation178_spill] sm:$0xff] %v15167_v30 }
 0xd04   :  { %8438 = vmatmul.f32.gmra.mxu3 %v8285_v0  ;;  %v8293_v0 = vld [vmem:[#allocation3 + $0x212] sm:$0xff] }
 0xd07   :  { %v8391_v12 = vpop.f32.mrf.mxu3 }
 0xd08   :  { %v15162_v61 = vadd.f32 %v8391_v12, %v8205_v23  ;;  %v8213_v12 = vadd.f32 %v14781_v41, %v14777_v11  ;;  %v8296_v11 = vld [vmem:[#allocation3 + $0x232] sm:$0xff]  ;;  %v17236_v23 = vld [vmem:[#allocation72_spill] sm:$0xff] }
 0xd09   :  { %v17235_v41 = vld [vmem:[#allocation190_spill] sm:$0xff] }
 0xd0a   :  { %v8216_v13 = vadd.f32 %v17236_v23, %v17235_v41  ;;  %v17245_v41 = vld [vmem:[#allocation19_spill] sm:$0xff]  ;;  %v17246_v23 = vld [vmem:[#allocation118_spill] sm:$0xff] }
 0xd0c   :  { %8441 = vmatmul.f32.gmra.mxu3 %v8286_v35 }
 0xd0f   :  { %v8394_v62 = vpop.f32.mrf.mxu3 }
 0xd10   :  { %v15155_v37 = vadd.f32 %v8394_v62, %v8206_v54 }
 0xd14   :  { %8444 = vmatmul.f32.gmra.mxu3 %v8287_v26  ;;  %v8294_v26 = vld [vmem:[#allocation3 + $0x21a] sm:$0xff] }
 0xd17   :  { %v8397_v44 = vpop.f32.mrf.mxu3 }
 0xd18   :  { %v15150_v19 = vadd.f32 %v8397_v44, %v8207_v36 }
 0xd1c   :  { %8447 = vmatmul.f32.gmra.mxu3 %v8288_v9  ;;  %v8295_v9 = vld [vmem:[#allocation3 + $0x22a] sm:$0xff] }
 0xd1f   :  { %v8400_v42 = vpop.f32.mrf.mxu3 }
 0xd20   :  { %v15146_v31 = vadd.f32 %v8400_v42, %v8208_v4  ;;  %v17232_v4 = vld [vmem:[#allocation124_spill] sm:$0xff]  ;;  %v17233_v42 = vld [vmem:[#allocation182_spill] sm:$0xff] }
 0xd21   :  { %v8215_v36 = vadd.f32 %v17233_v42, %v17232_v4  ;;  %v17243_v42 = vld [vmem:[#allocation173_spill] sm:$0xff] }
 0xd22   :  { %8611 = vmatpush.msrb.mxu1 %v15146_v31 }
 0xd24   :  { %8450 = vmatmul.f32.gmra.mxu3 %v8289_v20  ;;  %8612 = vmatpush.msrb.mxu1 %v15150_v19 }
 0xd26   :  { %8613 = vmatpush.msrb.mxu1 %v15155_v37 }
 0xd27   :  { %v8403_v24 = vpop.f32.mrf.mxu3 }
 0xd28   :  { %v15169_v50 = vadd.f32 %v8403_v24, %v8209_v49  ;;  %8614 = vmatpush.msrb.mxu1 %v15162_v61 }
 0xd2a   :  { %17221 = vst [vmem:[#allocation58_spill] sm:$0xff] %v15169_v50  ;;  %8615 = vmatpush.msrb.mxu1 %v15167_v30 }
 0xd2c   :  { %8453 = vmatmul.f32.gmra.mxu3 %v8290_v47  ;;  %8616 = vmatpush.msrb.mxu1 %v15174_v18  ;;  %v8298_v47 = vld [vmem:[#allocation3 + $0x24a] sm:$0xff] }
 0xd2e   :  { %8617 = vmatpush.msrb.mxu1 %v15177_v5 }
 0xd2f   :  { %v8406_v32 = vpop.f32.mrf.mxu3 }
 0xd30   :  { %v15183_v60 = vadd.f32 %v8406_v32, %v8210_v21  ;;  %8618 = vmatpush.msrb.mxu1 %v15140_v10  ;;  %v8299_v32 = vld [vmem:[#allocation3 + $0x25a] sm:$0xff] }
 0xd32   :  { %17226 = vst [vmem:[#allocation218_spill] sm:$0xff] %v15183_v60  ;;  %8619 = vmatpush.msrb.mxu1 %v15136_v14 }
 0xd34   :  { %8456 = vmatmul.f32.gmra.mxu3 %v8291_v17  ;;  %8620 = vmatpush.msrb.mxu1 %v15132_v59 }
 0xd36   :  { %8621 = vmatpush.msrb.mxu1 %v15128_v58 }
 0xd37   :  { %v8409_v40 = vpop.f32.mrf.mxu3 }
 0xd38   :  { %v15191_v39 = vadd.f32 %v8409_v40, %v8211_v38  ;;  %8622 = vmatpush.msrb.mxu1 %v15124_v55  ;;  %v8300_v38 = vld [vmem:[#allocation3 + $0x262] sm:$0xff] }
 0xd3a   :  { %17227 = vst [vmem:[#allocation82_spill] sm:$0xff] %v15191_v39  ;;  %8623 = vmatpush.msrb.mxu1 %v15120_v3 }
 0xd3c   :  { %8459 = vmatmul.f32.gmra.mxu3 %v8292_v51  ;;  %8624 = vmatpush.msrb.mxu1 %v15116_v2  ;;  %v8301_v51 = vld [vmem:[#allocation3 + $0x272] sm:$0xff]  ;;  %v17298_v2 = vld [vmem:[#allocation209_spill] sm:$0xff] }
 0xd3e   :  { %8625 = vmatpush.msrb.mxu1 %v15112_v53  ;;  %v17296_v53 = vld [vmem:[#allocation183_spill] sm:$0xff] }
 0xd3f   :  { %v8412_v29 = vpop.f32.mrf.mxu3 }
 0xd40   :  { %v15199_v25 = vadd.f32 %v8412_v29, %v8212_v22  ;;  %8626 = vmatpush.msrb.mxu1 %v15108_v48  ;;  %v8302_v29 = vld [vmem:[#allocation3 + $0x27a] sm:$0xff] }
 0xd41   :  { %8627 = vmatmul.f32.vlgmr.msrb.gmra.mxu1 %v17229_v45  ;;  %v17294_v48 = vld [vmem:[#allocation216_spill] sm:$0xff] }
 0xd42   :  { %17228 = vst [vmem:[#allocation109_spill] sm:$0xff] %v15199_v25 }
 0xd44   :  { %8462 = vmatmul.f32.gmra.mxu3 %v8293_v0 }
 0xd47   :  { %v8415_v35 = vpop.f32.mrf.mxu3 }
 0xd48   :  { %v15205_v62 = vadd.f32 %v8415_v35, %v8213_v12  ;;  %v8303_v12 = vld [vmem:[#allocation3 + $0x28a] sm:$0xff] }
 0xd4a   :  { %17230 = vst [vmem:[#allocation85_spill] sm:$0xff] %v15205_v62 }
 0xd4c   :  { %8465 = vmatmul.f32.gmra.mxu3 %v8294_v26  ;;  %v8304_v26 = vld [vmem:[#allocation3 + $0x292] sm:$0xff] }
 0xd4f   :  { %v8418_v8 = vpop.f32.mrf.mxu3 }
 0xd50   :  { %v15209_v44 = vadd.f32 %v8418_v8, %v8214_v46  ;;  %v17241_v46 = vld [vmem:[#allocation18_spill] sm:$0xff]  ;;  %v17242_v8 = vld [vmem:[#allocation16_spill] sm:$0xff] }
 0xd52   :  { %17231 = vst [vmem:[#allocation197_spill] sm:$0xff] %v15209_v44 }
 0xd54   :  { %8468 = vmatmul.f32.gmra.mxu3 %v8295_v9  ;;  %v8224_v9 = vadd.f32 %v17242_v8, %v17241_v46  ;;  %v17253_v46 = vld [vmem:[#allocation20_spill] sm:$0xff]  ;;  %v17254_v8 = vld [vmem:[#allocation22_spill] sm:$0xff] }
 0xd57   :  { %v8421_v54 = vpop.f32.mrf.mxu3 }
 0xd58   :  { %v15213_v20 = vadd.f32 %v8421_v54, %v8215_v36  ;;  %v17244_v36 = vld [vmem:[#allocation181_spill] sm:$0xff] }
 0xd59   :  { %v8223_v54 = vadd.f32 %v17244_v36, %v17243_v42  ;;  %v17257_v42 = vld [vmem:[#allocation179_spill] sm:$0xff] }
 0xd5a   :  { %17234 = vst [vmem:[#allocation111_spill] sm:$0xff] %v15213_v20  ;;  %v17258_v36 = vld [vmem:[#allocation187_spill] sm:$0xff] }
 0xd5c   :  { %8471 = vmatmul.f32.gmra.mxu3 %v8296_v11 }
 0xd5f   :  { %v8424_v49 = vpop.f32.mrf.mxu3 }
 0xd60   :  { %v15217_v24 = vadd.f32 %v8424_v49, %v8216_v13  ;;  %v8222_v13 = vadd.f32 %v17246_v23, %v17245_v41 }
 0xd62   :  { %17237 = vst [vmem:[#allocation208_spill] sm:$0xff] %v15217_v24 }
 0xd64   :  { %8474 = vmatmul.f32.gmra.mxu3 %v8297_v56  ;;  %v8305_v56 = vld [vmem:[#allocation3 + $0x2a2] sm:$0xff] }
 0xd67   :  { %v8427_v34 = vpop.f32.mrf.mxu3 }
 0xd68   :  { %v15221_v33 = vadd.f32 %v8427_v34, %v8217_v16  ;;  %v8221_v16 = vadd.f32 %v17248_v57, %v17247_v63 }
 0xd6a   :  { %17240 = vst [vmem:[#allocation214_spill] sm:$0xff] %v15221_v33 }
 0xd6c   :  { %8477 = vmatmul.f32.gmra.mxu3 %v8298_v47  ;;  %v17249_v47 = vld [vmem:[#allocation120_spill] sm:$0xff] }
 0xd6f   :  { %v8430_v21 = vpop.f32.mrf.mxu3 }
 0xd74   :  { %8480 = vmatmul.f32.gmra.mxu3 %v8299_v32  ;;  %v17250_v32 = vld [vmem:[#allocation176_spill] sm:$0xff] }
 0xd77   :  { %v8433_v17 = vpop.f32.mrf.mxu3 }
 0xd7c   :  { %8483 = vmatmul.f32.gmra.mxu3 %v8300_v38  ;;  %v8220_v38 = vadd.f32 %v17250_v32, %v17249_v47 }
 0xd7f   :  { %v8436_v40 = vpop.f32.mrf.mxu3 }
 0xd84   :  { %8486 = vmatmul.f32.gmra.mxu3 %v8301_v51  ;;  %v17251_v51 = vld [vmem:[#allocation116_spill] sm:$0xff] }
 0xd87   :  { %v8439_v22 = vpop.f32.mrf.mxu3 }
 0xd8c   :  { %8489 = vmatmul.f32.gmra.mxu3 %v8302_v29  ;;  %v17252_v29 = vld [vmem:[#allocation169_spill] sm:$0xff] }
 0xd8f   :  { %v8442_v0 = vpop.f32.mrf.mxu3 }
 0xd90   :  { %v15236_v34 = vadd.f32 %v8442_v0, %v8222_v13  ;;  %v17261_v13 = vld [vmem:[#allocation177_spill] sm:$0xff] }
 0xd94   :  { %8492 = vmatmul.f32.gmra.mxu3 %v8303_v12  ;;  %v8225_v12 = vadd.f32 %v17252_v29, %v17251_v51  ;;  %v8308_v51 = vld [vmem:[#allocation3 + $0x2c2] sm:$0xff]  ;;  %v17267_v29 = vld [vmem:[#allocation166_spill] sm:$0xff] }
 0xd97   :  { %v8445_v35 = vpop.f32.mrf.mxu3 }
 0xd98   :  { %v15231_v49 = vadd.f32 %v8445_v35, %v8223_v54  ;;  %v8218_v54 = vadd.f32 %v17258_v36, %v17257_v42  ;;  %v17270_v42 = vld [vmem:[#allocation68_spill] sm:$0xff]  ;;  %v17271_v36 = vld [vmem:[#allocation10_spill] sm:$0xff] }
 0xd9a   :  { %v15258_v23 = vadd.f32 %v8430_v21, %v8218_v54  ;;  %v17264_v21 = vld [vmem:[#allocation13_spill] sm:$0xff]  ;;  %v8229_v54 = vadd.f32 %v17271_v36, %v17270_v42  ;;  %v17282_v42 = vld [vmem:[#allocation168_spill] sm:$0xff] }
 0xd9c   :  { %8495 = vmatmul.f32.gmra.mxu3 %v8304_v26  ;;  %v15243_v26 = vadd.f32 %v8439_v22, %v8221_v16  ;;  %v8306_v22 = vld [vmem:[#allocation3 + $0x2aa] sm:$0xff]  ;;  %17260 = vst [vmem:[#allocation113_spill] sm:$0xff] %v15258_v23 }
 0xd9d   :  { %v17265_v16 = vld [vmem:[#allocation114_spill] sm:$0xff] }
 0xd9e   :  { %v8227_v47 = vadd.f32 %v17265_v16, %v17264_v21 }
 0xd9f   :  { %v8448_v4 = vpop.f32.mrf.mxu3 }
 0xda0   :  { %v15227_v11 = vadd.f32 %v8448_v4, %v8224_v9  ;;  %v8219_v9 = vadd.f32 %v17254_v8, %v17253_v46  ;;  %v15248_v4 = vadd.f32 %v8436_v40, %v8220_v38  ;;  %v17262_v40 = vld [vmem:[#allocation17_spill] sm:$0xff] }
 0xda2   :  { %8631 = vmatpush.msrb.mxu2 %v15227_v11  ;;  %17255 = vst [vmem:[#allocation185_spill] sm:$0xff] %v15248_v4  ;;  %v15255_v41 = vadd.f32 %v8433_v17, %v8219_v9  ;;  %v8307_v17 = vld [vmem:[#allocation3 + $0x2ba] sm:$0xff]  ;;  %v8309_v9 = vld [vmem:[#allocation3 + $0x2d2] sm:$0xff] }
 0xda4   :  { %8498 = vmatmul.f32.gmra.mxu3 %v8305_v56  ;;  %8632 = vmatpush.msrb.mxu2 %v15231_v49  ;;  %17259 = vst [vmem:[#allocation53_spill] sm:$0xff] %v15255_v41  ;;  %v8226_v56 = vadd.f32 %v17262_v40, %v17261_v13  ;;  %v8310_v40 = vld [vmem:[#allocation3 + $0x2da] sm:$0xff] }
 0xda6   :  { %8633 = vmatpush.msrb.mxu2 %v15236_v34 }
 0xda7   :  { %v8451_v35 = vpop.f32.mrf.mxu3 }
 0xda8   :  { %v15250_v0 = vadd.f32 %v8451_v35, %v8225_v12  ;;  %8634 = vmatpush.msrb.mxu2 %v15243_v26  ;;  %v17268_v12 = vld [vmem:[#allocation174_spill] sm:$0xff] }
 0xda9   :  { %v8228_v35 = vadd.f32 %v17268_v12, %v17267_v29 }
 0xdaa   :  { %17256 = vst [vmem:[#allocation224_spill] sm:$0xff] %v15250_v0  ;;  %8635 = vmatpush.msrb.mxu2 %v15248_v4 }
 0xdac   :  { %8501 = vmatmul.f32.gmra.mxu3 %v8306_v22  ;;  %8636 = vmatpush.msrb.mxu2 %v15255_v41 }
 0xdae   :  { %8637 = vmatpush.msrb.mxu2 %v15258_v23 }
 0xdaf   :  { %v8454_v63 = vpop.f32.mrf.mxu3 }
 0xdb0   :  { %v15264_v57 = vadd.f32 %v8454_v63, %v8226_v56  ;;  %8638 = vmatpush.msrb.mxu2 %v15221_v33  ;;  %v17273_v56 = vld [vmem:[#allocation112_spill] sm:$0xff]  ;;  %v17274_v63 = vld [vmem:[#allocation163_spill] sm:$0xff] }
 0xdb2   :  { %17263 = vst [vmem:[#allocation60_spill] sm:$0xff] %v15264_v57  ;;  %8639 = vmatpush.msrb.mxu2 %v15217_v24 }
 0xdb4   :  { %8504 = vmatmul.f32.gmra.mxu3 %v8307_v17  ;;  %8640 = vmatpush.msrb.mxu2 %v15213_v20  ;;  %v8230_v17 = vadd.f32 %v17274_v63, %v17273_v56  ;;  %v17285_v63 = vld [vmem:[#allocation161_spill] sm:$0xff] }
 0xdb5   :  { %v17303_v20 = vld [vmem:[#allocation125_spill] sm:$0xff] }
 0xdb6   :  { %8641 = vmatpush.msrb.mxu2 %v15209_v44  ;;  %v17302_v44 = vld [vmem:[#allocation128_spill] sm:$0xff] }
 0xdb7   :  { %v8457_v32 = vpop.f32.mrf.mxu3 }
 0xdb8   :  { %v15272_v38 = vadd.f32 %v8457_v32, %v8227_v47  ;;  %8642 = vmatpush.msrb.mxu2 %v15205_v62  ;;  %v17276_v47 = vld [vmem:[#allocation7_spill] sm:$0xff] }
 0xdb9   :  { %v17277_v32 = vld [vmem:[#allocation171_spill] sm:$0xff] }
 0xdba   :  { %17266 = vst [vmem:[#allocation54_spill] sm:$0xff] %v15272_v38  ;;  %8643 = vmatpush.msrb.mxu2 %v15199_v25  ;;  %v17299_v25 = vld [vmem:[#allocation70_spill] sm:$0xff] }
 0xdbc   :  { %8507 = vmatmul.f32.gmra.mxu3 %v8308_v51  ;;  %8644 = vmatpush.msrb.mxu2 %v15191_v39  ;;  %v17278_v51 = vld [vmem:[#allocation15_spill] sm:$0xff] }
 0xdbd   :  { %v8231_v29 = vadd.f32 %v17278_v51, %v17277_v32  ;;  %v17288_v32 = vld [vmem:[#allocation67_spill] sm:$0xff] }
 0xdbe   :  { %8645 = vmatpush.msrb.mxu2 %v15183_v60  ;;  %v17295_v60 = vld [vmem:[#allocation165_spill] sm:$0xff] }
 0xdbf   :  { %v8460_v46 = vpop.f32.mrf.mxu3 }
 0xdc0   :  { %v15280_v8 = vadd.f32 %v8460_v46, %v8228_v35  ;;  %8646 = vmatpush.msrb.mxu2 %v15169_v50  ;;  %v17280_v46 = vld [vmem:[#allocation14_spill] sm:$0xff]  ;;  %v17293_v50 = vld [vmem:[#allocation121_spill] sm:$0xff] }
 0xdc1   :  { %8647 = vmatmul.f32.vlgmr.msrb.gmra.mxu2 %v17229_v45 }
 0xdc2   :  { %17269 = vst [vmem:[#allocation188_spill] sm:$0xff] %v15280_v8 }
 0xdc4   :  { %8510 = vmatmul.f32.gmra.mxu3 %v8309_v9  ;;  %v17281_v9 = vld [vmem:[#allocation110_spill] sm:$0xff] }
 0xdc5   :  { %v8232_v36 = vadd.f32 %v17282_v42, %v17281_v9  ;;  %v17291_v42 = vld [vmem:[#allocation191_spill] sm:$0xff] }
 0xdc7   :  { %v8463_v22 = vpop.f32.mrf.mxu3 }
 0xdc8   :  { %v15286_v13 = vadd.f32 %v8463_v22, %v8229_v54 }
 0xdca   :  { %17272 = vst [vmem:[#allocation159_spill] sm:$0xff] %v15286_v13 }
 0xdcc   :  { %8513 = vmatmul.f32.gmra.mxu3 %v8310_v40  ;;  %v17284_v40 = vld [vmem:[#allocation12_spill] sm:$0xff] }
 0xdcf   :  { %v8466_v21 = vpop.f32.mrf.mxu3 }
 0xdd0   :  { %v15290_v16 = vadd.f32 %v8466_v21, %v8230_v17  ;;  %v17287_v21 = vld [vmem:[#allocation219_spill] sm:$0xff] }
 0xdd2   :  { %17275 = vst [vmem:[#allocation151_spill] sm:$0xff] %v15290_v16 }
 0xdd4   :  { %8516 = vmatmul.f32.gmra.mxu3 %v17276_v47 }
 0xdd7   :  { %v8469_v12 = vpop.f32.mrf.mxu3 }
 0xdd8   :  { %v15295_v35 = vadd.f32 %v8469_v12, %v8231_v29  ;;  %v17289_v29 = vld [vmem:[#allocation69_spill] sm:$0xff] }
 0xdda   :  { %17279 = vst [vmem:[#allocation117_spill] sm:$0xff] %v15295_v35 }
 0xddc   :  { %8519 = vmatmul.f32.gmra.mxu3 %v17280_v46  ;;  %v17290_v46 = vld [vmem:[#allocation123_spill] sm:$0xff] }
 0xddf   :  { %v8472_v54 = vpop.f32.mrf.mxu3 }
 0xde0   :  { %v15300_v22 = vadd.f32 %v8472_v54, %v8232_v36  ;;  %v8319_v54 = vld [vmem:[#allocation3 + $0x34a] sm:$0xff] }
 0xde2   :  { %17283 = vst [vmem:[#allocation86_spill] sm:$0xff] %v15300_v22 }
 0xde4   :  { %8522 = vmatmul.f32.gmra.mxu3 %v17284_v40 }
 0xde7   :  { %v8475_v56 = vpop.f32.mrf.mxu3 }
 0xde8   :  { %v15304_v17 = vadd.f32 %v8475_v56, %v17285_v63  ;;  %v8320_v56 = vld [vmem:[#allocation3 + $0x352] sm:$0xff] }
 0xde9   :  { %v17292_v63 = vld [vmem:[#allocation66_spill] sm:$0xff] }
 0xdea   :  { %17286 = vst [vmem:[#allocation83_spill] sm:$0xff] %v15304_v17 }
 0xdec   :  { %8525 = vmatmul.f32.gmra.mxu3 %v17287_v21  ;;  %v7531_v21 = vadd.f32 %v17293_v50, %v17292_v63  ;;  %v17304_v50 = vld [vmem:[#allocation101_spill] sm:$0xff] }
 0xdee   :  { %v7886_v39 = vadd.f32 %v17296_v53, %v7531_v21  ;;  %v17307_v53 = vld [vmem:[#allocation157_spill] sm:$0xff] }
 0xdef   :  { %v8478_v47 = vpop.f32.mrf.mxu3 }
 0xdf4   :  { %8528 = vmatmul.f32.gmra.mxu3 %v17288_v32  ;;  %v7530_v32 = vadd.f32 %v17295_v60, %v17294_v48  ;;  %v17306_v48 = vld [vmem:[#allocation104_spill] sm:$0xff] }
 0xdf5   :  { %v7527_v60 = vadd.f32 %v17307_v53, %v17306_v48 }
 0xdf6   :  { %v7885_v3 = vadd.f32 %v17299_v25, %v7530_v32  ;;  %v17312_v32 = vld [vmem:[#allocation65_spill] sm:$0xff] }
 0xdf7   :  { %v8481_v51 = vpop.f32.mrf.mxu3 }
 0xdf8   :  { %v8239_v63 = vadd.f32 %v17304_v50, %v7885_v3  ;;  %v17318_v50 = vld [vmem:[#allocation213_spill] sm:$0xff] }
 0xdfc   :  { %8531 = vmatmul.f32.gmra.mxu3 %v17289_v29  ;;  %v17297_v29 = vld [vmem:[#allocation180_spill] sm:$0xff] }
 0xdff   :  { %v8484_v12 = vpop.f32.mrf.mxu3 }
 0xe04   :  { %8534 = vmatmul.f32.gmra.mxu3 %v17290_v46  ;;  %v7529_v46 = vadd.f32 %v17298_v2, %v17297_v29  ;;  %v17309_v2 = vld [vmem:[#allocation92_spill] sm:$0xff] }
 0xe06   :  { %v7884_v59 = vadd.f32 %v17303_v20, %v7529_v46  ;;  %v17314_v46 = vld [vmem:[#allocation170_spill] sm:$0xff] }
 0xe07   :  { %v8487_v9 = vpop.f32.mrf.mxu3 }
 0xe08   :  { %v8238_v29 = vadd.f32 %v17309_v2, %v7884_v59  ;;  %v17322_v2 = vld [vmem:[#allocation62_spill] sm:$0xff] }
 0xe0c   :  { %8537 = vmatmul.f32.gmra.mxu3 %v17291_v42  ;;  %v17300_v42 = vld [vmem:[#allocation144_spill] sm:$0xff] }
 0xe0d   :  { %v8240_v62 = vadd.f32 %v17300_v42, %v7886_v39  ;;  %v17311_v39 = vld [vmem:[#allocation205_spill] sm:$0xff] }
 0xe0e   :  { %v17313_v42 = vld [vmem:[#allocation201_spill] sm:$0xff] }
 0xe0f   :  { %v8490_v36 = vpop.f32.mrf.mxu3  ;;  %v7882_v20 = vadd.f32 %v17313_v42, %v7527_v60 }
 0xe14   :  { %8540 = vmatmul.f32.gmra.mxu3 %v8319_v54  ;;  %v17301_v54 = vld [vmem:[#allocation167_spill] sm:$0xff] }
 0xe15   :  { %v7528_v58 = vadd.f32 %v17302_v44, %v17301_v54  ;;  %v7526_v44 = vadd.f32 %v17312_v32, %v17311_v39  ;;  %v17317_v54 = vld [vmem:[#allocation160_spill] sm:$0xff]  ;;  %v17325_v32 = vld [vmem:[#allocation11_spill] sm:$0xff] }
 0xe17   :  { %v8493_v40 = vpop.f32.mrf.mxu3  ;;  %v7881_v59 = vadd.f32 %v17318_v50, %v7526_v44 }
 0xe18   :  { %v15330_v25 = vadd.f32 %v8493_v40, %v8239_v63  ;;  %v17319_v40 = vld [vmem:[#allocation89_spill] sm:$0xff] }
 0xe19   :  { %v8236_v63 = vadd.f32 %v17319_v40, %v7882_v20 }
 0xe1a   :  { %17310 = vst [vmem:[#allocation212_spill] sm:$0xff] %v15330_v25 }
 0xe1c   :  { %8543 = vmatmul.f32.gmra.mxu3 %v8320_v56  ;;  %v17308_v56 = vld [vmem:[#allocation115_spill] sm:$0xff] }
 0xe1d   :  { %v7883_v21 = vadd.f32 %v17308_v56, %v7528_v58  ;;  %v17321_v56 = vld [vmem:[#allocation164_spill] sm:$0xff] }
 0xe1f   :  { %v8496_v55 = vpop.f32.mrf.mxu3  ;;  %v8237_v3 = vadd.f32 %v17314_v46, %v7883_v21  ;;  %v8235_v21 = vadd.f32 %v17322_v2, %v7881_v59  ;;  %v17331_v59 = vld [vmem:[#allocation193_spill] sm:$0xff] }
 0xe20   :  { %v15324_v24 = vadd.f32 %v8496_v55, %v8240_v62  ;;  %v15337_v55 = vadd.f32 %v8490_v36, %v8238_v29  ;;  %v17316_v62 = vld [vmem:[#allocation158_spill] sm:$0xff]  ;;  %v15349_v36 = vadd.f32 %v8484_v12, %v8236_v63  ;;  %v17324_v29 = vld [vmem:[#allocation55_spill] sm:$0xff] }
 0xe21   :  { %v7525_v58 = vadd.f32 %v17317_v54, %v17316_v62  ;;  %v15344_v48 = vadd.f32 %v8487_v9, %v8237_v3  ;;  %v15356_v42 = vadd.f32 %v8481_v51, %v8235_v21  ;;  %v17328_v12 = vld [vmem:[#allocation95_spill] sm:$0xff]  ;;  %v17329_v3 = vld [vmem:[#allocation81_spill] sm:$0xff]  ;;  %v17330_v54 = vld [vmem:[#allocation56_spill] sm:$0xff]  ;;  %v7463_v21 = vpop.f32.mrf.mxu1 }
 0xe22   :  { %17305 = vst [vmem:[#allocation194_spill] sm:$0xff] %v15324_v24  ;;  %8651 = vmatpush.msra.mxu1 %v15324_v24 }
 0xe23   :  { %17315 = vst [vmem:[#allocation200_spill] sm:$0xff] %v15337_v55  ;;  %v7880_v60 = vadd.f32 %v17321_v56, %v7525_v58 }
 0xe24   :  { %8652 = vmatpush.msra.mxu1 %v15330_v25  ;;  %17320 = vst [vmem:[#allocation119_spill] sm:$0xff] %v15344_v48 }
 0xe25   :  { %17323 = vst [vmem:[#allocation63_spill] sm:$0xff] %v15349_v36  ;;  %v8234_v44 = vadd.f32 %v17325_v32, %v7880_v60  ;;  %v8172_v32 = vpop.f32.mrf.mxu0 }
 0xe26   :  { %8653 = vmatpush.msra.mxu1 %v15337_v55  ;;  %17326 = vst [vmem:[#allocation198_spill] sm:$0xff] %v15356_v42 }
 0xe27   :  { %v8499_v53 = vpop.f32.mrf.mxu3  ;;  %v15359_v9 = vadd.f32 %v8478_v47, %v8234_v44 }
 0xe28   :  { %v15352_v39 = vadd.f32 %v8499_v53, %v17324_v29  ;;  %8654 = vmatpush.msra.mxu1 %v15344_v48  ;;  %v17332_v53 = vld [vmem:[#allocation222_spill] sm:$0xff]  ;;  %v7818_v29 = vpop.f32.mrf.mxu2 }
 0xe29   :  { %17327 = vst [vmem:[#allocation76_spill] sm:$0xff] %v15359_v9 }
 0xe2a   :  { %8655 = vmatpush.msra.mxu1 %v15349_v36 }
 0xe2c   :  { %8656 = vmatpush.msra.mxu1 %v15356_v42 }
 0xe2e   :  { %8657 = vmatpush.msra.mxu1 %v15359_v9 }
 0xe2f   :  { %v8502_v20 = vpop.f32.mrf.mxu3 }
 0xe30   :  { %v15364_v46 = vadd.f32 %v8502_v20, %v17328_v12  ;;  %8658 = vmatpush.msra.mxu1 %v15304_v17  ;;  %v7466_v12 = vpop.f32.mrf.mxu1 }
 0xe32   :  { %8659 = vmatpush.msra.mxu1 %v15300_v22 }
 0xe34   :  { %8660 = vmatpush.msra.mxu1 %v15295_v35 }
 0xe36   :  { %8661 = vmatpush.msra.mxu1 %v15290_v16 }
 0xe37   :  { %v8505_v51 = vpop.f32.mrf.mxu3 }
 0xe38   :  { %v15371_v47 = vadd.f32 %v8505_v51, %v17329_v3  ;;  %8662 = vmatpush.msra.mxu1 %v15286_v13  ;;  %v7821_v51 = vpop.f32.mrf.mxu2 }
 0xe3a   :  { %8663 = vmatpush.msra.mxu1 %v15280_v8 }
 0xe3c   :  { %8664 = vmatpush.msra.mxu1 %v15272_v38 }
 0xe3e   :  { %8665 = vmatpush.msra.mxu1 %v15264_v57 }
 0xe3f   :  { %v8508_v62 = vpop.f32.mrf.mxu3 }
 0xe40   :  { %v15378_v58 = vadd.f32 %v8508_v62, %v17330_v54  ;;  %8666 = vmatpush.msra.mxu1 %v15250_v0  ;;  %v8175_v54 = vpop.f32.mrf.mxu0 }
 0xe41   :  { %8667 = vmatmul.f32.vlgmr.msra.gmra.mxu1 %v17229_v45 }
 0xe47   :  { %v8511_v50 = vpop.f32.mrf.mxu3 }
 0xe48   :  { %v15383_v40 = vadd.f32 %v8511_v50, %v17331_v59  ;;  %v7469_v50 = vpop.f32.mrf.mxu1 }
 0xe49   :  { %v7543_v18 = vadd.f32 %v7469_v50, %v15088_v27 }
 0xe4f   :  { %v8514_v63 = vpop.f32.mrf.mxu3 }
 0xe50   :  { %v15386_v56 = vadd.f32 %v8514_v63, %v17332_v53  ;;  %v7824_v63 = vpop.f32.mrf.mxu2  ;;  %v8178_v53 = vpop.f32.mrf.mxu0 }
 0xe57   :  { %v8517_v60 = vpop.f32.mrf.mxu3 }
 0xe58   :  { %v15389_v2 = vadd.f32 %v8517_v60, %v15070_v43  ;;  %v7472_v60 = vpop.f32.mrf.mxu1  ;;  %v7827_v0 = vpop.f32.mrf.mxu2 }
 0xe59   :  { %v8181_v57 = vpop.f32.mrf.mxu0  ;;  %v7544_v10 = vadd.f32 %v7472_v60, %v15092_v6  ;;  %v17334_v6 = vld [vmem:[#allocation153_spill] sm:$0xff] }
 0xe5b   :  { %v7899_v4 = vadd.f32 %v7827_v0, %v7544_v10 }
 0xe5f   :  { %v8520_v44 = vpop.f32.mrf.mxu3 }
 0xe60   :  { %v15392_v20 = vadd.f32 %v8520_v44, %v15074_v15  ;;  %v7475_v8 = vpop.f32.mrf.mxu1  ;;  %v7830_v13 = vpop.f32.mrf.mxu2 }
 0xe61   :  { %v8184_v15 = vpop.f32.mrf.mxu0  ;;  %v7545_v25 = vadd.f32 %v7475_v8, %v15096_v7  ;;  %v7898_v7 = vadd.f32 %v7824_v63, %v7543_v18  ;;  %v8253_v8 = vadd.f32 %v8181_v57, %v7899_v4 }
 0xe63   :  { %v7900_v23 = vadd.f32 %v7830_v13, %v7545_v25 }
 0xe65   :  { %v8254_v30 = vadd.f32 %v8184_v15, %v7900_v23 }
 0xe67   :  { %v8523_v3 = vpop.f32.mrf.mxu3 }
 0xe68   :  { %v15395_v62 = vadd.f32 %v8523_v3, %v15080_v52  ;;  %v7478_v16 = vpop.f32.mrf.mxu1  ;;  %v7833_v35 = vpop.f32.mrf.mxu2 }
 0xe69   :  { %v8187_v17 = vpop.f32.mrf.mxu0  ;;  %v7546_v48 = vadd.f32 %v7478_v16, %v15100_v1  ;;  %v17333_v1 = vld [vmem:[#allocation210_spill] sm:$0xff] }
 0xe6a   :  { %v7542_v16 = vadd.f32 %v7466_v12, %v17333_v1  ;;  %v17335_v12 = vld [vmem:[#allocation178_spill] sm:$0xff] }
 0xe6b   :  { %v7901_v24 = vadd.f32 %v7833_v35, %v7546_v48 }
 0xe6d   :  { %v8255_v5 = vadd.f32 %v8187_v17, %v7901_v24  ;;  %v7541_v24 = vadd.f32 %v7463_v21, %v17334_v6 }
 0xe6f   :  { %v8526_v59 = vpop.f32.mrf.mxu3  ;;  %v7896_v27 = vadd.f32 %v7818_v29, %v7541_v24  ;;  %v17342_v24 = vld [vmem:[#allocation214_spill] sm:$0xff] }
 0xe70   :  { %v7481_v52 = vpop.f32.mrf.mxu1  ;;  %v7836_v9 = vpop.f32.mrf.mxu2 }
 0xe71   :  { %v7547_v42 = vadd.f32 %v7481_v52, %v15104_v28  ;;  %v8190_v36 = vpop.f32.mrf.mxu0  ;;  %v8250_v18 = vadd.f32 %v8172_v32, %v7896_v27 }
 0xe73   :  { %v7902_v55 = vadd.f32 %v7836_v9, %v7547_v42 }
 0xe75   :  { %v8256_v14 = vadd.f32 %v8190_v36, %v7902_v55 }
 0xe77   :  { %v8529_v43 = vpop.f32.mrf.mxu3 }
 0xe78   :  { %v8628_v0 = vpop.f32.mrf.mxu1  ;;  %v8648_v23 = vpop.f32.mrf.mxu2 }
 0xe79   :  { %v8649_v57 = vadd.f32 %v8648_v23, %v8628_v0  ;;  %v17344_v0 = vld [vmem:[#allocation208_spill] sm:$0xff] }
 0xe7f   :  { %v8532_v38 = vpop.f32.mrf.mxu3 }
 0xe87   :  { %v8535_v44 = vpop.f32.mrf.mxu3 }
 0xe88   :  { %v15412_v13 = vadd.f32 %v8535_v44, %v8253_v8  ;;  %v17339_v44 = vld [vmem:[#allocation107_spill] sm:$0xff]  ;;  %v17341_v8 = vld [vmem:[#allocation148_spill] sm:$0xff] }
 0xe8f   :  { %v8538_v22 = vpop.f32.mrf.mxu3 }
 0xe90   :  { %v15408_v35 = vadd.f32 %v8538_v22, %v8254_v30  ;;  %v15421_v30 = vadd.f32 %v8526_v59, %v8250_v18  ;;  %v17337_v59 = vld [vmem:[#allocation39_spill] sm:$0xff] }
 0xe97   :  { %v8541_v3 = vpop.f32.mrf.mxu3 }
 0xe98   :  { %v15404_v28 = vadd.f32 %v8541_v3, %v8255_v5  ;;  %v17340_v3 = vld [vmem:[#allocation113_spill] sm:$0xff] }
 0xe9f   :  { %v8544_v33 = vpop.f32.mrf.mxu3 }
 0xea0   :  { %v15401_v41 = vadd.f32 %v8544_v33, %v8256_v14  ;;  %v7897_v14 = vadd.f32 %v7821_v51, %v7542_v16  ;;  %v8252_v33 = vadd.f32 %v8178_v53, %v7898_v7  ;;  %v17338_v53 = vld [vmem:[#allocation53_spill] sm:$0xff] }
 0xea2   :  { %8671 = vmatpush.msra.mxu2 %v15401_v41  ;;  %v8251_v10 = vadd.f32 %v8175_v54, %v7897_v14  ;;  %v15415_v5 = vadd.f32 %v8532_v38, %v8252_v33  ;;  %v17336_v54 = vld [vmem:[#allocation185_spill] sm:$0xff] }
 0xea4   :  { %8672 = vmatpush.msra.mxu2 %v15404_v28  ;;  %v15418_v4 = vadd.f32 %v8529_v43, %v8251_v10  ;;  %v17343_v10 = vld [vmem:[#allocation57_spill] sm:$0xff] }
 0xea6   :  { %8673 = vmatpush.msra.mxu2 %v15408_v35 }
 0xea8   :  { %8674 = vmatpush.msra.mxu2 %v15412_v13 }
 0xeaa   :  { %8675 = vmatpush.msra.mxu2 %v15415_v5 }
 0xeac   :  { %8676 = vmatpush.msra.mxu2 %v15418_v4 }
 0xeae   :  { %8677 = vmatpush.msra.mxu2 %v15421_v30 }
 0xeb0   :  { %8678 = vmatpush.msra.mxu2 %v15395_v62 }
 0xeb2   :  { %8679 = vmatpush.msra.mxu2 %v15392_v20 }
 0xeb4   :  { %8680 = vmatpush.msra.mxu2 %v15389_v2 }
 0xeb6   :  { %8681 = vmatpush.msra.mxu2 %v15386_v56 }
 0xeb8   :  { %8682 = vmatpush.msra.mxu2 %v15383_v40 }
 0xeba   :  { %8683 = vmatpush.msra.mxu2 %v15378_v58 }
 0xebc   :  { %8684 = vmatpush.msra.mxu2 %v15371_v47 }
 0xebe   :  { %8685 = vmatpush.msra.mxu2 %v15364_v46  ;;  %v8668_v38 = vpop.f32.mrf.mxu1 }
 0xebf   :  { %v8669_v17 = vadd.f32 %v8668_v38, %v8649_v57 }
 0xec0   :  { %8686 = vmatpush.msra.mxu2 %v15352_v39 }
 0xec1   :  { %8687 = vmatmul.f32.vlgmr.msra.gmra.mxu2 %v17229_v45 }
 0xf44   :  { %v8688_v22 = vpop.f32.mrf.mxu2 }
 0xf45   :  { %v8689_v25 = vadd.f32 %v8688_v22, %v8669_v17  ;;  %v17345_v22 = vld [vmem:[#allocation175_spill] sm:$0xff] }
 0xf47   :  { %v8691_v55 = vmul.f32 0.001953125, %v8689_v25  ;;  %v17346_v25 = vld [vmem:[#allocation111_spill] sm:$0xff] }
 0xf49   :  { %v15435_v48 = vperm.slane %v8691_v55, 0 }
 0xf4b   :  { %v15439_v36 = vsub.f32 %v15146_v31, %v15435_v48  ;;  %v15443_v42 = vsub.f32 %v15227_v11, %v15435_v48  ;;  %v15447_v9 = vsub.f32 %v15150_v19, %v15435_v48  ;;  %v15451_v21 = vsub.f32 %v15231_v49, %v15435_v48 }
 0xf4c   :  { %v15455_v29 = vsub.f32 %v15155_v37, %v15435_v48  ;;  %v15459_v31 = vsub.f32 %v15236_v34, %v15435_v48  ;;  %v15467_v19 = vsub.f32 %v15162_v61, %v15435_v48  ;;  %v15471_v49 = vsub.f32 %v15243_v26, %v15435_v48 }
 0xf4d   :  { %v8772_v11 = vmul.f32 %v15439_v36, %v15439_v36  ;;  %v8788_v32 = vmul.f32 %v15443_v42, %v15443_v42  ;;  %v8771_v37 = vmul.f32 %v15447_v9, %v15447_v9  ;;  %v8787_v34 = vmul.f32 %v15451_v21, %v15451_v21 }
 0xf4e   :  { %v15479_v51 = vsub.f32 %v17335_v12, %v15435_v48  ;;  %v15483_v61 = vsub.f32 %v17336_v54, %v15435_v48  ;;  %v8770_v26 = vmul.f32 %v15455_v29, %v15455_v29  ;;  %v8786_v50 = vmul.f32 %v15459_v31, %v15459_v31  ;;  %v17348_v12 = vld [vmem:[#allocation197_spill] sm:$0xff] }
 0xf4f   :  { %8821 = vmatpush.msrb.mxu1 %v8772_v11  ;;  %8841 = vmatpush.msrb.mxu2 %v8788_v32  ;;  %v15491_v63 = vsub.f32 %v17337_v59, %v15435_v48  ;;  %v15495_v43 = vsub.f32 %v17338_v53, %v15435_v48  ;;  %v8769_v60 = vmul.f32 %v15467_v19, %v15467_v19  ;;  %v17349_v59 = vld [vmem:[#allocation221_spill] sm:$0xff] }
 0xf50   :  { %v8785_v15 = vmul.f32 %v15471_v49, %v15471_v49  ;;  %v15503_v52 = vsub.f32 %v17339_v44, %v15435_v48  ;;  %v15507_v1 = vsub.f32 %v17340_v3, %v15435_v48  ;;  %v8768_v16 = vmul.f32 %v15479_v51, %v15479_v51 }
 0xf51   :  { %8822 = vmatpush.msrb.mxu1 %v8771_v37  ;;  %8842 = vmatpush.msrb.mxu2 %v8787_v34  ;;  %v8784_v7 = vmul.f32 %v15483_v61, %v15483_v61  ;;  %v15515_v6 = vsub.f32 %v17341_v8, %v15435_v48  ;;  %v15519_v14 = vsub.f32 %v17342_v24, %v15435_v48  ;;  %v17347_v37 = vld [vmem:[#allocation51_spill] sm:$0xff]  ;;  %v17352_v8 = vld [vmem:[#allocation109_spill] sm:$0xff] }
 0xf52   :  { %v8767_v33 = vmul.f32 %v15491_v63, %v15491_v63  ;;  %v8783_v27 = vmul.f32 %v15495_v43, %v15495_v43  ;;  %v15527_v18 = vsub.f32 %v17343_v10, %v15435_v48  ;;  %v15531_v23 = vsub.f32 %v17344_v0, %v15435_v48  ;;  %v17353_v10 = vld [vmem:[#allocation50_spill] sm:$0xff] }
 0xf53   :  { %8823 = vmatpush.msrb.mxu1 %v8770_v26  ;;  %8843 = vmatpush.msrb.mxu2 %v8786_v50  ;;  %v8766_v57 = vmul.f32 %v15503_v52, %v15503_v52  ;;  %v8782_v38 = vmul.f32 %v15507_v1, %v15507_v1  ;;  %v15539_v17 = vsub.f32 %v17345_v22, %v15435_v48 }
 0xf54   :  { %v15543_v55 = vsub.f32 %v17346_v25, %v15435_v48  ;;  %v8765_v11 = vmul.f32 %v15515_v6, %v15515_v6  ;;  %v8781_v32 = vmul.f32 %v15519_v14, %v15519_v14  ;;  %v15551_v34 = vsub.f32 %v17347_v37, %v15435_v48  ;;  %v17356_v37 = vld [vmem:[#allocation218_spill] sm:$0xff] }
 0xf55   :  { %8824 = vmatpush.msrb.mxu1 %v8769_v60  ;;  %8844 = vmatpush.msrb.mxu2 %v8785_v15  ;;  %v15555_v54 = vsub.f32 %v17348_v12, %v15435_v48  ;;  %v8764_v26 = vmul.f32 %v15527_v18, %v15527_v18  ;;  %v8780_v50 = vmul.f32 %v15531_v23, %v15531_v23  ;;  %v17350_v60 = vld [vmem:[#allocation85_spill] sm:$0xff] }
 0xf56   :  { %v15563_v53 = vsub.f32 %v17349_v59, %v15435_v48  ;;  %v15567_v15 = vsub.f32 %v17350_v60, %v15435_v48  ;;  %v8763_v44 = vmul.f32 %v15539_v17, %v15539_v17  ;;  %v8779_v3 = vmul.f32 %v15543_v55, %v15543_v55  ;;  %v17357_v59 = vld [vmem:[#allocation98_spill] sm:$0xff] }
 0xf57   :  { %8825 = vmatpush.msrb.mxu1 %v8768_v16  ;;  %8845 = vmatpush.msrb.mxu2 %v8784_v7  ;;  %v17351_v16 = vld [vmem:[#allocation172_spill] sm:$0xff]  ;;  %v15579_v24 = vsub.f32 %v17352_v8, %v15435_v48  ;;  %v15587_v0 = vsub.f32 %v17353_v10, %v15435_v48  ;;  %v15603_v12 = vsub.f32 %v17356_v37, %v15435_v48 }
 0xf58   :  { %v15575_v7 = vsub.f32 %v17351_v16, %v15435_v48  ;;  %v8761_v22 = vmul.f32 %v15563_v53, %v15563_v53  ;;  %v8777_v25 = vmul.f32 %v15567_v15, %v15567_v15  ;;  %v15611_v60 = vsub.f32 %v17357_v59, %v15435_v48 }
 0xf59   :  { %8826 = vmatpush.msrb.mxu1 %v8767_v33  ;;  %8846 = vmatpush.msrb.mxu2 %v8783_v27  ;;  %v8762_v33 = vmul.f32 %v15551_v34, %v15551_v34  ;;  %v8778_v27 = vmul.f32 %v15555_v54, %v15555_v54  ;;  %v8759_v16 = vmul.f32 %v15587_v0, %v15587_v0 }
 0xf5a   :  { %v15627_v10 = vsub.f32 %v15401_v41, %v15435_v48  ;;  %v15639_v37 = vsub.f32 %v15404_v28, %v15435_v48  ;;  %v8757_v41 = vmul.f32 %v15611_v60, %v15611_v60 }
 0xf5b   :  { %8827 = vmatpush.msrb.mxu1 %v8766_v57  ;;  %8847 = vmatpush.msrb.mxu2 %v8782_v38  ;;  %v17354_v57 = vld [vmem:[#allocation82_spill] sm:$0xff] }
 0xf5c   :  { %v15591_v38 = vsub.f32 %v17354_v57, %v15435_v48  ;;  %17360 = vst [vmem:[#allocation44_spill] sm:$0xff] %v15627_v10 }
 0xf5d   :  { %8828 = vmatpush.msrb.mxu1 %v8765_v11  ;;  %8848 = vmatpush.msrb.mxu2 %v8781_v32  ;;  %v17355_v11 = vld [vmem:[#allocation84_spill] sm:$0xff]  ;;  %17362 = vst [vmem:[#allocation35_spill] sm:$0xff] %v15639_v37 }
 0xf5e   :  { %v15599_v32 = vsub.f32 %v17355_v11, %v15435_v48  ;;  %v8775_v8 = vmul.f32 %v15591_v38, %v15591_v38 }
 0xf5f   :  { %8829 = vmatpush.msrb.mxu1 %v8764_v26  ;;  %8849 = vmatpush.msrb.mxu2 %v8780_v50  ;;  %v8760_v26 = vmul.f32 %v15575_v7, %v15575_v7  ;;  %v8776_v50 = vmul.f32 %v15579_v24, %v15579_v24 }
 0xf60   :  { %v8758_v57 = vmul.f32 %v15599_v32, %v15599_v32 }
 0xf61   :  { %8830 = vmatpush.msrb.mxu1 %v8763_v44  ;;  %8850 = vmatpush.msrb.mxu2 %v8779_v3  ;;  %v17358_v44 = vld [vmem:[#allocation58_spill] sm:$0xff] }
 0xf62   :  { %v15615_v3 = vsub.f32 %v17358_v44, %v15435_v48  ;;  %v15651_v44 = vsub.f32 %v15408_v35, %v15435_v48 }
 0xf63   :  { %8831 = vmatpush.msrb.mxu1 %v8762_v33  ;;  %8851 = vmatpush.msrb.mxu2 %v8778_v27  ;;  %v17359_v33 = vld [vmem:[#allocation194_spill] sm:$0xff] }
 0xf64   :  { %v15623_v27 = vsub.f32 %v17359_v33, %v15435_v48  ;;  %17364 = vst [vmem:[#allocation36_spill] sm:$0xff] %v15651_v44 }
 0xf65   :  { %8832 = vmatpush.msrb.mxu1 %v8761_v22  ;;  %8852 = vmatpush.msrb.mxu2 %v8777_v25  ;;  %v8774_v22 = vmul.f32 %v15603_v12, %v15603_v12  ;;  %v17361_v25 = vld [vmem:[#allocation212_spill] sm:$0xff] }
 0xf66   :  { %v15635_v11 = vsub.f32 %v17361_v25, %v15435_v48  ;;  %v8804_v28 = vmul.f32 %v15623_v27, %v15623_v27  ;;  %v17367_v25 = vld [vmem:[#allocation63_spill] sm:$0xff] }
 0xf67   :  { %8833 = vmatpush.msrb.mxu1 %v8760_v26  ;;  %8853 = vmatpush.msrb.mxu2 %v8776_v50  ;;  %v8773_v26 = vmul.f32 %v15615_v3, %v15615_v3  ;;  %v17363_v50 = vld [vmem:[#allocation200_spill] sm:$0xff] }
 0xf68   :  { %v15647_v59 = vsub.f32 %v17363_v50, %v15435_v48  ;;  %v8803_v35 = vmul.f32 %v15635_v11, %v15635_v11  ;;  %v15671_v50 = vsub.f32 %v17367_v25, %v15435_v48 }
 0xf69   :  { %8834 = vmatpush.msrb.mxu1 %v8759_v16  ;;  %8854 = vmatpush.msrb.mxu2 %v8775_v8  ;;  %v8820_v16 = vmul.f32 %v15627_v10, %v15627_v10  ;;  %v17365_v8 = vld [vmem:[#allocation119_spill] sm:$0xff] }
 0xf6a   :  { %v15659_v33 = vsub.f32 %v17365_v8, %v15435_v48  ;;  %v15689_v8 = vsub.f32 %v15418_v4, %v15435_v48  ;;  %v8800_v4 = vmul.f32 %v15671_v50, %v15671_v50 }
 0xf6b   :  { %8835 = vmatpush.msrb.mxu1 %v8758_v57  ;;  %8855 = vmatpush.msrb.mxu2 %v8774_v22  ;;  %v15663_v57 = vsub.f32 %v15412_v13, %v15435_v48  ;;  %v8819_v22 = vmul.f32 %v15639_v37, %v15639_v37  ;;  %v15677_v13 = vsub.f32 %v15415_v5, %v15435_v48 }
 0xf6c   :  { %17370 = vst [vmem:[#allocation42_spill] sm:$0xff] %v15689_v8  ;;  %v8801_v5 = vmul.f32 %v15659_v33, %v15659_v33 }
 0xf6d   :  { %8836 = vmatpush.msrb.mxu1 %v8757_v41  ;;  %8856 = vmatpush.msrb.mxu2 %v8773_v26  ;;  %17366 = vst [vmem:[#allocation77_spill] sm:$0xff] %v15663_v57  ;;  %v8802_v41 = vmul.f32 %v15647_v59, %v15647_v59  ;;  %v8818_v26 = vmul.f32 %v15651_v44, %v15651_v44 }
 0xf6e   :  { %8857 = vmatmul.f32.vlgmr.msrb.gmra.mxu2 %v17229_v45  ;;  %8837 = vmatmul.f32.vlgmr.msrb.gmra.mxu1 %v17229_v45  ;;  %17368 = vst [vmem:[#allocation38_spill] sm:$0xff] %v15677_v13 }
 0xf6f   :  { %8861 = vmatpush.msra.mxu1 %v8804_v28  ;;  %8881 = vmatpush.msra.mxu2 %v8820_v16  ;;  %v17369_v28 = vld [vmem:[#allocation198_spill] sm:$0xff] }
 0xf70   :  { %v15685_v16 = vsub.f32 %v17369_v28, %v15435_v48  ;;  %v15701_v28 = vsub.f32 %v15421_v30, %v15435_v48 }
 0xf71   :  { %8862 = vmatpush.msra.mxu1 %v8803_v35  ;;  %8882 = vmatpush.msra.mxu2 %v8819_v22  ;;  %v8817_v35 = vmul.f32 %v15663_v57, %v15663_v57  ;;  %v17371_v22 = vld [vmem:[#allocation76_spill] sm:$0xff] }
 0xf72   :  { %v15697_v25 = vsub.f32 %v17371_v22, %v15435_v48  ;;  %17372 = vst [vmem:[#allocation78_spill] sm:$0xff] %v15701_v28  ;;  %v15713_v22 = vsub.f32 %v15395_v62, %v15435_v48  ;;  %v8799_v30 = vmul.f32 %v15685_v16, %v15685_v16 }
 0xf73   :  { %8863 = vmatpush.msra.mxu1 %v8802_v41  ;;  %8883 = vmatpush.msra.mxu2 %v8818_v26  ;;  %v8816_v41 = vmul.f32 %v15677_v13, %v15677_v13  ;;  %v17373_v26 = vld [vmem:[#allocation83_spill] sm:$0xff] }
 0xf74   :  { %v15709_v10 = vsub.f32 %v17373_v26, %v15435_v48  ;;  %17374 = vst [vmem:[#allocation217_spill] sm:$0xff] %v15713_v22  ;;  %v15725_v26 = vsub.f32 %v15392_v20, %v15435_v48  ;;  %v8798_v62 = vmul.f32 %v15697_v25, %v15697_v25 }
 0xf75   :  { %8864 = vmatpush.msra.mxu1 %v8801_v5  ;;  %8884 = vmatpush.msra.mxu2 %v8817_v35  ;;  %v8815_v5 = vmul.f32 %v15689_v8, %v15689_v8  ;;  %v17375_v35 = vld [vmem:[#allocation86_spill] sm:$0xff] }
 0xf76   :  { %v15721_v37 = vsub.f32 %v17375_v35, %v15435_v48  ;;  %17376 = vst [vmem:[#allocation131_spill] sm:$0xff] %v15725_v26  ;;  %v15737_v35 = vsub.f32 %v15389_v2, %v15435_v48  ;;  %v8797_v20 = vmul.f32 %v15709_v10, %v15709_v10 }
 0xf77   :  { %8865 = vmatpush.msra.mxu1 %v8800_v4  ;;  %8885 = vmatpush.msra.mxu2 %v8816_v41  ;;  %v8814_v4 = vmul.f32 %v15701_v28, %v15701_v28  ;;  %v17377_v41 = vld [vmem:[#allocation117_spill] sm:$0xff] }
 0xf78   :  { %v15733_v44 = vsub.f32 %v17377_v41, %v15435_v48  ;;  %17378 = vst [vmem:[#allocation48_spill] sm:$0xff] %v15737_v35  ;;  %v15749_v41 = vsub.f32 %v15386_v56, %v15435_v48  ;;  %v8796_v2 = vmul.f32 %v15721_v37, %v15721_v37 }
 0xf79   :  { %8866 = vmatpush.msra.mxu1 %v8799_v30  ;;  %8886 = vmatpush.msra.mxu2 %v8815_v5  ;;  %v8813_v30 = vmul.f32 %v15713_v22, %v15713_v22  ;;  %v17379_v5 = vld [vmem:[#allocation151_spill] sm:$0xff] }
 0xf7a   :  { %v15745_v57 = vsub.f32 %v17379_v5, %v15435_v48  ;;  %17380 = vst [vmem:[#allocation73_spill] sm:$0xff] %v15749_v41  ;;  %v15761_v5 = vsub.f32 %v15383_v40, %v15435_v48  ;;  %v8795_v56 = vmul.f32 %v15733_v44, %v15733_v44 }
 0xf7b   :  { %8867 = vmatpush.msra.mxu1 %v8798_v62  ;;  %8887 = vmatpush.msra.mxu2 %v8814_v4  ;;  %v8812_v62 = vmul.f32 %v15725_v26, %v15725_v26  ;;  %v17381_v4 = vld [vmem:[#allocation159_spill] sm:$0xff]  ;;  %v15795_v26 = vsub.f32 %v15364_v46, %v15435_v48 }
 0xf7c   :  { %v15757_v13 = vsub.f32 %v17381_v4, %v15435_v48  ;;  %17382 = vst [vmem:[#allocation27_spill] sm:$0xff] %v15761_v5  ;;  %v15773_v4 = vsub.f32 %v15378_v58, %v15435_v48  ;;  %v8794_v40 = vmul.f32 %v15745_v57, %v15745_v57 }
 0xf7d   :  { %8868 = vmatpush.msra.mxu1 %v8797_v20  ;;  %8888 = vmatpush.msra.mxu2 %v8813_v30  ;;  %v8811_v20 = vmul.f32 %v15737_v35, %v15737_v35  ;;  %v17383_v30 = vld [vmem:[#allocation188_spill] sm:$0xff]  ;;  %17388 = vst [vmem:[#allocation80_spill] sm:$0xff] %v15795_v26  ;;  %v15805_v35 = vsub.f32 %v15352_v39, %v15435_v48 }
 0xf7e   :  { %v15769_v8 = vsub.f32 %v17383_v30, %v15435_v48  ;;  %17384 = vst [vmem:[#allocation29_spill] sm:$0xff] %v15773_v4  ;;  %v15785_v30 = vsub.f32 %v15371_v47, %v15435_v48  ;;  %v8793_v58 = vmul.f32 %v15757_v13, %v15757_v13 }
 0xf7f   :  { %8869 = vmatpush.msra.mxu1 %v8796_v2  ;;  %8889 = vmatpush.msra.mxu2 %v8812_v62  ;;  %v8810_v2 = vmul.f32 %v15749_v41, %v15749_v41  ;;  %v17385_v62 = vld [vmem:[#allocation54_spill] sm:$0xff]  ;;  %17390 = vst [vmem:[#allocation32_spill] sm:$0xff] %v15805_v35  ;;  %v8805_v39 = vmul.f32 %v15805_v35, %v15805_v35 }
 0xf80   :  { %v15781_v28 = vsub.f32 %v17385_v62, %v15435_v48  ;;  %17386 = vst [vmem:[#allocation75_spill] sm:$0xff] %v15785_v30  ;;  %v8792_v47 = vmul.f32 %v15769_v8, %v15769_v8 }
 0xf81   :  { %8870 = vmatpush.msra.mxu1 %v8795_v56  ;;  %8890 = vmatpush.msra.mxu2 %v8811_v20  ;;  %v8809_v56 = vmul.f32 %v15761_v5, %v15761_v5  ;;  %v17387_v20 = vld [vmem:[#allocation60_spill] sm:$0xff] }
 0xf82   :  { %v8726_v22 = vsub.f32 %v17387_v20, %v15435_v48  ;;  %v8791_v46 = vmul.f32 %v15781_v28, %v15781_v28  ;;  %v8806_v20 = vmul.f32 %v15795_v26, %v15795_v26 }
 0xf83   :  { %8871 = vmatpush.msra.mxu1 %v8794_v40  ;;  %8891 = vmatpush.msra.mxu2 %v8810_v2  ;;  %v8808_v40 = vmul.f32 %v15773_v4, %v15773_v4  ;;  %v17389_v2 = vld [vmem:[#allocation224_spill] sm:$0xff] }
 0xf84   :  { %v8725_v62 = vsub.f32 %v17389_v2, %v15435_v48 }
 0xf85   :  { %8872 = vmatpush.msra.mxu1 %v8793_v58  ;;  %8892 = vmatpush.msra.mxu2 %v8809_v56  ;;  %v8807_v58 = vmul.f32 %v15785_v30, %v15785_v30  ;;  %v8790_v56 = vmul.f32 %v8726_v22, %v8726_v22 }
 0xf86   :  { %v8789_v2 = vmul.f32 %v8725_v62, %v8725_v62 }
 0xf87   :  { %8873 = vmatpush.msra.mxu1 %v8792_v47  ;;  %8893 = vmatpush.msra.mxu2 %v8808_v40 }
 0xf89   :  { %8874 = vmatpush.msra.mxu1 %v8791_v46  ;;  %8894 = vmatpush.msra.mxu2 %v8807_v58 }
 0xf8b   :  { %8875 = vmatpush.msra.mxu1 %v8790_v56  ;;  %8895 = vmatpush.msra.mxu2 %v8806_v20 }
 0xf8d   :  { %8876 = vmatpush.msra.mxu1 %v8789_v2  ;;  %8896 = vmatpush.msra.mxu2 %v8805_v39 }
 0xf8e   :  { %8897 = vmatmul.f32.vlgmr.msra.gmra.mxu2 %v17229_v45  ;;  %8877 = vmatmul.f32.vlgmr.msra.gmra.mxu1 %v17229_v45  ;;  %v8902_v45 = vld [vmem:[%s16033_s3] sm:$0x1] }
 0xfeb   :  { %v8838_v48 = vpop.f32.mrf.mxu1 }
 0xff1   :  { %v8858_v47 = vpop.f32.mrf.mxu2 }
 0xff2   :  { %v8859_v46 = vadd.f32 %v8858_v47, %v8838_v48 }
0x100b   :  { %v8878_v40 = vpop.f32.mrf.mxu1 }
0x100c   :  { %v8879_v58 = vadd.f32 %v8878_v40, %v8859_v46 }
0x1011   :  { %v8898_v41 = vpop.f32.mrf.mxu2 }
0x1012   :  { %v8899_v5 = vadd.f32 %v8898_v41, %v8879_v58  ;;  %v15825_v41 = vld [vmem:[%s16031_s4] ss:$0 sm:$0xff] }
0x1014   :  { %v8901_v4 = vmul.f32 0.001953125, %v8899_v5 }
0x1016   :  { %v8903_v56 = vadd.f32 1e-05, %v8901_v4 }
0x1018   :  { %9979 = vrsqrt.f32 %v8903_v56  ;;  %vm8910_vm8 = vweird.f32 %v8903_v56 }
0x101e   :  { %v9980_v20 = vpop.eup %9979 }
0x101f   :  { %v8905_v30 = vmul.f32 %v9980_v20, %v8903_v56  ;;  %vm8911_vm7 = vweird.f32 %v9980_v20 }
0x1020   :  { %vm8912_vm9 = vmor %vm8910_vm8, %vm8911_vm7 }
0x1021   :  { %v8906_v26 = vmul.f32 %v9980_v20, %v8905_v30 }
0x1023   :  { %v8907_v35 = vmul.f32 0.5, %v8906_v26 }
0x1025   :  { %v8908_v2 = vsub.f32 1.5, %v8907_v35 }
0x1027   :  { %v8909_v39 = vmul.f32 %v9980_v20, %v8908_v2 }
0x1029   :  { %v8913_v48 = vsel %vm8912_vm9, %v9980_v20, %v8909_v39 }
0x102a   :  { %v8914_v47 = vmul.f32 %v8913_v48, %v8902_v45 }
0x102c   :  { %v15820_v40 = vperm.slane %v8914_v47, 0 }
0x102e   :  { %v8950_v26 = vmul.f32 %v15820_v40, %v8725_v62  ;;  %v8934_v35 = vmul.f32 %v15820_v40, %v15615_v3  ;;  %v8918_v5 = vmul.f32 %v15820_v40, %v15611_v60  ;;  %v8951_v56 = vmul.f32 %v15820_v40, %v8726_v22 }
0x102f   :  { %v8935_v62 = vmul.f32 %v15820_v40, %v15603_v12  ;;  %v8919_v3 = vmul.f32 %v15820_v40, %v15599_v32  ;;  %v8952_v22 = vmul.f32 %v15820_v40, %v15781_v28  ;;  %v8936_v12 = vmul.f32 %v15820_v40, %v15591_v38 }
0x1030   :  { %v9018_v4 = vadd.f32 %v15825_v41, %v8950_v26  ;;  %v9002_v30 = vadd.f32 %v15825_v41, %v8934_v35  ;;  %v8986_v46 = vadd.f32 %v15825_v41, %v8918_v5  ;;  %v9019_v60 = vadd.f32 %v15825_v41, %v8951_v56 }
0x1031   :  { %v9003_v45 = vadd.f32 %v15825_v41, %v8935_v62  ;;  %v8987_v39 = vadd.f32 %v15825_v41, %v8919_v3  ;;  %v8920_v32 = vmul.f32 %v15820_v40, %v15587_v0  ;;  %v9020_v35 = vadd.f32 %v15825_v41, %v8952_v22 }
0x1032   :  { %v9082_v58 = vmax.f32 %v9018_v4, 0.0  ;;  %v9066_v20 = vmax.f32 %v9002_v30, 0.0  ;;  %v9050_v2 = vmax.f32 %v8986_v46, 0.0  ;;  %v9083_v48 = vmax.f32 %v9019_v60, 0.0 }
0x1033   :  { %v9067_v47 = vmax.f32 %v9003_v45, 0.0  ;;  %v9051_v26 = vmax.f32 %v8987_v39, 0.0  ;;  %v9004_v5 = vadd.f32 %v15825_v41, %v8936_v12  ;;  %v8988_v4 = vadd.f32 %v15825_v41, %v8920_v32 }
0x1034   :  { %9178 = vxpose.xlu2.b32.start [1/16] (narrow) %v9082_v58, 8  ;;  %9146 = vxpose.xlu1.b32.start [1/16] (narrow) %v9066_v20, 8  ;;  %v9084_v30 = vmax.f32 %v9020_v35, 0.0  ;;  %v8953_v28 = vmul.f32 %v15820_v40, %v15769_v8  ;;  %v8937_v38 = vmul.f32 %v15820_v40, %v15579_v24  ;;  %v8921_v0 = vmul.f32 %v15820_v40, %v15575_v7 }
0x1035   :  { %9114 = vxpose.xlu0.b32.start [1/16] (narrow) %v9050_v2, 8  ;;  %v9068_v46 = vmax.f32 %v9004_v5, 0.0  ;;  %v9052_v58 = vmax.f32 %v8988_v4, 0.0  ;;  %v8954_v8 = vmul.f32 %v15820_v40, %v15757_v13  ;;  %v8938_v24 = vmul.f32 %v15820_v40, %v15567_v15 }
0x1036   :  { %v9021_v56 = vadd.f32 %v15825_v41, %v8953_v28  ;;  %v9005_v20 = vadd.f32 %v15825_v41, %v8937_v38  ;;  %v8989_v2 = vadd.f32 %v15825_v41, %v8921_v0  ;;  %v8922_v7 = vmul.f32 %v15820_v40, %v15563_v53 }
0x1037   :  { %v9022_v45 = vadd.f32 %v15825_v41, %v8954_v8  ;;  %v9006_v39 = vadd.f32 %v15825_v41, %v8938_v24  ;;  %v8955_v13 = vmul.f32 %v15820_v40, %v15745_v57  ;;  %v8939_v15 = vmul.f32 %v15820_v40, %v15555_v54 }
0x1038   :  { %v9085_v62 = vmax.f32 %v9021_v56, 0.0  ;;  %v9069_v3 = vmax.f32 %v9005_v20, 0.0  ;;  %v9053_v60 = vmax.f32 %v8989_v2, 0.0  ;;  %v8923_v53 = vmul.f32 %v15820_v40, %v15551_v34 }
0x1039   :  { %v9086_v22 = vmax.f32 %v9022_v45, 0.0  ;;  %v9023_v12 = vadd.f32 %v15825_v41, %v8955_v13  ;;  %v9007_v32 = vadd.f32 %v15825_v41, %v8939_v15  ;;  %v8956_v57 = vmul.f32 %v15820_v40, %v15733_v44 }
0x103a   :  { %v8991_v35 = vadd.f32 %v15825_v41, %v8923_v53  ;;  %v8940_v54 = vmul.f32 %v15820_v40, %v15543_v55  ;;  %v8924_v34 = vmul.f32 %v15820_v40, %v15539_v17  ;;  %v8957_v44 = vmul.f32 %v15820_v40, %v15721_v37 }
0x103b   :  { %v9087_v5 = vmax.f32 %v9023_v12, 0.0  ;;  %v9071_v4 = vmax.f32 %v9007_v32, 0.0  ;;  %v9024_v28 = vadd.f32 %v15825_v41, %v8956_v57  ;;  %v8941_v55 = vmul.f32 %v15820_v40, %v15531_v23 }
0x103c   :  { %9179 = vxpose.xlu2.b32.cont [2/16] (narrow) %v9083_v48, 8  ;;  %9147 = vxpose.xlu1.b32.cont [2/16] (narrow) %v9067_v47, 8  ;;  %v8990_v48 = vadd.f32 %v15825_v41, %v8922_v7  ;;  %v9070_v47 = vmax.f32 %v9006_v39, 0.0  ;;  %v8925_v17 = vmul.f32 %v15820_v40, %v15527_v18  ;;  %v9025_v20 = vadd.f32 %v15825_v41, %v8957_v44 }
0x103d   :  { %9115 = vxpose.xlu0.b32.cont [2/16] (narrow) %v9051_v26, 8  ;;  %v9088_v38 = vmax.f32 %v9024_v28, 0.0  ;;  %v9009_v2 = vadd.f32 %v15825_v41, %v8941_v55  ;;  %v8958_v37 = vmul.f32 %v15820_v40, %v15709_v10  ;;  %v8942_v23 = vmul.f32 %v15820_v40, %v15519_v14 }
0x103e   :  { %v9054_v26 = vmax.f32 %v8990_v48, 0.0  ;;  %v9089_v8 = vmax.f32 %v9025_v20, 0.0  ;;  %v8926_v18 = vmul.f32 %v15820_v40, %v15515_v6  ;;  %v8959_v10 = vmul.f32 %v15820_v40, %v15697_v25 }
0x103f   :  { %v9026_v24 = vadd.f32 %v15825_v41, %v8958_v37  ;;  %v9010_v7 = vadd.f32 %v15825_v41, %v8942_v23  ;;  %v8943_v14 = vmul.f32 %v15820_v40, %v15507_v1  ;;  %v8927_v6 = vmul.f32 %v15820_v40, %v15503_v52 }
0x1040   :  { %v8994_v45 = vadd.f32 %v15825_v41, %v8926_v18  ;;  %v9027_v13 = vadd.f32 %v15825_v41, %v8959_v10  ;;  %v8960_v25 = vmul.f32 %v15820_v40, %v15685_v16  ;;  %v8944_v1 = vmul.f32 %v15820_v40, %v15495_v43 }
0x1041   :  { %v9090_v39 = vmax.f32 %v9026_v24, 0.0  ;;  %v9074_v48 = vmax.f32 %v9010_v7, 0.0  ;;  %v8928_v52 = vmul.f32 %v15820_v40, %v15491_v63  ;;  %v8961_v16 = vmul.f32 %v15820_v40, %v15671_v50 }
0x1042   :  { %v9091_v15 = vmax.f32 %v9027_v13, 0.0  ;;  %v9028_v32 = vadd.f32 %v15825_v41, %v8960_v25  ;;  %v8945_v43 = vmul.f32 %v15820_v40, %v15483_v61  ;;  %v8929_v63 = vmul.f32 %v15820_v40, %v15479_v51  ;;  %v17391_v13 = vld [vmem:[#allocation32_spill] sm:$0xff] }
0x1043   :  { %v8962_v50 = vmul.f32 %v15820_v40, %v15659_v33  ;;  %v8946_v61 = vmul.f32 %v15820_v40, %v15471_v49  ;;  %v8930_v51 = vmul.f32 %v15820_v40, %v15467_v19  ;;  %v8963_v33 = vmul.f32 %v15820_v40, %v15647_v59 }
0x1044   :  { %9180 = vxpose.xlu2.b32.cont [3/16] (narrow) %v9084_v30, 8  ;;  %9148 = vxpose.xlu1.b32.cont [3/16] (narrow) %v9068_v46, 8  ;;  %v9055_v30 = vmax.f32 %v8991_v35, 0.0  ;;  %v9008_v46 = vadd.f32 %v15825_v41, %v8940_v54  ;;  %v9012_v35 = vadd.f32 %v15825_v41, %v8944_v1  ;;  %v9092_v57 = vmax.f32 %v9028_v32, 0.0  ;;  %v17394_v32 = vld [vmem:[#allocation29_spill] sm:$0xff] }
0x1045   :  { %9116 = vxpose.xlu0.b32.cont [3/16] (narrow) %v9052_v58, 8  ;;  %v8992_v58 = vadd.f32 %v15825_v41, %v8924_v34  ;;  %v9029_v54 = vadd.f32 %v15825_v41, %v8961_v16  ;;  %v9013_v34 = vadd.f32 %v15825_v41, %v8945_v43  ;;  %v8997_v28 = vadd.f32 %v15825_v41, %v8929_v63  ;;  %v17395_v16 = vld [vmem:[#allocation27_spill] sm:$0xff]  ;;  %v17396_v63 = vld [vmem:[#allocation73_spill] sm:$0xff] }
0x1046   :  { %v9072_v0 = vmax.f32 %v9008_v46, 0.0  ;;  %v9030_v44 = vadd.f32 %v15825_v41, %v8962_v50  ;;  %v8947_v49 = vmul.f32 %v15820_v40, %v15459_v31  ;;  %v8931_v19 = vmul.f32 %v15820_v40, %v15455_v29 }
0x1047   :  { %v9056_v56 = vmax.f32 %v8992_v58, 0.0  ;;  %v9093_v46 = vmax.f32 %v9029_v54, 0.0  ;;  %v9077_v58 = vmax.f32 %v9013_v34, 0.0  ;;  %v8964_v59 = vmul.f32 %v15820_v40, %v15635_v11 }
0x1048   :  { %v9094_v55 = vmax.f32 %v9030_v44, 0.0  ;;  %v8948_v31 = vmul.f32 %v15820_v40, %v15451_v21  ;;  %v8932_v29 = vmul.f32 %v15820_v40, %v15447_v9  ;;  %v8965_v11 = vmul.f32 %v15820_v40, %v15623_v27 }
0x1049   :  { %v9032_v23 = vadd.f32 %v15825_v41, %v8964_v59  ;;  %v8949_v21 = vmul.f32 %v15820_v40, %v15443_v42  ;;  %v8933_v9 = vmul.f32 %v15820_v40, %v15439_v36  ;;  %v17392_v42 = vld [vmem:[#allocation80_spill] sm:$0xff]  ;;  %v8971_v54 = vmul.f32 %v15820_v40, %v17396_v63 }
0x104a   :  { %v9016_v18 = vadd.f32 %v15825_v41, %v8948_v31  ;;  %v9000_v24 = vadd.f32 %v15825_v41, %v8932_v29  ;;  %v9033_v10 = vadd.f32 %v15825_v41, %v8965_v11 }
0x104b   :  { %v9096_v7 = vmax.f32 %v9032_v23, 0.0  ;;  %v17403_v23 = vld [vmem:[#allocation77_spill] sm:$0xff] }
0x104c   :  { %9181 = vxpose.xlu2.b32.cont [4/16] (narrow) %v9085_v62, 8  ;;  %9149 = vxpose.xlu1.b32.cont [4/16] (narrow) %v9069_v3, 8  ;;  %v8993_v62 = vadd.f32 %v15825_v41, %v8925_v17  ;;  %v9073_v3 = vmax.f32 %v9009_v2, 0.0  ;;  %v9031_v2 = vadd.f32 %v15825_v41, %v8963_v33 }
0x104d   :  { %9117 = vxpose.xlu0.b32.cont [4/16] (narrow) %v9053_v60, 8 }
0x104e   :  { %v9057_v60 = vmax.f32 %v8993_v62, 0.0  ;;  %v9015_v62 = vadd.f32 %v15825_v41, %v8947_v49  ;;  %v9095_v37 = vmax.f32 %v9031_v2, 0.0 }
0x1054   :  { %9182 = vxpose.xlu2.b32.cont [5/16] (narrow) %v9086_v22, 8  ;;  %9150 = vxpose.xlu1.b32.cont [5/16] (narrow) %v9070_v47, 8  ;;  %v9058_v22 = vmax.f32 %v8994_v45, 0.0  ;;  %v9011_v47 = vadd.f32 %v15825_v41, %v8943_v14  ;;  %v9080_v45 = vmax.f32 %v9016_v18, 0.0  ;;  %v9097_v14 = vmax.f32 %v9033_v10, 0.0 }
0x1055   :  { %9118 = vxpose.xlu0.b32.cont [5/16] (narrow) %v9054_v26, 8  ;;  %v8995_v26 = vadd.f32 %v15825_v41, %v8927_v6  ;;  %v8978_v18 = vmul.f32 %v15820_v40, %v17403_v23 }
0x1056   :  { %v9075_v53 = vmax.f32 %v9011_v47, 0.0  ;;  %v8966_v47 = vmul.f32 %v15820_v40, %v17391_v13  ;;  %v17406_v13 = vld [vmem:[#allocation44_spill] sm:$0xff] }
0x1057   :  { %v9059_v12 = vmax.f32 %v8995_v26, 0.0  ;;  %v8967_v26 = vmul.f32 %v15820_v40, %v17392_v42 }
0x1058   :  { %v9034_v36 = vadd.f32 %v15825_v41, %v8966_v47  ;;  %v8981_v47 = vmul.f32 %v15820_v40, %v17406_v13 }
0x1059   :  { %v9035_v25 = vadd.f32 %v15825_v41, %v8967_v26 }
0x105a   :  { %v9049_v42 = vadd.f32 %v15825_v41, %v8981_v47 }
0x105b   :  { %v9099_v1 = vmax.f32 %v9035_v25, 0.0 }
0x105c   :  { %9183 = vxpose.xlu2.b32.cont [6/16] (narrow) %v9087_v5, 8  ;;  %9151 = vxpose.xlu1.b32.cont [6/16] (narrow) %v9071_v4, 8  ;;  %v8996_v5 = vadd.f32 %v15825_v41, %v8928_v52  ;;  %v9076_v4 = vmax.f32 %v9012_v35, 0.0  ;;  %v8969_v35 = vmul.f32 %v15820_v40, %v17394_v32  ;;  %v9113_v26 = vmax.f32 %v9049_v42, 0.0 }
0x105d   :  { %9119 = vxpose.xlu0.b32.cont [6/16] (narrow) %v9055_v30, 8 }
0x105e   :  { %v9060_v30 = vmax.f32 %v8996_v5, 0.0 }
0x1064   :  { %9184 = vxpose.xlu2.b32.cont [7/16] (narrow) %v9088_v38, 8  ;;  %9152 = vxpose.xlu1.b32.cont [7/16] (narrow) %v9072_v0, 8  ;;  %v9061_v38 = vmax.f32 %v8997_v28, 0.0  ;;  %v9014_v0 = vadd.f32 %v15825_v41, %v8946_v61  ;;  %v9039_v28 = vadd.f32 %v15825_v41, %v8971_v54  ;;  %v17398_v61 = vld [vmem:[#allocation131_spill] sm:$0xff] }
0x1065   :  { %9120 = vxpose.xlu0.b32.cont [7/16] (narrow) %v9056_v56, 8  ;;  %v8998_v56 = vadd.f32 %v15825_v41, %v8930_v51  ;;  %v8973_v51 = vmul.f32 %v15820_v40, %v17398_v61 }
0x1066   :  { %v9078_v17 = vmax.f32 %v9014_v0, 0.0 }
0x1067   :  { %v9062_v20 = vmax.f32 %v8998_v56, 0.0  ;;  %v9041_v0 = vadd.f32 %v15825_v41, %v8973_v51  ;;  %v17399_v56 = vld [vmem:[#allocation217_spill] sm:$0xff] }
0x1069   :  { %v9105_v33 = vmax.f32 %v9041_v0, 0.0 }
0x106c   :  { %9185 = vxpose.xlu2.b32.cont [8/16] (narrow) %v9089_v8, 8  ;;  %9153 = vxpose.xlu1.b32.cont [8/16] (narrow) %v9073_v3, 8  ;;  %v8999_v8 = vadd.f32 %v15825_v41, %v8931_v19  ;;  %v9079_v3 = vmax.f32 %v9015_v62, 0.0  ;;  %v17401_v62 = vld [vmem:[#allocation42_spill] sm:$0xff] }
0x106d   :  { %9121 = vxpose.xlu0.b32.cont [8/16] (narrow) %v9057_v60, 8 }
0x106e   :  { %v9063_v60 = vmax.f32 %v8999_v8, 0.0  ;;  %v8976_v8 = vmul.f32 %v15820_v40, %v17401_v62 }
0x1070   :  { %v9044_v59 = vadd.f32 %v15825_v41, %v8976_v8 }
0x1072   :  { %v9108_v31 = vmax.f32 %v9044_v59, 0.0 }
0x1074   :  { %9186 = vxpose.xlu2.b32.cont [9/16] (narrow) %v9090_v39, 8  ;;  %9154 = vxpose.xlu1.b32.cont [9/16] (narrow) %v9074_v48, 8  ;;  %v9064_v39 = vmax.f32 %v9000_v24, 0.0  ;;  %v9017_v48 = vadd.f32 %v15825_v41, %v8949_v21  ;;  %v17404_v21 = vld [vmem:[#allocation36_spill] sm:$0xff] }
0x1075   :  { %9122 = vxpose.xlu0.b32.cont [9/16] (narrow) %v9058_v22, 8  ;;  %v9001_v22 = vadd.f32 %v15825_v41, %v8933_v9  ;;  %v8979_v9 = vmul.f32 %v15820_v40, %v17404_v21 }
0x1076   :  { %v9081_v6 = vmax.f32 %v9017_v48, 0.0 }
0x1077   :  { %v9065_v27 = vmax.f32 %v9001_v22, 0.0  ;;  %v9047_v48 = vadd.f32 %v15825_v41, %v8979_v9  ;;  %v17405_v22 = vld [vmem:[#allocation35_spill] sm:$0xff] }
0x107c   :  { %9187 = vxpose.xlu2.b32.cont [10/16] (narrow) %v9091_v15, 8  ;;  %9155 = vxpose.xlu1.b32.cont [10/16] (narrow) %v9075_v53, 8  ;;  %v9098_v15 = vmax.f32 %v9034_v36, 0.0  ;;  %v17393_v53 = vld [vmem:[#allocation75_spill] sm:$0xff] }
0x107d   :  { %9123 = vxpose.xlu0.b32.cont [10/16] (narrow) %v9059_v12, 8  ;;  %v8968_v12 = vmul.f32 %v15820_v40, %v17393_v53 }
0x107f   :  { %v9036_v52 = vadd.f32 %v15825_v41, %v8968_v12 }
0x1081   :  { %v9100_v5 = vmax.f32 %v9036_v52, 0.0 }
0x1084   :  { %9188 = vxpose.xlu2.b32.cont [11/16] (narrow) %v9092_v57, 8  ;;  %9156 = vxpose.xlu1.b32.cont [11/16] (narrow) %v9076_v4, 8  ;;  %v9037_v57 = vadd.f32 %v15825_v41, %v8969_v35  ;;  %v8970_v4 = vmul.f32 %v15820_v40, %v17395_v16 }
0x1085   :  { %9124 = vxpose.xlu0.b32.cont [11/16] (narrow) %v9060_v30, 8 }
0x1086   :  { %v9101_v30 = vmax.f32 %v9037_v57, 0.0  ;;  %v9038_v43 = vadd.f32 %v15825_v41, %v8970_v4 }
0x1088   :  { %v9102_v34 = vmax.f32 %v9038_v43, 0.0 }
0x108c   :  { %9189 = vxpose.xlu2.b32.cont [12/16] (narrow) %v9093_v46, 8  ;;  %9157 = vxpose.xlu1.b32.cont [12/16] (narrow) %v9077_v58, 8  ;;  %v17397_v46 = vld [vmem:[#allocation48_spill] sm:$0xff]  ;;  %v9103_v58 = vmax.f32 %v9039_v28, 0.0 }
0x108d   :  { %9125 = vxpose.xlu0.b32.cont [12/16] (narrow) %v9061_v38, 8  ;;  %v8972_v50 = vmul.f32 %v15820_v40, %v17397_v46 }
0x108f   :  { %v9040_v38 = vadd.f32 %v15825_v41, %v8972_v50 }
0x1091   :  { %v9104_v44 = vmax.f32 %v9040_v38, 0.0 }
0x1094   :  { %9190 = vxpose.xlu2.b32.cont [13/16] (narrow) %v9094_v55, 8  ;;  %9158 = vxpose.xlu1.b32.cont [13/16] (narrow) %v9078_v17, 8  ;;  %v8974_v55 = vmul.f32 %v15820_v40, %v17399_v56 }
0x1095   :  { %9126 = vxpose.xlu0.b32.cont [13/16] (narrow) %v9062_v20, 8  ;;  %v17400_v20 = vld [vmem:[#allocation78_spill] sm:$0xff] }
0x1096   :  { %v9042_v17 = vadd.f32 %v15825_v41, %v8974_v55  ;;  %v8975_v49 = vmul.f32 %v15820_v40, %v17400_v20 }
0x1098   :  { %v9106_v19 = vmax.f32 %v9042_v17, 0.0  ;;  %v9043_v2 = vadd.f32 %v15825_v41, %v8975_v49 }
0x109c   :  { %9191 = vxpose.xlu2.b32.cont [14/16] (narrow) %v9095_v37, 8  ;;  %9159 = vxpose.xlu1.b32.cont [14/16] (narrow) %v9079_v3, 8  ;;  %v9107_v37 = vmax.f32 %v9043_v2, 0.0  ;;  %v17402_v3 = vld [vmem:[#allocation38_spill] sm:$0xff] }
0x109d   :  { %9127 = vxpose.xlu0.b32.cont [14/16] (narrow) %v9063_v60, 8  ;;  %v8977_v60 = vmul.f32 %v15820_v40, %v17402_v3 }
0x109f   :  { %v9045_v29 = vadd.f32 %v15825_v41, %v8977_v60 }
0x10a1   :  { %v9109_v24 = vmax.f32 %v9045_v29, 0.0 }
0x10a4   :  { %9192 = vxpose.xlu2.b32.cont [15/16] (narrow) %v9096_v7, 8  ;;  %9160 = vxpose.xlu1.b32.cont [15/16] (narrow) %v9080_v45, 8 }
0x10a5   :  { %9128 = vxpose.xlu0.b32.cont [15/16] (narrow) %v9064_v39, 8  ;;  %v9046_v39 = vadd.f32 %v15825_v41, %v8978_v18 }
0x10a7   :  { %v9110_v10 = vmax.f32 %v9046_v39, 0.0 }
0x10ac   :  { %9193 = vxpose.xlu2.b32.end [16/16] (narrow) %v9097_v14, 8  ;;  %9161 = vxpose.xlu1.b32.end [16/16] (narrow) %v9081_v6, 8  ;;  %v8980_v14 = vmul.f32 %v15820_v40, %v17405_v22  ;;  %v9111_v6 = vmax.f32 %v9047_v48, 0.0 }
0x10ad   :  { %9129 = vxpose.xlu0.b32.end [16/16] (narrow) %v9065_v27, 8 }
0x10ae   :  { %v9048_v27 = vadd.f32 %v15825_v41, %v8980_v14 }
0x10b0   :  { %v9112_v36 = vmax.f32 %v9048_v27, 0.0 }
0x10b5   :  { %9210 = vxpose.xlu0.b32.start [1/16] (narrow) %v9098_v15, 8 }
0x10bd   :  { %9211 = vxpose.xlu0.b32.cont [2/16] (narrow) %v9099_v1, 8 }
0x10c5   :  { %9212 = vxpose.xlu0.b32.cont [3/16] (narrow) %v9100_v5, 8 }
0x10cd   :  { %9213 = vxpose.xlu0.b32.cont [4/16] (narrow) %v9101_v30, 8  ;;  %v9194_v11 = vpop.trf.xlu2 }
0x10ce   :  { %9244 = vst [vmem:[%s16034_s5 + $0x10] sm:$0xff] %v9194_v11 }
0x10d5   :  { %9214 = vxpose.xlu0.b32.cont [5/16] (narrow) %v9102_v34, 8 }
0x10d8   :  { %v9162_v45 = vpop.trf.xlu1 }
0x10d9   :  { %v9130_v7 = vpop.trf.xlu0  ;;  %9243 = vst [vmem:[%s16034_s5 + $0x8] sm:$0xff] %v9162_v45 }
0x10da   :  { %9242 = vst [vmem:[%s16034_s5] sm:$0xff] %v9130_v7 }
0x10dd   :  { %9215 = vxpose.xlu0.b32.cont [6/16] (narrow) %v9103_v58, 8 }
0x10e5   :  { %9216 = vxpose.xlu0.b32.cont [7/16] (narrow) %v9104_v44, 8 }
0x10ed   :  { %9217 = vxpose.xlu0.b32.cont [8/16] (narrow) %v9105_v33, 8 }
0x10f5   :  { %9218 = vxpose.xlu0.b32.cont [9/16] (narrow) %v9106_v19, 8 }
0x10fd   :  { %9219 = vxpose.xlu0.b32.cont [10/16] (narrow) %v9107_v37, 8 }
0x1105   :  { %9220 = vxpose.xlu0.b32.cont [11/16] (narrow) %v9108_v31, 8 }
0x110d   :  { %9221 = vxpose.xlu0.b32.cont [12/16] (narrow) %v9109_v24, 8 }
0x1115   :  { %9222 = vxpose.xlu0.b32.cont [13/16] (narrow) %v9110_v10, 8 }
0x111d   :  { %9223 = vxpose.xlu0.b32.cont [14/16] (narrow) %v9111_v6, 8 }
0x1125   :  { %9224 = vxpose.xlu0.b32.cont [15/16] (narrow) %v9112_v36, 8 }
0x112d   :  { %9225 = vxpose.xlu0.b32.end [16/16] (narrow) %v9113_v26, 8 }
0x1159   :  { %v9226_v15 = vpop.trf.xlu0 }
0x115a   :  { %9245 = vst [vmem:[%s16034_s5 + $0x18] sm:$0xff] %v9226_v15 }

</bundles_post_ra>
